<compile_context>
chip_gen: v7x
topology: tpu7x:2x2x1
jax: 0.10.0
libtpu: 0.0.40
codegen_flags: <defaults>
</compile_context>

<pallas_src>
import functools
import math

import jax
import jax.numpy as jnp
from jax.experimental import pallas as pl
from jax.experimental.pallas import tpu as pltpu


NEG_INF = -1e9      # key-padding fill (reference uses -inf; finite keeps softmax NaN-free)
CAUSAL_NEG = -1e8   # fill_with_neg_inf2 in the reference fills with -1e8


def _layer_norm(x, g, b, eps=1e-5):
    mu = jnp.mean(x, axis=-1, keepdims=True)
    var = jnp.mean((x - mu) ** 2, axis=-1, keepdims=True)
    return (x - mu) * jax.lax.rsqrt(var + eps) * g + b


def _softmax(s):
    m = jnp.max(s, axis=-1, keepdims=True)
    e = jnp.exp(s - m)
    # denominator >= 1 (max-subtracted); approx reciprocal rides the EUP slot
    return e * pl.reciprocal(jnp.sum(e, axis=-1, keepdims=True), approx=True)


def decoder_kernel(num_heads, kernel_size,
                   dec_ref, enc_ref, pos_ref, selfpad_ref, encpad_ref, causal_ref,
                   ln1_g, ln1_b, wq_s, wk_s, wv_s, wo_s,
                   ln2_g, ln2_b, wq_c, wk_c, wv_c, wo_c,
                   ln3_g, ln3_b, w_ffn1, b_ffn1, w_ffn2, b_ffn2,
                   lnf_g, lnf_b,
                   hid_ref, logits_ref,
                   x_scratch):
    l = pl.program_id(1)
    n_layers = pl.num_programs(1)

    Bb, T, H = dec_ref.shape
    nH = num_heads
    Dh = H // nH
    scale = Dh ** -0.5
    K = kernel_size
    F = w_ffn2.shape[0]
    Tp = logits_ref.shape[-1]            # lane-padded key length of the logits output
    cdt = wq_s.dtype                     # matmul compute dtype (bf16); accumulation is f32
    M = Bb * T

    # ---- carried activation: init with dec + positional embedding at layer 0 ----
    @pl.when(l == 0)
    def _():
        x_scratch[...] = (dec_ref[...] + pos_ref[...]).reshape(M, H)   # dropout = identity

    x = x_scratch[...]                   # (Bb*T, H) f32

    # layer-invariant masks come from the wrapper; their block index is constant
    # across the layer axis, so they are DMA'd only once per batch block
    self_pad = selfpad_ref[...] > 0.5    # (Bb, 1, T), True = padded key
    enc_pad = encpad_ref[...] > 0.5
    causal = causal_ref[...]             # (T, T) additive mask (strict upper = -1e8)

    def attend(y_q, y_kv, wq, wk, wv, wo, use_causal, key_pad, store_logits):
        # merged-M projections: (Bb*T, H) x (H, H), bf16 operands, f32 accumulate
        q = jnp.dot(y_q.astype(cdt), wq[...], preferred_element_type=jnp.float32) * scale
        k = jnp.dot(y_kv.astype(cdt), wk[...], preferred_element_type=jnp.float32)
        v = jnp.dot(y_kv.astype(cdt), wv[...], preferred_element_type=jnp.float32)
        q3 = q.reshape(Bb, T, H)
        k3 = k.reshape(Bb, T, H)
        v3 = v.reshape(Bb, T, H)

        def split_heads(a):              # (T, H) -> (nH, T, Dh)
            return jnp.transpose(a.reshape(T, nH, Dh), (1, 0, 2))

        outs = []
        for b in range(Bb):              # small static unroll; batched-head einsums per sample
            qh = split_heads(q3[b]).astype(cdt)
            kh = split_heads(k3[b]).astype(cdt)
            vh = split_heads(v3[b]).astype(cdt)
            s = jnp.einsum("htd,hsd->hts", qh, kh,
                           preferred_element_type=jnp.float32)        # (nH, T, T) f32
            if use_causal:
                s = s + causal[None]
            s = jnp.where(key_pad[b][None], jnp.float32(NEG_INF), s)
            if store_logits:
                # TODO(synk): assumes the reference returns pre-softmax masked scores
                if Tp > T:
                    s_st = jnp.concatenate(
                        [s, jnp.zeros((nH, T, Tp - T), jnp.float32)], axis=-1)
                else:
                    s_st = s
                logits_ref[b] = s_st
            p = _softmax(s).astype(cdt)
            o = jnp.einsum("hts,hsd->htd", p, vh,
                           preferred_element_type=jnp.float32)        # (nH, T, Dh)
            outs.append(jnp.transpose(o, (1, 0, 2)).reshape(T, H))
        o_all = jnp.concatenate(outs, axis=0)                          # (Bb*T, H)
        return jnp.dot(o_all.astype(cdt), wo[...], preferred_element_type=jnp.float32)

    # ---------- self attention (pre-LN, causal + key padding) ----------
    residual = x
    y = _layer_norm(x, ln1_g[...], ln1_b[...])
    x = residual + attend(y, y, wq_s, wk_s, wv_s, wo_s, True, self_pad, False)

    # ---------- cross attention over encoder_out (logits returned) ----------
    residual = x
    y = _layer_norm(x, ln2_g[...], ln2_b[...])
    enc2 = enc_ref[...].reshape(M, H)
    x = residual + attend(y, enc2, wq_c, wk_c, wv_c, wo_c, False, enc_pad, True)

    # ---------- causal conv FFN (left pad K-1): shift inputs, then K tap matmuls ----------
    residual = x
    y = _layer_norm(x, ln3_g[...], ln3_b[...])
    local_t = jax.lax.broadcasted_iota(jnp.int32, (M, H), 0) % T
    acc = jnp.dot(y.astype(cdt), w_ffn1[K - 1],
                  preferred_element_type=jnp.float32)                  # shift-0 tap
    for kk in range(K - 1):
        shift = K - 1 - kk
        rolled = pltpu.roll(y, shift=shift, axis=0)                    # (Bb*T, H) sublane roll
        # rows whose source is before the sequence start (or another batch element
        # after the merged-roll wrap) are zeroed
        masked = jnp.where(local_t < shift, jnp.float32(0.0), rolled)
        acc = acc + jnp.dot(masked.astype(cdt), w_ffn1[kk],
                            preferred_element_type=jnp.float32)
    hid = (acc + b_ffn1[...]) * (K ** -0.5)
    # TODO(synk): PyTorch F.gelu is erf-based; tanh approximation used here.
    hid = jax.nn.gelu(hid, approximate=True)
    x = residual + jnp.dot(hid.astype(cdt), w_ffn2[...],
                           preferred_element_type=jnp.float32) + b_ffn2[...]

    x_scratch[...] = x

    # ---------- finalize: final LayerNorm (output projection is its own kernel) ----------
    @pl.when(l == n_layers - 1)
    def _():
        hid_ref[...] = _layer_norm(x, lnf_g[...], lnf_b[...]).reshape(Bb, T, H)


def output_projection_kernel(x_ref, w_ref, o_ref):
    o_ref[...] = jnp.dot(x_ref[...].astype(w_ref.dtype), w_ref[...],
                         preferred_element_type=jnp.float32)


def sinusoidal_table(num_embeddings, dim, padding_idx=0):
    half = dim // 2
    emb = math.log(10000.0) / (half - 1)
    emb = jnp.exp(jnp.arange(half, dtype=jnp.float32) * -emb)
    emb = jnp.arange(num_embeddings, dtype=jnp.float32)[:, None] * emb[None, :]
    table = jnp.concatenate([jnp.sin(emb), jnp.cos(emb)], axis=1)
    if dim % 2 == 1:
        table = jnp.concatenate([table, jnp.zeros((num_embeddings, 1), jnp.float32)], axis=1)
    table = table.at[padding_idx].set(0.0)
    return table


def transformer_asr_decoder(dec_inputs, encoder_out, params, *,
                            num_heads, kernel_size, batch_block=None):
    B, T, H = dec_inputs.shape
    L = params["ln1_g"].shape[0]
    W = params["w_proj"].shape[-1]
    K = kernel_size
    nH = num_heads
    F_dim = params["b_ffn1"].shape[-1]
    cdt = jnp.bfloat16

    # ---- batch blocking: Bb samples per grid step (weights streamed once per block) ----
    Bb = batch_block if batch_block is not None else min(B, 4)
    nB = (B + Bb - 1) // Bb
    B_pad = nB * Bb
    if B_pad != B:
        pad = B_pad - B
        dec_inputs = jnp.concatenate(
            [dec_inputs, jnp.zeros((pad, T, H), dec_inputs.dtype)], axis=0)
        encoder_out = jnp.concatenate(
            [encoder_out, jnp.zeros((pad, T, H), encoder_out.dtype)], axis=0)

    # ---- layer-invariant glue hoisted out of the kernel ----
    nonpad = (jnp.sum(jnp.abs(dec_inputs), axis=-1) != 0.0).astype(jnp.int32)
    positions = jnp.cumsum(nonpad, axis=1) * nonpad           # padding_idx == 0
    table = sinusoidal_table(T + 2, H, padding_idx=0)
    pos_emb = table[positions]                                # (B_pad, T, H)

    self_pad = (jnp.sum(jnp.abs(dec_inputs), axis=-1) == 0.0
                ).astype(jnp.float32)[:, None, :]             # (B_pad, 1, T)
    enc_pad = (jnp.sum(jnp.abs(encoder_out), axis=-1) == 0.0
               ).astype(jnp.float32)[:, None, :]
    row = jax.lax.broadcasted_iota(jnp.int32, (T, T), 0)
    col = jax.lax.broadcasted_iota(jnp.int32, (T, T), 1)
    causal = jnp.where(col > row, jnp.float32(CAUSAL_NEG), jnp.float32(0.0))

    Tp = ((T + 127) // 128) * 128        # lane-dense attention-logits last dim
    W_pad = ((W + 127) // 128) * 128     # lane-dense output projection

    # bf16 weights: halve HBM weight traffic & VMEM residency; f32 accumulation in-kernel
    per_layer_arrays = [
        params["ln1_g"], params["ln1_b"],
        params["wq_s"].astype(cdt), params["wk_s"].astype(cdt),
        params["wv_s"].astype(cdt), params["wo_s"].astype(cdt),
        params["ln2_g"], params["ln2_b"],
        params["wq_c"].astype(cdt), params["wk_c"].astype(cdt),
        params["wv_c"].astype(cdt), params["wo_c"].astype(cdt),
        params["ln3_g"], params["ln3_b"],
        params["w_ffn1"].astype(cdt), params["b_ffn1"],
        params["w_ffn2"].astype(cdt), params["b_ffn2"],
    ]
    final_arrays = [params["lnf_g"], params["lnf_b"]]

    def per_batch(shape):
        rest = tuple(shape[1:]); n = len(rest)
        return pl.BlockSpec((Bb,) + rest, lambda b, l, _n=n: (b,) + (0,) * _n)

    def per_layer(shape):
        rest = tuple(shape[1:]); n = len(rest)
        return pl.BlockSpec((None,) + rest, lambda b, l, _n=n: (l,) + (0,) * _n)

    def replicated(shape):
        n = len(shape)
        return pl.BlockSpec(tuple(shape), lambda b, l, _n=n: (0,) * _n)

    in_specs = ([per_batch(dec_inputs.shape),
                 per_batch(encoder_out.shape),
                 per_batch(pos_emb.shape),
                 per_batch(self_pad.shape),
                 per_batch(enc_pad.shape),
                 replicated(causal.shape)]
                + [per_layer(p.shape) for p in per_layer_arrays]
                + [replicated(p.shape) for p in final_arrays])

    out_shape = (jax.ShapeDtypeStruct((B_pad, T, H), jnp.float32),
                 jax.ShapeDtypeStruct((B_pad, L, nH, T, Tp), jnp.float32))
    out_specs = (pl.BlockSpec((Bb, T, H), lambda b, l: (b, 0, 0)),
                 pl.BlockSpec((Bb, None, nH, T, Tp), lambda b, l: (b, l, 0, 0, 0)))

    # explicit scoped-VMEM budget from the double-buffered block sizes (+ headroom)
    in_bytes = (3 * Bb * T * H * 4 + 2 * Bb * T * 4 + T * T * 4
                + 6 * H * 4 + 8 * H * H * 2
                + K * H * F_dim * 2 + F_dim * 4 + F_dim * H * 2 + H * 4
                + 2 * H * 4)
    out_bytes = Bb * T * H * 4 + Bb * nH * T * Tp * 4
    scratch_bytes = Bb * T * H * 4
    est = 2 * (in_bytes + out_bytes) + scratch_bytes + (4 << 20)
    try:
        vmem_cap = int(pltpu.get_tpu_info().vmem_capacity_bytes)
    except Exception:
        vmem_cap = 64 * 1024 * 1024       # v7x per-TC capacity (most restrictive)
    vmem_limit = int(min(max(est, 32 << 20), int(vmem_cap * 0.85)))

    kernel = functools.partial(decoder_kernel, nH, K)
    hidden, attn_logits = pl.pallas_call(
        kernel,
        out_shape=out_shape,
        grid=(nB, L),
        in_specs=in_specs,
        out_specs=out_specs,
        scratch_shapes=[pltpu.VMEM((Bb * T, H), jnp.float32)],   # activation carried over layers
        compiler_params=pltpu.CompilerParams(
            dimension_semantics=("parallel", "arbitrary"),
            vmem_limit_bytes=vmem_limit),
    )(dec_inputs, encoder_out, pos_emb, self_pad, enc_pad, causal,
      *per_layer_arrays, *final_arrays)

    hidden = hidden[:B]                              # drop batch padding
    attn_logits = attn_logits[:B, :, :, :, :T]       # trim lane padding

    # ---- final output projection: separate call so w_proj is not resident in the layer loop
    w_proj_pad = jnp.zeros((H, W_pad), cdt).at[:, :W].set(params["w_proj"].astype(cdt))
    M = B * T
    x2d = hidden.reshape(M, H)
    TN = 512 if W_pad % 512 == 0 else (256 if W_pad % 256 == 0 else 128)
    TM = 256 if (M % 256 == 0 and M > 256) else M
    proj = pl.pallas_call(
        output_projection_kernel,
        out_shape=jax.ShapeDtypeStruct((M, W_pad), jnp.float32),
        grid=(M // TM, W_pad // TN),
        in_specs=[pl.BlockSpec((TM, H), lambda i, j: (i, 0)),
                  pl.BlockSpec((H, TN), lambda i, j: (0, j))],
        out_specs=pl.BlockSpec((TM, TN), lambda i, j: (i, j)),
        compiler_params=pltpu.CompilerParams(
            dimension_semantics=("parallel", "parallel")),
    )(x2d, w_proj_pad)
    x_out = proj[:, :W].reshape(B, T, W)

    return x_out, [attn_logits[:, l] for l in range(L)]


def init_params(key, L, H, W, nH, K):
    F = 4 * H
    ks = jax.random.split(key, 12)

    def n(k, shape, scale):
        return jax.random.normal(k, shape, jnp.float32) * scale

    s_h = H ** -0.5
    s_f = F ** -0.5
    return {
        "ln1_g": jnp.ones((L, 1, H), jnp.float32),
        "ln1_b": jnp.zeros((L, 1, H), jnp.float32),
        "wq_s": n(ks[0], (L, H, H), s_h),
        "wk_s": n(ks[1], (L, H, H), s_h),
        "wv_s": n(ks[2], (L, H, H), s_h),
        "wo_s": n(ks[3], (L, H, H), s_h),
        "ln2_g": jnp.ones((L, 1, H), jnp.float32),
        "ln2_b": jnp.zeros((L, 1, H), jnp.float32),
        "wq_c": n(ks[4], (L, H, H), s_h),
        "wk_c": n(ks[5], (L, H, H), s_h),
        "wv_c": n(ks[6], (L, H, H), s_h),
        "wo_c": n(ks[7], (L, H, H), s_h),
        "ln3_g": jnp.ones((L, 1, H), jnp.float32),
        "ln3_b": jnp.zeros((L, 1, H), jnp.float32),
        "w_ffn1": n(ks[8], (L, K, H, F), (H * K) ** -0.5),
        "b_ffn1": jnp.zeros((L, 1, F), jnp.float32),
        "w_ffn2": n(ks[9], (L, F, H), s_f),
        "b_ffn2": jnp.zeros((L, 1, H), jnp.float32),
        "lnf_g": jnp.ones((1, H), jnp.float32),
        "lnf_b": jnp.zeros((1, H), jnp.float32),
        "w_proj": n(ks[10], (H, W), s_h),
    }


if __name__ == "__main__":
    B, T, H = 2, 16, 32          # batch, seq, hidden
    L, nH, W, K = 2, 2, 12, 9    # layers, heads, out_dim, FFN conv kernel size

    key = jax.random.PRNGKey(0)
    k_dec, k_enc, k_par = jax.random.split(key, 3)
    dec_inputs = jax.random.normal(k_dec, (B, T, H), jnp.float32)
    encoder_out = jax.random.normal(k_enc, (B, T, H), jnp.float32)
    # zero out trailing frames so the padding-mask path is exercised
    tmask = (jnp.arange(T) < T - 2).astype(jnp.float32)
    dec_inputs = dec_inputs * tmask[None, :, None]
    encoder_out = encoder_out * tmask[None, :, None]

    params = init_params(k_par, L, H, W, nH, K)

    x_out, attn_logits = transformer_asr_decoder(
        dec_inputs, encoder_out, params, num_heads=nH, kernel_size=K)
    jax.block_until_ready((x_out, attn_logits))

    assert x_out.shape == (B, T, W), x_out.shape
    assert len(attn_logits) == L and attn_logits[0].shape == (B, nH, T, T)
    assert bool(jnp.isfinite(x_out).all())
    assert bool(jnp.isfinite(jnp.stack(attn_logits)).all())
    print("KERNEL_OK")
</pallas_src>

<mosaic_0001>
module attributes {stable_mosaic.version = 11 : i64} {
  func.func @decoder_kernel(%arg0: i32, %arg1: i32, %arg2: memref<2x16x32xf32, #tpu.memory_space<vmem>>, %arg3: memref<2x16x32xf32, #tpu.memory_space<vmem>>, %arg4: memref<2x16x32xf32, #tpu.memory_space<vmem>>, %arg5: memref<2x1x16xf32, #tpu.memory_space<vmem>>, %arg6: memref<2x1x16xf32, #tpu.memory_space<vmem>>, %arg7: memref<16x16xf32, #tpu.memory_space<vmem>>, %arg8: memref<1x1x32xf32, #tpu.memory_space<vmem>>, %arg9: memref<1x1x32xf32, #tpu.memory_space<vmem>>, %arg10: memref<1x32x32xbf16, #tpu.memory_space<vmem>>, %arg11: memref<1x32x32xbf16, #tpu.memory_space<vmem>>, %arg12: memref<1x32x32xbf16, #tpu.memory_space<vmem>>, %arg13: memref<1x32x32xbf16, #tpu.memory_space<vmem>>, %arg14: memref<1x1x32xf32, #tpu.memory_space<vmem>>, %arg15: memref<1x1x32xf32, #tpu.memory_space<vmem>>, %arg16: memref<1x32x32xbf16, #tpu.memory_space<vmem>>, %arg17: memref<1x32x32xbf16, #tpu.memory_space<vmem>>, %arg18: memref<1x32x32xbf16, #tpu.memory_space<vmem>>, %arg19: memref<1x32x32xbf16, #tpu.memory_space<vmem>>, %arg20: memref<1x1x32xf32, #tpu.memory_space<vmem>>, %arg21: memref<1x1x32xf32, #tpu.memory_space<vmem>>, %arg22: memref<1x9x32x128xbf16, #tpu.memory_space<vmem>>, %arg23: memref<1x1x128xf32, #tpu.memory_space<vmem>>, %arg24: memref<1x128x32xbf16, #tpu.memory_space<vmem>>, %arg25: memref<1x1x32xf32, #tpu.memory_space<vmem>>, %arg26: memref<1x32xf32, #tpu.memory_space<vmem>>, %arg27: memref<1x32xf32, #tpu.memory_space<vmem>>, %arg28: memref<2x16x32xf32, #tpu.memory_space<vmem>>, %arg29: memref<2x1x2x16x128xf32, #tpu.memory_space<vmem>>, %arg30: memref<32x32xf32, #tpu.memory_space<vmem>>) attributes {dimension_semantics = [#tpu.dimension_semantics<parallel>, #tpu.dimension_semantics<arbitrary>], iteration_bounds = array<i64: 1, 2>, scalar_prefetch = 0 : i64, scratch_operands = 1 : i64, tpu.core_type = #tpu.core_type<tc>, window_params = [{transform_indices = @transform_0, window_bounds = array<i64: 2, 16, 32>}, {transform_indices = @transform_1, window_bounds = array<i64: 2, 16, 32>}, {transform_indices = @transform_2, window_bounds = array<i64: 2, 16, 32>}, {transform_indices = @transform_3, window_bounds = array<i64: 2, 1, 16>}, {transform_indices = @transform_4, window_bounds = array<i64: 2, 1, 16>}, {pipeline_mode = #tpu.pipeline_mode<synchronous>, transform_indices = @transform_5, window_bounds = array<i64: 16, 16>}, {transform_indices = @transform_6, window_bounds = array<i64: 1, 1, 32>}, {transform_indices = @transform_7, window_bounds = array<i64: 1, 1, 32>}, {transform_indices = @transform_8, window_bounds = array<i64: 1, 32, 32>}, {transform_indices = @transform_9, window_bounds = array<i64: 1, 32, 32>}, {transform_indices = @transform_10, window_bounds = array<i64: 1, 32, 32>}, {transform_indices = @transform_11, window_bounds = array<i64: 1, 32, 32>}, {transform_indices = @transform_12, window_bounds = array<i64: 1, 1, 32>}, {transform_indices = @transform_13, window_bounds = array<i64: 1, 1, 32>}, {transform_indices = @transform_14, window_bounds = array<i64: 1, 32, 32>}, {transform_indices = @transform_15, window_bounds = array<i64: 1, 32, 32>}, {transform_indices = @transform_16, window_bounds = array<i64: 1, 32, 32>}, {transform_indices = @transform_17, window_bounds = array<i64: 1, 32, 32>}, {transform_indices = @transform_18, window_bounds = array<i64: 1, 1, 32>}, {transform_indices = @transform_19, window_bounds = array<i64: 1, 1, 32>}, {transform_indices = @transform_20, window_bounds = array<i64: 1, 9, 32, 128>}, {transform_indices = @transform_21, window_bounds = array<i64: 1, 1, 128>}, {transform_indices = @transform_22, window_bounds = array<i64: 1, 128, 32>}, {transform_indices = @transform_23, window_bounds = array<i64: 1, 1, 32>}, {pipeline_mode = #tpu.pipeline_mode<synchronous>, transform_indices = @transform_24, window_bounds = array<i64: 1, 32>}, {pipeline_mode = #tpu.pipeline_mode<synchronous>, transform_indices = @transform_25, window_bounds = array<i64: 1, 32>}, {transform_indices = @transform_26, window_bounds = array<i64: 2, 16, 32>}, {transform_indices = @transform_27, window_bounds = array<i64: 2, 1, 2, 16, 128>}]} {
    %c0_i32 = arith.constant 0 : i32
    %0 = arith.cmpi eq, %arg1, %c0_i32 : i32
    %1 = arith.extui %0 : i1 to i32
    %c0_i32_0 = arith.constant 0 : i32
    %2 = arith.cmpi ne, %1, %c0_i32_0 : i32
    scf.if %2 {
      %c0_190 = arith.constant 0 : index
      %c0_191 = arith.constant 0 : index
      %c0_192 = arith.constant 0 : index
      %434 = vector.load %arg2[%c0_190, %c0_191, %c0_192] : memref<2x16x32xf32, #tpu.memory_space<vmem>>, vector<2x16x32xf32>
      %c0_193 = arith.constant 0 : index
      %c0_194 = arith.constant 0 : index
      %c0_195 = arith.constant 0 : index
      %435 = vector.load %arg4[%c0_193, %c0_194, %c0_195] : memref<2x16x32xf32, #tpu.memory_space<vmem>>, vector<2x16x32xf32>
      %436 = arith.addf %434, %435 : vector<2x16x32xf32>
      %437 = vector.shape_cast %436 : vector<2x16x32xf32> to vector<32x32xf32>
      %c0_196 = arith.constant 0 : index
      %c0_197 = arith.constant 0 : index
      %438 = vector.load %arg30[%c0_196, %c0_197] : memref<32x32xf32, #tpu.memory_space<vmem>>, vector<32x32xf32>
      tpu.vector_store %arg30[%c0_196, %c0_197], %437 {strides = array<i32>} : memref<32x32xf32, #tpu.memory_space<vmem>>, vector<32x32xf32>,
    } else {
    }
    %c0 = arith.constant 0 : index
    %c0_1 = arith.constant 0 : index
    %3 = vector.load %arg30[%c0, %c0_1] : memref<32x32xf32, #tpu.memory_space<vmem>>, vector<32x32xf32>
    %c0_2 = arith.constant 0 : index
    %c0_3 = arith.constant 0 : index
    %c0_4 = arith.constant 0 : index
    %4 = vector.load %arg5[%c0_2, %c0_3, %c0_4] : memref<2x1x16xf32, #tpu.memory_space<vmem>>, vector<2x1x16xf32>
    %cst = arith.constant 5.000000e-01 : f32
    %5 = vector.broadcast %cst : f32 to vector<2x1x16xf32>
    %6 = arith.cmpf ogt, %4, %5 : vector<2x1x16xf32>
    %c0_5 = arith.constant 0 : index
    %c0_6 = arith.constant 0 : index
    %c0_7 = arith.constant 0 : index
    %7 = vector.load %arg6[%c0_5, %c0_6, %c0_7] : memref<2x1x16xf32, #tpu.memory_space<vmem>>, vector<2x1x16xf32>
    %cst_8 = arith.constant 5.000000e-01 : f32
    %8 = vector.broadcast %cst_8 : f32 to vector<2x1x16xf32>
    %9 = arith.cmpf ogt, %7, %8 : vector<2x1x16xf32>
    %c0_9 = arith.constant 0 : index
    %c0_10 = arith.constant 0 : index
    %10 = vector.load %arg7[%c0_9, %c0_10] : memref<16x16xf32, #tpu.memory_space<vmem>>, vector<16x16xf32>
    %c0_11 = arith.constant 0 : index
    %c0_12 = arith.constant 0 : index
    %c0_13 = arith.constant 0 : index
    %11 = vector.load %arg8[%c0_11, %c0_12, %c0_13] : memref<1x1x32xf32, #tpu.memory_space<vmem>>, vector<1x1x32xf32>
    %12 = vector.shape_cast %11 : vector<1x1x32xf32> to vector<1x32xf32>
    %c0_14 = arith.constant 0 : index
    %c0_15 = arith.constant 0 : index
    %c0_16 = arith.constant 0 : index
    %13 = vector.load %arg9[%c0_14, %c0_15, %c0_16] : memref<1x1x32xf32, #tpu.memory_space<vmem>>, vector<1x1x32xf32>
    %14 = vector.shape_cast %13 : vector<1x1x32xf32> to vector<1x32xf32>
    %cst_17 = arith.constant dense<0.000000e+00> : vector<32xf32>
    %15 = vector.multi_reduction <add>, %3, %cst_17 [1] : vector<32x32xf32> to vector<32xf32>
    %16 = vector.shape_cast %15 : vector<32xf32> to vector<32x1xf32>
    %cst_18 = arith.constant 3.200000e+01 : f32
    %17 = vector.broadcast %cst_18 : f32 to vector<32x1xf32>
    %18 = arith.divf %16, %17 : vector<32x1xf32>
    %19 = vector.broadcast %18 : vector<32x1xf32> to vector<32x32xf32>
    %20 = arith.subf %3, %19 : vector<32x32xf32>
    %21 = arith.mulf %20, %20 : vector<32x32xf32>
    %cst_19 = arith.constant dense<0.000000e+00> : vector<32xf32>
    %22 = vector.multi_reduction <add>, %21, %cst_19 [1] : vector<32x32xf32> to vector<32xf32>
    %23 = vector.shape_cast %22 : vector<32xf32> to vector<32x1xf32>
    %cst_20 = arith.constant 3.200000e+01 : f32
    %24 = vector.broadcast %cst_20 : f32 to vector<32x1xf32>
    %25 = arith.divf %23, %24 : vector<32x1xf32>
    %26 = vector.broadcast %18 : vector<32x1xf32> to vector<32x32xf32>
    %27 = arith.subf %3, %26 : vector<32x32xf32>
    %cst_21 = arith.constant 9.99999974E-6 : f32
    %28 = vector.broadcast %cst_21 : f32 to vector<32x1xf32>
    %29 = arith.addf %25, %28 : vector<32x1xf32>
    %30 = math.rsqrt %29 : vector<32x1xf32>
    %31 = vector.broadcast %30 : vector<32x1xf32> to vector<32x32xf32>
    %32 = arith.mulf %27, %31 : vector<32x32xf32>
    %33 = vector.broadcast %12 : vector<1x32xf32> to vector<32x32xf32>
    %34 = arith.mulf %32, %33 : vector<32x32xf32>
    %35 = vector.broadcast %14 : vector<1x32xf32> to vector<32x32xf32>
    %36 = arith.addf %34, %35 : vector<32x32xf32>
    %37 = arith.truncf %36 : vector<32x32xf32> to vector<32x32xbf16>
    %c0_22 = arith.constant 0 : index
    %c0_23 = arith.constant 0 : index
    %c0_24 = arith.constant 0 : index
    %38 = vector.load %arg10[%c0_22, %c0_23, %c0_24] : memref<1x32x32xbf16, #tpu.memory_space<vmem>>, vector<1x32x32xbf16>
    %39 = vector.shape_cast %38 : vector<1x32x32xbf16> to vector<32x32xbf16>
    %cst_25 = arith.constant dense<0.000000e+00> : vector<32x32xf32>
    %40 = tpu.matmul %37, %39, %cst_25 {dimension_numbers = #tpu.dot_dimension_numbers<[1], [0], [0], [1], [0, 0, 1, 1], [], []>} : vector<32x32xbf16>, vector<32x32xbf16>, vector<32x32xf32> -> vector<32x32xf32>
    %cst_26 = arith.constant 2.500000e-01 : f32
    %41 = vector.broadcast %cst_26 : f32 to vector<32x32xf32>
    %42 = arith.mulf %40, %41 : vector<32x32xf32>
    %43 = arith.truncf %36 : vector<32x32xf32> to vector<32x32xbf16>
    %c0_27 = arith.constant 0 : index
    %c0_28 = arith.constant 0 : index
    %c0_29 = arith.constant 0 : index
    %44 = vector.load %arg11[%c0_27, %c0_28, %c0_29] : memref<1x32x32xbf16, #tpu.memory_space<vmem>>, vector<1x32x32xbf16>
    %45 = vector.shape_cast %44 : vector<1x32x32xbf16> to vector<32x32xbf16>
    %cst_30 = arith.constant dense<0.000000e+00> : vector<32x32xf32>
    %46 = tpu.matmul %43, %45, %cst_30 {dimension_numbers = #tpu.dot_dimension_numbers<[1], [0], [0], [1], [0, 0, 1, 1], [], []>} : vector<32x32xbf16>, vector<32x32xbf16>, vector<32x32xf32> -> vector<32x32xf32>
    %47 = arith.truncf %36 : vector<32x32xf32> to vector<32x32xbf16>
    %c0_31 = arith.constant 0 : index
    %c0_32 = arith.constant 0 : index
    %c0_33 = arith.constant 0 : index
    %48 = vector.load %arg12[%c0_31, %c0_32, %c0_33] : memref<1x32x32xbf16, #tpu.memory_space<vmem>>, vector<1x32x32xbf16>
    %49 = vector.shape_cast %48 : vector<1x32x32xbf16> to vector<32x32xbf16>
    %cst_34 = arith.constant dense<0.000000e+00> : vector<32x32xf32>
    %50 = tpu.matmul %47, %49, %cst_34 {dimension_numbers = #tpu.dot_dimension_numbers<[1], [0], [0], [1], [0, 0, 1, 1], [], []>} : vector<32x32xbf16>, vector<32x32xbf16>, vector<32x32xf32> -> vector<32x32xf32>
    %51 = vector.shape_cast %42 : vector<32x32xf32> to vector<2x16x32xf32>
    %52 = vector.shape_cast %46 : vector<32x32xf32> to vector<2x16x32xf32>
    %53 = vector.shape_cast %50 : vector<32x32xf32> to vector<2x16x32xf32>
    %54 = vector.extract_strided_slice %51 {offsets = [0, 0, 0], sizes = [1, 16, 32], strides = [1, 1, 1]} : vector<2x16x32xf32> to vector<1x16x32xf32>
    %55 = vector.shape_cast %54 : vector<1x16x32xf32> to vector<16x32xf32>
    %56 = vector.shape_cast %55 : vector<16x32xf32> to vector<16x2x16xf32>
    %57 = tpu.transpose %56, [1, 0, 2] : vector<16x2x16xf32> -> vector<2x16x16xf32>
    %58 = arith.truncf %57 : vector<2x16x16xf32> to vector<2x16x16xbf16>
    %59 = vector.extract_strided_slice %52 {offsets = [0, 0, 0], sizes = [1, 16, 32], strides = [1, 1, 1]} : vector<2x16x32xf32> to vector<1x16x32xf32>
    %60 = vector.shape_cast %59 : vector<1x16x32xf32> to vector<16x32xf32>
    %61 = vector.shape_cast %60 : vector<16x32xf32> to vector<16x2x16xf32>
    %62 = tpu.transpose %61, [1, 0, 2] : vector<16x2x16xf32> -> vector<2x16x16xf32>
    %63 = arith.truncf %62 : vector<2x16x16xf32> to vector<2x16x16xbf16>
    %64 = vector.extract_strided_slice %53 {offsets = [0, 0, 0], sizes = [1, 16, 32], strides = [1, 1, 1]} : vector<2x16x32xf32> to vector<1x16x32xf32>
    %65 = vector.shape_cast %64 : vector<1x16x32xf32> to vector<16x32xf32>
    %66 = vector.shape_cast %65 : vector<16x32xf32> to vector<16x2x16xf32>
    %67 = tpu.transpose %66, [1, 0, 2] : vector<16x2x16xf32> -> vector<2x16x16xf32>
    %68 = arith.truncf %67 : vector<2x16x16xf32> to vector<2x16x16xbf16>
    "tpu.trace_start"() <{level = 10 : i32, message = "htd,hsd->hts"}> : () -> ()
    %cst_35 = arith.constant dense<0.000000e+00> : vector<2x16x16xf32>
    %69 = tpu.matmul %58, %63, %cst_35 {dimension_numbers = #tpu.dot_dimension_numbers<[2], [2], [1], [1], [0, 0, 0, 1, 1, 1], [0], [0]>} : vector<2x16x16xbf16>, vector<2x16x16xbf16>, vector<2x16x16xf32> -> vector<2x16x16xf32>
    "tpu.trace_stop"() : () -> ()
    %70 = vector.shape_cast %10 : vector<16x16xf32> to vector<1x16x16xf32>
    %71 = vector.broadcast %70 : vector<1x16x16xf32> to vector<2x16x16xf32>
    %72 = arith.addf %69, %71 : vector<2x16x16xf32>
    %73 = vector.extract_strided_slice %6 {offsets = [0, 0, 0], sizes = [1, 1, 16], strides = [1, 1, 1]} : vector<2x1x16xi1> to vector<1x1x16xi1>
    %74 = vector.shape_cast %73 : vector<1x1x16xi1> to vector<1x16xi1>
    %75 = vector.shape_cast %74 : vector<1x16xi1> to vector<1x1x16xi1>
    %cst_36 = arith.constant -1.000000e+09 : f32
    %76 = vector.shape_cast %75 : vector<1x1x16xi1> to vector<1x1x16xi1>
    %77 = vector.broadcast %76 : vector<1x1x16xi1> to vector<2x16x16xi1>
    %78 = vector.broadcast %cst_36 : f32 to vector<2x16x16xf32>
    %79 = arith.select %77, %78, %72 : vector<2x16x16xi1>, vector<2x16x16xf32>
    %cst_37 = arith.constant dense<0xFF800000> : vector<2x16xf32>
    %80 = vector.multi_reduction <maximumf>, %79, %cst_37 [2] : vector<2x16x16xf32> to vector<2x16xf32>
    %81 = vector.shape_cast %80 : vector<2x16xf32> to vector<2x16x1xf32>
    %82 = vector.broadcast %81 : vector<2x16x1xf32> to vector<2x16x16xf32>
    %83 = arith.subf %79, %82 : vector<2x16x16xf32>
    %84 = math.exp %83 : vector<2x16x16xf32>
    %cst_38 = arith.constant dense<0.000000e+00> : vector<2x16xf32>
    %85 = vector.multi_reduction <add>, %84, %cst_38 [2] : vector<2x16x16xf32> to vector<2x16xf32>
    %86 = vector.shape_cast %85 : vector<2x16xf32> to vector<2x16x1xf32>
    %87 = tpu.reciprocal %86 {approx = true} : vector<2x16x1xf32> -> vector<2x16x1xf32>
    %88 = vector.broadcast %87 : vector<2x16x1xf32> to vector<2x16x16xf32>
    %89 = arith.mulf %84, %88 : vector<2x16x16xf32>
    %90 = arith.truncf %89 : vector<2x16x16xf32> to vector<2x16x16xbf16>
    "tpu.trace_start"() <{level = 10 : i32, message = "hts,hsd->htd"}> : () -> ()
    %cst_39 = arith.constant dense<0.000000e+00> : vector<2x16x16xf32>
    %91 = tpu.matmul %90, %68, %cst_39 {dimension_numbers = #tpu.dot_dimension_numbers<[2], [1], [1], [2], [0, 0, 0, 1, 1, 2], [0], [0]>} : vector<2x16x16xbf16>, vector<2x16x16xbf16>, vector<2x16x16xf32> -> vector<2x16x16xf32>
    "tpu.trace_stop"() : () -> ()
    %92 = tpu.transpose %91, [1, 0, 2] : vector<2x16x16xf32> -> vector<16x2x16xf32>
    %93 = vector.shape_cast %92 : vector<16x2x16xf32> to vector<16x32xf32>
    %94 = vector.extract_strided_slice %51 {offsets = [1, 0, 0], sizes = [1, 16, 32], strides = [1, 1, 1]} : vector<2x16x32xf32> to vector<1x16x32xf32>
    %95 = vector.shape_cast %94 : vector<1x16x32xf32> to vector<16x32xf32>
    %96 = vector.shape_cast %95 : vector<16x32xf32> to vector<16x2x16xf32>
    %97 = tpu.transpose %96, [1, 0, 2] : vector<16x2x16xf32> -> vector<2x16x16xf32>
    %98 = arith.truncf %97 : vector<2x16x16xf32> to vector<2x16x16xbf16>
    %99 = vector.extract_strided_slice %52 {offsets = [1, 0, 0], sizes = [1, 16, 32], strides = [1, 1, 1]} : vector<2x16x32xf32> to vector<1x16x32xf32>
    %100 = vector.shape_cast %99 : vector<1x16x32xf32> to vector<16x32xf32>
    %101 = vector.shape_cast %100 : vector<16x32xf32> to vector<16x2x16xf32>
    %102 = tpu.transpose %101, [1, 0, 2] : vector<16x2x16xf32> -> vector<2x16x16xf32>
    %103 = arith.truncf %102 : vector<2x16x16xf32> to vector<2x16x16xbf16>
    %104 = vector.extract_strided_slice %53 {offsets = [1, 0, 0], sizes = [1, 16, 32], strides = [1, 1, 1]} : vector<2x16x32xf32> to vector<1x16x32xf32>
    %105 = vector.shape_cast %104 : vector<1x16x32xf32> to vector<16x32xf32>
    %106 = vector.shape_cast %105 : vector<16x32xf32> to vector<16x2x16xf32>
    %107 = tpu.transpose %106, [1, 0, 2] : vector<16x2x16xf32> -> vector<2x16x16xf32>
    %108 = arith.truncf %107 : vector<2x16x16xf32> to vector<2x16x16xbf16>
    "tpu.trace_start"() <{level = 10 : i32, message = "htd,hsd->hts"}> : () -> ()
    %cst_40 = arith.constant dense<0.000000e+00> : vector<2x16x16xf32>
    %109 = tpu.matmul %98, %103, %cst_40 {dimension_numbers = #tpu.dot_dimension_numbers<[2], [2], [1], [1], [0, 0, 0, 1, 1, 1], [0], [0]>} : vector<2x16x16xbf16>, vector<2x16x16xbf16>, vector<2x16x16xf32> -> vector<2x16x16xf32>
    "tpu.trace_stop"() : () -> ()
    %110 = vector.shape_cast %10 : vector<16x16xf32> to vector<1x16x16xf32>
    %111 = vector.broadcast %110 : vector<1x16x16xf32> to vector<2x16x16xf32>
    %112 = arith.addf %109, %111 : vector<2x16x16xf32>
    %113 = vector.extract_strided_slice %6 {offsets = [1, 0, 0], sizes = [1, 1, 16], strides = [1, 1, 1]} : vector<2x1x16xi1> to vector<1x1x16xi1>
    %114 = vector.shape_cast %113 : vector<1x1x16xi1> to vector<1x16xi1>
    %115 = vector.shape_cast %114 : vector<1x16xi1> to vector<1x1x16xi1>
    %cst_41 = arith.constant -1.000000e+09 : f32
    %116 = vector.shape_cast %115 : vector<1x1x16xi1> to vector<1x1x16xi1>
    %117 = vector.broadcast %116 : vector<1x1x16xi1> to vector<2x16x16xi1>
    %118 = vector.broadcast %cst_41 : f32 to vector<2x16x16xf32>
    %119 = arith.select %117, %118, %112 : vector<2x16x16xi1>, vector<2x16x16xf32>
    %cst_42 = arith.constant dense<0xFF800000> : vector<2x16xf32>
    %120 = vector.multi_reduction <maximumf>, %119, %cst_42 [2] : vector<2x16x16xf32> to vector<2x16xf32>
    %121 = vector.shape_cast %120 : vector<2x16xf32> to vector<2x16x1xf32>
    %122 = vector.broadcast %121 : vector<2x16x1xf32> to vector<2x16x16xf32>
    %123 = arith.subf %119, %122 : vector<2x16x16xf32>
    %124 = math.exp %123 : vector<2x16x16xf32>
    %cst_43 = arith.constant dense<0.000000e+00> : vector<2x16xf32>
    %125 = vector.multi_reduction <add>, %124, %cst_43 [2] : vector<2x16x16xf32> to vector<2x16xf32>
    %126 = vector.shape_cast %125 : vector<2x16xf32> to vector<2x16x1xf32>
    %127 = tpu.reciprocal %126 {approx = true} : vector<2x16x1xf32> -> vector<2x16x1xf32>
    %128 = vector.broadcast %127 : vector<2x16x1xf32> to vector<2x16x16xf32>
    %129 = arith.mulf %124, %128 : vector<2x16x16xf32>
    %130 = arith.truncf %129 : vector<2x16x16xf32> to vector<2x16x16xbf16>
    "tpu.trace_start"() <{level = 10 : i32, message = "hts,hsd->htd"}> : () -> ()
    %cst_44 = arith.constant dense<0.000000e+00> : vector<2x16x16xf32>
    %131 = tpu.matmul %130, %108, %cst_44 {dimension_numbers = #tpu.dot_dimension_numbers<[2], [1], [1], [2], [0, 0, 0, 1, 1, 2], [0], [0]>} : vector<2x16x16xbf16>, vector<2x16x16xbf16>, vector<2x16x16xf32> -> vector<2x16x16xf32>
    "tpu.trace_stop"() : () -> ()
    %132 = tpu.transpose %131, [1, 0, 2] : vector<2x16x16xf32> -> vector<16x2x16xf32>
    %133 = vector.shape_cast %132 : vector<16x2x16xf32> to vector<16x32xf32>
    %134 = tpu.concatenate %93, %133 in 0 : vector<16x32xf32>, vector<16x32xf32> -> vector<32x32xf32>
    %135 = arith.truncf %134 : vector<32x32xf32> to vector<32x32xbf16>
    %c0_45 = arith.constant 0 : index
    %c0_46 = arith.constant 0 : index
    %c0_47 = arith.constant 0 : index
    %136 = vector.load %arg13[%c0_45, %c0_46, %c0_47] : memref<1x32x32xbf16, #tpu.memory_space<vmem>>, vector<1x32x32xbf16>
    %137 = vector.shape_cast %136 : vector<1x32x32xbf16> to vector<32x32xbf16>
    %cst_48 = arith.constant dense<0.000000e+00> : vector<32x32xf32>
    %138 = tpu.matmul %135, %137, %cst_48 {dimension_numbers = #tpu.dot_dimension_numbers<[1], [0], [0], [1], [0, 0, 1, 1], [], []>} : vector<32x32xbf16>, vector<32x32xbf16>, vector<32x32xf32> -> vector<32x32xf32>
    %139 = arith.addf %3, %138 : vector<32x32xf32>
    %c0_49 = arith.constant 0 : index
    %c0_50 = arith.constant 0 : index
    %c0_51 = arith.constant 0 : index
    %140 = vector.load %arg14[%c0_49, %c0_50, %c0_51] : memref<1x1x32xf32, #tpu.memory_space<vmem>>, vector<1x1x32xf32>
    %141 = vector.shape_cast %140 : vector<1x1x32xf32> to vector<1x32xf32>
    %c0_52 = arith.constant 0 : index
    %c0_53 = arith.constant 0 : index
    %c0_54 = arith.constant 0 : index
    %142 = vector.load %arg15[%c0_52, %c0_53, %c0_54] : memref<1x1x32xf32, #tpu.memory_space<vmem>>, vector<1x1x32xf32>
    %143 = vector.shape_cast %142 : vector<1x1x32xf32> to vector<1x32xf32>
    %cst_55 = arith.constant dense<0.000000e+00> : vector<32xf32>
    %144 = vector.multi_reduction <add>, %139, %cst_55 [1] : vector<32x32xf32> to vector<32xf32>
    %145 = vector.shape_cast %144 : vector<32xf32> to vector<32x1xf32>
    %cst_56 = arith.constant 3.200000e+01 : f32
    %146 = vector.broadcast %cst_56 : f32 to vector<32x1xf32>
    %147 = arith.divf %145, %146 : vector<32x1xf32>
    %148 = vector.broadcast %147 : vector<32x1xf32> to vector<32x32xf32>
    %149 = arith.subf %139, %148 : vector<32x32xf32>
    %150 = arith.mulf %149, %149 : vector<32x32xf32>
    %cst_57 = arith.constant dense<0.000000e+00> : vector<32xf32>
    %151 = vector.multi_reduction <add>, %150, %cst_57 [1] : vector<32x32xf32> to vector<32xf32>
    %152 = vector.shape_cast %151 : vector<32xf32> to vector<32x1xf32>
    %cst_58 = arith.constant 3.200000e+01 : f32
    %153 = vector.broadcast %cst_58 : f32 to vector<32x1xf32>
    %154 = arith.divf %152, %153 : vector<32x1xf32>
    %155 = vector.broadcast %147 : vector<32x1xf32> to vector<32x32xf32>
    %156 = arith.subf %139, %155 : vector<32x32xf32>
    %cst_59 = arith.constant 9.99999974E-6 : f32
    %157 = vector.broadcast %cst_59 : f32 to vector<32x1xf32>
    %158 = arith.addf %154, %157 : vector<32x1xf32>
    %159 = math.rsqrt %158 : vector<32x1xf32>
    %160 = vector.broadcast %159 : vector<32x1xf32> to vector<32x32xf32>
    %161 = arith.mulf %156, %160 : vector<32x32xf32>
    %162 = vector.broadcast %141 : vector<1x32xf32> to vector<32x32xf32>
    %163 = arith.mulf %161, %162 : vector<32x32xf32>
    %164 = vector.broadcast %143 : vector<1x32xf32> to vector<32x32xf32>
    %165 = arith.addf %163, %164 : vector<32x32xf32>
    %c0_60 = arith.constant 0 : index
    %c0_61 = arith.constant 0 : index
    %c0_62 = arith.constant 0 : index
    %166 = vector.load %arg3[%c0_60, %c0_61, %c0_62] : memref<2x16x32xf32, #tpu.memory_space<vmem>>, vector<2x16x32xf32>
    %167 = vector.shape_cast %166 : vector<2x16x32xf32> to vector<32x32xf32>
    %168 = arith.truncf %165 : vector<32x32xf32> to vector<32x32xbf16>
    %c0_63 = arith.constant 0 : index
    %c0_64 = arith.constant 0 : index
    %c0_65 = arith.constant 0 : index
    %169 = vector.load %arg16[%c0_63, %c0_64, %c0_65] : memref<1x32x32xbf16, #tpu.memory_space<vmem>>, vector<1x32x32xbf16>
    %170 = vector.shape_cast %169 : vector<1x32x32xbf16> to vector<32x32xbf16>
    %cst_66 = arith.constant dense<0.000000e+00> : vector<32x32xf32>
    %171 = tpu.matmul %168, %170, %cst_66 {dimension_numbers = #tpu.dot_dimension_numbers<[1], [0], [0], [1], [0, 0, 1, 1], [], []>} : vector<32x32xbf16>, vector<32x32xbf16>, vector<32x32xf32> -> vector<32x32xf32>
    %cst_67 = arith.constant 2.500000e-01 : f32
    %172 = vector.broadcast %cst_67 : f32 to vector<32x32xf32>
    %173 = arith.mulf %171, %172 : vector<32x32xf32>
    %174 = arith.truncf %167 : vector<32x32xf32> to vector<32x32xbf16>
    %c0_68 = arith.constant 0 : index
    %c0_69 = arith.constant 0 : index
    %c0_70 = arith.constant 0 : index
    %175 = vector.load %arg17[%c0_68, %c0_69, %c0_70] : memref<1x32x32xbf16, #tpu.memory_space<vmem>>, vector<1x32x32xbf16>
    %176 = vector.shape_cast %175 : vector<1x32x32xbf16> to vector<32x32xbf16>
    %cst_71 = arith.constant dense<0.000000e+00> : vector<32x32xf32>
    %177 = tpu.matmul %174, %176, %cst_71 {dimension_numbers = #tpu.dot_dimension_numbers<[1], [0], [0], [1], [0, 0, 1, 1], [], []>} : vector<32x32xbf16>, vector<32x32xbf16>, vector<32x32xf32> -> vector<32x32xf32>
    %178 = arith.truncf %167 : vector<32x32xf32> to vector<32x32xbf16>
    %c0_72 = arith.constant 0 : index
    %c0_73 = arith.constant 0 : index
    %c0_74 = arith.constant 0 : index
    %179 = vector.load %arg18[%c0_72, %c0_73, %c0_74] : memref<1x32x32xbf16, #tpu.memory_space<vmem>>, vector<1x32x32xbf16>
    %180 = vector.shape_cast %179 : vector<1x32x32xbf16> to vector<32x32xbf16>
    %cst_75 = arith.constant dense<0.000000e+00> : vector<32x32xf32>
    %181 = tpu.matmul %178, %180, %cst_75 {dimension_numbers = #tpu.dot_dimension_numbers<[1], [0], [0], [1], [0, 0, 1, 1], [], []>} : vector<32x32xbf16>, vector<32x32xbf16>, vector<32x32xf32> -> vector<32x32xf32>
    %182 = vector.shape_cast %173 : vector<32x32xf32> to vector<2x16x32xf32>
    %183 = vector.shape_cast %177 : vector<32x32xf32> to vector<2x16x32xf32>
    %184 = vector.shape_cast %181 : vector<32x32xf32> to vector<2x16x32xf32>
    %185 = vector.extract_strided_slice %182 {offsets = [0, 0, 0], sizes = [1, 16, 32], strides = [1, 1, 1]} : vector<2x16x32xf32> to vector<1x16x32xf32>
    %186 = vector.shape_cast %185 : vector<1x16x32xf32> to vector<16x32xf32>
    %187 = vector.shape_cast %186 : vector<16x32xf32> to vector<16x2x16xf32>
    %188 = tpu.transpose %187, [1, 0, 2] : vector<16x2x16xf32> -> vector<2x16x16xf32>
    %189 = arith.truncf %188 : vector<2x16x16xf32> to vector<2x16x16xbf16>
    %190 = vector.extract_strided_slice %183 {offsets = [0, 0, 0], sizes = [1, 16, 32], strides = [1, 1, 1]} : vector<2x16x32xf32> to vector<1x16x32xf32>
    %191 = vector.shape_cast %190 : vector<1x16x32xf32> to vector<16x32xf32>
    %192 = vector.shape_cast %191 : vector<16x32xf32> to vector<16x2x16xf32>
    %193 = tpu.transpose %192, [1, 0, 2] : vector<16x2x16xf32> -> vector<2x16x16xf32>
    %194 = arith.truncf %193 : vector<2x16x16xf32> to vector<2x16x16xbf16>
    %195 = vector.extract_strided_slice %184 {offsets = [0, 0, 0], sizes = [1, 16, 32], strides = [1, 1, 1]} : vector<2x16x32xf32> to vector<1x16x32xf32>
    %196 = vector.shape_cast %195 : vector<1x16x32xf32> to vector<16x32xf32>
    %197 = vector.shape_cast %196 : vector<16x32xf32> to vector<16x2x16xf32>
    %198 = tpu.transpose %197, [1, 0, 2] : vector<16x2x16xf32> -> vector<2x16x16xf32>
    %199 = arith.truncf %198 : vector<2x16x16xf32> to vector<2x16x16xbf16>
    "tpu.trace_start"() <{level = 10 : i32, message = "htd,hsd->hts"}> : () -> ()
    %cst_76 = arith.constant dense<0.000000e+00> : vector<2x16x16xf32>
    %200 = tpu.matmul %189, %194, %cst_76 {dimension_numbers = #tpu.dot_dimension_numbers<[2], [2], [1], [1], [0, 0, 0, 1, 1, 1], [0], [0]>} : vector<2x16x16xbf16>, vector<2x16x16xbf16>, vector<2x16x16xf32> -> vector<2x16x16xf32>
    "tpu.trace_stop"() : () -> ()
    %201 = vector.extract_strided_slice %9 {offsets = [0, 0, 0], sizes = [1, 1, 16], strides = [1, 1, 1]} : vector<2x1x16xi1> to vector<1x1x16xi1>
    %202 = vector.shape_cast %201 : vector<1x1x16xi1> to vector<1x16xi1>
    %203 = vector.shape_cast %202 : vector<1x16xi1> to vector<1x1x16xi1>
    %cst_77 = arith.constant -1.000000e+09 : f32
    %204 = vector.shape_cast %203 : vector<1x1x16xi1> to vector<1x1x16xi1>
    %205 = vector.broadcast %204 : vector<1x1x16xi1> to vector<2x16x16xi1>
    %206 = vector.broadcast %cst_77 : f32 to vector<2x16x16xf32>
    %207 = arith.select %205, %206, %200 : vector<2x16x16xi1>, vector<2x16x16xf32>
    %cst_78 = arith.constant 0.000000e+00 : f32
    %208 = vector.broadcast %cst_78 : f32 to vector<2x16x112xf32>
    %209 = tpu.concatenate %207, %208 in 2 : vector<2x16x16xf32>, vector<2x16x112xf32> -> vector<2x16x128xf32>
    %c0_79 = arith.constant 0 : index
    %c0_80 = arith.constant 0 : index
    %c0_81 = arith.constant 0 : index
    %c0_82 = arith.constant 0 : index
    %c0_83 = arith.constant 0 : index
    %210 = vector.load %arg29[%c0_79, %c0_80, %c0_81, %c0_82, %c0_83] : memref<2x1x2x16x128xf32, #tpu.memory_space<vmem>>, vector<1x1x2x16x128xf32>
    %211 = vector.shape_cast %210 : vector<1x1x2x16x128xf32> to vector<2x16x128xf32>
    %212 = vector.shape_cast %209 : vector<2x16x128xf32> to vector<1x1x2x16x128xf32>
    tpu.vector_store %arg29[%c0_79, %c0_80, %c0_81, %c0_82, %c0_83], %212 {strides = array<i32>} : memref<2x1x2x16x128xf32, #tpu.memory_space<vmem>>, vector<1x1x2x16x128xf32>,
    %cst_84 = arith.constant dense<0xFF800000> : vector<2x16xf32>
    %213 = vector.multi_reduction <maximumf>, %207, %cst_84 [2] : vector<2x16x16xf32> to vector<2x16xf32>
    %214 = vector.shape_cast %213 : vector<2x16xf32> to vector<2x16x1xf32>
    %215 = vector.broadcast %214 : vector<2x16x1xf32> to vector<2x16x16xf32>
    %216 = arith.subf %207, %215 : vector<2x16x16xf32>
    %217 = math.exp %216 : vector<2x16x16xf32>
    %cst_85 = arith.constant dense<0.000000e+00> : vector<2x16xf32>
    %218 = vector.multi_reduction <add>, %217, %cst_85 [2] : vector<2x16x16xf32> to vector<2x16xf32>
    %219 = vector.shape_cast %218 : vector<2x16xf32> to vector<2x16x1xf32>
    %220 = tpu.reciprocal %219 {approx = true} : vector<2x16x1xf32> -> vector<2x16x1xf32>
    %221 = vector.broadcast %220 : vector<2x16x1xf32> to vector<2x16x16xf32>
    %222 = arith.mulf %217, %221 : vector<2x16x16xf32>
    %223 = arith.truncf %222 : vector<2x16x16xf32> to vector<2x16x16xbf16>
    "tpu.trace_start"() <{level = 10 : i32, message = "hts,hsd->htd"}> : () -> ()
    %cst_86 = arith.constant dense<0.000000e+00> : vector<2x16x16xf32>
    %224 = tpu.matmul %223, %199, %cst_86 {dimension_numbers = #tpu.dot_dimension_numbers<[2], [1], [1], [2], [0, 0, 0, 1, 1, 2], [0], [0]>} : vector<2x16x16xbf16>, vector<2x16x16xbf16>, vector<2x16x16xf32> -> vector<2x16x16xf32>
    "tpu.trace_stop"() : () -> ()
    %225 = tpu.transpose %224, [1, 0, 2] : vector<2x16x16xf32> -> vector<16x2x16xf32>
    %226 = vector.shape_cast %225 : vector<16x2x16xf32> to vector<16x32xf32>
    %227 = vector.extract_strided_slice %182 {offsets = [1, 0, 0], sizes = [1, 16, 32], strides = [1, 1, 1]} : vector<2x16x32xf32> to vector<1x16x32xf32>
    %228 = vector.shape_cast %227 : vector<1x16x32xf32> to vector<16x32xf32>
    %229 = vector.shape_cast %228 : vector<16x32xf32> to vector<16x2x16xf32>
    %230 = tpu.transpose %229, [1, 0, 2] : vector<16x2x16xf32> -> vector<2x16x16xf32>
    %231 = arith.truncf %230 : vector<2x16x16xf32> to vector<2x16x16xbf16>
    %232 = vector.extract_strided_slice %183 {offsets = [1, 0, 0], sizes = [1, 16, 32], strides = [1, 1, 1]} : vector<2x16x32xf32> to vector<1x16x32xf32>
    %233 = vector.shape_cast %232 : vector<1x16x32xf32> to vector<16x32xf32>
    %234 = vector.shape_cast %233 : vector<16x32xf32> to vector<16x2x16xf32>
    %235 = tpu.transpose %234, [1, 0, 2] : vector<16x2x16xf32> -> vector<2x16x16xf32>
    %236 = arith.truncf %235 : vector<2x16x16xf32> to vector<2x16x16xbf16>
    %237 = vector.extract_strided_slice %184 {offsets = [1, 0, 0], sizes = [1, 16, 32], strides = [1, 1, 1]} : vector<2x16x32xf32> to vector<1x16x32xf32>
    %238 = vector.shape_cast %237 : vector<1x16x32xf32> to vector<16x32xf32>
    %239 = vector.shape_cast %238 : vector<16x32xf32> to vector<16x2x16xf32>
    %240 = tpu.transpose %239, [1, 0, 2] : vector<16x2x16xf32> -> vector<2x16x16xf32>
    %241 = arith.truncf %240 : vector<2x16x16xf32> to vector<2x16x16xbf16>
    "tpu.trace_start"() <{level = 10 : i32, message = "htd,hsd->hts"}> : () -> ()
    %cst_87 = arith.constant dense<0.000000e+00> : vector<2x16x16xf32>
    %242 = tpu.matmul %231, %236, %cst_87 {dimension_numbers = #tpu.dot_dimension_numbers<[2], [2], [1], [1], [0, 0, 0, 1, 1, 1], [0], [0]>} : vector<2x16x16xbf16>, vector<2x16x16xbf16>, vector<2x16x16xf32> -> vector<2x16x16xf32>
    "tpu.trace_stop"() : () -> ()
    %243 = vector.extract_strided_slice %9 {offsets = [1, 0, 0], sizes = [1, 1, 16], strides = [1, 1, 1]} : vector<2x1x16xi1> to vector<1x1x16xi1>
    %244 = vector.shape_cast %243 : vector<1x1x16xi1> to vector<1x16xi1>
    %245 = vector.shape_cast %244 : vector<1x16xi1> to vector<1x1x16xi1>
    %cst_88 = arith.constant -1.000000e+09 : f32
    %246 = vector.shape_cast %245 : vector<1x1x16xi1> to vector<1x1x16xi1>
    %247 = vector.broadcast %246 : vector<1x1x16xi1> to vector<2x16x16xi1>
    %248 = vector.broadcast %cst_88 : f32 to vector<2x16x16xf32>
    %249 = arith.select %247, %248, %242 : vector<2x16x16xi1>, vector<2x16x16xf32>
    %cst_89 = arith.constant 0.000000e+00 : f32
    %250 = vector.broadcast %cst_89 : f32 to vector<2x16x112xf32>
    %251 = tpu.concatenate %249, %250 in 2 : vector<2x16x16xf32>, vector<2x16x112xf32> -> vector<2x16x128xf32>
    %c1 = arith.constant 1 : index
    %c0_90 = arith.constant 0 : index
    %c0_91 = arith.constant 0 : index
    %c0_92 = arith.constant 0 : index
    %c0_93 = arith.constant 0 : index
    %252 = vector.load %arg29[%c1, %c0_90, %c0_91, %c0_92, %c0_93] : memref<2x1x2x16x128xf32, #tpu.memory_space<vmem>>, vector<1x1x2x16x128xf32>
    %253 = vector.shape_cast %252 : vector<1x1x2x16x128xf32> to vector<2x16x128xf32>
    %254 = vector.shape_cast %251 : vector<2x16x128xf32> to vector<1x1x2x16x128xf32>
    tpu.vector_store %arg29[%c1, %c0_90, %c0_91, %c0_92, %c0_93], %254 {strides = array<i32>} : memref<2x1x2x16x128xf32, #tpu.memory_space<vmem>>, vector<1x1x2x16x128xf32>,
    %cst_94 = arith.constant dense<0xFF800000> : vector<2x16xf32>
    %255 = vector.multi_reduction <maximumf>, %249, %cst_94 [2] : vector<2x16x16xf32> to vector<2x16xf32>
    %256 = vector.shape_cast %255 : vector<2x16xf32> to vector<2x16x1xf32>
    %257 = vector.broadcast %256 : vector<2x16x1xf32> to vector<2x16x16xf32>
    %258 = arith.subf %249, %257 : vector<2x16x16xf32>
    %259 = math.exp %258 : vector<2x16x16xf32>
    %cst_95 = arith.constant dense<0.000000e+00> : vector<2x16xf32>
    %260 = vector.multi_reduction <add>, %259, %cst_95 [2] : vector<2x16x16xf32> to vector<2x16xf32>
    %261 = vector.shape_cast %260 : vector<2x16xf32> to vector<2x16x1xf32>
    %262 = tpu.reciprocal %261 {approx = true} : vector<2x16x1xf32> -> vector<2x16x1xf32>
    %263 = vector.broadcast %262 : vector<2x16x1xf32> to vector<2x16x16xf32>
    %264 = arith.mulf %259, %263 : vector<2x16x16xf32>
    %265 = arith.truncf %264 : vector<2x16x16xf32> to vector<2x16x16xbf16>
    "tpu.trace_start"() <{level = 10 : i32, message = "hts,hsd->htd"}> : () -> ()
    %cst_96 = arith.constant dense<0.000000e+00> : vector<2x16x16xf32>
    %266 = tpu.matmul %265, %241, %cst_96 {dimension_numbers = #tpu.dot_dimension_numbers<[2], [1], [1], [2], [0, 0, 0, 1, 1, 2], [0], [0]>} : vector<2x16x16xbf16>, vector<2x16x16xbf16>, vector<2x16x16xf32> -> vector<2x16x16xf32>
    "tpu.trace_stop"() : () -> ()
    %267 = tpu.transpose %266, [1, 0, 2] : vector<2x16x16xf32> -> vector<16x2x16xf32>
    %268 = vector.shape_cast %267 : vector<16x2x16xf32> to vector<16x32xf32>
    %269 = tpu.concatenate %226, %268 in 0 : vector<16x32xf32>, vector<16x32xf32> -> vector<32x32xf32>
    %270 = arith.truncf %269 : vector<32x32xf32> to vector<32x32xbf16>
    %c0_97 = arith.constant 0 : index
    %c0_98 = arith.constant 0 : index
    %c0_99 = arith.constant 0 : index
    %271 = vector.load %arg19[%c0_97, %c0_98, %c0_99] : memref<1x32x32xbf16, #tpu.memory_space<vmem>>, vector<1x32x32xbf16>
    %272 = vector.shape_cast %271 : vector<1x32x32xbf16> to vector<32x32xbf16>
    %cst_100 = arith.constant dense<0.000000e+00> : vector<32x32xf32>
    %273 = tpu.matmul %270, %272, %cst_100 {dimension_numbers = #tpu.dot_dimension_numbers<[1], [0], [0], [1], [0, 0, 1, 1], [], []>} : vector<32x32xbf16>, vector<32x32xbf16>, vector<32x32xf32> -> vector<32x32xf32>
    %274 = arith.addf %139, %273 : vector<32x32xf32>
    %c0_101 = arith.constant 0 : index
    %c0_102 = arith.constant 0 : index
    %c0_103 = arith.constant 0 : index
    %275 = vector.load %arg20[%c0_101, %c0_102, %c0_103] : memref<1x1x32xf32, #tpu.memory_space<vmem>>, vector<1x1x32xf32>
    %276 = vector.shape_cast %275 : vector<1x1x32xf32> to vector<1x32xf32>
    %c0_104 = arith.constant 0 : index
    %c0_105 = arith.constant 0 : index
    %c0_106 = arith.constant 0 : index
    %277 = vector.load %arg21[%c0_104, %c0_105, %c0_106] : memref<1x1x32xf32, #tpu.memory_space<vmem>>, vector<1x1x32xf32>
    %278 = vector.shape_cast %277 : vector<1x1x32xf32> to vector<1x32xf32>
    %cst_107 = arith.constant dense<0.000000e+00> : vector<32xf32>
    %279 = vector.multi_reduction <add>, %274, %cst_107 [1] : vector<32x32xf32> to vector<32xf32>
    %280 = vector.shape_cast %279 : vector<32xf32> to vector<32x1xf32>
    %cst_108 = arith.constant 3.200000e+01 : f32
    %281 = vector.broadcast %cst_108 : f32 to vector<32x1xf32>
    %282 = arith.divf %280, %281 : vector<32x1xf32>
    %283 = vector.broadcast %282 : vector<32x1xf32> to vector<32x32xf32>
    %284 = arith.subf %274, %283 : vector<32x32xf32>
    %285 = arith.mulf %284, %284 : vector<32x32xf32>
    %cst_109 = arith.constant dense<0.000000e+00> : vector<32xf32>
    %286 = vector.multi_reduction <add>, %285, %cst_109 [1] : vector<32x32xf32> to vector<32xf32>
    %287 = vector.shape_cast %286 : vector<32xf32> to vector<32x1xf32>
    %cst_110 = arith.constant 3.200000e+01 : f32
    %288 = vector.broadcast %cst_110 : f32 to vector<32x1xf32>
    %289 = arith.divf %287, %288 : vector<32x1xf32>
    %290 = vector.broadcast %282 : vector<32x1xf32> to vector<32x32xf32>
    %291 = arith.subf %274, %290 : vector<32x32xf32>
    %cst_111 = arith.constant 9.99999974E-6 : f32
    %292 = vector.broadcast %cst_111 : f32 to vector<32x1xf32>
    %293 = arith.addf %289, %292 : vector<32x1xf32>
    %294 = math.rsqrt %293 : vector<32x1xf32>
    %295 = vector.broadcast %294 : vector<32x1xf32> to vector<32x32xf32>
    %296 = arith.mulf %291, %295 : vector<32x32xf32>
    %297 = vector.broadcast %276 : vector<1x32xf32> to vector<32x32xf32>
    %298 = arith.mulf %296, %297 : vector<32x32xf32>
    %299 = vector.broadcast %278 : vector<1x32xf32> to vector<32x32xf32>
    %300 = arith.addf %298, %299 : vector<32x32xf32>
    %301 = tpu.iota {dimensions = array<i32: 0>} : vector<32x32xi32>
    %c16_i32 = arith.constant 16 : i32
    %c0_i32_112 = arith.constant 0 : i32
    %302 = arith.cmpi eq, %c16_i32, %c0_i32_112 : i32
    %c1_i32 = arith.constant 1 : i32
    %303 = arith.select %302, %c1_i32, %c16_i32 : i32
    %304 = vector.broadcast %303 : i32 to vector<32x32xi32>
    %305 = arith.remsi %301, %304 : vector<32x32xi32>
    %c0_i32_113 = arith.constant 0 : i32
    %306 = vector.broadcast %c0_i32_113 : i32 to vector<32x32xi32>
    %307 = arith.cmpi ne, %305, %306 : vector<32x32xi32>
    %c0_i32_114 = arith.constant 0 : i32
    %308 = vector.broadcast %c0_i32_114 : i32 to vector<32x32xi32>
    %309 = arith.cmpi slt, %305, %308 : vector<32x32xi32>
    %c0_i32_115 = arith.constant 0 : i32
    %310 = arith.cmpi slt, %303, %c0_i32_115 : i32
    %311 = vector.broadcast %310 : i1 to vector<32x32xi1>
    %312 = vector.broadcast %311 : vector<32x32xi1> to vector<32x32xi1>
    %313 = arith.xori %309, %312 : vector<32x32xi1>
    %314 = arith.andi %313, %307 : vector<32x32xi1>
    %315 = vector.broadcast %303 : i32 to vector<32x32xi32>
    %316 = arith.addi %305, %315 : vector<32x32xi32>
    %317 = arith.select %314, %316, %305 : vector<32x32xi1>, vector<32x32xi32>
    %318 = arith.truncf %300 : vector<32x32xf32> to vector<32x32xbf16>
    %c0_116 = arith.constant 0 : index
    %c8 = arith.constant 8 : index
    %c0_117 = arith.constant 0 : index
    %c0_118 = arith.constant 0 : index
    %319 = vector.load %arg22[%c0_116, %c8, %c0_117, %c0_118] : memref<1x9x32x128xbf16, #tpu.memory_space<vmem>>, vector<1x1x32x128xbf16>
    %320 = vector.shape_cast %319 : vector<1x1x32x128xbf16> to vector<32x128xbf16>
    %cst_119 = arith.constant dense<0.000000e+00> : vector<32x128xf32>
    %321 = tpu.matmul %318, %320, %cst_119 {dimension_numbers = #tpu.dot_dimension_numbers<[1], [0], [0], [1], [0, 0, 1, 1], [], []>} : vector<32x32xbf16>, vector<32x128xbf16>, vector<32x128xf32> -> vector<32x128xf32>
    %c8_i32 = arith.constant 8 : i32
    %322 = tpu.dynamic_rotate %300 by %c8_i32 dim 0 : vector<32x32xf32>, i32 -> vector<32x32xf32>
    %c8_i32_120 = arith.constant 8 : i32
    %323 = vector.broadcast %c8_i32_120 : i32 to vector<32x32xi32>
    %324 = arith.cmpi slt, %317, %323 : vector<32x32xi32>
    %cst_121 = arith.constant 0.000000e+00 : f32
    %325 = vector.broadcast %cst_121 : f32 to vector<32x32xf32>
    %326 = arith.select %324, %325, %322 : vector<32x32xi1>, vector<32x32xf32>
    %327 = arith.truncf %326 : vector<32x32xf32> to vector<32x32xbf16>
    %c0_122 = arith.constant 0 : index
    %c0_123 = arith.constant 0 : index
    %c0_124 = arith.constant 0 : index
    %c0_125 = arith.constant 0 : index
    %328 = vector.load %arg22[%c0_122, %c0_123, %c0_124, %c0_125] : memref<1x9x32x128xbf16, #tpu.memory_space<vmem>>, vector<1x1x32x128xbf16>
    %329 = vector.shape_cast %328 : vector<1x1x32x128xbf16> to vector<32x128xbf16>
    %cst_126 = arith.constant dense<0.000000e+00> : vector<32x128xf32>
    %330 = tpu.matmul %327, %329, %cst_126 {dimension_numbers = #tpu.dot_dimension_numbers<[1], [0], [0], [1], [0, 0, 1, 1], [], []>} : vector<32x32xbf16>, vector<32x128xbf16>, vector<32x128xf32> -> vector<32x128xf32>
    %331 = arith.addf %321, %330 : vector<32x128xf32>
    %c7_i32 = arith.constant 7 : i32
    %332 = tpu.dynamic_rotate %300 by %c7_i32 dim 0 : vector<32x32xf32>, i32 -> vector<32x32xf32>
    %c7_i32_127 = arith.constant 7 : i32
    %333 = vector.broadcast %c7_i32_127 : i32 to vector<32x32xi32>
    %334 = arith.cmpi slt, %317, %333 : vector<32x32xi32>
    %cst_128 = arith.constant 0.000000e+00 : f32
    %335 = vector.broadcast %cst_128 : f32 to vector<32x32xf32>
    %336 = arith.select %334, %335, %332 : vector<32x32xi1>, vector<32x32xf32>
    %337 = arith.truncf %336 : vector<32x32xf32> to vector<32x32xbf16>
    %c0_129 = arith.constant 0 : index
    %c1_130 = arith.constant 1 : index
    %c0_131 = arith.constant 0 : index
    %c0_132 = arith.constant 0 : index
    %338 = vector.load %arg22[%c0_129, %c1_130, %c0_131, %c0_132] : memref<1x9x32x128xbf16, #tpu.memory_space<vmem>>, vector<1x1x32x128xbf16>
    %339 = vector.shape_cast %338 : vector<1x1x32x128xbf16> to vector<32x128xbf16>
    %cst_133 = arith.constant dense<0.000000e+00> : vector<32x128xf32>
    %340 = tpu.matmul %337, %339, %cst_133 {dimension_numbers = #tpu.dot_dimension_numbers<[1], [0], [0], [1], [0, 0, 1, 1], [], []>} : vector<32x32xbf16>, vector<32x128xbf16>, vector<32x128xf32> -> vector<32x128xf32>
    %341 = arith.addf %331, %340 : vector<32x128xf32>
    %c6_i32 = arith.constant 6 : i32
    %342 = tpu.dynamic_rotate %300 by %c6_i32 dim 0 : vector<32x32xf32>, i32 -> vector<32x32xf32>
    %c6_i32_134 = arith.constant 6 : i32
    %343 = vector.broadcast %c6_i32_134 : i32 to vector<32x32xi32>
    %344 = arith.cmpi slt, %317, %343 : vector<32x32xi32>
    %cst_135 = arith.constant 0.000000e+00 : f32
    %345 = vector.broadcast %cst_135 : f32 to vector<32x32xf32>
    %346 = arith.select %344, %345, %342 : vector<32x32xi1>, vector<32x32xf32>
    %347 = arith.truncf %346 : vector<32x32xf32> to vector<32x32xbf16>
    %c0_136 = arith.constant 0 : index
    %c2 = arith.constant 2 : index
    %c0_137 = arith.constant 0 : index
    %c0_138 = arith.constant 0 : index
    %348 = vector.load %arg22[%c0_136, %c2, %c0_137, %c0_138] : memref<1x9x32x128xbf16, #tpu.memory_space<vmem>>, vector<1x1x32x128xbf16>
    %349 = vector.shape_cast %348 : vector<1x1x32x128xbf16> to vector<32x128xbf16>
    %cst_139 = arith.constant dense<0.000000e+00> : vector<32x128xf32>
    %350 = tpu.matmul %347, %349, %cst_139 {dimension_numbers = #tpu.dot_dimension_numbers<[1], [0], [0], [1], [0, 0, 1, 1], [], []>} : vector<32x32xbf16>, vector<32x128xbf16>, vector<32x128xf32> -> vector<32x128xf32>
    %351 = arith.addf %341, %350 : vector<32x128xf32>
    %c5_i32 = arith.constant 5 : i32
    %352 = tpu.dynamic_rotate %300 by %c5_i32 dim 0 : vector<32x32xf32>, i32 -> vector<32x32xf32>
    %c5_i32_140 = arith.constant 5 : i32
    %353 = vector.broadcast %c5_i32_140 : i32 to vector<32x32xi32>
    %354 = arith.cmpi slt, %317, %353 : vector<32x32xi32>
    %cst_141 = arith.constant 0.000000e+00 : f32
    %355 = vector.broadcast %cst_141 : f32 to vector<32x32xf32>
    %356 = arith.select %354, %355, %352 : vector<32x32xi1>, vector<32x32xf32>
    %357 = arith.truncf %356 : vector<32x32xf32> to vector<32x32xbf16>
    %c0_142 = arith.constant 0 : index
    %c3 = arith.constant 3 : index
    %c0_143 = arith.constant 0 : index
    %c0_144 = arith.constant 0 : index
    %358 = vector.load %arg22[%c0_142, %c3, %c0_143, %c0_144] : memref<1x9x32x128xbf16, #tpu.memory_space<vmem>>, vector<1x1x32x128xbf16>
    %359 = vector.shape_cast %358 : vector<1x1x32x128xbf16> to vector<32x128xbf16>
    %cst_145 = arith.constant dense<0.000000e+00> : vector<32x128xf32>
    %360 = tpu.matmul %357, %359, %cst_145 {dimension_numbers = #tpu.dot_dimension_numbers<[1], [0], [0], [1], [0, 0, 1, 1], [], []>} : vector<32x32xbf16>, vector<32x128xbf16>, vector<32x128xf32> -> vector<32x128xf32>
    %361 = arith.addf %351, %360 : vector<32x128xf32>
    %c4_i32 = arith.constant 4 : i32
    %362 = tpu.dynamic_rotate %300 by %c4_i32 dim 0 : vector<32x32xf32>, i32 -> vector<32x32xf32>
    %c4_i32_146 = arith.constant 4 : i32
    %363 = vector.broadcast %c4_i32_146 : i32 to vector<32x32xi32>
    %364 = arith.cmpi slt, %317, %363 : vector<32x32xi32>
    %cst_147 = arith.constant 0.000000e+00 : f32
    %365 = vector.broadcast %cst_147 : f32 to vector<32x32xf32>
    %366 = arith.select %364, %365, %362 : vector<32x32xi1>, vector<32x32xf32>
    %367 = arith.truncf %366 : vector<32x32xf32> to vector<32x32xbf16>
    %c0_148 = arith.constant 0 : index
    %c4 = arith.constant 4 : index
    %c0_149 = arith.constant 0 : index
    %c0_150 = arith.constant 0 : index
    %368 = vector.load %arg22[%c0_148, %c4, %c0_149, %c0_150] : memref<1x9x32x128xbf16, #tpu.memory_space<vmem>>, vector<1x1x32x128xbf16>
    %369 = vector.shape_cast %368 : vector<1x1x32x128xbf16> to vector<32x128xbf16>
    %cst_151 = arith.constant dense<0.000000e+00> : vector<32x128xf32>
    %370 = tpu.matmul %367, %369, %cst_151 {dimension_numbers = #tpu.dot_dimension_numbers<[1], [0], [0], [1], [0, 0, 1, 1], [], []>} : vector<32x32xbf16>, vector<32x128xbf16>, vector<32x128xf32> -> vector<32x128xf32>
    %371 = arith.addf %361, %370 : vector<32x128xf32>
    %c3_i32 = arith.constant 3 : i32
    %372 = tpu.dynamic_rotate %300 by %c3_i32 dim 0 : vector<32x32xf32>, i32 -> vector<32x32xf32>
    %c3_i32_152 = arith.constant 3 : i32
    %373 = vector.broadcast %c3_i32_152 : i32 to vector<32x32xi32>
    %374 = arith.cmpi slt, %317, %373 : vector<32x32xi32>
    %cst_153 = arith.constant 0.000000e+00 : f32
    %375 = vector.broadcast %cst_153 : f32 to vector<32x32xf32>
    %376 = arith.select %374, %375, %372 : vector<32x32xi1>, vector<32x32xf32>
    %377 = arith.truncf %376 : vector<32x32xf32> to vector<32x32xbf16>
    %c0_154 = arith.constant 0 : index
    %c5 = arith.constant 5 : index
    %c0_155 = arith.constant 0 : index
    %c0_156 = arith.constant 0 : index
    %378 = vector.load %arg22[%c0_154, %c5, %c0_155, %c0_156] : memref<1x9x32x128xbf16, #tpu.memory_space<vmem>>, vector<1x1x32x128xbf16>
    %379 = vector.shape_cast %378 : vector<1x1x32x128xbf16> to vector<32x128xbf16>
    %cst_157 = arith.constant dense<0.000000e+00> : vector<32x128xf32>
    %380 = tpu.matmul %377, %379, %cst_157 {dimension_numbers = #tpu.dot_dimension_numbers<[1], [0], [0], [1], [0, 0, 1, 1], [], []>} : vector<32x32xbf16>, vector<32x128xbf16>, vector<32x128xf32> -> vector<32x128xf32>
    %381 = arith.addf %371, %380 : vector<32x128xf32>
    %c2_i32 = arith.constant 2 : i32
    %382 = tpu.dynamic_rotate %300 by %c2_i32 dim 0 : vector<32x32xf32>, i32 -> vector<32x32xf32>
    %c2_i32_158 = arith.constant 2 : i32
    %383 = vector.broadcast %c2_i32_158 : i32 to vector<32x32xi32>
    %384 = arith.cmpi slt, %317, %383 : vector<32x32xi32>
    %cst_159 = arith.constant 0.000000e+00 : f32
    %385 = vector.broadcast %cst_159 : f32 to vector<32x32xf32>
    %386 = arith.select %384, %385, %382 : vector<32x32xi1>, vector<32x32xf32>
    %387 = arith.truncf %386 : vector<32x32xf32> to vector<32x32xbf16>
    %c0_160 = arith.constant 0 : index
    %c6 = arith.constant 6 : index
    %c0_161 = arith.constant 0 : index
    %c0_162 = arith.constant 0 : index
    %388 = vector.load %arg22[%c0_160, %c6, %c0_161, %c0_162] : memref<1x9x32x128xbf16, #tpu.memory_space<vmem>>, vector<1x1x32x128xbf16>
    %389 = vector.shape_cast %388 : vector<1x1x32x128xbf16> to vector<32x128xbf16>
    %cst_163 = arith.constant dense<0.000000e+00> : vector<32x128xf32>
    %390 = tpu.matmul %387, %389, %cst_163 {dimension_numbers = #tpu.dot_dimension_numbers<[1], [0], [0], [1], [0, 0, 1, 1], [], []>} : vector<32x32xbf16>, vector<32x128xbf16>, vector<32x128xf32> -> vector<32x128xf32>
    %391 = arith.addf %381, %390 : vector<32x128xf32>
    %c1_i32_164 = arith.constant 1 : i32
    %392 = tpu.dynamic_rotate %300 by %c1_i32_164 dim 0 : vector<32x32xf32>, i32 -> vector<32x32xf32>
    %c1_i32_165 = arith.constant 1 : i32
    %393 = vector.broadcast %c1_i32_165 : i32 to vector<32x32xi32>
    %394 = arith.cmpi slt, %317, %393 : vector<32x32xi32>
    %cst_166 = arith.constant 0.000000e+00 : f32
    %395 = vector.broadcast %cst_166 : f32 to vector<32x32xf32>
    %396 = arith.select %394, %395, %392 : vector<32x32xi1>, vector<32x32xf32>
    %397 = arith.truncf %396 : vector<32x32xf32> to vector<32x32xbf16>
    %c0_167 = arith.constant 0 : index
    %c7 = arith.constant 7 : index
    %c0_168 = arith.constant 0 : index
    %c0_169 = arith.constant 0 : index
    %398 = vector.load %arg22[%c0_167, %c7, %c0_168, %c0_169] : memref<1x9x32x128xbf16, #tpu.memory_space<vmem>>, vector<1x1x32x128xbf16>
    %399 = vector.shape_cast %398 : vector<1x1x32x128xbf16> to vector<32x128xbf16>
    %cst_170 = arith.constant dense<0.000000e+00> : vector<32x128xf32>
    %400 = tpu.matmul %397, %399, %cst_170 {dimension_numbers = #tpu.dot_dimension_numbers<[1], [0], [0], [1], [0, 0, 1, 1], [], []>} : vector<32x32xbf16>, vector<32x128xbf16>, vector<32x128xf32> -> vector<32x128xf32>
    %401 = arith.addf %391, %400 : vector<32x128xf32>
    %c0_171 = arith.constant 0 : index
    %c0_172 = arith.constant 0 : index
    %c0_173 = arith.constant 0 : index
    %402 = vector.load %arg23[%c0_171, %c0_172, %c0_173] : memref<1x1x128xf32, #tpu.memory_space<vmem>>, vector<1x1x128xf32>
    %403 = vector.shape_cast %402 : vector<1x1x128xf32> to vector<1x128xf32>
    %404 = vector.broadcast %403 : vector<1x128xf32> to vector<32x128xf32>
    %405 = arith.addf %401, %404 : vector<32x128xf32>
    %cst_174 = arith.constant 0.333333343 : f32
    %406 = vector.broadcast %cst_174 : f32 to vector<32x128xf32>
    %407 = arith.mulf %405, %406 : vector<32x128xf32>
    %408 = arith.mulf %407, %407 : vector<32x128xf32>
    %409 = arith.mulf %407, %408 : vector<32x128xf32>
    %cst_175 = arith.constant 4.471500e-02 : f32
    %410 = vector.broadcast %cst_175 : f32 to vector<32x128xf32>
    %411 = arith.mulf %410, %409 : vector<32x128xf32>
    %412 = arith.addf %407, %411 : vector<32x128xf32>
    %cst_176 = arith.constant 0.797884583 : f32
    %413 = vector.broadcast %cst_176 : f32 to vector<32x128xf32>
    %414 = arith.mulf %413, %412 : vector<32x128xf32>
    %415 = math.tanh %414 : vector<32x128xf32>
    %cst_177 = arith.constant 1.000000e+00 : f32
    %416 = vector.broadcast %cst_177 : f32 to vector<32x128xf32>
    %417 = arith.addf %416, %415 : vector<32x128xf32>
    %cst_178 = arith.constant 5.000000e-01 : f32
    %418 = vector.broadcast %cst_178 : f32 to vector<32x128xf32>
    %419 = arith.mulf %418, %417 : vector<32x128xf32>
    %420 = arith.mulf %407, %419 : vector<32x128xf32>
    %421 = arith.truncf %420 : vector<32x128xf32> to vector<32x128xbf16>
    %c0_179 = arith.constant 0 : index
    %c0_180 = arith.constant 0 : index
    %c0_181 = arith.constant 0 : index
    %422 = vector.load %arg24[%c0_179, %c0_180, %c0_181] : memref<1x128x32xbf16, #tpu.memory_space<vmem>>, vector<1x128x32xbf16>
    %423 = vector.shape_cast %422 : vector<1x128x32xbf16> to vector<128x32xbf16>
    %cst_182 = arith.constant dense<0.000000e+00> : vector<32x32xf32>
    %424 = tpu.matmul %421, %423, %cst_182 {dimension_numbers = #tpu.dot_dimension_numbers<[1], [0], [0], [1], [0, 0, 1, 1], [], []>} : vector<32x128xbf16>, vector<128x32xbf16>, vector<32x32xf32> -> vector<32x32xf32>
    %425 = arith.addf %274, %424 : vector<32x32xf32>
    %c0_183 = arith.constant 0 : index
    %c0_184 = arith.constant 0 : index
    %c0_185 = arith.constant 0 : index
    %426 = vector.load %arg25[%c0_183, %c0_184, %c0_185] : memref<1x1x32xf32, #tpu.memory_space<vmem>>, vector<1x1x32xf32>
    %427 = vector.shape_cast %426 : vector<1x1x32xf32> to vector<1x32xf32>
    %428 = vector.broadcast %427 : vector<1x32xf32> to vector<32x32xf32>
    %429 = arith.addf %425, %428 : vector<32x32xf32>
    %c0_186 = arith.constant 0 : index
    %c0_187 = arith.constant 0 : index
    %430 = vector.load %arg30[%c0_186, %c0_187] : memref<32x32xf32, #tpu.memory_space<vmem>>, vector<32x32xf32>
    tpu.vector_store %arg30[%c0_186, %c0_187], %429 {strides = array<i32>} : memref<32x32xf32, #tpu.memory_space<vmem>>, vector<32x32xf32>,
    %c1_i32_188 = arith.constant 1 : i32
    %431 = arith.cmpi eq, %arg1, %c1_i32_188 : i32
    %432 = arith.extui %431 : i1 to i32
    %c0_i32_189 = arith.constant 0 : i32
    %433 = arith.cmpi ne, %432, %c0_i32_189 : i32
    scf.if %433 {
      %c0_190 = arith.constant 0 : index
      %c0_191 = arith.constant 0 : index
      %434 = vector.load %arg26[%c0_190, %c0_191] : memref<1x32xf32, #tpu.memory_space<vmem>>, vector<1x32xf32>
      %c0_192 = arith.constant 0 : index
      %c0_193 = arith.constant 0 : index
      %435 = vector.load %arg27[%c0_192, %c0_193] : memref<1x32xf32, #tpu.memory_space<vmem>>, vector<1x32xf32>
      %cst_194 = arith.constant dense<0.000000e+00> : vector<32xf32>
      %436 = vector.multi_reduction <add>, %429, %cst_194 [1] : vector<32x32xf32> to vector<32xf32>
      %437 = vector.shape_cast %436 : vector<32xf32> to vector<32x1xf32>
      %cst_195 = arith.constant 3.200000e+01 : f32
      %438 = vector.broadcast %cst_195 : f32 to vector<32x1xf32>
      %439 = arith.divf %437, %438 : vector<32x1xf32>
      %440 = vector.broadcast %439 : vector<32x1xf32> to vector<32x32xf32>
      %441 = arith.subf %429, %440 : vector<32x32xf32>
      %442 = arith.mulf %441, %441 : vector<32x32xf32>
      %cst_196 = arith.constant dense<0.000000e+00> : vector<32xf32>
      %443 = vector.multi_reduction <add>, %442, %cst_196 [1] : vector<32x32xf32> to vector<32xf32>
      %444 = vector.shape_cast %443 : vector<32xf32> to vector<32x1xf32>
      %cst_197 = arith.constant 3.200000e+01 : f32
      %445 = vector.broadcast %cst_197 : f32 to vector<32x1xf32>
      %446 = arith.divf %444, %445 : vector<32x1xf32>
      %447 = vector.broadcast %439 : vector<32x1xf32> to vector<32x32xf32>
      %448 = arith.subf %429, %447 : vector<32x32xf32>
      %cst_198 = arith.constant 9.99999974E-6 : f32
      %449 = vector.broadcast %cst_198 : f32 to vector<32x1xf32>
      %450 = arith.addf %446, %449 : vector<32x1xf32>
      %451 = math.rsqrt %450 : vector<32x1xf32>
      %452 = vector.broadcast %451 : vector<32x1xf32> to vector<32x32xf32>
      %453 = arith.mulf %448, %452 : vector<32x32xf32>
      %454 = vector.broadcast %434 : vector<1x32xf32> to vector<32x32xf32>
      %455 = arith.mulf %453, %454 : vector<32x32xf32>
      %456 = vector.broadcast %435 : vector<1x32xf32> to vector<32x32xf32>
      %457 = arith.addf %455, %456 : vector<32x32xf32>
      %458 = vector.shape_cast %457 : vector<32x32xf32> to vector<2x16x32xf32>
      %c0_199 = arith.constant 0 : index
      %c0_200 = arith.constant 0 : index
      %c0_201 = arith.constant 0 : index
      %459 = vector.load %arg28[%c0_199, %c0_200, %c0_201] : memref<2x16x32xf32, #tpu.memory_space<vmem>>, vector<2x16x32xf32>
      tpu.vector_store %arg28[%c0_199, %c0_200, %c0_201], %458 {strides = array<i32>} : memref<2x16x32xf32, #tpu.memory_space<vmem>>, vector<2x16x32xf32>,
    } else {
    }
    return
  }
  func.func @transform_0(%arg0: i32, %arg1: i32) -> (i32, i32, i32) {
    %c0_i32 = arith.constant 0 : i32
    %c0_i32_0 = arith.constant 0 : i32
    %c0_i32_1 = arith.constant 0 : i32
    return %arg0, %c0_i32, %c0_i32_0 : i32, i32, i32
  }
  func.func @transform_1(%arg0: i32, %arg1: i32) -> (i32, i32, i32) {
    %c0_i32 = arith.constant 0 : i32
    %c0_i32_0 = arith.constant 0 : i32
    %c0_i32_1 = arith.constant 0 : i32
    return %arg0, %c0_i32, %c0_i32_0 : i32, i32, i32
  }
  func.func @transform_2(%arg0: i32, %arg1: i32) -> (i32, i32, i32) {
    %c0_i32 = arith.constant 0 : i32
    %c0_i32_0 = arith.constant 0 : i32
    %c0_i32_1 = arith.constant 0 : i32
    return %arg0, %c0_i32, %c0_i32_0 : i32, i32, i32
  }
  func.func @transform_3(%arg0: i32, %arg1: i32) -> (i32, i32, i32) {
    %c0_i32 = arith.constant 0 : i32
    %c0_i32_0 = arith.constant 0 : i32
    %c0_i32_1 = arith.constant 0 : i32
    return %arg0, %c0_i32, %c0_i32_0 : i32, i32, i32
  }
  func.func @transform_4(%arg0: i32, %arg1: i32) -> (i32, i32, i32) {
    %c0_i32 = arith.constant 0 : i32
    %c0_i32_0 = arith.constant 0 : i32
    %c0_i32_1 = arith.constant 0 : i32
    return %arg0, %c0_i32, %c0_i32_0 : i32, i32, i32
  }
  func.func @transform_5(%arg0: i32, %arg1: i32) -> (i32, i32) {
    %c0_i32 = arith.constant 0 : i32
    %c0_i32_0 = arith.constant 0 : i32
    %c0_i32_1 = arith.constant 0 : i32
    return %c0_i32, %c0_i32_0 : i32, i32
  }
  func.func @transform_6(%arg0: i32, %arg1: i32) -> (i32, i32, i32) {
    %c0_i32 = arith.constant 0 : i32
    %c0_i32_0 = arith.constant 0 : i32
    %c0_i32_1 = arith.constant 0 : i32
    return %arg1, %c0_i32, %c0_i32_0 : i32, i32, i32
  }
  func.func @transform_7(%arg0: i32, %arg1: i32) -> (i32, i32, i32) {
    %c0_i32 = arith.constant 0 : i32
    %c0_i32_0 = arith.constant 0 : i32
    %c0_i32_1 = arith.constant 0 : i32
    return %arg1, %c0_i32, %c0_i32_0 : i32, i32, i32
  }
  func.func @transform_8(%arg0: i32, %arg1: i32) -> (i32, i32, i32) {
    %c0_i32 = arith.constant 0 : i32
    %c0_i32_0 = arith.constant 0 : i32
    %c0_i32_1 = arith.constant 0 : i32
    return %arg1, %c0_i32, %c0_i32_0 : i32, i32, i32
  }
  func.func @transform_9(%arg0: i32, %arg1: i32) -> (i32, i32, i32) {
    %c0_i32 = arith.constant 0 : i32
    %c0_i32_0 = arith.constant 0 : i32
    %c0_i32_1 = arith.constant 0 : i32
    return %arg1, %c0_i32, %c0_i32_0 : i32, i32, i32
  }
  func.func @transform_10(%arg0: i32, %arg1: i32) -> (i32, i32, i32) {
    %c0_i32 = arith.constant 0 : i32
    %c0_i32_0 = arith.constant 0 : i32
    %c0_i32_1 = arith.constant 0 : i32
    return %arg1, %c0_i32, %c0_i32_0 : i32, i32, i32
  }
  func.func @transform_11(%arg0: i32, %arg1: i32) -> (i32, i32, i32) {
    %c0_i32 = arith.constant 0 : i32
    %c0_i32_0 = arith.constant 0 : i32
    %c0_i32_1 = arith.constant 0 : i32
    return %arg1, %c0_i32, %c0_i32_0 : i32, i32, i32
  }
  func.func @transform_12(%arg0: i32, %arg1: i32) -> (i32, i32, i32) {
    %c0_i32 = arith.constant 0 : i32
    %c0_i32_0 = arith.constant 0 : i32
    %c0_i32_1 = arith.constant 0 : i32
    return %arg1, %c0_i32, %c0_i32_0 : i32, i32, i32
  }
  func.func @transform_13(%arg0: i32, %arg1: i32) -> (i32, i32, i32) {
    %c0_i32 = arith.constant 0 : i32
    %c0_i32_0 = arith.constant 0 : i32
    %c0_i32_1 = arith.constant 0 : i32
    return %arg1, %c0_i32, %c0_i32_0 : i32, i32, i32
  }
  func.func @transform_14(%arg0: i32, %arg1: i32) -> (i32, i32, i32) {
    %c0_i32 = arith.constant 0 : i32
    %c0_i32_0 = arith.constant 0 : i32
    %c0_i32_1 = arith.constant 0 : i32
    return %arg1, %c0_i32, %c0_i32_0 : i32, i32, i32
  }
  func.func @transform_15(%arg0: i32, %arg1: i32) -> (i32, i32, i32) {
    %c0_i32 = arith.constant 0 : i32
    %c0_i32_0 = arith.constant 0 : i32
    %c0_i32_1 = arith.constant 0 : i32
    return %arg1, %c0_i32, %c0_i32_0 : i32, i32, i32
  }
  func.func @transform_16(%arg0: i32, %arg1: i32) -> (i32, i32, i32) {
    %c0_i32 = arith.constant 0 : i32
    %c0_i32_0 = arith.constant 0 : i32
    %c0_i32_1 = arith.constant 0 : i32
    return %arg1, %c0_i32, %c0_i32_0 : i32, i32, i32
  }
  func.func @transform_17(%arg0: i32, %arg1: i32) -> (i32, i32, i32) {
    %c0_i32 = arith.constant 0 : i32
    %c0_i32_0 = arith.constant 0 : i32
    %c0_i32_1 = arith.constant 0 : i32
    return %arg1, %c0_i32, %c0_i32_0 : i32, i32, i32
  }
  func.func @transform_18(%arg0: i32, %arg1: i32) -> (i32, i32, i32) {
    %c0_i32 = arith.constant 0 : i32
    %c0_i32_0 = arith.constant 0 : i32
    %c0_i32_1 = arith.constant 0 : i32
    return %arg1, %c0_i32, %c0_i32_0 : i32, i32, i32
  }
  func.func @transform_19(%arg0: i32, %arg1: i32) -> (i32, i32, i32) {
    %c0_i32 = arith.constant 0 : i32
    %c0_i32_0 = arith.constant 0 : i32
    %c0_i32_1 = arith.constant 0 : i32
    return %arg1, %c0_i32, %c0_i32_0 : i32, i32, i32
  }
  func.func @transform_20(%arg0: i32, %arg1: i32) -> (i32, i32, i32, i32) {
    %c0_i32 = arith.constant 0 : i32
    %c0_i32_0 = arith.constant 0 : i32
    %c0_i32_1 = arith.constant 0 : i32
    %c0_i32_2 = arith.constant 0 : i32
    return %arg1, %c0_i32, %c0_i32_0, %c0_i32_1 : i32, i32, i32, i32
  }
  func.func @transform_21(%arg0: i32, %arg1: i32) -> (i32, i32, i32) {
    %c0_i32 = arith.constant 0 : i32
    %c0_i32_0 = arith.constant 0 : i32
    %c0_i32_1 = arith.constant 0 : i32
    return %arg1, %c0_i32, %c0_i32_0 : i32, i32, i32
  }
  func.func @transform_22(%arg0: i32, %arg1: i32) -> (i32, i32, i32) {
    %c0_i32 = arith.constant 0 : i32
    %c0_i32_0 = arith.constant 0 : i32
    %c0_i32_1 = arith.constant 0 : i32
    return %arg1, %c0_i32, %c0_i32_0 : i32, i32, i32
  }
  func.func @transform_23(%arg0: i32, %arg1: i32) -> (i32, i32, i32) {
    %c0_i32 = arith.constant 0 : i32
    %c0_i32_0 = arith.constant 0 : i32
    %c0_i32_1 = arith.constant 0 : i32
    return %arg1, %c0_i32, %c0_i32_0 : i32, i32, i32
  }
  func.func @transform_24(%arg0: i32, %arg1: i32) -> (i32, i32) {
    %c0_i32 = arith.constant 0 : i32
    %c0_i32_0 = arith.constant 0 : i32
    %c0_i32_1 = arith.constant 0 : i32
    return %c0_i32, %c0_i32_0 : i32, i32
  }
  func.func @transform_25(%arg0: i32, %arg1: i32) -> (i32, i32) {
    %c0_i32 = arith.constant 0 : i32
    %c0_i32_0 = arith.constant 0 : i32
    %c0_i32_1 = arith.constant 0 : i32
    return %c0_i32, %c0_i32_0 : i32, i32
  }
  func.func @transform_26(%arg0: i32, %arg1: i32) -> (i32, i32, i32) {
    %c0_i32 = arith.constant 0 : i32
    %c0_i32_0 = arith.constant 0 : i32
    %c0_i32_1 = arith.constant 0 : i32
    return %arg0, %c0_i32, %c0_i32_0 : i32, i32, i32
  }
  func.func @transform_27(%arg0: i32, %arg1: i32) -> (i32, i32, i32, i32, i32) {
    %c0_i32 = arith.constant 0 : i32
    %c0_i32_0 = arith.constant 0 : i32
    %c0_i32_1 = arith.constant 0 : i32
    %c0_i32_2 = arith.constant 0 : i32
    return %arg0, %arg1, %c0_i32, %c0_i32_0, %c0_i32_1 : i32, i32, i32, i32, i32
  }
}

</mosaic_0001>

<bundles_post_ra>
// kernel: tpu_custom_call.1
= control target key start
LH: loop header
LB: loop body
LE: loop exit
PB: predicated region body
PF: predicated region fallthrough
CT: control target
= control target key end

     0   :  { %s20636_s0 = inlined_call_operand.vmem [shape: f32[2,16,32], index: 0, kind: input, shape index: {}]   ;;  %s20637_s1 = inlined_call_operand.vmem [shape: f32[2,16,32], index: 1, kind: input, shape index: {}]   ;;  %s20638_s2 = inlined_call_operand.vmem [shape: f32[2,16,32], index: 2, kind: input, shape index: {}]   ;;  %s20639_s3 = inlined_call_operand.hbm [shape: f32[2,1,16], index: 3, kind: input, shape index: {}]   ;;  %s20640_s4 = inlined_call_operand.hbm [shape: f32[2,1,16], index: 4, kind: input, shape index: {}]   ;;  %s20641_s5 = inlined_call_operand.hbm [shape: f32[16,16], index: 5, kind: input, shape index: {}]   ;;  %s20642_s6 = inlined_call_operand.hbm [shape: f32[2,1,32], index: 6, kind: input, shape index: {}]   ;;  %s20643_s7 = inlined_call_operand.hbm [shape: f32[2,1,32], index: 7, kind: input, shape index: {}]   ;;  %s20644_s8 = inlined_call_operand.vmem [shape: bf16[2,32,32], index: 8, kind: input, shape index: {}]   ;;  %s20645_s9 = inlined_call_operand.vmem [shape: bf16[2,32,32], index: 9, kind: input, shape index: {}]   ;;  %s20646_s10 = inlined_call_operand.vmem [shape: bf16[2,32,32], index: 10, kind: input, shape index: {}]   ;;  %s20647_s11 = inlined_call_operand.hbm [shape: bf16[2,32,32], index: 11, kind: input, shape index: {}]   ;;  %s20648_s12 = inlined_call_operand.hbm [shape: f32[2,1,32], index: 12, kind: input, shape index: {}]   ;;  %s20649_s13 = inlined_call_operand.hbm [shape: f32[2,1,32], index: 13, kind: input, shape index: {}]   ;;  %s20650_s14 = inlined_call_operand.hbm [shape: bf16[2,32,32], index: 14, kind: input, shape index: {}]   ;;  %s20651_s15 = inlined_call_operand.hbm [shape: bf16[2,32,32], index: 15, kind: input, shape index: {}]   ;;  %s20652_s16 = inlined_call_operand.hbm [shape: bf16[2,32,32], index: 16, kind: input, shape index: {}]   ;;  %s20653_s17 = inlined_call_operand.hbm [shape: bf16[2,32,32], index: 17, kind: input, shape index: {}]   ;;  %s20654_s18 = inlined_call_operand.vmem [shape: f32[2,1,32], index: 18, kind: input, shape index: {}]   ;;  %s20655_s19 = inlined_call_operand.vmem [shape: f32[2,1,32], index: 19, kind: input, shape index: {}]   ;;  %s20656_s20 = inlined_call_operand.hbm [shape: bf16[2,9,32,128], index: 20, kind: input, shape index: {}]   ;;  %s20657_s21 = inlined_call_operand.vmem [shape: f32[2,1,128], index: 21, kind: input, shape index: {}]   ;;  %s20658_s22 = inlined_call_operand.vmem [shape: bf16[2,128,32], index: 22, kind: input, shape index: {}]   ;;  %s20659_s23 = inlined_call_operand.vmem [shape: f32[2,1,32], index: 23, kind: input, shape index: {}]   ;;  %s20660_s24 = inlined_call_operand.vmem [shape: f32[1,32], index: 24, kind: input, shape index: {}]   ;;  %s20661_s25 = inlined_call_operand.vmem [shape: f32[1,32], index: 25, kind: input, shape index: {}]   ;;  %s20662_s26 = inlined_call_operand.hbm [shape: f32[2,16,32], index: 26, kind: output, shape index: {0}]   ;;  %s20663_s27 = inlined_call_operand.hbm [shape: f32[2,2,2,16,128], index: 27, kind: output, shape index: {1}]  }
   0x1   :  { %20818 = sst [smem:[#allocation74_spill]] %s20636_s0 }
   0x2   :  { %20819 = sst [smem:[#allocation75_spill]] %s20637_s1 }
   0x3   :  { %20820 = sst [smem:[#allocation76_spill]] %s20638_s2 }
   0x4   :  { %20821 = sst [smem:[#allocation77_spill]] %s20639_s3 }
   0x5   :  { %20822 = sst [smem:[#allocation78_spill]] %s20640_s4 }
   0x6   :  { %20823 = sst [smem:[#allocation79_spill]] %s20641_s5 }
   0x7   :  { %20824 = sst [smem:[#allocation80_spill]] %s20642_s6 }
   0x8   :  { %20825 = sst [smem:[#allocation81_spill]] %s20643_s7 }
   0x9   :  { %20826 = sst [smem:[#allocation82_spill]] %s20644_s8 }
   0xa   :  { %20827 = sst [smem:[#allocation83_spill]] %s20645_s9 }
   0xb   :  { %20828 = sst [smem:[#allocation84_spill]] %s20646_s10 }
   0xc   :  { %20829 = sst [smem:[#allocation85_spill]] %s20647_s11 }
   0xd   :  { %20830 = sst [smem:[#allocation86_spill]] %s20648_s12 }
   0xe   :  { %20831 = sst [smem:[#allocation87_spill]] %s20649_s13 }
   0xf   :  { %20832 = sst [smem:[#allocation88_spill]] %s20650_s14 }
  0x10   :  { %20833 = sst [smem:[#allocation89_spill]] %s20651_s15 }
  0x11   :  { %20834 = sst [smem:[#allocation90_spill]] %s20652_s16 }
  0x12   :  { %20835 = sst [smem:[#allocation91_spill]] %s20653_s17 }
  0x13   :  { %20836 = sst [smem:[#allocation92_spill]] %s20654_s18 }
  0x14   :  { %20837 = sst [smem:[#allocation93_spill]] %s20655_s19 }
  0x15   :  { %20838 = sst [smem:[#allocation94_spill]] %s20656_s20 }
  0x16   :  { %20839 = sst [smem:[#allocation95_spill]] %s20657_s21 }
  0x17   :  { %20840 = sst [smem:[#allocation96_spill]] %s20658_s22 }
  0x18   :  { %20841 = sst [smem:[#allocation97_spill]] %s20659_s23 }
  0x19   :  { %20842 = sst [smem:[#allocation98_spill]] %s20660_s24 }
  0x1a   :  { %20843 = sst [smem:[#allocation99_spill]] %s20661_s25 }
  0x1b   :  { %20844 = sst [smem:[#allocation100_spill]] %s20662_s26 }
  0x1c   :  { %20845 = sst [smem:[#allocation101_spill]] %s20663_s27 }
  0x1d   :  { %33 = vsyncpa [#allocation4], 0 }
  0x1e   :  { %34 = vsyncpa [#allocation7], 0 }
  0x1f   :  { %35 = vsyncpa [#allocation10], 0 }
  0x20   :  { %37 = vsyncpa [#allocation10 + $0x1], 0 }
  0x21   :  { %38 = vsyncpa [#allocation13], 0 }
  0x22   :  { %40 = vsyncpa [#allocation13 + $0x1], 0 }
  0x23   :  { %41 = vsyncpa [#allocation16], 0 }
  0x24   :  { %43 = vsyncpa [#allocation16 + $0x1], 0 }
  0x25   :  { %44 = vsyncpa [#allocation19], 0 }
  0x26   :  { %46 = vsyncpa [#allocation19 + $0x1], 0 }
  0x27   :  { %47 = vsyncpa [#allocation22], 0 }
  0x28   :  { %49 = vsyncpa [#allocation22 + $0x1], 0 }
  0x29   :  { %50 = vsyncpa [#allocation5], 0 }
  0x2a   :  { %51 = vsyncpa [#allocation26], 0 }
  0x2b   :  { %53 = vsyncpa [#allocation26 + $0x1], 0  ;;  %s15939_s7 = smov 0   ;;  %s15941_s4 = smov 0  }
  0x2c   :  { %s15943_s8 = smov 0   ;;  %s15945_s30 = smov 0  }
  0x2d   :  { %s15947_s9 = smov 0   ;;  %s15949_s5 = smov 0  }
  0x2e LB: > { %20846 = sst [smem:[#allocation38_spill]] %s15741_s7  ;;  %s15970_s28 = sadd.s32 4294967295, %s15761_s5   ;;  %s15761_s5 = sphi %s15949_s5, %s59_s5   ;;  %s15757_s9 = sphi %s15947_s9, %s21184_s9   ;;  %s15753_s30 = sphi %s15945_s30, %s21183_s30   ;;  %s15749_s8 = sphi %s15943_s8, %s21181_s8   ;;  %s15745_s4 = sphi %s15941_s4, %s21180_s4   ;;  %s15741_s7 = sphi %s15939_s7, %s21179_s7  }
  0x2f   : > { %20847 = sst [smem:[#allocation39_spill]] %s15745_s4  ;;  %s14035_s0 = sadd.s32 4294967294, %s15761_s5  }
  0x30   : > { %20848 = sst [smem:[#allocation40_spill]] %s15749_s8  ;;  %p236_p0 = scmp.ne.s32.totalorder %s15749_s8, %s15745_s4 }
  0x31   : > { %20849 = sst [smem:[#allocation41_spill]] %s15753_s30  ;;  %p237_p1 = scmp.eq.s32.totalorder %s15761_s5, 0 }
  0x32   : > { %20850 = sst [smem:[#allocation42_spill]] %s15761_s5  ;;  %p242_p2 = scmp.ne.s32.totalorder %s15745_s4, %s15741_s7 }
  0x33   : > { %20851 = sst [smem:[#allocation43_spill]] %s15970_s28  ;;  %p20679_p3 = scmp.eq.s32.totalorder %s15970_s28, 0 }
  0x34   : > { %p20673_p4 = scmp.eq.s32.totalorder %s15970_s28, 1  ;;  %p15981_p5 = por %p237_p1, %p236_p0 }
  0x35   : > { %p784_p6 = scmp.eq.s32.totalorder %s14035_s0, 1  ;;  %p15987_p7 = por %p20679_p3, %p242_p2 }
  0x36   : > { %p15993_p8 = por %p20673_p4, %p236_p0  ;;  %p14036_p10 = scmp.ge.s32.totalorder %s15761_s5, 1 }
  0x37   : > { %s20853_s1 = scalar_select %p15987_p7, 1, 0 }
  0x38   : > { %s20855_s6 = scalar_select %p15993_p8, 1, 0 }
  0x39   : > { %20854 = sst [smem:[#allocation44_spill]] %s20853_s1  ;;  %p15997_p9 = por %p784_p6, %p242_p2 }
  0x3a   : > { %20856 = sst [smem:[#allocation45_spill]] %s20855_s6  ;;  %p791_p11 = scmp.lt.s32.totalorder %s15761_s5, 3 }
  0x3b   : > { %s20857_s11 = scalar_select %p15997_p9, 1, 0 }
  0x3c   : > { %p16003_p12 = pnand %p14036_p10, %p791_p11  ;;  %s15763_s3 = smov [#allocation6]  }
  0x3d   : > { %20858 = sst [smem:[#allocation46_spill]] %s20857_s11  ;;  %s852_s0 = sshll.u32 %s15763_s3, 4  ;;  %s853_s0 = int_to_ptr.vmem [resolvable:$true] %s852_s0 }
  0x3e   : > { %s20859_s2 = scalar_select %p16003_p12, 1, 0 }
  0x3f   : > { %p14744_p1 = pneg %p16003_p12  ;;  %p14792_p0 = scmp.lt.s32.totalorder %s15761_s5, 2 }
  0x40   : > { %20860 = sst [smem:[#allocation47_spill]] %s20859_s2  ;;  %s68_s7 = sadd.s32 1, %s15757_s9 }
  0x41   : > { %p16013_p4 = pnand %p14744_p1, %p20679_p3  ;;  %p16019_p2 = pnand %p14792_p0, %p15981_p5 }
  0x42   : > { %p16024_p6 = scmp.ge.s32.totalorder %s68_s7, 2  ;;  %s20864_s26 = sld [smem:[#allocation78_spill]] }
  0x43   : > { %s20861_s10 = scalar_select %p16013_p4, 1, 0 }
  0x44   : > { %s20862_s11 = scalar_select %p16019_p2, 1, 0 }
  0x45   : > { %s20863_s27 = scalar_select %p16024_p6, 1, 0 }
  0x46   : > { %p16036_p11 = pneg %p16013_p4 }
  0x48   : > { %s15269_s25 = scalar_lea.hbm %s20864_s26, 32 }
  0x49   : > { %p15270_p10 = scmp.ne.s32.totalorder %s20864_s26, %s15269_s25  ;;  %p15276_p0 = scmp.lt.u32.totalorder %s15269_s25, %s20864_s26 }
  0x4a   : > { %s20865_s29 = scalar_select %p16036_p11, 1, 0 }
  0x4b   : > { %p15272_p5 = pnand %p16036_p11, %p15270_p10 }
  0x4d   : > { %p15273_p1 = pneg %p15272_p5 }
  0x4f   : > { %p15278_p13 = pnand %p15276_p0, %p15273_p1 }
  0x51   : > { %15281 = shalt.err (!%p15278_p13)
}
  0x52   : > { %s15282_s6 = scalar_lea.vmem %s853_s0, 32  ;;  %p15290_p7 = scmp.lt.s32.totalorder %s853_s0, %s853_s0 }
  0x53   : > { %p15283_p3 = scmp.ne.s32.totalorder %s853_s0, %s15282_s6  ;;  %p15291_p12 = scmp.lt.s32.totalorder %s15282_s6, %s15282_s6 }
  0x55   : > { %p15285_p9 = pnand %p15283_p3, %p16036_p11  ;;  %p15292_p2 = por %p15291_p12, %p15290_p7 }
  0x57   : > { %p15286_p8 = pneg %p15285_p9 }
  0x59   : > { %p15293_p6 = pnand %p15292_p2, %p15286_p8 }
  0x5b   : > { %15296 = shalt.err (!%p15293_p6)
}
  0x5c   : > { %s20685_s23 = smov 16   ;;  %s20686_s21 = smov 1  }
  0x5d   : > { %14750 = dma.hbm_to_vmem [thread:$0]  (!%p16013_p4), %s20864_s26, 32, %s853_s0, [#allocation7], %s20685_s23, %s20685_s23, %s20686_s21  }
  0x5e   : > { %s16056_s25 = sand.u32 1, %s15761_s5   ;;  %p20866_p3 = scmp.ne.s32.totalorder %s20863_s27, 0 }
  0x5f   : > { %s16063_s3 = sand.u32 1, %s15749_s8   ;;  %s16068_s19 = sshll.u32 %s15757_s9, 4 }
  0x60   : > { %s21186_s7 = smov (%p20866_p3, %s68_s7), 0  ;;  %s20868_s22 = sld [smem:[#allocation80_spill]] }
  0x61   : > { %20867 = sst [smem:[#allocation48_spill]] %s21186_s7  ;;  %s226_s6 = ssub.s32 %s15757_s9, %s21186_s7 }
  0x62   : > { %p227_p7 = scmp.eq.s32.totalorder %s226_s6, 0  ;;  %s888_s27 = scalar_lea.vmem [#allocation9], %s16063_s3 }
  0x63   : > { %s895_s0 = sshll.u32 %s888_s27, 4  ;;  %s20869_s23 = sadd.s32 1, %s15749_s8  ;;  %s16082_s0 = int_to_ptr.vmem [resolvable:$true] %s895_s0 }
  0x64   : > { %s16080_s21 = scalar_select %p227_p7, %s15749_s8, %s20869_s23  }
  0x65   : > { %p20871_p9 = scmp.ne.s32.totalorder %s20862_s11, 0 }
  0x66   : > { %s16074_s24 = scalar_lea.hbm %s20868_s22, %s16068_s19  ;;  %20870 = sst [smem:[#allocation49_spill]] %s16080_s21 }
  0x67   : > { %s15297_s26 = scalar_lea.hbm %s16074_s24, 16  ;;  %p16089_p12 = pneg %p20871_p9 }
  0x68   : > { %p15298_p8 = scmp.ne.s32.totalorder %s16074_s24, %s15297_s26  ;;  %s15302_s27 = scalar_lea.hbm %s20868_s22, 32 }
  0x69   : > { %s20872_s7 = scalar_select %p16089_p12, 1, 0 }
  0x6a   : > { %p15300_p13 = pnand %p16089_p12, %p15298_p8  ;;  %p15303_p6 = scmp.lt.u32.totalorder %s16074_s24, %s20868_s22 }
  0x6b   : > { %p15304_p10 = scmp.lt.u32.totalorder %s15302_s27, %s15297_s26  ;;  %p15306_p1 = scmp.lt.u32.totalorder %s15297_s26, %s16074_s24 }
  0x6c   : > { %p15301_p2 = pneg %p15300_p13 }
  0x6d   : > { %p15305_p5 = por %p15304_p10, %p15303_p6 }
  0x6f   : > { %p15307_p0 = por %p15306_p1, %p15305_p5 }
  0x71   : > { %p15308_p3 = pnand %p15307_p0, %p15301_p2 }
  0x73   : > { %15311 = shalt.err (!%p15308_p3)
}
  0x74   : > { %s15312_s6 = scalar_lea.vmem %s16082_s0, 16  ;;  %s15766_s18 = smov [#allocation9]  }
  0x75   : > { %p15313_p7 = scmp.ne.s32.totalorder %s16082_s0, %s15312_s6  ;;  %s15317_s30 = sshll.u32 %s15766_s18, 4  ;;  %s15318_s30 = int_to_ptr.vmem [resolvable:$false] %s15317_s30 }
  0x76   : > { %s15319_s21 = scalar_lea.vmem %s15318_s30, 32  ;;  %p15320_p4 = scmp.lt.s32.totalorder %s16082_s0, %s15318_s30 }
  0x77   : > { %p15315_p8 = pnand %p15313_p7, %p16089_p12  ;;  %p15321_p11 = scmp.lt.s32.totalorder %s15319_s21, %s15312_s6 }
  0x79   : > { %p15316_p13 = pneg %p15315_p8  ;;  %p15322_p6 = por %p15321_p11, %p15320_p4 }
  0x7b   : > { %p15323_p10 = pnand %p15322_p6, %p15316_p13 }
  0x7d   : > { %15326 = shalt.err (!%p15323_p10)
}
  0x7e   : > { %s20873_s26 = scalar_lea.sflag [#allocation10], %s16056_s25  ;;  %s16115_s27 = sshll.u32 %s16063_s3, 4 }
  0x7f   : > { %14757 = dma.hbm_to_vmem [thread:$0]  (!%p20871_p9), %s16074_s24, 16, %s16082_s0, %s20873_s26  }
  0x80   : > { %s16118_s23 = sshll.u32 %s15757_s9, 8  ;;  %s20874_s30 = sld [smem:[#allocation85_spill]] }
  0x81   : > { %s947_s8 = scalar_lea.vmem [#allocation12], %s16115_s27  ;;  %s20704_s24 = scalar_lea.sflag [#allocation13], %s16056_s25 }
  0x82   : > { %s954_s5 = sshll.u32 %s947_s8, 4  ;;  %s16127_s5 = int_to_ptr.vmem [resolvable:$true] %s954_s5 }
  0x86   : > { %s20875_s21 = smov %s20874_s30  ;;  %s16124_s22 = scalar_lea.hbm %s20874_s30, %s16118_s23 }
  0x87   : > { %s15327_s0 = scalar_lea.hbm %s16124_s22, 256  ;;  %s15332_s6 = scalar_lea.hbm %s20875_s21, 512 }
  0x88   : > { %p15328_p4 = scmp.ne.s32.totalorder %s16124_s22, %s15327_s0  ;;  %p15333_p5 = scmp.lt.u32.totalorder %s16124_s22, %s20875_s21 }
  0x89   : > { %p15334_p1 = scmp.lt.u32.totalorder %s15332_s6, %s15327_s0  ;;  %p15336_p3 = scmp.lt.u32.totalorder %s15327_s0, %s16124_s22 }
  0x8a   : > { %p15330_p11 = pnand %p15328_p4, %p16089_p12 }
  0x8b   : > { %p15335_p0 = por %p15334_p1, %p15333_p5 }
  0x8c   : > { %p15331_p2 = pneg %p15330_p11 }
  0x8d   : > { %p15337_p7 = por %p15336_p3, %p15335_p0 }
  0x8f   : > { %p15338_p8 = pnand %p15337_p7, %p15331_p2 }
  0x91   : > { %15341 = shalt.err (!%p15338_p8)
}
  0x92   : > { %s15342_s8 = scalar_lea.vmem %s16127_s5, 256  ;;  %s15767_s1 = smov [#allocation12]  }
  0x93   : > { %p15343_p13 = scmp.ne.s32.totalorder %s16127_s5, %s15342_s8  ;;  %s15347_s26 = sshll.u32 %s15767_s1, 4  ;;  %s15348_s26 = int_to_ptr.vmem [resolvable:$false] %s15347_s26 }
  0x94   : > { %s15349_s18 = scalar_lea.vmem %s15348_s26, 512  ;;  %p15350_p4 = scmp.lt.s32.totalorder %s16127_s5, %s15348_s26 }
  0x95   : > { %p15345_p6 = pnand %p15343_p13, %p16089_p12  ;;  %p15351_p11 = scmp.lt.s32.totalorder %s15349_s18, %s15342_s8 }
  0x97   : > { %p15346_p10 = pneg %p15345_p6  ;;  %p15352_p5 = por %p15351_p11, %p15350_p4 }
  0x99   : > { %p15353_p1 = pnand %p15352_p5, %p15346_p10 }
  0x9b   : > { %15356 = shalt.err (!%p15353_p1)
}
  0x9c   : > { %s20705_s0 = smov 64   ;;  %s15769_s6 = smov 4  }
  0x9d   : > { %14763 = dma.hbm_to_vmem [thread:$0]  (!%p20871_p9), %s16124_s22, 256, %s16127_s5, %s20704_s24, %s20705_s0, %s20705_s0, %s15769_s6  }
  0x9e   : > { %s20876_s13 = sld [smem:[#allocation87_spill]]  ;;  %s984_s26 = scalar_lea.vmem [#allocation15], %s16063_s3 }
  0x9f   : > { %s991_s18 = sshll.u32 %s984_s26, 4  ;;  %s20709_s21 = scalar_lea.sflag [#allocation16], %s16056_s25  ;;  %s992_s18 = int_to_ptr.vmem [resolvable:$true] %s991_s18 }
  0xa4   : > { %s16160_s1 = scalar_lea.hbm %s20876_s13, %s16068_s19  ;;  %s15362_s22 = scalar_lea.hbm %s20876_s13, 32 }
  0xa5   : > { %s15357_s4 = scalar_lea.hbm %s16160_s1, 16  ;;  %p15363_p7 = scmp.lt.u32.totalorder %s16160_s1, %s20876_s13 }
  0xa6   : > { %p15358_p2 = scmp.ne.s32.totalorder %s16160_s1, %s15357_s4  ;;  %p15364_p8 = scmp.lt.u32.totalorder %s15362_s22, %s15357_s4 }
  0xa7   : > { %p15366_p6 = scmp.lt.u32.totalorder %s15357_s4, %s16160_s1 }
  0xa8   : > { %p15360_p0 = pnand %p15358_p2, %p16089_p12  ;;  %p15365_p13 = por %p15364_p8, %p15363_p7 }
  0xaa   : > { %p15361_p3 = pneg %p15360_p0  ;;  %p15367_p10 = por %p15366_p6, %p15365_p13 }
  0xac   : > { %p15368_p4 = pnand %p15367_p10, %p15361_p3 }
  0xae   : > { %15371 = shalt.err (!%p15368_p4)
}
  0xaf   : > { %s15372_s26 = scalar_lea.vmem %s992_s18, 16  ;;  %s15770_s24 = smov [#allocation15]  }
  0xb0   : > { %p15373_p11 = scmp.ne.s32.totalorder %s992_s18, %s15372_s26  ;;  %s15377_s0 = sshll.u32 %s15770_s24, 4  ;;  %s15378_s0 = int_to_ptr.vmem [resolvable:$false] %s15377_s0 }
  0xb1   : > { %s15379_s28 = scalar_lea.vmem %s15378_s0, 32  ;;  %p15380_p2 = scmp.lt.s32.totalorder %s992_s18, %s15378_s0 }
  0xb2   : > { %p15375_p5 = pnand %p15373_p11, %p16089_p12  ;;  %p15381_p0 = scmp.lt.s32.totalorder %s15379_s28, %s15372_s26 }
  0xb4   : > { %p15376_p1 = pneg %p15375_p5  ;;  %p15382_p9 = por %p15381_p0, %p15380_p2 }
  0xb6   : > { %p15383_p7 = pnand %p15382_p9, %p15376_p1 }
  0xb8   : > { %15386 = shalt.err (!%p15383_p7)
}
  0xb9   : > { %p20877_p8 = scmp.ne.s32.totalorder %s20862_s11, 0  ;;  %s20878_s15 = sld [smem:[#allocation89_spill]] }
  0xba   : > { %s1023_s0 = scalar_lea.vmem [#allocation18], %s16115_s27  ;;  %s20708_s30 = scalar_lea.sflag [#allocation19], %s16056_s25 }
  0xbb   : > { %14769 = dma.hbm_to_vmem [thread:$0]  (!%p20877_p8), %s16160_s1, 16, %s992_s18, %s20709_s21  }
  0xbc   : > { %s1030_s22 = sshll.u32 %s1023_s0, 4  ;;  %s16190_s22 = int_to_ptr.vmem [resolvable:$true] %s1030_s22 }
  0xbf   : > { %s16187_s24 = scalar_lea.hbm %s20878_s15, %s16118_s23  ;;  %s15392_s26 = scalar_lea.hbm %s20878_s15, 512 }
  0xc0   : > { %s15387_s8 = scalar_lea.hbm %s16187_s24, 256  ;;  %p15393_p6 = scmp.lt.u32.totalorder %s16187_s24, %s20878_s15 }
  0xc1   : > { %p15388_p9 = scmp.ne.s32.totalorder %s16187_s24, %s15387_s8  ;;  %p15394_p10 = scmp.lt.u32.totalorder %s15392_s26, %s15387_s8 }
  0xc2   : > { %p15396_p11 = scmp.lt.u32.totalorder %s15387_s8, %s16187_s24 }
  0xc3   : > { %p15390_p3 = pnand %p15388_p9, %p16089_p12  ;;  %p15395_p4 = por %p15394_p10, %p15393_p6 }
  0xc5   : > { %p15391_p13 = pneg %p15390_p3  ;;  %p15397_p5 = por %p15396_p11, %p15395_p4 }
  0xc7   : > { %p15398_p1 = pnand %p15397_p5, %p15391_p13 }
  0xc9   : > { %15401 = shalt.err (!%p15398_p1)
}
  0xca   : > { %s15402_s5 = scalar_lea.vmem %s16190_s22, 256  ;;  %s15771_s0 = smov [#allocation18]  }
  0xcb   : > { %p15403_p2 = scmp.ne.s32.totalorder %s16190_s22, %s15402_s5  ;;  %s15407_s1 = sshll.u32 %s15771_s0, 4  ;;  %s15408_s1 = int_to_ptr.vmem [resolvable:$false] %s15407_s1 }
  0xcc   : > { %s15409_s18 = scalar_lea.vmem %s15408_s1, 512  ;;  %p15410_p9 = scmp.lt.s32.totalorder %s16190_s22, %s15408_s1 }
  0xcd   : > { %p15405_p0 = pnand %p15403_p2, %p16089_p12  ;;  %p15411_p3 = scmp.lt.s32.totalorder %s15409_s18, %s15402_s5 }
  0xcf   : > { %p15406_p7 = pneg %p15405_p0  ;;  %p15412_p6 = por %p15411_p3, %p15410_p9 }
  0xd1   : > { %p15413_p10 = pnand %p15412_p6, %p15406_p7 }
  0xd3   : > { %15416 = shalt.err (!%p15413_p10)
}
  0xd4   : > { %s20879_s8 = smov 64   ;;  %s20880_s17 = sld [smem:[#allocation91_spill]] }
  0xd5   : > { %14775 = dma.hbm_to_vmem [thread:$0]  (!%p20877_p8), %s16187_s24, 256, %s16190_s22, %s20708_s30, %s20879_s8, %s20879_s8, %s15769_s6  }
  0xd6   : > { %s1065_s5 = scalar_lea.vmem [#allocation21], %s16115_s27  ;;  %s1062_s1 = scalar_lea.sflag [#allocation22], %s16056_s25 }
  0xd7   : > { %s1072_s0 = sshll.u32 %s1065_s5, 4  ;;  %s16226_s0 = int_to_ptr.vmem [resolvable:$true] %s1072_s0 }
  0xda   : > { %s16223_s4 = scalar_lea.hbm %s20880_s17, %s16118_s23  ;;  %s15422_s26 = scalar_lea.hbm %s20880_s17, 512 }
  0xdb   : > { %s15417_s18 = scalar_lea.hbm %s16223_s4, 256  ;;  %p15423_p5 = scmp.lt.u32.totalorder %s16223_s4, %s20880_s17 }
  0xdc   : > { %p15418_p13 = scmp.ne.s32.totalorder %s16223_s4, %s15417_s18  ;;  %p15424_p1 = scmp.lt.u32.totalorder %s15422_s26, %s15417_s18 }
  0xdd   : > { %p15426_p0 = scmp.lt.u32.totalorder %s15417_s18, %s16223_s4 }
  0xde   : > { %p15420_p4 = pnand %p15418_p13, %p16089_p12  ;;  %p15425_p2 = por %p15424_p1, %p15423_p5 }
  0xe0   : > { %p15421_p11 = pneg %p15420_p4  ;;  %p15427_p7 = por %p15426_p0, %p15425_p2 }
  0xe2   : > { %p15428_p9 = pnand %p15427_p7, %p15421_p11 }
  0xe4   : > { %15431 = shalt.err (!%p15428_p9)
}
  0xe5   : > { %s15432_s5 = scalar_lea.vmem %s16226_s0, 256  ;;  %s15772_s24 = smov [#allocation21]  }
  0xe6   : > { %p15433_p3 = scmp.ne.s32.totalorder %s16226_s0, %s15432_s5  ;;  %s15437_s22 = sshll.u32 %s15772_s24, 4  ;;  %s15438_s22 = int_to_ptr.vmem [resolvable:$false] %s15437_s22 }
  0xe7   : > { %s15439_s30 = scalar_lea.vmem %s15438_s22, 512  ;;  %p15440_p13 = scmp.lt.s32.totalorder %s16226_s0, %s15438_s22 }
  0xe8   : > { %p15435_p6 = pnand %p15433_p3, %p16089_p12  ;;  %p15441_p4 = scmp.lt.s32.totalorder %s15439_s30, %s15432_s5 }
  0xea   : > { %p15436_p10 = pneg %p15435_p6  ;;  %p15442_p5 = por %p15441_p4, %p15440_p13 }
  0xec   : > { %p15443_p1 = pnand %p15442_p5, %p15436_p10 }
  0xee   : > { %15446 = shalt.err (!%p15443_p1)
}
  0xef   : > { %14781 = dma.hbm_to_vmem [thread:$0]  (!%p20877_p8), %s16223_s4, 256, %s16226_s0, %s1062_s1, %s20879_s8, %s20879_s8, %s15769_s6  }
  0xf0   : > { %s15773_s18 = smov [#allocation3]   ;;  %s15774_s28 = smov [#allocation8]  }
  0xf1   : > { %s836_s26 = sshll.u32 %s15773_s18, 4  ;;  %s865_s24 = sshll.u32 %s15774_s28, 4  ;;  %s837_s26 = int_to_ptr.vmem [resolvable:$true] %s836_s26  ;;  %s866_s24 = int_to_ptr.vmem [resolvable:$true] %s865_s24 }
  0xf2   : > { %s20881_s30 = sld [smem:[#allocation77_spill]]  ;;  %p20883_p2 = scmp.ne.s32.totalorder %s20865_s29, 0 }
  0xf8   : > { %s20882_s21 = smov %s20881_s30  ;;  %s15447_s13 = scalar_lea.hbm %s20881_s30, 32 }
  0xf9   : > { %p15448_p11 = scmp.ne.s32.totalorder %s20882_s21, %s15447_s13  ;;  %p15454_p9 = scmp.lt.u32.totalorder %s15447_s13, %s20882_s21 }
  0xfb   : > { %p15450_p0 = pnand %p15448_p11, %p20883_p2 }
  0xfd   : > { %p15451_p7 = pneg %p15450_p0 }
  0xff   : > { %p15456_p3 = pnand %p15454_p9, %p15451_p7 }
 0x101   : > { %15459 = shalt.err (!%p15456_p3)
}
 0x102   : > { %s15460_s4 = scalar_lea.vmem %s837_s26, 32  ;;  %p15468_p4 = scmp.lt.s32.totalorder %s837_s26, %s837_s26 }
 0x103   : > { %p15461_p6 = scmp.ne.s32.totalorder %s837_s26, %s15460_s4  ;;  %p15469_p5 = scmp.lt.s32.totalorder %s15460_s4, %s15460_s4 }
 0x105   : > { %p15463_p10 = pnand %p15461_p6, %p20883_p2  ;;  %p15470_p1 = por %p15469_p5, %p15468_p4 }
 0x107   : > { %p15464_p13 = pneg %p15463_p10 }
 0x109   : > { %p15471_p8 = pnand %p15470_p1, %p15464_p13 }
 0x10b   : > { %15474 = shalt.err (!%p15471_p8)
}
 0x10c   : > { %p20884_p11 = scmp.ne.s32.totalorder %s20861_s10, 0  ;;  %s20885_s15 = smov 1  }
 0x10d   : > { %s20886_s17 = smov 16   ;;  %s20887_s18 = sld [smem:[#allocation79_spill]] }
 0x10e   : > { %14747 = dma.hbm_to_vmem [thread:$0]  (!%p20884_p11), %s20882_s21, 32, %s837_s26, [#allocation4], %s20886_s17, %s20886_s17, %s20885_s15  }
 0x113   : > { %s15475_s28 = scalar_lea.hbm %s20887_s18, 256 }
 0x114   : > { %p15476_p0 = scmp.ne.s32.totalorder %s20887_s18, %s15475_s28  ;;  %p15482_p9 = scmp.lt.u32.totalorder %s15475_s28, %s20887_s18 }
 0x116   : > { %p15478_p8 = pnand %p15476_p0, %p20883_p2 }
 0x118   : > { %p15479_p7 = pneg %p15478_p8 }
 0x11a   : > { %p15484_p3 = pnand %p15482_p9, %p15479_p7 }
 0x11c   : > { %15487 = shalt.err (!%p15484_p3)
}
 0x11d   : > { %s15488_s20 = scalar_lea.vmem %s866_s24, 256  ;;  %p15496_p4 = scmp.lt.s32.totalorder %s866_s24, %s866_s24 }
 0x11e   : > { %p15489_p6 = scmp.ne.s32.totalorder %s866_s24, %s15488_s20  ;;  %p15497_p5 = scmp.lt.s32.totalorder %s15488_s20, %s15488_s20 }
 0x120   : > { %p15491_p10 = pnand %p15489_p6, %p20883_p2  ;;  %p15498_p1 = por %p15497_p5, %p15496_p4 }
 0x122   : > { %p15492_p13 = pneg %p15491_p10 }
 0x124   : > { %p15499_p12 = pnand %p15498_p1, %p15492_p13 }
 0x126   : > { %15502 = shalt.err (!%p15499_p12)
}
 0x127   : > { %s15775_s26 = smov 128   ;;  %s15776_s15 = smov 8  }
 0x128   : > { %14753 = dma.hbm_to_vmem [thread:$0]  (!%p20884_p11), %s20887_s18, 256, %s866_s24, [#allocation7], %s15775_s26, %s15775_s26, %s15776_s15  }
 0x129   : > { %s20888_s0 = sld [smem:[#allocation81_spill]]  ;;  %s905_s5 = scalar_lea.vmem [#allocation11], %s16063_s3 }
 0x12a   : > { %s912_s22 = sshll.u32 %s905_s5, 4  ;;  %p20889_p2 = scmp.ne.s32.totalorder %s20872_s7, 0  ;;  %s913_s22 = int_to_ptr.vmem [resolvable:$true] %s912_s22 }
 0x12f   : > { %s16298_s28 = scalar_lea.hbm %s20888_s0, %s16068_s19  ;;  %s15508_s24 = scalar_lea.hbm %s20888_s0, 32 }
 0x130   : > { %s15503_s30 = scalar_lea.hbm %s16298_s28, 16  ;;  %p15509_p11 = scmp.lt.u32.totalorder %s16298_s28, %s20888_s0 }
 0x131   : > { %p15504_p12 = scmp.ne.s32.totalorder %s16298_s28, %s15503_s30  ;;  %p15510_p7 = scmp.lt.u32.totalorder %s15508_s24, %s15503_s30 }
 0x132   : > { %p15512_p3 = scmp.lt.u32.totalorder %s15503_s30, %s16298_s28 }
 0x133   : > { %p15506_p0 = pnand %p15504_p12, %p20889_p2  ;;  %p15511_p9 = por %p15510_p7, %p15509_p11 }
 0x135   : > { %p15507_p8 = pneg %p15506_p0  ;;  %p15513_p6 = por %p15512_p3, %p15511_p9 }
 0x137   : > { %p15514_p10 = pnand %p15513_p6, %p15507_p8 }
 0x139   : > { %15517 = shalt.err (!%p15514_p10)
}
 0x13a   : > { %s15518_s15 = scalar_lea.vmem %s913_s22, 16  ;;  %s15777_s17 = smov [#allocation11]  }
 0x13b   : > { %p15519_p13 = scmp.ne.s32.totalorder %s913_s22, %s15518_s15  ;;  %s15523_s13 = sshll.u32 %s15777_s17, 4  ;;  %s15524_s13 = int_to_ptr.vmem [resolvable:$false] %s15523_s13 }
 0x13c   : > { %s15525_s2 = scalar_lea.vmem %s15524_s13, 32  ;;  %p15526_p1 = scmp.lt.s32.totalorder %s913_s22, %s15524_s13 }
 0x13d   : > { %p15521_p4 = pnand %p15519_p13, %p20889_p2  ;;  %p15527_p12 = scmp.lt.s32.totalorder %s15525_s2, %s15518_s15 }
 0x13f   : > { %p15522_p5 = pneg %p15521_p4  ;;  %p15528_p0 = por %p15527_p12, %p15526_p1 }
 0x141   : > { %p15529_p7 = pnand %p15528_p0, %p15522_p5 }
 0x143   : > { %15532 = shalt.err (!%p15529_p7)
}
 0x144   : > { %p20890_p11 = scmp.ne.s32.totalorder %s20862_s11, 0  ;;  %s20891_s29 = scalar_lea.sflag [#allocation10], %s16056_s25 }
 0x145   : > { %s20892_s12 = sld [smem:[#allocation86_spill]]  ;;  %s967_s4 = scalar_lea.vmem [#allocation14], %s16063_s3 }
 0x146   : > { %14760 = dma.hbm_to_vmem [thread:$0]  (!%p20890_p11), %s16298_s28, 16, %s913_s22, %s20891_s29  }
 0x147   : > { %s974_s24 = sshll.u32 %s967_s4, 4  ;;  %s975_s24 = int_to_ptr.vmem [resolvable:$true] %s974_s24 }
 0x14b   : > { %s16324_s10 = scalar_lea.hbm %s20892_s12, %s16068_s19  ;;  %s15538_s28 = scalar_lea.hbm %s20892_s12, 32 }
 0x14c   : > { %s15533_s20 = scalar_lea.hbm %s16324_s10, 16  ;;  %p15539_p6 = scmp.lt.u32.totalorder %s16324_s10, %s20892_s12 }
 0x14d   : > { %p15534_p8 = scmp.ne.s32.totalorder %s16324_s10, %s15533_s20  ;;  %p15540_p10 = scmp.lt.u32.totalorder %s15538_s28, %s15533_s20 }
 0x14e   : > { %p15542_p4 = scmp.lt.u32.totalorder %s15533_s20, %s16324_s10 }
 0x14f   : > { %p15536_p9 = pnand %p15534_p8, %p20889_p2  ;;  %p15541_p13 = por %p15540_p10, %p15539_p6 }
 0x151   : > { %p15537_p3 = pneg %p15536_p9  ;;  %p15543_p5 = por %p15542_p4, %p15541_p13 }
 0x153   : > { %p15544_p1 = pnand %p15543_p5, %p15537_p3 }
 0x155   : > { %15547 = shalt.err (!%p15544_p1)
}
 0x156   : > { %s15548_s19 = scalar_lea.vmem %s975_s24, 16  ;;  %s15778_s13 = smov [#allocation14]  }
 0x157   : > { %p15549_p12 = scmp.ne.s32.totalorder %s975_s24, %s15548_s19  ;;  %s15553_s2 = sshll.u32 %s15778_s13, 4  ;;  %s15554_s2 = int_to_ptr.vmem [resolvable:$false] %s15553_s2 }
 0x158   : > { %s15555_s29 = scalar_lea.vmem %s15554_s2, 32  ;;  %p15556_p8 = scmp.lt.s32.totalorder %s975_s24, %s15554_s2 }
 0x159   : > { %p15551_p0 = pnand %p15549_p12, %p20889_p2  ;;  %p15557_p9 = scmp.lt.s32.totalorder %s15555_s29, %s15548_s19 }
 0x15b   : > { %p15552_p7 = pneg %p15551_p0  ;;  %p15558_p11 = por %p15557_p9, %p15556_p8 }
 0x15d   : > { %p15559_p6 = pnand %p15558_p11, %p15552_p7 }
 0x15f   : > { %15562 = shalt.err (!%p15559_p6)
}
 0x160   : > { %p20893_p10 = scmp.ne.s32.totalorder %s20862_s11, 0  ;;  %s20894_s5 = scalar_lea.sflag [#allocation13], %s16056_s25 }
 0x161   : > { %s20895_s14 = sld [smem:[#allocation88_spill]]  ;;  %s1002_s26 = scalar_lea.vmem [#allocation17], %s16115_s27 }
 0x162   : > { %14766 = dma.hbm_to_vmem [thread:$0]  (!%p20893_p10), %s16324_s10, 16, %s975_s24, %s20894_s5  }
 0x163   : > { %s1009_s15 = sshll.u32 %s1002_s26, 4  ;;  %s16353_s15 = int_to_ptr.vmem [resolvable:$true] %s1009_s15 }
 0x167   : > { %s16350_s20 = scalar_lea.hbm %s20895_s14, %s16118_s23  ;;  %s15568_s24 = scalar_lea.hbm %s20895_s14, 512 }
 0x168   : > { %s15563_s28 = scalar_lea.hbm %s16350_s20, 256  ;;  %p15569_p4 = scmp.lt.u32.totalorder %s16350_s20, %s20895_s14 }
 0x169   : > { %p15564_p11 = scmp.ne.s32.totalorder %s16350_s20, %s15563_s28  ;;  %p15570_p5 = scmp.lt.u32.totalorder %s15568_s24, %s15563_s28 }
 0x16a   : > { %p15572_p12 = scmp.lt.u32.totalorder %s15563_s28, %s16350_s20 }
 0x16b   : > { %p15566_p3 = pnand %p15564_p11, %p20889_p2  ;;  %p15571_p1 = por %p15570_p5, %p15569_p4 }
 0x16d   : > { %p15567_p13 = pneg %p15566_p3  ;;  %p15573_p0 = por %p15572_p12, %p15571_p1 }
 0x16f   : > { %p15574_p7 = pnand %p15573_p0, %p15567_p13 }
 0x171   : > { %15577 = shalt.err (!%p15574_p7)
}
 0x172   : > { %s15578_s13 = scalar_lea.vmem %s16353_s15, 256  ;;  %s15779_s2 = smov [#allocation17]  }
 0x173   : > { %p15579_p8 = scmp.ne.s32.totalorder %s16353_s15, %s15578_s13  ;;  %s15583_s29 = sshll.u32 %s15779_s2, 4  ;;  %s15584_s29 = int_to_ptr.vmem [resolvable:$false] %s15583_s29 }
 0x174   : > { %s15585_s5 = scalar_lea.vmem %s15584_s29, 512  ;;  %p15586_p11 = scmp.lt.s32.totalorder %s16353_s15, %s15584_s29 }
 0x175   : > { %p15581_p9 = pnand %p15579_p8, %p20889_p2  ;;  %p15587_p3 = scmp.lt.s32.totalorder %s15585_s5, %s15578_s13 }
 0x177   : > { %p15582_p6 = pneg %p15581_p9  ;;  %p15588_p4 = por %p15587_p3, %p15586_p11 }
 0x179   : > { %p15589_p5 = pnand %p15588_p4, %p15582_p6 }
 0x17b   : > { %15592 = shalt.err (!%p15589_p5)
}
 0x17c   : > { %s20896_s30 = scalar_lea.sflag [#allocation16], %s16056_s25  ;;  %s20897_s16 = sld [smem:[#allocation90_spill]] }
 0x17d   : > { %14772 = dma.hbm_to_vmem [thread:$0]  (!%p20893_p10), %s16350_s20, 256, %s16353_s15, %s20896_s30, %s20879_s8, %s20879_s8, %s15769_s6  }
 0x17e   : > { %s1044_s22 = scalar_lea.vmem [#allocation20], %s16115_s27  ;;  %s14697_s24 = smul.u32 144, %s16063_s3 }
 0x17f   : > { %s1051_s10 = sshll.u32 %s1044_s22, 4  ;;  %s16388_s10 = int_to_ptr.vmem [resolvable:$true] %s1051_s10 }
 0x182   : > { %s16385_s28 = scalar_lea.hbm %s20897_s16, %s16118_s23  ;;  %s15598_s19 = scalar_lea.hbm %s20897_s16, 512 }
 0x183   : > { %s15593_s17 = scalar_lea.hbm %s16385_s28, 256  ;;  %p15599_p0 = scmp.lt.u32.totalorder %s16385_s28, %s20897_s16 }
 0x184   : > { %p15594_p13 = scmp.ne.s32.totalorder %s16385_s28, %s15593_s17  ;;  %p15600_p7 = scmp.lt.u32.totalorder %s15598_s19, %s15593_s17 }
 0x185   : > { %p15602_p9 = scmp.lt.u32.totalorder %s15593_s17, %s16385_s28 }
 0x186   : > { %p15596_p1 = pnand %p15594_p13, %p20889_p2  ;;  %p15601_p8 = por %p15600_p7, %p15599_p0 }
 0x188   : > { %p15597_p12 = pneg %p15596_p1  ;;  %p15603_p6 = por %p15602_p9, %p15601_p8 }
 0x18a   : > { %p15604_p11 = pnand %p15603_p6, %p15597_p12 }
 0x18c   : > { %15607 = shalt.err (!%p15604_p11)
}
 0x18d   : > { %s15608_s27 = scalar_lea.vmem %s16388_s10, 256  ;;  %s15780_s2 = smov [#allocation20]  }
 0x18e   : > { %p15609_p3 = scmp.ne.s32.totalorder %s16388_s10, %s15608_s27  ;;  %s15613_s29 = sshll.u32 %s15780_s2, 4  ;;  %s15614_s29 = int_to_ptr.vmem [resolvable:$false] %s15613_s29 }
 0x18f   : > { %s15615_s5 = scalar_lea.vmem %s15614_s29, 512  ;;  %p15616_p13 = scmp.lt.s32.totalorder %s16388_s10, %s15614_s29 }
 0x190   : > { %p15611_p4 = pnand %p15609_p3, %p20889_p2  ;;  %p15617_p1 = scmp.lt.s32.totalorder %s15615_s5, %s15608_s27 }
 0x192   : > { %p15612_p5 = pneg %p15611_p4  ;;  %p15618_p0 = por %p15617_p1, %p15616_p13 }
 0x194   : > { %p15619_p7 = pnand %p15618_p0, %p15612_p5 }
 0x196   : > { %15622 = shalt.err (!%p15619_p7)
}
 0x197   : > { %s20898_s30 = scalar_lea.sflag [#allocation19], %s16056_s25  ;;  %s14698_s4 = smul.u32 2304, %s15757_s9 }
 0x198   : > { %14778 = dma.hbm_to_vmem [thread:$0]  (!%p20893_p10), %s16385_s28, 256, %s16388_s10, %s20898_s30, %s20879_s8, %s20879_s8, %s15769_s6  }
 0x199   : > { %s1098_s26 = scalar_lea.vmem [#allocation23], %s14697_s24  ;;  %s20899_s15 = sld [smem:[#allocation94_spill]] }
 0x19a   : > { %s1105_s22 = sshll.u32 %s1098_s26, 4  ;;  %s16425_s22 = int_to_ptr.vmem [resolvable:$true] %s1105_s22 }
 0x19f   : > { %s16423_s19 = scalar_lea.hbm %s20899_s15, %s14698_s4  ;;  %s15628_s10 = scalar_lea.hbm %s20899_s15, 4608 }
 0x1a0   : > { %s15623_s23 = scalar_lea.hbm %s16423_s19, 2304  ;;  %p15629_p6 = scmp.lt.u32.totalorder %s16423_s19, %s20899_s15 }
 0x1a1   : > { %p15624_p12 = scmp.ne.s32.totalorder %s16423_s19, %s15623_s23  ;;  %p15630_p11 = scmp.lt.u32.totalorder %s15628_s10, %s15623_s23 }
 0x1a2   : > { %p15632_p4 = scmp.lt.u32.totalorder %s15623_s23, %s16423_s19 }
 0x1a3   : > { %p15626_p8 = pnand %p15624_p12, %p20889_p2  ;;  %p15631_p3 = por %p15630_p11, %p15629_p6 }
 0x1a5   : > { %p15627_p9 = pneg %p15626_p8  ;;  %p15633_p5 = por %p15632_p4, %p15631_p3 }
 0x1a7   : > { %p15634_p13 = pnand %p15633_p5, %p15627_p9 }
 0x1a9   : > { %15637 = shalt.err (!%p15634_p13)
}
 0x1aa   : > { %s15638_s27 = scalar_lea.vmem %s16425_s22, 2304  ;;  %s15781_s2 = smov [#allocation23]  }
 0x1ab   : > { %p15639_p1 = scmp.ne.s32.totalorder %s16425_s22, %s15638_s27  ;;  %s15643_s29 = sshll.u32 %s15781_s2, 4  ;;  %s15644_s29 = int_to_ptr.vmem [resolvable:$false] %s15643_s29 }
 0x1ac   : > { %s15645_s5 = scalar_lea.vmem %s15644_s29, 4608  ;;  %p15646_p12 = scmp.lt.s32.totalorder %s16425_s22, %s15644_s29 }
 0x1ad   : > { %p15641_p0 = pnand %p15639_p1, %p20889_p2  ;;  %p15647_p8 = scmp.lt.s32.totalorder %s15645_s5, %s15638_s27 }
 0x1af   : > { %p15642_p7 = pneg %p15641_p0  ;;  %p15648_p6 = por %p15647_p8, %p15646_p12 }
 0x1b1   : > { %p15649_p11 = pnand %p15648_p6, %p15642_p7 }
 0x1b3   : > { %15652 = shalt.err (!%p15649_p11)
}
 0x1b4   : > { %14784 = dma.hbm_to_vmem [thread:$0]  (!%p20893_p10), %s16423_s19, 2304, %s16425_s22, %s1062_s1, %s20879_s8, %s20879_s8, %s15769_s6  }
 0x1b5   : > { %s20900_s7 = sld [smem:[#allocation47_spill]] }
 0x1bb   : > { %p20901_p2 = scmp.ne.s32.totalorder %s20900_s7, 0 }
 0x1bd   : > { %1137 = sbr.rel (%p20901_p2) target bundleno = 6910 (0x1afe), region = 124 }
 0x1c4   : > { %s20902_s30 = sld [smem:[#allocation43_spill]] }
 0x1ca   : > { %p20903_p9 = scmp.eq.s32.totalorder %s20902_s30, 0 }
 0x1cc   : > { %15704 = dma.done.wait (%p20903_p9), [#allocation4], 32   ;;  %p20904_p3 = pmov %p20903_p9 }
 0x1ce   : > { %15706 = vsyncadd (%p20904_p3), [#allocation4], 4294967264  ;;  %p20905_p4 = pmov %p20904_p3 }
 0x1cf   : > { %p20906_p5 = pmov %p20904_p3 }
 0x1d0   : > { %15708 = dma.done.wait (%p20905_p4), [#allocation7], 288  }
 0x1d1   : > { %15710 = vsyncadd (%p20906_p5), [#allocation7], 4294967008  ;;  %s20907_s11 = sld [smem:[#allocation39_spill]]  ;;  %s1151_s4 = sand.u32 1, %s20902_s30  }
 0x1d2   : > { %s20908_s25 = sld [smem:[#allocation44_spill]]  ;;  %s1152_s8 = scalar_lea.sflag [#allocation10], %s1151_s4 }
 0x1d7   : > { %s16465_s6 = sand.u32 1, %s20907_s11  }
 0x1d8   : > { %p20909_p10 = scmp.ne.s32.totalorder %s20908_s25, 0 }
 0x1da   : > { %15712 = dma.done.wait (%p20909_p10), %s1152_s8, 32  }
 0x1db   : > { %15714 = vsyncadd (%p20909_p10), %s1152_s8, 4294967264  ;;  %s16473_s26 = sshll.u32 %s16465_s6, 4  ;;  %s1168_s17 = scalar_lea.sflag [#allocation13], %s1151_s4 }
 0x1dc   : > { %15716 = dma.done.wait (%p20909_p10), %s1168_s17, 272  }
 0x1dd   : > { %15718 = vsyncadd (%p20909_p10), %s1168_s17, 4294967024  ;;  %s1185_s23 = scalar_lea.sflag [#allocation16], %s1151_s4 }
 0x1de   : > { %15720 = dma.done.wait (%p20909_p10), %s1185_s23, 272  }
 0x1df   : > { %15722 = vsyncadd (%p20909_p10), %s1185_s23, 4294967024  ;;  %s1202_s10 = scalar_lea.sflag [#allocation19], %s1151_s4 }
 0x1e0   : > { %15724 = dma.done.wait (%p20909_p10), %s1202_s10, 512  }
 0x1e1   : > { %15726 = vsyncadd (%p20909_p10), %s1202_s10, 4294966784  ;;  %s1220_s27 = scalar_lea.sflag [#allocation22], %s1151_s4 }
 0x1e2   : > { %15728 = dma.done.wait (%p20909_p10), %s1220_s27, 2560  }
 0x1e3   : > { %15730 = vsyncadd (%p20909_p10), %s1220_s27, 4294964736  ;;  %s20910_s29 = sld [smem:[#allocation41_spill]]  ;;  %s14699_s5 = smul.u32 144, %s16465_s6 }
 0x1e4   : > { %s14073_s7 = sshll.u32 %s16465_s6, 6  ;;  %s20912_s27 = sld [smem:[#allocation82_spill]] }
 0x1e5   : > { %s20913_s19 = sld [smem:[#allocation83_spill]]  ;;  %s20914_s22 = sld [smem:[#allocation84_spill]] }
 0x1e6   : > { %s20915_s14 = sld [smem:[#allocation93_spill]]  ;;  %s20916_s17 = sld [smem:[#allocation95_spill]] }
 0x1e7   : > { %s20917_s16 = sld [smem:[#allocation96_spill]]  ;;  %s20918_s18 = sld [smem:[#allocation97_spill]] }
 0x1e8   : > { %s16545_s24 = scalar_lea.vmem [#allocation25], %s14073_s7 }
 0x1e9   : > { %p1417_p13 = scmp.lt.s32.totalorder %s20910_s29, 1  ;;  %p14082_p1 = scmp.ne.s32.totalorder %s20910_s29, 0 }
 0x1ea   : > { %s20919_s0 = sld [smem:[#allocation74_spill]] (!%p14082_p1)  ;;  %s20920_s15 = sld [smem:[#allocation76_spill]] (!%p14082_p1)  ;;  %vm1468_vm0 = vcmask (!%p14082_p1), 261120  }
 0x1eb   : > { %s16503_s30 = scalar_select %p1417_p13, %s20910_s29, 1 }
 0x1ec   : > { %1455 = sbr.rel (%p14082_p1) target bundleno = 503 (0x1f7), region = 180 }
 0x1ed   : > { %s14298_s11 = sshll.u32 %s16503_s30, 4  ;;  %s1437_s4 = scalar_lea.vmem %s20915_s14, %s16503_s30 }
 0x1ee   : > { %s16513_s2 = scalar_lea.vmem %s20912_s27, %s14298_s11  ;;  %s16518_s3 = scalar_lea.vmem %s20913_s19, %s14298_s11 }
 0x1ef   : > { %s16523_s1 = scalar_lea.vmem %s20914_s22, %s14298_s11  ;;  %s1440_s23 = scalar_lea.vmem %s20916_s17, %s16503_s30 }
 0x1f0   : > { %s14301_s10 = sshll.u32 %s16503_s30, 6  ;;  %s1448_s20 = scalar_lea.vmem %s20918_s18, %s16503_s30  ;;  %v1456_v0 = vld [vmem:[%s20919_s0] sm:$0xff] (!%p14082_p1)  ;;  %v1457_v2 = vld [vmem:[%s20919_s0 + $0x8] sm:$0xff] (!%p14082_p1)  ;;  %v1458_v5 = vld [vmem:[%s20919_s0 + $0x10] sm:$0xff] (!%p14082_p1) }
 0x1f1   : > { %s16537_s28 = scalar_lea.vmem %s20917_s16, %s14301_s10  ;;  %s16543_s22 = scalar_lea.vmem [#allocation23], %s14699_s5  ;;  %v1460_v1 = vld [vmem:[%s20920_s15] sm:$0xff] (!%p14082_p1)  ;;  %v1461_v4 = vld [vmem:[%s20920_s15 + $0x8] sm:$0xff] (!%p14082_p1)  ;;  %v1462_v6 = vld [vmem:[%s20920_s15 + $0x10] sm:$0xff] (!%p14082_p1) }
 0x1f2   : > { %v1464_v3 = vadd.f32 (!%p14082_p1), %v1460_v1, %v1456_v0  ;;  %v1465_v7 = vadd.f32 (!%p14082_p1), %v1461_v4, %v1457_v2  ;;  %v1466_v8 = vadd.f32 (!%p14082_p1), %v1462_v6, %v1458_v5  ;;  %v1459_v9 = vld [vmem:[%s20919_s0 + $0x18] sm:$0xff] (!%p14082_p1) }
 0x1f3   : > { %v1463_v10 = vld [vmem:[%s20920_s15 + $0x18] sm:$0xff] }
 0x1f4   : > { %1469 = vst.msk [vmem:[#allocation2] sm:$0xff] %vm1468_vm0, %v1464_v3  ;;  %v1467_v11 = vadd.f32 %v1463_v10, %v1459_v9  ;;  %1470 = vst.msk [vmem:[#allocation2 + $0x8] sm:$0xff] %vm1468_vm0, %v1465_v7 }
 0x1f5   : > { %1471 = vst.msk [vmem:[#allocation2 + $0x10] sm:$0xff] %vm1468_vm0, %v1466_v8 }
 0x1f6   : > { %1472 = vst.msk [vmem:[#allocation2 + $0x18] sm:$0xff] %vm1468_vm0, %v1467_v11 }
 0x1f7 PF: > { %vm1489_vm1 = vcmask 261120   ;;  %v14893_v40 = vld [vmem:[%s16513_s2] sm:$0xff]   ;;  %v14894_v41 = vld [vmem:[%s16513_s2 + $0x8] sm:$0xff]   ;;  %s20921_s2 = scalar_lea.vmem [#allocation9], %s16465_s6  ;;  %s20922_s14 = scalar_lea.vmem [#allocation11], %s16465_s6  ;;  %vm15784_vm2 = vmmov 0  }
 0x1f8   : > { %14413 = vmatprep.subr.bf16.mxu1 %v14893_v40  ;;  %v14895_v42 = vld [vmem:[%s16518_s3] sm:$0xff]   ;;  %v14896_v11 = vld [vmem:[%s16518_s3 + $0x8] sm:$0xff]   ;;  %vm2496_vm3 = vcmask 130048   ;;  %vm3870_vm5 = vcmask 1041409   ;;  %vm3873_vm6 = vcmask 1042434   ;;  %vm3876_vm7 = vcmask 1043459  }
 0x1f9   : > { %14414 = vmatpush3.bf16.msra.mxu1 %v14893_v40  ;;  %v14083_v57 = vld [vmem:[%s20921_s2] ss:$0 sm:$0xff]  ;;  %vm3879_vm8 = vcmask 1044484   ;;  %vm3882_vm9 = vcmask 1045509   ;;  %vm3885_vm10 = vcmask 1046534   ;;  %vm3888_vm11 = vcmask 1047559  }
 0x1fa   : > { %14415 = vmatprep.subr.bf16.mxu1 %v14894_v41  ;;  %v14084_v63 = vld [vmem:[%s20922_s14] ss:$0 sm:$0xff]  ;;  %s15788_s3 = smov 16   ;;  %s21028_s11 = scalar_lea.vmem [#allocation12], %s16473_s26 }
 0x1fb   : > { %v1473_v12 = vld [vmem:[#allocation2] sm:$0xff]  ;;  %v1474_v14 = vld [vmem:[#allocation2 + $0x8] sm:$0xff]  ;;  %s21029_s17 = smov %s21028_s11  ;;  %s21034_s16 = scalar_lea.vmem [#allocation18], %s16473_s26 }
 0x1fc   : > { %v1475_v13 = vld [vmem:[#allocation2 + $0x10] sm:$0xff]  ;;  %v1490_v15 = vsel %vm1489_vm1, %v1473_v12, 0.0  ;;  %v1493_v18 = vsel %vm1489_vm1, %v1474_v14, 0.0  ;;  %s21035_s8 = smov %s21034_s16  ;;  %s21036_s29 = sld [smem:[#allocation75_spill]] }
 0x1fd   : > { %v1496_v16 = vsel %vm1489_vm1, %v1475_v13, 0.0  ;;  %v1476_v17 = vld [vmem:[#allocation2 + $0x18] sm:$0xff]  ;;  %1491 = vadd.xlane.f32.xlu0 %v1490_v15  ;;  %14416 = vmatpush3.bf16.msra.mxu1 %v14894_v41  ;;  %s21037_s12 = scalar_lea.vmem [#allocation17], %s16473_s26  ;;  %s21039_s14 = scalar_lea.vmem [#allocation14], %s16465_s6 }
 0x1fe   : > { %1497 = vadd.xlane.f32.xlu1 %v1496_v16  ;;  %v1499_v19 = vsel %vm1489_vm1, %v1476_v17, 0.0  ;;  %14421 = vmatprep.subr.bf16.mxu1 %v14895_v42  ;;  %s21038_s2 = smov %s21037_s12  ;;  %s21154_s18 = sld [smem:[#allocation92_spill]] }
 0x201   : > { %1494 = vadd.xlane.f32.xlu0 %v1493_v18 }
 0x202   : > { %1500 = vadd.xlane.f32.xlu1 %v1499_v19 }
 0x204   : > { %s21155_s5 = scalar_lea.vmem %s21154_s18, %s16503_s30  ;;  %s21160_s30 = sld [smem:[#allocation41_spill]] }
 0x20a   : > { %p14283_p0 = scmp.ne.s32.totalorder %s21160_s30, 1 }
 0x28a   : > { %v1492_v20 = vpop.xlane.xlu0 %1491 }
 0x28b   : > { %v1498_v21 = vpop.xlane.xlu1 %1497  ;;  %v1503_v22 = vmul.f32 0.03125, %v1492_v20 }
 0x28c   : > { %v1505_v23 = vmul.f32 0.03125, %v1498_v21 }
 0x28d   : > { %v1507_v24 = vsub.f32 %v1473_v12, %v1503_v22  ;;  %v14897_v12 = vld [vmem:[%s16523_s1] sm:$0xff]  }
 0x28e   : > { %v1509_v25 = vsub.f32 %v1475_v13, %v1505_v23  ;;  %v1495_v26 = vpop.xlane.xlu0 %1494  ;;  %v14898_v13 = vld [vmem:[%s16523_s1 + $0x8] sm:$0xff]   ;;  %s15783_s1 = smov 112  }
 0x28f   : > { %v1501_v27 = vpop.xlane.xlu1 %1500  ;;  %v1504_v28 = vmul.f32 0.03125, %v1495_v26  ;;  %v1511_v30 = vmul.f32 %v1507_v24, %v1507_v24 }
 0x290   : > { %v1506_v29 = vmul.f32 0.03125, %v1501_v27  ;;  %v1513_v31 = vmul.f32 %v1509_v25, %v1509_v25 }
 0x291   : > { %v1508_v32 = vsub.f32 %v1474_v14, %v1504_v28  ;;  %v1515_v34 = vsel %vm1489_vm1, %v1511_v30, 0.0  ;;  %v20718_v14 = vmov 0.0  }
 0x292   : > { %v1510_v33 = vsub.f32 %v1476_v17, %v1506_v29  ;;  %1516 = vadd.xlane.f32.xlu0 %v1515_v34  ;;  %v1521_v35 = vsel %vm1489_vm1, %v1513_v31, 0.0  ;;  %14443 = vmatprep.subr.bf16.mxu0 %v20718_v14  ;;  %v15785_v29 = vmov 1983009808   ;;  %v1782_v31 = vlaneseq }
 0x293   : > { %v1512_v36 = vmul.f32 %v1508_v32, %v1508_v32  ;;  %14445 = vmatprep.mubr.msk.bf16.mxu0 %vm15784_vm2, %v20718_v14  ;;  %v1780_v30 = vunpack.c.l.s4 %v15785_v29 }
 0x294   : > { %v1514_v37 = vmul.f32 %v1510_v33, %v1510_v33 }
 0x295   : > { %v1518_v38 = vsel %vm1489_vm1, %v1512_v36, 0.0  ;;  %v1781_v34 = vunpack.c.0.s8 %v1780_v30 }
 0x296   : > { %1522 = vadd.xlane.f32.xlu0 %v1521_v35  ;;  %1519 = vadd.xlane.f32.xlu1 %v1518_v38  ;;  %v1524_v39 = vsel %vm1489_vm1, %v1514_v37, 0.0  ;;  %v16622_v35 = vshrl.u32 %v1782_v31, 7 }
 0x298   : > { %20929 = vst [vmem:[#allocation56_spill] sm:$0xff] %v16622_v35  ;;  %v16625_v37 = vsub.s32 %v1781_v34, %v16622_v35 }
 0x29a   : > { %1525 = vadd.xlane.f32.xlu1 %v1524_v39  ;;  %20930 = vst [vmem:[#allocation57_spill] sm:$0xff] %v16625_v37 }
 0x31f   : > { %v1517_v43 = vpop.xlane.xlu0 %1516 }
 0x320   : > { %v1527_v44 = vmul.f32 0.03125, %v1517_v43 }
 0x322   : > { %v1531_v45 = vadd.f32 1e-05, %v1527_v44 }
 0x323   : > { %v1520_v46 = vpop.xlane.xlu1 %1519  ;;  %v1523_v47 = vpop.xlane.xlu0 %1522 }
 0x324   : > { %14935 = vrsqrt.f32 %v1531_v45  ;;  %v1528_v48 = vmul.f32 0.03125, %v1520_v46  ;;  %v1529_v49 = vmul.f32 0.03125, %v1523_v47 }
 0x326   : > { %v1532_v50 = vadd.f32 1e-05, %v1528_v48  ;;  %v1533_v51 = vadd.f32 1e-05, %v1529_v49 }
 0x327   : > { %v1526_v52 = vpop.xlane.xlu1 %1525 }
 0x328   : > { %14937 = vrsqrt.f32 %v1532_v50  ;;  %v1530_v53 = vmul.f32 0.03125, %v1526_v52 }
 0x329   : > { %14939 = vrsqrt.f32 %v1533_v51 }
 0x32a   : > { %v1534_v54 = vadd.f32 1e-05, %v1530_v53 }
 0x32c   : > { %14941 = vrsqrt.f32 %v1534_v54 }
 0x32e   : > { %v14936_v55 = vpop.eup %14935 }
 0x32f   : > { %v1539_v56 = vmul.f32 %v14936_v55, %v1507_v24 }
 0x331   : > { %v1549_v61 = vmul.f32 %v14083_v57, %v1539_v56 }
 0x332   : > { %v14938_v58 = vpop.eup %14937 }
 0x333   : > { %v14940_v59 = vpop.eup %14939  ;;  %v1540_v60 = vmul.f32 %v14938_v58, %v1508_v32  ;;  %v1559_v3 = vadd.f32 %v14084_v63, %v1549_v61  ;;  %v15786_v32 = vmov 1934713408  }
 0x334   : > { %v1541_v62 = vmul.f32 %v14940_v59, %v1509_v25 }
 0x335   : > { %v1550_v0 = vmul.f32 %v14083_v57, %v1540_v60 }
 0x336   : > { %v14942_v1 = vpop.eup %14941  ;;  %v1551_v5 = vmul.f32 %v14083_v57, %v1541_v62 }
 0x337   : > { %v1542_v2 = vmul.f32 %v14942_v1, %v1510_v33  ;;  %v1560_v4 = vadd.f32 %v14084_v63, %v1550_v0  ;;  %v1811_v33 = vunpack.c.l.s4 %v15786_v32 }
 0x338   : > { %v1561_v8 = vadd.f32 %v14084_v63, %v1551_v5 }
 0x339   : > { %v1563_v6 = vpack.c.bf16 %v1560_v4, %v1559_v3  ;;  %v1552_v7 = vmul.f32 %v14083_v57, %v1542_v2  ;;  %v1812_v36 = vunpack.c.0.s8 %v1811_v33 }
 0x33b   : > { %14417 = vmatprep.mubr.msk.bf16.mxu1 %vm1489_vm1, %v1563_v6  ;;  %v1562_v9 = vadd.f32 %v14084_v63, %v1552_v7 }
 0x33d   : > { %v1564_v10 = vpack.c.bf16 %v1562_v9, %v1561_v8 }
 0x33f   : > { %14418 = vmatmul.mubr.msk.bf16.vlgmr.msra.gmra.mrb[0].mxu1 %vm1489_vm1, %v1564_v10 }
 0x340   : > { %14422 = vmatpush3.bf16.msra.mxu1 %v14895_v42  ;;  %14425 = vmatprep.mubr.msk.bf16.mxu1 %vm1489_vm1, %v1563_v6  ;;  %v16631_v42 = vsub.s32 %v1812_v36, %v16622_v35 }
 0x341   : > { %14423 = vmatprep.subr.bf16.mxu1 %v14896_v11 }
 0x344   : > { %14424 = vmatpush3.bf16.msra.mxu1 %v14896_v11 }
 0x345   : > { %14429 = vmatprep.subr.bf16.mxu1 %v14897_v12 }
 0x347   : > { %14426 = vmatmul.mubr.msk.bf16.vlgmr.msra.gmra.mrb[4].mxu1 %vm1489_vm1, %v1564_v10 }
 0x348   : > { %14430 = vmatpush3.bf16.msra.mxu1 %v14897_v12  ;;  %14433 = vmatprep.mubr.msk.bf16.mxu1 %vm1489_vm1, %v1563_v6 }
 0x349   : > { %14431 = vmatprep.subr.bf16.mxu1 %v14898_v13 }
 0x34c   : > { %14432 = vmatpush3.bf16.msra.mxu1 %v14898_v13 }
 0x34d   : > { %14437 = vmatprep.subr.bf16.mxu1 %v20718_v14 }
 0x34f   : > { %14434 = vmatmul.mubr.msk.bf16.vlgmr.msra.gmra.mrb[8].mxu1 %vm1489_vm1, %v1564_v10 }
 0x350   : > { %14439 = vmatprep.mubr.msk.bf16.mxu1 %vm15784_vm2, %v20718_v14 }
 0x412   : > { %v16598_v15 = vpop.f32.mrb[0].mxu1 }
 0x413   : > { %20923 = vst [vmem:[#allocation50_spill] sm:$0xff] %v16598_v15  ;;  %v1621_v16 = vpop.f32.mrb[1].mxu1 }
 0x414   : > { %v16600_v17 = vpop.f32.mrb[2].mxu1  ;;  %v1636_v23 = vmul.f32 0.25, %v1621_v16 }
 0x415   : > { %20924 = vst [vmem:[#allocation51_spill] sm:$0xff] %v16600_v17  ;;  %v1624_v18 = vpop.f32.mrb[3].mxu1 }
 0x416   : > { %v1637_v26 = vmul.f32 0.25, %v1624_v18  ;;  %v1778_v39 = vcombine.high %v1636_v23, %v20718_v14  ;;  %v1785_v45 = vrot.slane %v1636_v23, %v16625_v37 }
 0x418   : > { %v1792_v53 = vrot.slane %v1778_v39, %v16625_v37  ;;  %v1844_v54 = vcombine.high %v1637_v26, %v20718_v14  ;;  %v1851_v10 = vrot.slane %v1637_v26, %v16625_v37 }
 0x41a   : > { %v16602_v19 = vpop.f32.mrb[4].mxu1  ;;  %v1858_v11 = vrot.slane %v1844_v54, %v16625_v37 }
 0x41b   : > { %v1690_v20 = vpop.f32.mrb[5].mxu1 }
 0x41c   : > { %2014 = vrot.lane.b32.xlu0 %v1690_v20, %s15783_s1  ;;  %v16605_v21 = vpop.f32.mrb[6].mxu1  ;;  %v2020_v38 = vcombine.high %v1690_v20, %v20718_v14  ;;  %v2027_v41 = vrot.slane %v1690_v20, %v16625_v37 }
 0x41d   : > { %v1693_v22 = vpop.f32.mrb[7].mxu1 }
 0x41e   : > { %2016 = vrot.lane.b32.xlu1 %v1693_v22, %s15783_s1  ;;  %v2034_v46 = vrot.slane %v2020_v38, %v16625_v37  ;;  %v2086_v47 = vcombine.high %v1693_v22, %v20718_v14  ;;  %v2093_v55 = vrot.slane %v1693_v22, %v16625_v37 }
 0x420   : > { %v2100_v61 = vrot.slane %v2086_v47, %v16625_v37 }
 0x422   : > { %1772 = vrot.lane.b32.xlu1 %v1636_v23, %s15783_s1  ;;  %v16609_v24 = vpop.f32.mrb[8].mxu1 }
 0x423   : > { %20925 = vst [vmem:[#allocation52_spill] sm:$0xff] %v16609_v24  ;;  %v16611_v25 = vpop.f32.mrb[9].mxu1 }
 0x424   : > { %20926 = vst [vmem:[#allocation53_spill] sm:$0xff] %v16611_v25  ;;  %v16613_v27 = vpop.f32.mrb[10].mxu1 }
 0x425   : > { %20927 = vst [vmem:[#allocation54_spill] sm:$0xff] %v16613_v27  ;;  %v16615_v28 = vpop.f32.mrb[11].mxu1 }
 0x426   : > { %20928 = vst [vmem:[#allocation55_spill] sm:$0xff] %v16615_v28  ;;  %1774 = vrot.lane.b32.xlu1 %v1637_v26, %s15783_s1 }
 0x48e   : > { %v2015_v40 = vpop.permute.xlu0 %2014 }
 0x48f   : > { %v2035_v43 = vcombine.high %v2015_v40, %v20718_v14  ;;  %v2042_v44 = vrot.slane %v2015_v40, %v16625_v37 }
 0x490   : > { %v2017_v48 = vpop.permute.xlu1 %2016 }
 0x491   : > { %v2049_v49 = vrot.slane %v2035_v43, %v16625_v37  ;;  %v2050_v50 = vcombine.low %v2027_v41, %v2042_v44  ;;  %v2051_v51 = vcombine.high %v2027_v41, %v2042_v44  ;;  %v2101_v52 = vcombine.high %v2017_v48, %v20718_v14 }
 0x492   : > { %v2108_v56 = vrot.slane %v2017_v48, %v16625_v37 }
 0x493   : > { %v2058_v57 = vrot.slane %v2050_v50, %v16631_v42  ;;  %v2065_v58 = vrot.slane %v2051_v51, %v16631_v42  ;;  %v2066_v59 = vcombine.low %v2034_v46, %v2049_v49  ;;  %v2067_v60 = vcombine.high %v2034_v46, %v2049_v49 }
 0x494   : > { %v2115_v62 = vrot.slane %v2101_v52, %v16625_v37  ;;  %v2116_v63 = vcombine.low %v2093_v55, %v2108_v56  ;;  %v2117_v0 = vcombine.high %v2093_v55, %v2108_v56  ;;  %v1773_v1 = vpop.permute.xlu1 %1772 }
 0x495   : > { %v2074_v2 = vrot.slane %v2066_v59, %v16631_v42  ;;  %v2081_v3 = vrot.slane %v2067_v60, %v16631_v42  ;;  %v2152_v4 = vcombine.low %v2058_v57, %v2065_v58  ;;  %v14101_v5 = vcombine.high %v2058_v57, %v2065_v58 }
 0x496   : > { %v2124_v6 = vrot.slane %v2116_v63, %v16631_v42  ;;  %v2131_v7 = vrot.slane %v2117_v0, %v16631_v42  ;;  %v2132_v8 = vcombine.low %v2100_v61, %v2115_v62  ;;  %v2133_v9 = vcombine.high %v2100_v61, %v2115_v62 }
 0x497   : > { %v2168_v12 = vcombine.low %v2074_v2, %v2081_v3  ;;  %v14102_v13 = vcombine.high %v2074_v2, %v2081_v3  ;;  %v2159_v29 = vrot.slane %v2152_v4, %v16625_v37  ;;  %v2167_v30 = vrot.slane %v14101_v5, %v16625_v37 }
 0x498   : > { %v2140_v16 = vrot.slane %v2132_v8, %v16631_v42  ;;  %v2147_v18 = vrot.slane %v2133_v9, %v16631_v42  ;;  %v2202_v20 = vcombine.low %v2124_v6, %v2131_v7  ;;  %v14103_v22 = vcombine.high %v2124_v6, %v2131_v7  ;;  %v1775_v23 = vpop.permute.xlu1 %1774 }
 0x499   : > { %v1793_v31 = vcombine.high %v1773_v1, %v20718_v14  ;;  %v1800_v32 = vrot.slane %v1773_v1, %v16625_v37  ;;  %v2175_v26 = vrot.slane %v2168_v12, %v16625_v37  ;;  %v2183_v33 = vrot.slane %v14102_v13, %v16625_v37 }
 0x49a   : > { %v2218_v34 = vcombine.low %v2140_v16, %v2147_v18  ;;  %v14104_v36 = vcombine.high %v2140_v16, %v2147_v18  ;;  %v1859_v41 = vcombine.high %v1775_v23, %v20718_v14  ;;  %v2209_v43 = vrot.slane %v2202_v20, %v16625_v37 }
 0x49b   : > { %v1807_v38 = vrot.slane %v1793_v31, %v16625_v37  ;;  %v1808_v39 = vcombine.low %v1785_v45, %v1800_v32  ;;  %v1809_v40 = vcombine.high %v1785_v45, %v1800_v32  ;;  %v2217_v44 = vrot.slane %v14103_v22, %v16625_v37 }
 0x49c   : > { %v2225_v46 = vrot.slane %v2218_v34, %v16625_v37  ;;  %v1866_v47 = vrot.slane %v1775_v23, %v16625_v37  ;;  %v2233_v52 = vrot.slane %v14104_v36, %v16625_v37  ;;  %v1873_v45 = vrot.slane %v1859_v41, %v16625_v37 }
 0x49d   : > { %v1816_v48 = vrot.slane %v1808_v39, %v16631_v42  ;;  %v1823_v49 = vrot.slane %v1809_v40, %v16631_v42  ;;  %v1824_v50 = vcombine.low %v1792_v53, %v1807_v38  ;;  %v1825_v51 = vcombine.high %v1792_v53, %v1807_v38 }
 0x49e   : > { %v1874_v54 = vcombine.low %v1851_v10, %v1866_v47  ;;  %v1875_v55 = vcombine.high %v1851_v10, %v1866_v47  ;;  %v1890_v62 = vcombine.low %v1858_v11, %v1873_v45  ;;  %v1891_v63 = vcombine.high %v1858_v11, %v1873_v45 }
 0x49f   : > { %v1832_v56 = vrot.slane %v1824_v50, %v16631_v42  ;;  %v1839_v57 = vrot.slane %v1825_v51, %v16631_v42  ;;  %v1910_v58 = vcombine.low %v1816_v48, %v1823_v49  ;;  %v14097_v59 = vcombine.high %v1816_v48, %v1823_v49 }
 0x4a0   : > { %v1882_v60 = vrot.slane %v1874_v54, %v16631_v42  ;;  %v1889_v61 = vrot.slane %v1875_v55, %v16631_v42  ;;  %v1898_v3 = vrot.slane %v1890_v62, %v16631_v42  ;;  %v1905_v4 = vrot.slane %v1891_v63, %v16631_v42 }
 0x4a1   : > { %v1917_v53 = vrot.slane %v1910_v58, %v16625_v37  ;;  %v1925_v0 = vrot.slane %v14097_v59, %v16625_v37  ;;  %v1926_v1 = vcombine.low %v1832_v56, %v1839_v57  ;;  %v14098_v2 = vcombine.high %v1832_v56, %v1839_v57 }
 0x4a2   : > { %v1960_v5 = vcombine.low %v1882_v60, %v1889_v61  ;;  %v14099_v6 = vcombine.high %v1882_v60, %v1889_v61  ;;  %v2184_v9 = vcombine.low %v2159_v29, %v2167_v30  ;;  %v2192_v10 = vcombine.low %v2175_v26, %v2183_v33  ;;  %v1485_v61 = vld [vmem:[#allocation8] sm:$0xff] }
 0x4a3   : > { %v1933_v7 = vrot.slane %v1926_v1, %v16625_v37  ;;  %v1941_v8 = vrot.slane %v14098_v2, %v16625_v37  ;;  %v1976_v13 = vcombine.low %v1898_v3, %v1905_v4  ;;  %v14100_v16 = vcombine.high %v1898_v3, %v1905_v4 }
 0x4a4   : > { %v1967_v11 = vrot.slane %v1960_v5, %v16625_v37  ;;  %v1975_v12 = vrot.slane %v14099_v6, %v16625_v37  ;;  %v1942_v18 = vcombine.low %v1917_v53, %v1925_v0  ;;  %v2199_v22 = vrot.slane %v2192_v10, %v16631_v42  ;;  %v16707_v0 = vld [vmem:[#allocation3] sm:$0x1]  ;;  %v1486_v5 = vld [vmem:[#allocation8 + $0x8] sm:$0xff] }
 0x4a5   : > { %v1950_v20 = vcombine.low %v1933_v7, %v1941_v8  ;;  %v2234_v23 = vcombine.low %v2209_v43, %v2217_v44  ;;  %v1983_v31 = vrot.slane %v1976_v13, %v16625_v37  ;;  %v1991_v32 = vrot.slane %v14100_v16, %v16625_v37 }
 0x4a6   : > { %v1992_v34 = vcombine.low %v1967_v11, %v1975_v12  ;;  %v2242_v36 = vcombine.low %v2225_v46, %v2233_v52  ;;  %v2191_v30 = vrot.slane %v2184_v9, %v16631_v42  ;;  %v1949_v39 = vrot.slane %v1942_v18, %v16631_v42 }
 0x4a7   : > { %v1957_v29 = vrot.slane %v1950_v20, %v16631_v42  ;;  %v2000_v26 = vcombine.low %v1983_v31, %v1991_v32  ;;  %v2241_v33 = vrot.slane %v2234_v23, %v16631_v42  ;;  %v15787_v58 = vmov 1966171168  }
 0x4a8   : > { %v2249_v38 = vrot.slane %v2242_v36, %v16631_v42  ;;  %v2200_v40 = vcombine.low %v2191_v30, %v2199_v22  ;;  %v2201_v41 = vcombine.high %v2191_v30, %v2199_v22  ;;  %v1999_v43 = vrot.slane %v1992_v34, %v16631_v42 }
 0x4a9   : > { %v2007_v44 = vrot.slane %v2000_v26, %v16631_v42  ;;  %v1958_v46 = vcombine.low %v1949_v39, %v1957_v29  ;;  %v1959_v49 = vcombine.high %v1949_v39, %v1957_v29  ;;  %v2599_v59 = vunpack.c.l.s4 %v15787_v58 }
 0x4aa   : > { %v2250_v47 = vcombine.low %v2241_v33, %v2249_v38  ;;  %v2251_v48 = vcombine.high %v2241_v33, %v2249_v38  ;;  %vm1479_vm4 = vcmp.gt.f32.partialorder %v16707_v0, 0.5 }
 0x4ab   : > { %v2008_v52 = vcombine.low %v1999_v43, %v2007_v44  ;;  %v2009_v45 = vcombine.high %v1999_v43, %v2007_v44  ;;  %v2600_v60 = vunpack.c.0.s8 %v2599_v59 }
 0x4ac   : > { %v2252_v50 = vpack.c.bf16 %v2250_v47, %v2200_v40  ;;  %v2253_v51 = vpack.c.bf16 %v2251_v48, %v2201_v41 }
 0x4ad   : > { %v2010_v56 = vpack.c.bf16 %v2008_v52, %v1958_v46  ;;  %v2011_v57 = vpack.c.bf16 %v2009_v45, %v1959_v49  ;;  %v16705_v62 = vsub.s32 %v2600_v60, %v16622_v35 }
 0x4ae   : > { %v2501_v54 = vsel %vm2496_vm3, %v2252_v50, 0  ;;  %v2548_v55 = vsel %vm2496_vm3, %v2253_v51, 0 }
 0x4af   : > { %14438 = vmatpush3.bf16.xpose.msra.mxu1 %v2501_v54  ;;  %14444 = vmatpush3.bf16.xpose.msra.mxu0 %v2548_v55  ;;  %20931 = vst [vmem:[#allocation58_spill] sm:$0xff] %v16705_v62 }
 0x4b0   : > { %14449 = vmatprep.subr.bf16.mxu1 %v20718_v14  ;;  %14455 = vmatprep.subr.bf16.mxu0 %v20718_v14 }
 0x4b6   : > { %14440 = vmatmul.mubr.msk.bf16.vlgmr.msra.gmra.mrb[12].mxu1 %vm2496_vm3, %v2010_v56  ;;  %14446 = vmatmul.mubr.msk.bf16.vlgmr.msra.gmra.mrb[0].mxu0 %vm2496_vm3, %v2011_v57 }
 0x4b7   : > { %14451 = vmatprep.mubr.msk.bf16.mxu1 %vm15784_vm2, %v20718_v14  ;;  %14457 = vmatprep.mubr.msk.bf16.mxu0 %vm15784_vm2, %v20718_v14 }
 0x589   : > { %v2537_v63 = vpop.f32.mrb[12].mxu1  ;;  %v2584_v53 = vpop.f32.mrb[0].mxu0 }
 0x58a   : > { %v2538_v1 = vadd.f32 %v2537_v63, %v1485_v61  ;;  %v2585_v2 = vadd.f32 %v2584_v53, %v1485_v61  ;;  %v14441_v3 = vpop.f32.mrb[13].mxu1  ;;  %v14447_v4 = vpop.f32.mrb[1].mxu0 }
 0x58b   : > { %v2540_v6 = vpop.f32.mrb[14].mxu1  ;;  %v2587_v7 = vpop.f32.mrb[2].mxu0 }
 0x58c   : > { %v2597_v8 = vcombine.high %v2538_v1, %v2538_v1  ;;  %v2604_v9 = vrot.slane %v2538_v1, %v16705_v62  ;;  %v2695_v10 = vcombine.high %v2585_v2, %v2585_v2  ;;  %v2702_v11 = vrot.slane %v2585_v2, %v16705_v62  ;;  %v14442_v12 = vpop.f32.mrb[15].mxu1  ;;  %v14448_v13 = vpop.f32.mrb[3].mxu0 }
 0x58d   : > { %v2541_v16 = vadd.f32 %v2540_v6, %v1486_v5  ;;  %v2588_v36 = vadd.f32 %v2587_v7, %v1486_v5 }
 0x58e   : > { %v2611_v18 = vrot.slane %v2597_v8, %v16705_v62  ;;  %v2612_v20 = vcombine.high %v2604_v9, %v2604_v9  ;;  %v2620_v22 = vrot.slane %v2604_v9, %v16705_v62  ;;  %v2709_v23 = vrot.slane %v2695_v10, %v16705_v62 }
 0x58f   : > { %v2710_v31 = vcombine.high %v2702_v11, %v2702_v11  ;;  %v2718_v32 = vrot.slane %v2702_v11, %v16705_v62  ;;  %v2646_v34 = vcombine.high %v2541_v16, %v2541_v16  ;;  %v2653_v41 = vrot.slane %v2541_v16, %v16705_v62 }
 0x590   : > { %v2613_v29 = vcombine.high %v2611_v18, %v2611_v18  ;;  %v2627_v30 = vrot.slane %v2611_v18, %v16705_v62  ;;  %v2634_v26 = vrot.slane %v2612_v20, %v16705_v62  ;;  %v2642_v33 = vcombine.high %v2620_v22, %v2620_v22 }
 0x591   : > { %v2711_v38 = vcombine.high %v2709_v23, %v2709_v23  ;;  %v2725_v39 = vrot.slane %v2709_v23, %v16705_v62  ;;  %v2732_v40 = vrot.slane %v2710_v31, %v16705_v62  ;;  %v16728_v46 = vsel %vm1479_vm4, -1e+09, %v2620_v22 }
 0x592   : > { %v2641_v43 = vrot.slane %v2613_v29, %v16705_v62  ;;  %v2643_v44 = vcombine.high %v2627_v30, %v2627_v30  ;;  %v2644_v47 = vcombine.high %v2634_v26, %v2634_v26  ;;  %v16724_v48 = vsel %vm1479_vm4, -1e+09, %v2634_v26 }
 0x593   : > { %v16732_v49 = vsel %vm1479_vm4, -1e+09, %v2642_v33  ;;  %v16736_v50 = vsel %vm1479_vm4, -1e+09, %v2627_v30  ;;  %v16739_v51 = vrot.slane %v2711_v38, %v16705_v62  ;;  %v2889_v55 = vcombine.low %v16728_v46, %v16724_v48 }
 0x594   : > { %v2645_v52 = vcombine.high %v2641_v43, %v2641_v43  ;;  %v16743_v45 = vsel %vm1479_vm4, -1e+09, %v2644_v47  ;;  %v16747_v54 = vsel %vm1479_vm4, -1e+09, %v2641_v43  ;;  %v16753_v56 = vsel %vm1479_vm4, -1e+09, %v2643_v44 }
 0x595   : > { %v2890_v57 = vcombine.low %v16732_v49, %v16743_v45  ;;  %v2740_v58 = vcombine.high %v2718_v32, %v2718_v32  ;;  %v2741_v59 = vcombine.high %v2725_v39, %v2725_v39  ;;  %v2891_v60 = vcombine.low %v16736_v50, %v16747_v54 }
 0x596   : > { %v2742_v61 = vcombine.high %v2732_v40, %v2732_v40  ;;  %v16761_v63 = vsel %vm1479_vm4, -1e+09, %v2718_v32  ;;  %v16765_v53 = vsel %vm1479_vm4, -1e+09, %v2732_v40  ;;  %v16775_v3 = vsel %vm1479_vm4, -1e+09, %v2725_v39 }
 0x597   : > { %v16771_v2 = vsel %vm1479_vm4, -1e+09, %v2740_v58  ;;  %v16780_v4 = vsel %vm1479_vm4, -1e+09, %v16739_v51  ;;  %v16788_v6 = vsel %vm1479_vm4, -1e+09, %v2741_v59  ;;  %v2660_v8 = vrot.slane %v2646_v34, %v16705_v62 }
 0x598   : > { %v16784_v5 = vsel %vm1479_vm4, -1e+09, %v2742_v61  ;;  %v2661_v10 = vcombine.high %v2653_v41, %v2653_v41  ;;  %v2669_v11 = vrot.slane %v2653_v41, %v16705_v62  ;;  %v2744_v12 = vcombine.high %v2588_v36, %v2588_v36 }
 0x599   : > { %v2988_v13 = vcombine.low %v16771_v2, %v16784_v5  ;;  %v2662_v16 = vcombine.high %v2660_v8, %v2660_v8  ;;  %v2676_v18 = vrot.slane %v2660_v8, %v16705_v62  ;;  %v2751_v20 = vrot.slane %v2588_v36, %v16705_v62 }
 0x59a   : > { %v2683_v22 = vrot.slane %v2661_v10, %v16705_v62  ;;  %v2691_v23 = vcombine.high %v2669_v11, %v2669_v11  ;;  %v2758_v31 = vrot.slane %v2744_v12, %v16705_v62  ;;  %v16804_v32 = vsel %vm1479_vm4, -1e+09, %v2645_v52 }
 0x59b   : > { %v2690_v34 = vrot.slane %v2662_v16, %v16705_v62  ;;  %v2692_v29 = vcombine.high %v2676_v18, %v2676_v18  ;;  %v16809_v30 = vsel %vm1479_vm4, -1e+09, %v2669_v11  ;;  %v2759_v26 = vcombine.high %v2751_v20, %v2751_v20 }
 0x59c   : > { %v2693_v33 = vcombine.high %v2683_v22, %v2683_v22  ;;  %v16813_v36 = vsel %vm1479_vm4, -1e+09, %v2683_v22  ;;  %v16817_v38 = vsel %vm1479_vm4, -1e+09, %v2676_v18  ;;  %v2760_v39 = vcombine.high %v2758_v31, %v2758_v31 }
 0x59d   : > { %v2694_v40 = vcombine.high %v2690_v34, %v2690_v34  ;;  %v16821_v41 = vsel %vm1479_vm4, -1e+09, %v2691_v23  ;;  %v16825_v43 = vsel %vm1479_vm4, -1e+09, %v2690_v34  ;;  %v16829_v44 = vsel %vm1479_vm4, -1e+09, %v2692_v29 }
 0x59e   : > { %v16833_v47 = vsel %vm1479_vm4, -1e+09, %v2693_v33  ;;  %v2938_v52 = vcombine.low %v16809_v30, %v16813_v36  ;;  %v2767_v58 = vrot.slane %v2751_v20, %v16705_v62  ;;  %v2774_v59 = vrot.slane %v2758_v31, %v16705_v62 }
 0x59f   : > { %v2939_v61 = vcombine.low %v16821_v41, %v16833_v47  ;;  %v2940_v8 = vcombine.low %v16817_v38, %v16825_v43  ;;  %v2781_v10 = vrot.slane %v2759_v26, %v16705_v62  ;;  %v2788_v11 = vrot.slane %v2760_v39, %v16705_v62 }
 0x5a0   : > { %v2789_v12 = vcombine.high %v2767_v58, %v2767_v58  ;;  %v2790_v16 = vcombine.high %v2774_v59, %v2774_v59  ;;  %v16847_v18 = vsel %vm1479_vm4, -1e+09, %v2767_v58  ;;  %v2892_v20 = vcombine.low %v16753_v56, %v16804_v32 }
 0x5a1   : > { %v2791_v22 = vcombine.high %v2781_v10, %v2781_v10  ;;  %v16853_v23 = vsel %vm1479_vm4, -1e+09, %v2781_v10  ;;  %v16857_v31 = vsel %vm1479_vm4, -1e+09, %v2774_v59  ;;  %v16861_v34 = vsel %vm1479_vm4, -1e+09, %v2788_v11 }
 0x5a2   : > { %20932 = vst [vmem:[#allocation59_spill] sm:$0xff] %v16857_v31  ;;  %20933 = vst [vmem:[#allocation60_spill] sm:$0xff] %v16861_v34  ;;  %v2792_v29 = vcombine.high %v2788_v11, %v2788_v11  ;;  %v16865_v26 = vsel %vm1479_vm4, -1e+09, %v2789_v12  ;;  %v16869_v33 = vsel %vm1479_vm4, -1e+09, %v2790_v16  ;;  %v3036_v39 = vcombine.low %v16847_v18, %v16853_v23 }
 0x5a3   : > { %20934 = vst [vmem:[#allocation61_spill] sm:$0xff] %v16869_v33  ;;  %v16875_v58 = vsel %vm1479_vm4, -1e+09, %v2791_v22  ;;  %v3038_v59 = vcombine.low %v16857_v31, %v16861_v34  ;;  %v2899_v10 = vrot.slane %v2889_v55, %v16705_v62  ;;  %v2906_v11 = vrot.slane %v2890_v57, %v16705_v62 }
 0x5a4   : > { %20935 = vst [vmem:[#allocation62_spill] sm:$0xff] %v16875_v58  ;;  %v3037_v12 = vcombine.low %v16865_v26, %v16875_v58  ;;  %v2913_v16 = vrot.slane %v2891_v60, %v16705_v62  ;;  %v2920_v14 = vrot.slane %v2892_v20, %v16705_v62  ;;  %v16890_v22 = vsel %vm1479_vm4, -1e+09, %v2694_v40 }
 0x5a5   : > { %v2921_v9 = vcombine.low %v2899_v10, %v2906_v11  ;;  %v2941_v7 = vcombine.low %v16829_v44, %v16890_v22  ;;  %v2948_v1 = vrot.slane %v2938_v52, %v16705_v62  ;;  %v2955_v55 = vrot.slane %v2939_v61, %v16705_v62 }
 0x5a6   : > { %v2922_v57 = vcombine.low %v2913_v16, %v2920_v14  ;;  %v2962_v27 = vrot.slane %v2940_v8, %v16705_v62  ;;  %v20936_v60 = vcombine.high %v16739_v51, %v16739_v51  ;;  %v3004_v40 = vrot.slane %v2988_v13, %v16705_v62 }
 0x5a7   : > { %v2969_v10 = vrot.slane %v2941_v7, %v16705_v62  ;;  %v2970_v11 = vcombine.low %v2948_v1, %v2955_v55  ;;  %v20937_v14 = vcombine.low %v16761_v63, %v16765_v53  ;;  %v2929_v8 = vrot.slane %v2921_v9, %v16705_v62 }
 0x5a8   : > { %v16902_v20 = vsel %vm1479_vm4, -1e+09, %v20936_v60  ;;  %v2936_v51 = vrot.slane %v2922_v57, %v16705_v62  ;;  %v20938_v16 = vcombine.low %v16775_v3, %v16780_v4  ;;  %v16920_v1 = vsel %vm1479_vm4, -1e+09, %v2792_v29 }
 0x5a9   : > { %v2990_v52 = vcombine.low %v16788_v6, %v16902_v20  ;;  %v2997_v61 = vrot.slane %v20937_v14, %v16705_v62  ;;  %20939 = vst [vmem:[#allocation63_spill] sm:$0xff] %v16920_v1  ;;  %v2971_v7 = vcombine.low %v2962_v27, %v2969_v10  ;;  %v3039_v14 = vcombine.low %v16869_v33, %v16920_v1 }
 0x5aa   : > { %v3011_v13 = vrot.slane %v20938_v16, %v16705_v62  ;;  %v2937_v24 = vcombine.low %v2929_v8, %v2936_v51  ;;  %v2978_v9 = vrot.slane %v2970_v11, %v16705_v62  ;;  %v3046_v57 = vrot.slane %v3036_v39, %v16705_v62 }
 0x5ab   : > { %v3018_v55 = vrot.slane %v2990_v52, %v16705_v62  ;;  %v3019_v60 = vcombine.low %v2997_v61, %v3004_v40  ;;  %v3053_v17 = vrot.slane %v3037_v12, %v16705_v62  ;;  %v2985_v16 = vrot.slane %v2971_v7, %v16705_v62 }
 0x5ac   : > { %v3060_v0 = vrot.slane %v3038_v59, %v16705_v62  ;;  %v3067_v27 = vrot.slane %v3039_v14, %v16705_v62  ;;  %v3089_v29 = vsel %vm2496_vm3, %v2937_v24, -inf  ;;  %v16948_v24 = vsub.s32 0, %v16622_v35 }
 0x5ad   : > { %v3020_v15 = vcombine.low %v3011_v13, %v3018_v55  ;;  %v3068_v40 = vcombine.low %v3046_v57, %v3053_v17  ;;  %3090 = vmax.xlane.f32.xlu0 %v3089_v29  ;;  %v2986_v10 = vcombine.low %v2978_v9, %v2985_v16  ;;  %v3027_v52 = vrot.slane %v3019_v60, %v16705_v62 }
 0x5ae   : > { %v3069_v61 = vcombine.low %v3060_v0, %v3067_v27  ;;  %v16951_v7 = vsub.s32 1, %v16622_v35  ;;  %v16954_v55 = vsub.s32 2, %v16622_v35  ;;  %v16957_v14 = vsub.s32 3, %v16622_v35 }
 0x5af   : > { %v3034_v11 = vrot.slane %v3020_v15, %v16705_v62  ;;  %v3092_v39 = vsel %vm2496_vm3, %v2986_v10, -inf  ;;  %v3076_v8 = vrot.slane %v3068_v40, %v16705_v62  ;;  %v16960_v9 = vsub.s32 4, %v16622_v35 }
 0x5b0   : > { %v3083_v51 = vrot.slane %v3069_v61, %v16705_v62  ;;  %3093 = vmax.xlane.f32.xlu1 %v3092_v39  ;;  %v16963_v57 = vsub.s32 5, %v16622_v35  ;;  %v16966_v16 = vsub.s32 6, %v16622_v35  ;;  %v20941_v27 = vmov 0.0  }
 0x5b1   : > { %v3035_v12 = vcombine.low %v3027_v52, %v3034_v11  ;;  %v4546_v29 = vcombine.high %v16602_v19, %v20941_v27  ;;  %v4612_v40 = vcombine.high %v16605_v21, %v20941_v27  ;;  %v16975_v10 = vsub.s32 7, %v16622_v35 }
 0x5b2   : > { %v3084_v13 = vcombine.low %v3076_v8, %v3083_v51  ;;  %v16980_v11 = vrot.slane %v16602_v19, %v16625_v37 }
 0x5b3   : > { %v3095_v59 = vsel %vm2496_vm3, %v3035_v12, -inf  ;;  %v16996_v35 = vrot.slane %v4612_v40, %v16625_v37 }
 0x5b4   : > { %3096 = vmax.xlane.f32.xlu0 %v3095_v59  ;;  %v3098_v17 = vsel %vm2496_vm3, %v3084_v13, -inf }
 0x5b8   : > { %3099 = vmax.xlane.f32.xlu0 %v3098_v17  ;;  %v16989_v17 = vrot.slane %v4546_v29, %v16625_v37 }
 0x5c1   : > { %2258 = vrot.lane.b32.xlu1 %v16615_v28, %s15783_s1 }
 0x5c5   : > { %4540 = vrot.lane.b32.xlu1 %v16602_v19, %s15783_s1  ;;  %v16993_v19 = vrot.slane %v16605_v21, %v16625_v37 }
 0x5c9   : > { %4542 = vrot.lane.b32.xlu1 %v16605_v21, %s15783_s1 }
 0x63a   : > { %v3091_v60 = vpop.xlane.xlu0 %3090 }
 0x63b   : > { %v3108_v52 = vrot.slane %v3091_v60, %v16948_v24  ;;  %v3112_v61 = vrot.slane %v3091_v60, %v16951_v7  ;;  %v3116_v39 = vrot.slane %v3091_v60, %v16954_v55  ;;  %v3120_v12 = vrot.slane %v3091_v60, %v16957_v14 }
 0x63c   : > { %v3124_v8 = vrot.slane %v3091_v60, %v16960_v9  ;;  %v3128_v51 = vrot.slane %v3091_v60, %v16963_v57  ;;  %v3132_v59 = vrot.slane %v3091_v60, %v16966_v16  ;;  %v3136_v28 = vrot.slane %v3091_v60, %v16975_v10 }
 0x63d   : > { %v16945_v15 = vpop.xlane.xlu1 %3093  ;;  %v17009_v21 = vsub.f32 %v16724_v48, %v3112_v61  ;;  %v17012_v40 = vsub.f32 %v16732_v49, %v3116_v39  ;;  %v17019_v33 = vsub.f32 %v16743_v45, %v3120_v12 }
 0x63e   : > { %v3140_v25 = vrot.slane %v16945_v15, %v16948_v24  ;;  %v3144_v1 = vrot.slane %v16945_v15, %v16951_v7  ;;  %v3148_v29 = vrot.slane %v16945_v15, %v16954_v55  ;;  %v3152_v60 = vrot.slane %v16945_v15, %v16957_v14 }
 0x63f   : > { %v17022_v34 = vsub.f32 %v16736_v50, %v3124_v8  ;;  %v17025_v31 = vsub.f32 %v16747_v54, %v3128_v51  ;;  %v17028_v48 = vsub.f32 %v16753_v56, %v3132_v59  ;;  %v17031_v49 = vsub.f32 %v16804_v32, %v3136_v28 }
 0x640   : > { %v3160_v61 = vrot.slane %v16945_v15, %v16963_v57  ;;  %v3164_v39 = vrot.slane %v16945_v15, %v16966_v16  ;;  %v3168_v45 = vrot.slane %v16945_v15, %v16975_v10  ;;  %v17040_v50 = vsub.f32 %v16809_v30, %v3140_v25 }
 0x641   : > { %v16968_v0 = vpop.permute.xlu1 %2258  ;;  %v17043_v54 = vsub.f32 %v16813_v36, %v3144_v1  ;;  %v17046_v56 = vsub.f32 %v16821_v41, %v3148_v29  ;;  %v17050_v12 = vsub.f32 %v16833_v47, %v3152_v60 }
 0x642   : > { %20940 = vst [vmem:[#allocation64_spill] sm:$0xff] %v16968_v0  ;;  %v17000_v0 = vsub.f32 %v16728_v46, %v3108_v52  ;;  %v3156_v46 = vrot.slane %v16945_v15, %v16960_v9  ;;  %v3097_v52 = vpop.xlane.xlu0 %3096  ;;  %v17066_v29 = vsub.f32 %v16825_v43, %v3160_v61  ;;  %v17069_v60 = vsub.f32 %v16829_v44, %v3164_v39 }
 0x643   : > { %v3172_v28 = vrot.slane %v3097_v52, %v16948_v24  ;;  %v3176_v15 = vrot.slane %v3097_v52, %v16951_v7  ;;  %v3180_v25 = vrot.slane %v3097_v52, %v16954_v55  ;;  %v3184_v30 = vrot.slane %v3097_v52, %v16957_v14 }
 0x644   : > { %v17053_v8 = vsub.f32 %v16817_v38, %v3156_v46  ;;  %v3188_v36 = vrot.slane %v3097_v52, %v16960_v9  ;;  %v3192_v41 = vrot.slane %v3097_v52, %v16963_v57  ;;  %v3196_v1 = vrot.slane %v3097_v52, %v16966_v16 }
 0x645   : > { %v4541_v13 = vpop.permute.xlu1 %4540  ;;  %v3200_v51 = vrot.slane %v3097_v52, %v16975_v10  ;;  %v17072_v46 = vsub.f32 %v16890_v22, %v3168_v45  ;;  %v17075_v58 = vsub.f32 %v16761_v63, %v3172_v28  ;;  %v17078_v52 = vsub.f32 %v16765_v53, %v3176_v15 }
 0x646   : > { %v4561_v47 = vcombine.high %v4541_v13, %v20941_v27  ;;  %v4568_v59 = vrot.slane %v4541_v13, %v16625_v37  ;;  %v17081_v62 = vsub.f32 %v16771_v2, %v3180_v25  ;;  %v17083_v13 = vpop.xlane.xlu0 %3099  ;;  %v17088_v44 = vsub.f32 %v16784_v5, %v3184_v30 }
 0x647   : > { %v17094_v53 = vsub.f32 %v16775_v3, %v3188_v36  ;;  %v17097_v2 = vsub.f32 %v16780_v4, %v3192_v41  ;;  %v17100_v45 = vsub.f32 %v16788_v6, %v3196_v1  ;;  %v17103_v28 = vsub.f32 %v16902_v20, %v3200_v51 }
 0x648   : > { %v4575_v43 = vrot.slane %v4561_v47, %v16625_v37  ;;  %v4576_v22 = vcombine.low %v16980_v11, %v4568_v59  ;;  %v4577_v63 = vcombine.high %v16980_v11, %v4568_v59  ;;  %v3204_v5 = vrot.slane %v17083_v13, %v16948_v24 }
 0x649   : > { %v4543_v32 = vpop.permute.xlu1 %4542  ;;  %v3208_v11 = vrot.slane %v17083_v13, %v16951_v7  ;;  %v3212_v4 = vrot.slane %v17083_v13, %v16954_v55  ;;  %v3216_v6 = vrot.slane %v17083_v13, %v16957_v14  ;;  %v3224_v1 = vrot.slane %v17083_v13, %v16963_v57 }
 0x64a   : > { %v4627_v38 = vcombine.high %v4543_v32, %v20941_v27  ;;  %v4634_v61 = vrot.slane %v4543_v32, %v16625_v37  ;;  %v4592_v32 = vcombine.low %v16989_v17, %v4575_v43  ;;  %v4593_v3 = vcombine.high %v16989_v17, %v4575_v43 }
 0x64b   : > { %v4584_v25 = vrot.slane %v4576_v22, %v16631_v42  ;;  %v4591_v30 = vrot.slane %v4577_v63, %v16631_v42  ;;  %v3220_v17 = vrot.slane %v17083_v13, %v16960_v9  ;;  %v3228_v51 = vrot.slane %v17083_v13, %v16966_v16 }
 0x64c   : > { %v4641_v39 = vrot.slane %v4627_v38, %v16625_v37  ;;  %v4642_v15 = vcombine.low %v16993_v19, %v4634_v61  ;;  %v4643_v20 = vcombine.high %v16993_v19, %v4634_v61  ;;  %v17130_v47 = vsub.f32 %v16847_v18, %v3204_v5 }
 0x64d   : > { %v17133_v59 = vsub.f32 %v16853_v23, %v3208_v11  ;;  %v4607_v38 = vrot.slane %v4593_v3, %v16631_v42  ;;  %v3297_v22 = vmul.f32 1.442695, %v17000_v0  ;;  %v3299_v63 = vmul.f32 1.442695, %v17009_v21 }
 0x64e   : > { %v4658_v36 = vcombine.low %v16996_v35, %v4641_v39  ;;  %v4659_v41 = vcombine.high %v16996_v35, %v4641_v39  ;;  %v4600_v35 = vrot.slane %v4592_v32, %v16631_v42  ;;  %v4650_v43 = vrot.slane %v4642_v15, %v16631_v42 }
 0x64f   : > { %v4657_v61 = vrot.slane %v4643_v20, %v16631_v42  ;;  %v4678_v39 = vcombine.low %v4584_v25, %v4591_v30  ;;  %v14121_v19 = vcombine.high %v4584_v25, %v4591_v30  ;;  %14943 = vpow2.f32 %v3297_v22 }
 0x650   : > { %v4666_v18 = vrot.slane %v4658_v36, %v16631_v42  ;;  %v4673_v5 = vrot.slane %v4659_v41, %v16631_v42  ;;  %v3301_v23 = vmul.f32 1.442695, %v17012_v40  ;;  %v3303_v11 = vmul.f32 1.442695, %v17019_v33 }
 0x651   : > { %v3305_v32 = vmul.f32 1.442695, %v17022_v34  ;;  %v4694_v3 = vcombine.low %v4600_v35, %v4607_v38  ;;  %v14122_v15 = vcombine.high %v4600_v35, %v4607_v38  ;;  %14945 = vpow2.f32 %v3299_v63 }
 0x652   : > { %v3307_v0 = vmul.f32 1.442695, %v17025_v31  ;;  %v4728_v20 = vcombine.low %v4650_v43, %v4657_v61  ;;  %v14123_v21 = vcombine.high %v4650_v43, %v4657_v61  ;;  %14947 = vpow2.f32 %v3301_v23 }
 0x653   : > { %v3309_v25 = vmul.f32 1.442695, %v17028_v48  ;;  %v4744_v30 = vcombine.low %v4666_v18, %v4673_v5  ;;  %v14124_v36 = vcombine.high %v4666_v18, %v4673_v5  ;;  %14949 = vpow2.f32 %v3303_v11 }
 0x654   : > { %v3311_v41 = vmul.f32 1.442695, %v17031_v49  ;;  %v4685_v40 = vrot.slane %v4678_v39, %v16625_v37  ;;  %v4693_v33 = vrot.slane %v14121_v19, %v16625_v37  ;;  %14951 = vpow2.f32 %v3305_v32 }
 0x655   : > { %v3313_v34 = vmul.f32 1.442695, %v17040_v50  ;;  %v4701_v35 = vrot.slane %v4694_v3, %v16625_v37  ;;  %v4709_v31 = vrot.slane %v14122_v15, %v16625_v37  ;;  %14953 = vpow2.f32 %v3307_v0 }
 0x656   : > { %v3315_v38 = vmul.f32 1.442695, %v17043_v54  ;;  %v4735_v48 = vrot.slane %v4728_v20, %v16625_v37  ;;  %v4743_v43 = vrot.slane %v14123_v21, %v16625_v37  ;;  %14955 = vpow2.f32 %v3309_v25  ;;  %v20942_v21 = vld [vmem:[#allocation58_spill] sm:$0xff] }
 0x657   : > { %v3317_v49 = vmul.f32 1.442695, %v17046_v56  ;;  %v4751_v61 = vrot.slane %v4744_v30, %v16625_v37  ;;  %v4759_v19 = vrot.slane %v14124_v36, %v16625_v37  ;;  %14957 = vpow2.f32 %v3311_v41 }
 0x658   : > { %v3319_v50 = vmul.f32 1.442695, %v17050_v12  ;;  %v17162_v22 = vsub.f32 %v16865_v26, %v3212_v4  ;;  %14959 = vpow2.f32 %v3313_v34  ;;  %v3321_v54 = vmul.f32 1.442695, %v17053_v8 }
 0x659   : > { %v3323_v63 = vmul.f32 1.442695, %v17066_v29  ;;  %14961 = vpow2.f32 %v3315_v38  ;;  %v3325_v39 = vmul.f32 1.442695, %v17069_v60  ;;  %v3327_v56 = vmul.f32 1.442695, %v17072_v46  ;;  %v17169_v5 = vpop.eup %14943 }
 0x65a   : > { %v3329_v18 = vmul.f32 1.442695, %v17075_v58  ;;  %14963 = vpow2.f32 %v3317_v49  ;;  %v3331_v12 = vmul.f32 1.442695, %v17078_v52  ;;  %v3333_v26 = vmul.f32 1.442695, %v17081_v62 }
 0x65b   : > { %v4710_v4 = vcombine.low %v4685_v40, %v4693_v33  ;;  %v17173_v23 = vpop.eup %14945  ;;  %14965 = vpow2.f32 %v3319_v50  ;;  %v4718_v8 = vcombine.low %v4701_v35, %v4709_v31  ;;  %v4760_v29 = vcombine.low %v4735_v48, %v4743_v43 }
 0x65c   : > { %v4768_v11 = vcombine.low %v4751_v61, %v4759_v19  ;;  %v17175_v32 = vpop.eup %14947  ;;  %v3393_v60 = vcombine.low %v17169_v5, %v17173_v23  ;;  %14967 = vpow2.f32 %v3321_v54  ;;  %v3335_v58 = vmul.f32 1.442695, %v17088_v44 }
 0x65d   : > { %v4717_v46 = vrot.slane %v4710_v4, %v16631_v42  ;;  %v17181_v52 = vpop.eup %14949  ;;  %14969 = vpow2.f32 %v3323_v63  ;;  %v4725_v62 = vrot.slane %v4718_v8, %v16631_v42  ;;  %v4767_v3 = vrot.slane %v4760_v29, %v16631_v42 }
 0x65e   : > { %v4775_v15 = vrot.slane %v4768_v11, %v16631_v42  ;;  %v17186_v0 = vpop.eup %14951  ;;  %v3394_v20 = vcombine.low %v17175_v32, %v17181_v52  ;;  %v3403_v25 = vrot.slane %v3393_v60, %v20942_v21  ;;  %14971 = vpow2.f32 %v3325_v39 }
 0x65f   : > { %v3337_v44 = vmul.f32 1.442695, %v17094_v53  ;;  %v17192_v30 = vpop.eup %14953  ;;  %14973 = vpow2.f32 %v3327_v56  ;;  %v3339_v36 = vmul.f32 1.442695, %v17097_v2  ;;  %v4726_v41 = vcombine.low %v4717_v46, %v4725_v62 }
 0x660   : > { %v4776_v40 = vcombine.low %v4767_v3, %v4775_v15  ;;  %v17195_v33 = vpop.eup %14955  ;;  %v3395_v34 = vcombine.low %v17186_v0, %v17192_v30  ;;  %v3410_v35 = vrot.slane %v3394_v20, %v20942_v21  ;;  %14975 = vpow2.f32 %v3329_v18 }
 0x661   : > { %v3341_v31 = vmul.f32 1.442695, %v17100_v45  ;;  %v17201_v38 = vpop.eup %14957  ;;  %14977 = vpow2.f32 %v3331_v12  ;;  %v4727_v48 = vcombine.high %v4717_v46, %v4725_v62  ;;  %v4777_v43 = vcombine.high %v4767_v3, %v4775_v15  ;;  %v20943_v45 = vld [vmem:[#allocation62_spill] sm:$0xff] }
 0x662   : > { %v17203_v53 = vpack.c.bf16 %v4776_v40, %v4726_v41  ;;  %v17205_v2 = vpop.eup %14959  ;;  %v3396_v49 = vcombine.low %v17195_v33, %v17201_v38  ;;  %v3417_v61 = vrot.slane %v3395_v34, %v20942_v21  ;;  %v3425_v19 = vcombine.low %v3403_v25, %v3410_v35  ;;  %v20949_v40 = vld [vmem:[#allocation63_spill] sm:$0xff] }
 0x663   : > { %14979 = vpow2.f32 %v3333_v26  ;;  %v17210_v50 = vpop.eup %14961  ;;  %v3292_v54 = vsub.f32 %v20943_v45, %v3216_v6  ;;  %v3343_v63 = vmul.f32 1.442695, %v17103_v28  ;;  %v17217_v39 = vpack.c.bf16 %v4777_v43, %v4727_v48  ;;  %v20945_v6 = vld [vmem:[#allocation59_spill] sm:$0xff] }
 0x664   : > { %14981 = vpow2.f32 %v3335_v58  ;;  %v17219_v56 = vpop.eup %14963  ;;  %v3424_v18 = vrot.slane %v3396_v49, %v20942_v21  ;;  %v3442_v12 = vcombine.low %v17205_v2, %v17210_v50  ;;  %v3345_v26 = vmul.f32 1.442695, %v17130_v47 }
 0x665   : > { %20944 = vst [vmem:[#allocation62_spill] sm:$0xff] %v17217_v39  ;;  %14983 = vpow2.f32 %v3337_v44  ;;  %v17225_v4 = vpop.eup %14965  ;;  %v3293_v8 = vsub.f32 %v20945_v6, %v3220_v17  ;;  %v3433_v28 = vrot.slane %v3425_v19, %v20942_v21  ;;  %v3347_v29 = vmul.f32 1.442695, %v17133_v59  ;;  %v20946_v17 = vld [vmem:[#allocation60_spill] sm:$0xff]  ;;  %v20947_v59 = vld [vmem:[#allocation61_spill] sm:$0xff] }
 0x666   : > { %14985 = vpow2.f32 %v3339_v36  ;;  %v17233_v11 = vpop.eup %14967  ;;  %v3426_v60 = vcombine.low %v3417_v61, %v3424_v18  ;;  %v3443_v58 = vcombine.low %v17219_v56, %v17225_v4  ;;  %v3452_v47 = vrot.slane %v3442_v12, %v20942_v21 }
 0x667   : > { %14987 = vpow2.f32 %v3341_v31  ;;  %v17238_v46 = vpop.eup %14969  ;;  %v3294_v62 = vsub.f32 %v20946_v17, %v3224_v1  ;;  %v3295_v3 = vsub.f32 %v20947_v59, %v3228_v51  ;;  %v3349_v15 = vmul.f32 1.442695, %v17162_v22 }
 0x668   : > { %14989 = vpow2.f32 %v3343_v63  ;;  %v17249_v20 = vpop.eup %14971  ;;  %v3440_v25 = vrot.slane %v3426_v60, %v20942_v21  ;;  %v3444_v44 = vcombine.low %v17233_v11, %v17238_v46  ;;  %v3459_v36 = vrot.slane %v3443_v58, %v20942_v21 }
 0x669   : > { %14991 = vpow2.f32 %v3345_v26  ;;  %v17255_v41 = vpop.eup %14973  ;;  %v20948_v1 = vrot.slane %v17083_v13, %v16975_v10  ;;  %v3351_v34 = vmul.f32 1.442695, %v3292_v54  ;;  %v3353_v22 = vmul.f32 1.442695, %v3293_v8 }
 0x66a   : > { %14993 = vpow2.f32 %v3347_v29  ;;  %v17261_v35 = vpop.eup %14975  ;;  %v3441_v31 = vcombine.low %v3433_v28, %v3440_v25  ;;  %v3445_v48 = vcombine.low %v17249_v20, %v17255_v41  ;;  %v3466_v43 = vrot.slane %v3444_v44, %v20942_v21 }
 0x66b   : > { %v3296_v51 = vsub.f32 %v20949_v40, %v20948_v1  ;;  %v3474_v49 = vcombine.low %v3452_v47, %v3459_v36  ;;  %v17266_v61 = vpop.eup %14977  ;;  %14995 = vpow2.f32 %v3349_v15  ;;  %v3355_v19 = vmul.f32 1.442695, %v3294_v62 }
 0x66c   : > { %v3593_v13 = vsel %vm2496_vm3, %v3441_v31, 0.0  ;;  %v3473_v54 = vrot.slane %v3445_v48, %v20942_v21  ;;  %v3491_v63 = vcombine.low %v17261_v35, %v17266_v61  ;;  %v3357_v18 = vmul.f32 1.442695, %v3295_v3 }
 0x66d   : > { %v17268_v45 = vpop.eup %14979  ;;  %3594 = vadd.xlane.f32.xlu0 %v3593_v13  ;;  %v3482_v26 = vrot.slane %v3474_v49, %v20942_v21  ;;  %14997 = vpow2.f32 %v3351_v34  ;;  %v3359_v6 = vmul.f32 1.442695, %v3296_v51 }
 0x66e   : > { %v17274_v12 = vpop.eup %14981  ;;  %v3475_v28 = vcombine.low %v3466_v43, %v3473_v54  ;;  %v3501_v60 = vrot.slane %v3491_v63, %v20942_v21  ;;  %14999 = vpow2.f32 %v3353_v22 }
 0x66f   : > { %v17277_v8 = vpop.eup %14983  ;;  %v3492_v29 = vcombine.low %v17268_v45, %v17274_v12  ;;  %15001 = vpow2.f32 %v3355_v19 }
 0x670   : > { %v17282_v58 = vpop.eup %14985  ;;  %v3489_v17 = vrot.slane %v3475_v28, %v20942_v21  ;;  %15003 = vpow2.f32 %v3357_v18 }
 0x671   : > { %v17284_v47 = vpop.eup %14987  ;;  %v3493_v62 = vcombine.low %v17277_v8, %v17282_v58  ;;  %v3508_v59 = vrot.slane %v3492_v29, %v20942_v21  ;;  %15005 = vpow2.f32 %v3359_v6 }
 0x672   : > { %20950 = vst [vmem:[#allocation59_spill] sm:$0xff] %v17284_v47  ;;  %v17290_v3 = vpop.eup %14989  ;;  %v3490_v25 = vcombine.low %v3482_v26, %v3489_v17 }
 0x673   : > { %20951 = vst [vmem:[#allocation60_spill] sm:$0xff] %v17290_v3  ;;  %v17292_v15 = vpop.eup %14991  ;;  %v3494_v44 = vcombine.low %v17284_v47, %v17290_v3  ;;  %v3515_v36 = vrot.slane %v3493_v62, %v20942_v21  ;;  %v3523_v1 = vcombine.low %v3501_v60, %v3508_v59 }
 0x674   : > { %20952 = vst [vmem:[#allocation61_spill] sm:$0xff] %v17292_v15  ;;  %v17297_v40 = vpop.eup %14993  ;;  %v3596_v51 = vsel %vm2496_vm3, %v3490_v25, 0.0 }
 0x675   : > { %v3522_v34 = vrot.slane %v3494_v44, %v20942_v21  ;;  %v3540_v22 = vcombine.low %v17292_v15, %v17297_v40  ;;  %v17303_v31 = vpop.eup %14995  ;;  %3597 = vadd.xlane.f32.xlu1 %v3596_v51  ;;  %v3531_v43 = vrot.slane %v3523_v1, %v20942_v21 }
 0x676   : > { %20953 = vst [vmem:[#allocation63_spill] sm:$0xff] %v17303_v31 }
 0x677   : > { %v3524_v48 = vcombine.low %v3515_v36, %v3522_v34  ;;  %v17306_v49 = vpop.eup %14997  ;;  %v3550_v63 = vrot.slane %v3540_v22, %v20942_v21 }
 0x678   : > { %20954 = vst [vmem:[#allocation65_spill] sm:$0xff] %v17306_v49  ;;  %v17308_v19 = vpop.eup %14999  ;;  %v3541_v54 = vcombine.low %v17303_v31, %v17306_v49 }
 0x679   : > { %20955 = vst [vmem:[#allocation66_spill] sm:$0xff] %v17308_v19  ;;  %v3538_v13 = vrot.slane %v3524_v48, %v20942_v21  ;;  %v17314_v18 = vpop.eup %15001  ;;  %v20959_v48 = vld [vmem:[#allocation53_spill] sm:$0xff] }
 0x67a   : > { %20956 = vst [vmem:[#allocation67_spill] sm:$0xff] %v17314_v18  ;;  %v17316_v26 = vpop.eup %15003  ;;  %v3542_v28 = vcombine.low %v17308_v19, %v17314_v18  ;;  %v3557_v29 = vrot.slane %v3541_v54, %v20942_v21  ;;  %v20961_v54 = vld [vmem:[#allocation51_spill] sm:$0xff] }
 0x67b   : > { %20957 = vst [vmem:[#allocation68_spill] sm:$0xff] %v17316_v26  ;;  %v3539_v6 = vcombine.low %v3531_v43, %v3538_v13  ;;  %v17321_v60 = vpop.eup %15005  ;;  %v20960_v43 = vld [vmem:[#allocation50_spill] sm:$0xff] }
 0x67c   : > { %20958 = vst [vmem:[#allocation69_spill] sm:$0xff] %v17321_v60  ;;  %v3543_v62 = vcombine.low %v17316_v26, %v17321_v60  ;;  %v3564_v59 = vrot.slane %v3542_v28, %v20942_v21  ;;  %v3572_v25 = vcombine.low %v3550_v63, %v3557_v29  ;;  %v1638_v13 = vmul.f32 0.25, %v20960_v43  ;;  %v20962_v63 = vld [vmem:[#allocation64_spill] sm:$0xff]  ;;  %v20963_v29 = vld [vmem:[#allocation55_spill] sm:$0xff] }
 0x67d   : > { %v3599_v17 = vsel %vm2496_vm3, %v3539_v6, 0.0  ;;  %v1639_v6 = vmul.f32 0.25, %v20961_v54  ;;  %v2343_v28 = vcombine.high %v20962_v63, %v20941_v27 }
 0x67e   : > { %3600 = vadd.xlane.f32.xlu0 %v3599_v17  ;;  %v3571_v44 = vrot.slane %v3543_v62, %v20942_v21  ;;  %v3580_v1 = vrot.slane %v3572_v25, %v20942_v21  ;;  %v2328_v17 = vcombine.high %v20963_v29, %v20941_v27  ;;  %v2350_v62 = vrot.slane %v20962_v63, %v16625_v37 }
 0x67f   : > { %v2335_v25 = vrot.slane %v20963_v29, %v16625_v37 }
 0x680   : > { %v3573_v36 = vcombine.low %v3564_v59, %v3571_v44  ;;  %v2357_v59 = vrot.slane %v2343_v28, %v16625_v37  ;;  %v2342_v44 = vrot.slane %v2328_v17, %v16625_v37 }
 0x682   : > { %v3587_v51 = vrot.slane %v3573_v36, %v20942_v21  ;;  %v2358_v36 = vcombine.low %v2335_v25, %v2350_v62 }
 0x684   : > { %v3588_v34 = vcombine.low %v3580_v1, %v3587_v51  ;;  %v2359_v1 = vcombine.high %v2335_v25, %v2350_v62  ;;  %v2374_v51 = vcombine.low %v2342_v44, %v2357_v59  ;;  %v4304_v25 = vcombine.high %v1638_v13, %v20941_v27 }
 0x686   : > { %v3602_v22 = vsel %vm2496_vm3, %v3588_v34, 0.0  ;;  %v2375_v34 = vcombine.high %v2342_v44, %v2357_v59  ;;  %v2373_v43 = vrot.slane %v2359_v1, %v16631_v42  ;;  %v2382_v54 = vrot.slane %v2374_v51, %v16631_v42 }
 0x687   : > { %3603 = vadd.xlane.f32.xlu1 %v3602_v22  ;;  %v2366_v22 = vrot.slane %v2358_v36, %v16631_v42  ;;  %v4370_v44 = vcombine.high %v1639_v6, %v20941_v27 }
 0x688   : > { %v2389_v21 = vrot.slane %v2375_v34, %v16631_v42 }
 0x689   : > { %v2444_v63 = vcombine.low %v2366_v22, %v2373_v43  ;;  %v14107_v39 = vcombine.high %v2366_v22, %v2373_v43  ;;  %v17367_v34 = vrot.slane %v4370_v44, %v16625_v37  ;;  %v2262_v22 = vcombine.high %v20959_v48, %v20941_v27 }
 0x68a   : > { %v2460_v28 = vcombine.low %v2382_v54, %v2389_v21  ;;  %v14108_v60 = vcombine.high %v2382_v54, %v2389_v21  ;;  %v17358_v21 = vrot.slane %v1638_v13, %v16625_v37  ;;  %v2269_v43 = vrot.slane %v20959_v48, %v16625_v37 }
 0x68b   : > { %v2451_v29 = vrot.slane %v2444_v63, %v16625_v37  ;;  %v2459_v17 = vrot.slane %v14107_v39, %v16625_v37  ;;  %v17364_v39 = vrot.slane %v1639_v6, %v16625_v37 }
 0x68c   : > { %v2467_v62 = vrot.slane %v2460_v28, %v16625_v37  ;;  %v2475_v59 = vrot.slane %v14108_v60, %v16625_v37 }
 0x68d   : > { %v2476_v36 = vcombine.low %v2451_v29, %v2459_v17 }
 0x68e   : > { %v2484_v1 = vcombine.low %v2467_v62, %v2475_v59 }
 0x68f   : > { %v17374_v54 = vrot.slane %v2476_v36, %v16631_v42 }
 0x694   : > { %2256 = vrot.lane.b32.xlu0 %v20959_v48, %s15783_s1 }
 0x698   : > { %4298 = vrot.lane.b32.xlu0 %v1638_v13, %s15783_s1  ;;  %4300 = vrot.lane.b32.xlu1 %v1639_v6, %s15783_s1  ;;  %v17377_v13 = vrot.slane %v2484_v1, %v16631_v42 }
 0x6fa   : > { %v3595_v26 = vpop.xlane.xlu0 %3594 }
 0x6fb   : > { %15007 = vrcp.f32 %v3595_v26  ;;  %v17361_v26 = vrot.slane %v4304_v25, %v16625_v37 }
 0x702   : > { %v3598_v51 = vpop.xlane.xlu1 %3597 }
 0x703   : > { %15009 = vrcp.f32 %v3598_v51 }
 0x705   : > { %v15008_v60 = vpop.eup %15007 }
 0x706   : > { %v3616_v63 = vrot.slane %v15008_v60, %v16948_v24  ;;  %v3620_v6 = vrot.slane %v15008_v60, %v16951_v7  ;;  %v3624_v28 = vrot.slane %v15008_v60, %v16954_v55  ;;  %v3628_v29 = vrot.slane %v15008_v60, %v16957_v14 }
 0x707   : > { %v3632_v17 = vrot.slane %v15008_v60, %v16960_v9  ;;  %v3636_v62 = vrot.slane %v15008_v60, %v16963_v57  ;;  %v3640_v48 = vrot.slane %v15008_v60, %v16966_v16  ;;  %v3644_v59 = vrot.slane %v15008_v60, %v16975_v10 }
 0x708   : > { %v3773_v25 = vmul.f32 %v17169_v5, %v3616_v63  ;;  %v3774_v44 = vmul.f32 %v17173_v23, %v3620_v6  ;;  %v3775_v36 = vmul.f32 %v17175_v32, %v3624_v28  ;;  %v3776_v1 = vmul.f32 %v17181_v52, %v3628_v29 }
 0x709   : > { %v3777_v51 = vmul.f32 %v17186_v0, %v3632_v17  ;;  %v3778_v18 = vmul.f32 %v17192_v30, %v3636_v62  ;;  %v17394_v19 = vmul.f32 %v17195_v33, %v3640_v48  ;;  %v17397_v49 = vmul.f32 %v17201_v38, %v3644_v59 }
 0x70a   : > { %v2276_v60 = vrot.slane %v2262_v22, %v16625_v37  ;;  %v3805_v5 = vpack.c.bf16 %v3773_v25, %v3773_v25  ;;  %v3806_v63 = vpack.c.bf16 %v3774_v44, %v3774_v44  ;;  %v3807_v23 = vpack.c.bf16 %v3775_v36, %v3775_v36 }
 0x70b   : > { %v3601_v15 = vpop.xlane.xlu0 %3600  ;;  %v3808_v0 = vpack.c.bf16 %v3776_v1, %v3776_v1  ;;  %v3809_v30 = vpack.c.bf16 %v3777_v51, %v3777_v51  ;;  %v3810_v33 = vpack.c.bf16 %v3778_v18, %v3778_v18  ;;  %v17408_v22 = vsel %vm2496_vm3, %v17203_v53, 0 }
 0x70c   : > { %15011 = vrcp.f32 %v3601_v15  ;;  %v17414_v29 = vunpack.c.l.b16 %v3805_v5  ;;  %v17416_v17 = vunpack.c.l.b16 %v3806_v63  ;;  %v17418_v62 = vunpack.c.l.b16 %v3807_v23 }
 0x70d   : > { %v17410_v6 = vpop.eup %15009  ;;  %v17430_v36 = vunpack.c.l.b16 %v3808_v0  ;;  %v17432_v1 = vunpack.c.l.b16 %v3809_v30  ;;  %v17440_v23 = vunpack.c.l.b16 %v3810_v33 }
 0x70e   : > { %v3648_v18 = vrot.slane %v17410_v6, %v16948_v24  ;;  %v3652_v48 = vrot.slane %v17410_v6, %v16951_v7  ;;  %v3656_v53 = vrot.slane %v17410_v6, %v16954_v55  ;;  %v3660_v59 = vrot.slane %v17410_v6, %v16957_v14 }
 0x70f   : > { %v2257_v15 = vpop.permute.xlu0 %2256  ;;  %v3664_v51 = vrot.slane %v17410_v6, %v16960_v9  ;;  %v3668_v5 = vrot.slane %v17410_v6, %v16963_v57  ;;  %v3672_v63 = vrot.slane %v17410_v6, %v16966_v16  ;;  %v3676_v0 = vrot.slane %v17410_v6, %v16975_v10 }
 0x710   : > { %v2277_v25 = vcombine.high %v2257_v15, %v20941_v27  ;;  %v2284_v44 = vrot.slane %v2257_v15, %v16625_v37  ;;  %v17446_v15 = vmul.f32 %v17205_v2, %v3648_v18  ;;  %v17449_v32 = vmul.f32 %v17210_v50, %v3652_v48 }
 0x711   : > { %v17452_v3 = vmul.f32 %v17219_v56, %v3656_v53  ;;  %v17455_v33 = vmul.f32 %v17225_v4, %v3660_v59  ;;  %v17464_v50 = vmul.f32 %v17233_v11, %v3664_v51  ;;  %v17467_v56 = vmul.f32 %v17238_v46, %v3668_v5 }
 0x712   : > { %v2291_v28 = vrot.slane %v2277_v25, %v16625_v37  ;;  %v2292_v38 = vcombine.low %v2269_v43, %v2284_v44  ;;  %v2293_v52 = vcombine.high %v2269_v43, %v2284_v44  ;;  %v17477_v11 = vmul.f32 %v17249_v20, %v3672_v63 }
 0x713   : > { %v4299_v30 = vpop.permute.xlu0 %4298 }
 0x714   : > { %v2300_v25 = vrot.slane %v2292_v38, %v16631_v42  ;;  %v2307_v43 = vrot.slane %v2293_v52, %v16631_v42  ;;  %v2308_v44 = vcombine.low %v2276_v60, %v2291_v28  ;;  %v2309_v47 = vcombine.high %v2276_v60, %v2291_v28  ;;  %v17459_v6 = vpop.xlane.xlu1 %3603 }
 0x715   : > { %v4319_v2 = vcombine.high %v4299_v30, %v20941_v27  ;;  %v4326_v18 = vrot.slane %v4299_v30, %v16625_v37  ;;  %15013 = vrcp.f32 %v17459_v6  ;;  %v3819_v6 = vpack.c.bf16 %v17477_v11, %v17477_v11 }
 0x716   : > { %v2316_v4 = vrot.slane %v2308_v44, %v16631_v42  ;;  %v2323_v38 = vrot.slane %v2309_v47, %v16631_v42  ;;  %v2394_v48 = vcombine.low %v2300_v25, %v2307_v43  ;;  %v14105_v52 = vcombine.high %v2300_v25, %v2307_v43  ;;  %v17471_v53 = vpop.eup %15011 }
 0x717   : > { %v4333_v60 = vrot.slane %v4319_v2, %v16625_v37  ;;  %v4334_v28 = vcombine.low %v17358_v21, %v4326_v18  ;;  %v4335_v59 = vcombine.high %v17358_v21, %v4326_v18  ;;  %v20967_v11 = vpack.c.bf16 %v17397_v49, %v17397_v49 }
 0x718   : > { %v2401_v46 = vrot.slane %v2394_v48, %v16625_v37  ;;  %v2409_v51 = vrot.slane %v14105_v52, %v16625_v37  ;;  %v2410_v5 = vcombine.low %v2316_v4, %v2323_v38  ;;  %v14106_v30 = vcombine.high %v2316_v4, %v2323_v38  ;;  %v4301_v2 = vpop.permute.xlu1 %4300 }
 0x719   : > { %v4342_v47 = vrot.slane %v4334_v28, %v16631_v42  ;;  %v4349_v25 = vrot.slane %v4335_v59, %v16631_v42  ;;  %v4350_v43 = vcombine.low %v17361_v26, %v4333_v60  ;;  %v4351_v44 = vcombine.high %v17361_v26, %v4333_v60 }
 0x71a   : > { %v2417_v21 = vrot.slane %v2410_v5, %v16625_v37  ;;  %v2425_v20 = vrot.slane %v14106_v30, %v16625_v37  ;;  %v2426_v63 = vcombine.low %v2401_v46, %v2409_v51  ;;  %v4385_v18 = vcombine.high %v4301_v2, %v20941_v27 }
 0x71b   : > { %v4358_v48 = vrot.slane %v4350_v43, %v16631_v42  ;;  %v4365_v4 = vrot.slane %v4351_v44, %v16631_v42  ;;  %v4436_v38 = vcombine.low %v4342_v47, %v4349_v25  ;;  %v14117_v52 = vcombine.high %v4342_v47, %v4349_v25 }
 0x71c   : > { %v4392_v28 = vrot.slane %v4301_v2, %v16625_v37  ;;  %v4399_v59 = vrot.slane %v4385_v18, %v16625_v37  ;;  %v2434_v31 = vcombine.low %v2417_v21, %v2425_v20  ;;  %v17493_v26 = vmul.f32 %v17255_v41, %v3676_v0 }
 0x71d   : > { %v4443_v60 = vrot.slane %v4436_v38, %v16625_v37  ;;  %v4451_v46 = vrot.slane %v14117_v52, %v16625_v37  ;;  %v4452_v51 = vcombine.low %v4358_v48, %v4365_v4  ;;  %v14118_v5 = vcombine.high %v4358_v48, %v4365_v4 }
 0x71e   : > { %v4400_v30 = vcombine.low %v17364_v39, %v4392_v28  ;;  %v4401_v43 = vcombine.high %v17364_v39, %v4392_v28  ;;  %v4416_v47 = vcombine.low %v17367_v34, %v4399_v59  ;;  %v4417_v25 = vcombine.high %v17367_v34, %v4399_v59 }
 0x71f   : > { %v4459_v44 = vrot.slane %v4452_v51, %v16625_v37  ;;  %v4467_v2 = vrot.slane %v14118_v5, %v16625_v37  ;;  %v2433_v41 = vrot.slane %v2426_v63, %v16631_v42  ;;  %v2441_v0 = vrot.slane %v2434_v31, %v16631_v42 }
 0x720   : > { %v4408_v21 = vrot.slane %v4400_v30, %v16631_v42  ;;  %v4415_v20 = vrot.slane %v4401_v43, %v16631_v42  ;;  %v4424_v18 = vrot.slane %v4416_v47, %v16631_v42  ;;  %v4431_v39 = vrot.slane %v4417_v25, %v16631_v42 }
 0x721   : > { %v4468_v48 = vcombine.low %v4443_v60, %v4451_v46  ;;  %v2442_v4 = vcombine.low %v2433_v41, %v2441_v0  ;;  %v2443_v34 = vcombine.high %v2433_v41, %v2441_v0  ;;  %v3813_v38 = vpack.c.bf16 %v17446_v15, %v17446_v15 }
 0x722   : > { %v4486_v52 = vcombine.low %v4408_v21, %v4415_v20  ;;  %v14119_v63 = vcombine.high %v4408_v21, %v4415_v20  ;;  %v4502_v28 = vcombine.low %v4424_v18, %v4431_v39  ;;  %v14120_v31 = vcombine.high %v4424_v18, %v4431_v39 }
 0x723   : > { %v4476_v59 = vcombine.low %v4459_v44, %v4467_v2  ;;  %v20964_v51 = vcombine.low %v17374_v54, %v17377_v13  ;;  %v20965_v30 = vcombine.high %v17374_v54, %v17377_v13  ;;  %v3814_v46 = vpack.c.bf16 %v17449_v32, %v17449_v32 }
 0x724   : > { %v4493_v15 = vrot.slane %v4486_v52, %v16625_v37  ;;  %v4501_v43 = vrot.slane %v14119_v63, %v16625_v37  ;;  %v4509_v47 = vrot.slane %v4502_v28, %v16625_v37  ;;  %v4517_v25 = vrot.slane %v14120_v31, %v16625_v37 }
 0x725   : > { %v2494_v5 = vpack.c.bf16 %v20964_v51, %v2442_v4  ;;  %v2495_v60 = vpack.c.bf16 %v20965_v30, %v2443_v34  ;;  %v3815_v54 = vpack.c.bf16 %v17452_v3, %v17452_v3  ;;  %v3816_v13 = vpack.c.bf16 %v17455_v33, %v17455_v33 }
 0x726   : > { %v3817_v32 = vpack.c.bf16 %v17464_v50, %v17464_v50  ;;  %v4518_v44 = vcombine.low %v4493_v15, %v4501_v43  ;;  %v4526_v2 = vcombine.low %v4509_v47, %v4517_v25  ;;  %v3818_v41 = vpack.c.bf16 %v17467_v56, %v17467_v56  ;;  %v15014_v25 = vpop.eup %15013 }
 0x727   : > { %14450 = vmatpush3.bf16.msra.mxu1 %v2494_v5  ;;  %14456 = vmatpush3.bf16.msra.mxu0 %v2495_v60  ;;  %v17536_v0 = vrot.slane %v4468_v48, %v16631_v42  ;;  %v3820_v3 = vpack.c.bf16 %v17493_v26, %v17493_v26  ;;  %v20966_v33 = vpack.c.bf16 %v17394_v19, %v17394_v19  ;;  %v3862_v21 = vunpack.c.l.b16 %v3814_v46 }
 0x728   : > { %14461 = vmatprep.subr.bf16.mxu1 %v20941_v27  ;;  %14467 = vmatprep.subr.bf16.mxu0 %v20941_v27  ;;  %v17545_v56 = vrot.slane %v4476_v59, %v16631_v42  ;;  %v3860_v20 = vunpack.c.l.b16 %v20967_v11  ;;  %v3861_v18 = vunpack.c.l.b16 %v3813_v38  ;;  %v3863_v39 = vunpack.c.l.b16 %v3815_v54 }
 0x729   : > { %v3859_v50 = vunpack.c.l.b16 %v20966_v33  ;;  %v17551_v48 = vrot.slane %v4518_v44, %v16631_v42  ;;  %v17554_v26 = vrot.slane %v4526_v2, %v16631_v42  ;;  %v3864_v19 = vunpack.c.l.b16 %v3816_v13 }
 0x72a   : > { %v3869_v4 = vrot.slane %v17416_v17, 7  ;;  %v3865_v34 = vunpack.c.l.b16 %v3817_v32  ;;  %v3866_v52 = vunpack.c.l.b16 %v3818_v41  ;;  %v3867_v63 = vunpack.c.l.b16 %v3819_v6 }
 0x72b   : > { %v3872_v28 = vrot.slane %v17418_v62, 6  ;;  %v3868_v31 = vunpack.c.l.b16 %v3820_v3  ;;  %v3875_v38 = vrot.slane %v17430_v36, 5  ;;  %v3890_v59 = vrot.slane %v3862_v21, 7 }
 0x72c   : > { %v3871_v49 = vsel %vm3870_vm5, %v3869_v4, %v17414_v29  ;;  %v3878_v5 = vrot.slane %v17432_v1, 4  ;;  %v3881_v30 = vrot.slane %v17440_v23, 3  ;;  %v3892_v60 = vrot.slane %v3863_v39, 6 }
 0x72d   : > { %v3874_v51 = vsel %vm3873_vm6, %v3872_v28, %v3871_v49  ;;  %v3884_v46 = vrot.slane %v3859_v50, 2  ;;  %v3891_v15 = vsel %vm3870_vm5, %v3890_v59, %v3861_v18  ;;  %v3894_v62 = vrot.slane %v3864_v19, 5 }
 0x72e   : > { %v3877_v17 = vsel %vm3876_vm7, %v3875_v38, %v3874_v51  ;;  %v3887_v47 = vrot.slane %v3860_v20, 1  ;;  %v3893_v29 = vsel %vm3873_vm6, %v3892_v60, %v3891_v15  ;;  %v3896_v36 = vrot.slane %v3865_v34, 4  ;;  %v20968_v15 = vld [vmem:[#allocation63_spill] sm:$0xff] }
 0x72f   : > { %v3880_v43 = vsel %vm3879_vm8, %v3878_v5, %v3877_v17  ;;  %v3895_v1 = vsel %vm3876_vm7, %v3894_v62, %v3893_v29  ;;  %v3898_v13 = vrot.slane %v3866_v52, 3  ;;  %v3900_v23 = vrot.slane %v3867_v63, 2  ;;  %v20969_v62 = vld [vmem:[#allocation59_spill] sm:$0xff] }
 0x730   : > { %v3883_v54 = vsel %vm3882_vm9, %v3881_v30, %v3880_v43  ;;  %v3897_v44 = vsel %vm3879_vm8, %v3896_v36, %v3895_v1  ;;  %v3902_v2 = vrot.slane %v3868_v31, 1  ;;  %v3680_v41 = vrot.slane %v17471_v53, %v16948_v24  ;;  %v20971_v36 = vld [vmem:[#allocation61_spill] sm:$0xff] }
 0x731   : > { %v3886_v32 = vsel %vm3885_vm10, %v3884_v46, %v3883_v54  ;;  %v3899_v6 = vsel %vm3882_vm9, %v3898_v13, %v3897_v44  ;;  %v3684_v3 = vrot.slane %v17471_v53, %v16951_v7  ;;  %v3688_v33 = vrot.slane %v17471_v53, %v16954_v55  ;;  %v20972_v54 = vld [vmem:[#allocation65_spill] sm:$0xff] }
 0x732   : > { %v3692_v50 = vrot.slane %v17471_v53, %v16957_v14  ;;  %v3889_v21 = vsel %vm3888_vm11, %v3887_v47, %v3886_v32  ;;  %v3901_v11 = vsel %vm3885_vm10, %v3900_v23, %v3899_v6  ;;  %v3696_v20 = vrot.slane %v17471_v53, %v16960_v9  ;;  %v20970_v47 = vld [vmem:[#allocation60_spill] sm:$0xff]  ;;  %v20976_v32 = vld [vmem:[#allocation69_spill] sm:$0xff] }
 0x733   : > { %v3700_v18 = vrot.slane %v17471_v53, %v16963_v57  ;;  %v3903_v39 = vsel %vm3888_vm11, %v3902_v2, %v3901_v11  ;;  %v3704_v19 = vrot.slane %v17471_v53, %v16966_v16  ;;  %v3716_v4 = vrot.slane %v15014_v25, %v16951_v7 }
 0x734   : > { %v3720_v34 = vrot.slane %v15014_v25, %v16954_v55  ;;  %v3904_v52 = vpack.c.b16 %v3903_v39, %v3889_v21  ;;  %v3708_v63 = vrot.slane %v17471_v53, %v16975_v10  ;;  %v3712_v28 = vrot.slane %v15014_v25, %v16948_v24 }
 0x735   : > { %v3724_v31 = vrot.slane %v15014_v25, %v16957_v14  ;;  %v3728_v49 = vrot.slane %v15014_v25, %v16960_v9  ;;  %v3732_v38 = vrot.slane %v15014_v25, %v16963_v57  ;;  %v3790_v59 = vmul.f32 %v17266_v61, %v3684_v3 }
 0x736   : > { %v3791_v51 = vmul.f32 %v17268_v45, %v3688_v33  ;;  %14452 = vmatmul.mubr.msk.bf16.vlgmr.msra.gmra.mrb[16].mxu1 %vm2496_vm3, %v3904_v52  ;;  %v3736_v5 = vrot.slane %v15014_v25, %v16966_v16  ;;  %v3740_v30 = vrot.slane %v15014_v25, %v16975_v10  ;;  %v3789_v53 = vmul.f32 %v17261_v35, %v3680_v41 }
 0x737   : > { %v3792_v60 = vmul.f32 %v17274_v12, %v3692_v50  ;;  %14462 = vmatpush3.bf16.xpose.msra.mxu1 %v17408_v22  ;;  %v3793_v17 = vmul.f32 %v17277_v8, %v3696_v20  ;;  %v3794_v46 = vmul.f32 %v17282_v58, %v3700_v18  ;;  %v3798_v61 = vmul.f32 %v17297_v40, %v3716_v4  ;;  %v20973_v12 = vld [vmem:[#allocation66_spill] sm:$0xff]  ;;  %v20974_v8 = vld [vmem:[#allocation67_spill] sm:$0xff]  ;;  %v20975_v40 = vld [vmem:[#allocation68_spill] sm:$0xff] }
 0x738   : > { %v3799_v45 = vmul.f32 %v20968_v15, %v3720_v34  ;;  %v3795_v43 = vmul.f32 %v20969_v62, %v3704_v19  ;;  %v3796_v29 = vmul.f32 %v20970_v47, %v3708_v63  ;;  %v3797_v25 = vmul.f32 %v20971_v36, %v3712_v28  ;;  %14463 = vmatprep.mubr.msk.bf16.mxu1 %vm15784_vm2, %v20941_v27 }
 0x739   : > { %v3800_v35 = vmul.f32 %v20972_v54, %v3724_v31  ;;  %v3801_v22 = vmul.f32 %v20973_v12, %v3728_v49  ;;  %v3802_v1 = vmul.f32 %v20974_v8, %v3732_v38  ;;  %v3822_v58 = vpack.c.bf16 %v3790_v59, %v3790_v59  ;;  %14473 = vmatprep.subr.bf16.mxu1 %v20941_v27 }
 0x73a   : > { %v3823_v13 = vpack.c.bf16 %v3791_v51, %v3791_v51  ;;  %v3803_v23 = vmul.f32 %v20975_v40, %v3736_v5  ;;  %v3804_v44 = vmul.f32 %v20976_v32, %v3740_v30  ;;  %v3821_v2 = vpack.c.bf16 %v3789_v53, %v3789_v53 }
 0x73b   : > { %v3824_v41 = vpack.c.bf16 %v3792_v60, %v3792_v60  ;;  %v3825_v6 = vpack.c.bf16 %v3793_v17, %v3793_v17  ;;  %v3826_v3 = vpack.c.bf16 %v3794_v46, %v3794_v46  ;;  %v3830_v33 = vpack.c.bf16 %v3798_v61, %v3798_v61 }
 0x73c   : > { %v3831_v50 = vpack.c.bf16 %v3799_v45, %v3799_v45  ;;  %v3827_v21 = vpack.c.bf16 %v3795_v43, %v3795_v43  ;;  %v3828_v11 = vpack.c.bf16 %v3796_v29, %v3796_v29  ;;  %v3829_v20 = vpack.c.bf16 %v3797_v25, %v3797_v25 }
 0x73d   : > { %v3832_v18 = vpack.c.bf16 %v3800_v35, %v3800_v35  ;;  %v3833_v39 = vpack.c.bf16 %v3801_v22, %v3801_v22  ;;  %v3834_v19 = vpack.c.bf16 %v3802_v1, %v3802_v1  ;;  %v3966_v4 = vunpack.c.l.b16 %v3822_v58 }
 0x73e   : > { %v3967_v34 = vunpack.c.l.b16 %v3823_v13  ;;  %v3835_v52 = vpack.c.bf16 %v3803_v23, %v3803_v23  ;;  %v3836_v63 = vpack.c.bf16 %v3804_v44, %v3804_v44  ;;  %v3965_v28 = vunpack.c.l.b16 %v3821_v2 }
 0x73f   : > { %v3968_v31 = vunpack.c.l.b16 %v3824_v41  ;;  %v3969_v49 = vunpack.c.l.b16 %v3825_v6  ;;  %v3970_v38 = vunpack.c.l.b16 %v3826_v3  ;;  %v3974_v59 = vunpack.c.l.b16 %v3830_v33 }
 0x740   : > { %v3975_v51 = vunpack.c.l.b16 %v3831_v50  ;;  %v3971_v5 = vunpack.c.l.b16 %v3827_v21  ;;  %v3972_v30 = vunpack.c.l.b16 %v3828_v11  ;;  %v3973_v53 = vunpack.c.l.b16 %v3829_v20 }
 0x741   : > { %v3976_v60 = vunpack.c.l.b16 %v3832_v18  ;;  %v3977_v17 = vunpack.c.l.b16 %v3833_v39  ;;  %v3978_v46 = vunpack.c.l.b16 %v3834_v19  ;;  %v3981_v61 = vrot.slane %v3966_v4, 7 }
 0x742   : > { %v3983_v15 = vrot.slane %v3967_v34, 6  ;;  %v3979_v45 = vunpack.c.l.b16 %v3835_v52  ;;  %v3980_v62 = vunpack.c.l.b16 %v3836_v63  ;;  %v3985_v43 = vrot.slane %v3968_v31, 5  ;;  %v20977_v34 = vld [vmem:[#allocation62_spill] sm:$0xff] }
 0x743   : > { %v3995_v47 = vrot.slane %v3974_v59, 7  ;;  %v3982_v29 = vsel %vm3870_vm5, %v3981_v61, %v3965_v28  ;;  %v3987_v36 = vrot.slane %v3969_v49, 4  ;;  %v3989_v25 = vrot.slane %v3970_v38, 3 }
 0x744   : > { %v3997_v54 = vrot.slane %v3975_v51, 6  ;;  %v3984_v35 = vsel %vm3873_vm6, %v3983_v15, %v3982_v29  ;;  %v3991_v12 = vrot.slane %v3971_v5, 2  ;;  %v3999_v8 = vrot.slane %v3976_v60, 5  ;;  %v17661_v60 = vld [vmem:[#allocation3 + $0x1] sm:$0x1] }
 0x745   : > { %v3996_v22 = vsel %vm3870_vm5, %v3995_v47, %v3973_v53  ;;  %v3986_v1 = vsel %vm3876_vm7, %v3985_v43, %v3984_v35  ;;  %v4001_v13 = vrot.slane %v3977_v17, 4  ;;  %v4484_v40 = vcombine.low %v17536_v0, %v17545_v56  ;;  %v17665_v43 = vld [vmem:[#allocation8 + $0x8] sm:$0xff] }
 0x746   : > { %v3998_v58 = vsel %vm3873_vm6, %v3997_v54, %v3996_v22  ;;  %v3988_v23 = vsel %vm3879_vm8, %v3987_v36, %v3986_v1  ;;  %v4003_v44 = vrot.slane %v3978_v46, 3  ;;  %v4534_v2 = vcombine.low %v17551_v48, %v17554_v26 }
 0x747   : > { %v4000_v32 = vsel %vm3876_vm7, %v3999_v8, %v3998_v58  ;;  %v3990_v41 = vsel %vm3882_vm9, %v3989_v25, %v3988_v23  ;;  %v3993_v6 = vrot.slane %v3972_v30, 1  ;;  %v4005_v33 = vrot.slane %v3979_v45, 2  ;;  %v20978_v45 = vld [vmem:[#allocation58_spill] sm:$0xff] }
 0x748   : > { %v4002_v3 = vsel %vm3879_vm8, %v4001_v13, %v4000_v32  ;;  %v3992_v50 = vsel %vm3885_vm10, %v3991_v12, %v3990_v41  ;;  %v4007_v11 = vrot.slane %v3980_v62, 1  ;;  %v4536_v20 = vpack.c.bf16 %v4534_v2, %v4484_v40 }
 0x749   : > { %v4004_v21 = vsel %vm3882_vm9, %v4003_v44, %v4002_v3  ;;  %v3994_v39 = vsel %vm3888_vm11, %v3993_v6, %v3992_v50  ;;  %v5073_v52 = vsel %vm2496_vm3, %v20977_v34, 0  ;;  %v4485_v63 = vcombine.high %v17536_v0, %v17545_v56  ;;  %v17657_v56 = vld [vmem:[#allocation8] sm:$0xff] }
 0x74a   : > { %v4006_v18 = vsel %vm3885_vm10, %v4005_v33, %v4004_v21  ;;  %14464 = vmatmul.mubr.msk.bf16.vlgmr.msra.gmra.mrb[20].mxu1 %vm2496_vm3, %v4536_v20  ;;  %v4535_v28 = vcombine.high %v17551_v48, %v17554_v26  ;;  %vm1480_vm12 = vcmp.gt.f32.partialorder %v17661_v60, 0.5 }
 0x74b   : > { %v4008_v19 = vsel %vm3888_vm11, %v4007_v11, %v4006_v18  ;;  %14475 = vmatprep.mubr.msk.bf16.mxu1 %vm15784_vm2, %v20941_v27 }
 0x74c   : > { %v4009_v4 = vpack.c.b16 %v4008_v19, %v3994_v39  ;;  %v4537_v31 = vpack.c.bf16 %v4535_v28, %v4485_v63 }
 0x74e   : > { %14458 = vmatmul.mubr.msk.bf16.vlgmr.msra.gmra.mrb[4].mxu0 %vm2496_vm3, %v4009_v4 }
 0x74f   : > { %14468 = vmatpush3.bf16.xpose.msra.mxu0 %v5073_v52  ;;  %14469 = vmatprep.mubr.msk.bf16.mxu0 %vm15784_vm2, %v20941_v27 }
 0x750   : > { %14479 = vmatprep.subr.bf16.mxu0 %v20941_v27 }
 0x756   : > { %14470 = vmatmul.mubr.msk.bf16.vlgmr.msra.gmra.mrb[8].mxu0 %vm2496_vm3, %v4537_v31 }
 0x757   : > { %14481 = vmatprep.mubr.msk.bf16.mxu0 %vm15784_vm2, %v20941_v27 }
 0x809   : > { %v3942_v49 = vpop.f32.mrb[16].mxu1 }
 0x80a   : > { %v14453_v38 = vpop.f32.mrb[17].mxu1  ;;  %v4054_v5 = vcombine.high %v3942_v49, %v20941_v27  ;;  %v4061_v53 = vrot.slane %v3942_v49, %v16625_v37 }
 0x80b   : > { %v3945_v59 = vpop.f32.mrb[18].mxu1 }
 0x80c   : > { %v14454_v51 = vpop.f32.mrb[19].mxu1  ;;  %v4120_v30 = vcombine.high %v3945_v59, %v20941_v27  ;;  %v4068_v46 = vrot.slane %v4054_v5, %v16625_v37  ;;  %v4127_v36 = vrot.slane %v3945_v59, %v16625_v37 }
 0x80e   : > { %v4134_v25 = vrot.slane %v4120_v30, %v16625_v37 }
 0x81d   : > { %v5062_v0 = vpop.f32.mrb[20].mxu1 }
 0x81e   : > { %v5063_v48 = vadd.f32 %v17657_v56, %v5062_v0  ;;  %v14465_v26 = vpop.f32.mrb[21].mxu1 }
 0x81f   : > { %v5065_v17 = vpop.f32.mrb[22].mxu1 }
 0x820   : > { %v5122_v15 = vcombine.high %v5063_v48, %v5063_v48  ;;  %v5129_v62 = vrot.slane %v5063_v48, %v20978_v45  ;;  %v17668_v47 = vadd.f32 %v17665_v43, %v5065_v17  ;;  %v14466_v29 = vpop.f32.mrb[23].mxu1 }
 0x821   : > { %v4047_v61 = vpop.f32.mrb[4].mxu0 }
 0x822   : > { %v4069_v54 = vcombine.high %v4047_v61, %v20941_v27  ;;  %v4076_v35 = vrot.slane %v4047_v61, %v16625_v37  ;;  %v14459_v12 = vpop.f32.mrb[5].mxu0  ;;  %v5136_v8 = vrot.slane %v5122_v15, %v20978_v45  ;;  %v5137_v1 = vcombine.high %v5129_v62, %v5129_v62 }
 0x823   : > { %v4050_v22 = vpop.f32.mrb[6].mxu0  ;;  %v5145_v58 = vrot.slane %v5129_v62, %v20978_v45  ;;  %v5171_v13 = vcombine.high %v17668_v47, %v17668_v47 }
 0x824   : > { %v4083_v40 = vrot.slane %v4069_v54, %v16625_v37  ;;  %v4084_v23 = vcombine.low %v4061_v53, %v4076_v35  ;;  %v4085_v32 = vcombine.high %v4061_v53, %v4076_v35  ;;  %v4135_v44 = vcombine.high %v4050_v22, %v20941_v27  ;;  %v14460_v2 = vpop.f32.mrb[7].mxu0 }
 0x825   : > { %v4142_v41 = vrot.slane %v4050_v22, %v16625_v37  ;;  %v5138_v6 = vcombine.high %v5136_v8, %v5136_v8  ;;  %v5152_v3 = vrot.slane %v5136_v8, %v20978_v45  ;;  %v5159_v33 = vrot.slane %v5137_v1, %v20978_v45 }
 0x826   : > { %v4092_v50 = vrot.slane %v4084_v23, %v16631_v42  ;;  %v4099_v21 = vrot.slane %v4085_v32, %v16631_v42  ;;  %v4100_v11 = vcombine.low %v4068_v46, %v4083_v40  ;;  %v4101_v20 = vcombine.high %v4068_v46, %v4083_v40 }
 0x827   : > { %v4149_v18 = vrot.slane %v4135_v44, %v16625_v37  ;;  %v4150_v39 = vcombine.low %v4127_v36, %v4142_v41  ;;  %v4151_v19 = vcombine.high %v4127_v36, %v4142_v41  ;;  %v5166_v4 = vrot.slane %v5138_v6, %v20978_v45 }
 0x828   : > { %v4108_v34 = vrot.slane %v4100_v11, %v16631_v42  ;;  %v4115_v52 = vrot.slane %v4101_v20, %v16631_v42  ;;  %v4186_v63 = vcombine.low %v4092_v50, %v4099_v21  ;;  %v14113_v28 = vcombine.high %v4092_v50, %v4099_v21 }
 0x829   : > { %v4158_v31 = vrot.slane %v4150_v39, %v16631_v42  ;;  %v4165_v49 = vrot.slane %v4151_v19, %v16631_v42  ;;  %v4166_v38 = vcombine.low %v4134_v25, %v4149_v18  ;;  %v4167_v59 = vcombine.high %v4134_v25, %v4149_v18  ;;  %v5109_v51 = vpop.f32.mrb[8].mxu0 }
 0x82a   : > { %v17693_v5 = vrot.slane %v4186_v63, %v16625_v37  ;;  %v17696_v30 = vrot.slane %v14113_v28, %v16625_v37  ;;  %v4202_v0 = vcombine.low %v4108_v34, %v4115_v52  ;;  %v14114_v48 = vcombine.high %v4108_v34, %v4115_v52  ;;  %v14471_v26 = vpop.f32.mrb[9].mxu0 }
 0x82b   : > { %v4174_v53 = vrot.slane %v4166_v38, %v16631_v42  ;;  %v4181_v17 = vrot.slane %v4167_v59, %v16631_v42  ;;  %v4236_v46 = vcombine.low %v4158_v31, %v4165_v49  ;;  %v14115_v61 = vcombine.high %v4158_v31, %v4165_v49  ;;  %v5112_v15 = vpop.f32.mrb[10].mxu0 }
 0x82c   : > { %v17701_v62 = vrot.slane %v4202_v0, %v16625_v37  ;;  %v17704_v29 = vrot.slane %v14114_v48, %v16625_v37  ;;  %v5167_v36 = vcombine.high %v5145_v58, %v5145_v58  ;;  %v5168_v25 = vcombine.high %v5152_v3, %v5152_v3  ;;  %v14472_v54 = vpop.f32.mrb[11].mxu0 }
 0x82d   : > { %v17707_v35 = vrot.slane %v4236_v46, %v16625_v37  ;;  %v17710_v12 = vrot.slane %v14115_v61, %v16625_v37  ;;  %v4252_v22 = vcombine.low %v4174_v53, %v4181_v17  ;;  %v14116_v8 = vcombine.high %v4174_v53, %v4181_v17 }
 0x82e   : > { %v5169_v1 = vcombine.high %v5159_v33, %v5159_v33  ;;  %v5170_v40 = vcombine.high %v5166_v4, %v5166_v4  ;;  %v17714_v23 = vsel %vm1480_vm12, -1e+09, %v5145_v58  ;;  %v17718_v32 = vsel %vm1480_vm12, -1e+09, %v5159_v33 }
 0x82f   : > { %v17721_v44 = vrot.slane %v4252_v22, %v16625_v37  ;;  %v17724_v2 = vrot.slane %v14116_v8, %v16625_v37  ;;  %v17728_v41 = vsel %vm1480_vm12, -1e+09, %v5167_v36  ;;  %v17732_v6 = vsel %vm1480_vm12, -1e+09, %v5152_v3 }
 0x830   : > { %v17736_v58 = vsel %vm1480_vm12, -1e+09, %v5169_v1  ;;  %v17740_v33 = vsel %vm1480_vm12, -1e+09, %v5166_v4  ;;  %v17744_v50 = vsel %vm1480_vm12, -1e+09, %v5168_v25  ;;  %v5414_v21 = vcombine.low %v17714_v23, %v17718_v32 }
 0x831   : > { %v5415_v11 = vcombine.low %v17728_v41, %v17736_v58  ;;  %v5178_v20 = vrot.slane %v17668_v47, %v20978_v45  ;;  %v5185_v18 = vrot.slane %v5171_v13, %v20978_v45  ;;  %v5110_v39 = vadd.f32 %v17657_v56, %v5109_v51 }
 0x832   : > { %v5113_v19 = vadd.f32 %v17665_v43, %v5112_v15  ;;  %v17759_v4 = vsel %vm1480_vm12, -1e+09, %v5170_v40  ;;  %v17762_v34 = vrot.slane %v5414_v21, %v20978_v45 }
 0x833   : > { %v5186_v52 = vcombine.high %v5178_v20, %v5178_v20  ;;  %v5187_v63 = vcombine.high %v5185_v18, %v5185_v18  ;;  %v5194_v28 = vrot.slane %v5178_v20, %v20978_v45  ;;  %v5201_v31 = vrot.slane %v5185_v18, %v20978_v45 }
 0x834   : > { %v5220_v47 = vcombine.high %v5110_v39, %v5110_v39  ;;  %v5227_v13 = vrot.slane %v5110_v39, %v20978_v45  ;;  %v5269_v49 = vcombine.high %v5113_v19, %v5113_v19  ;;  %v5276_v56 = vrot.slane %v5113_v19, %v20978_v45 }
 0x835   : > { %v5208_v43 = vrot.slane %v5186_v52, %v20978_v45  ;;  %v17770_v38 = vrot.slane %v5187_v63, %v20978_v45  ;;  %v5216_v59 = vcombine.high %v5194_v28, %v5194_v28  ;;  %v5217_v51 = vcombine.high %v5201_v31, %v5201_v31 }
 0x836   : > { %v17774_v0 = vsel %vm1480_vm12, -1e+09, %v5194_v28  ;;  %v17778_v48 = vsel %vm1480_vm12, -1e+09, %v5201_v31  ;;  %v5234_v26 = vrot.slane %v5220_v47, %v20978_v45  ;;  %v5235_v53 = vcombine.high %v5227_v13, %v5227_v13 }
 0x837   : > { %v5218_v17 = vcombine.high %v5208_v43, %v5208_v43  ;;  %v5219_v46 = vcombine.high %v17770_v38, %v17770_v38  ;;  %v17785_v61 = vsel %vm1480_vm12, -1e+09, %v5208_v43  ;;  %v17789_v15 = vsel %vm1480_vm12, -1e+09, %v5216_v59 }
 0x838   : > { %v17794_v36 = vsel %vm1480_vm12, -1e+09, %v17770_v38  ;;  %v17798_v25 = vsel %vm1480_vm12, -1e+09, %v5217_v51  ;;  %v5463_v54 = vcombine.low %v17774_v0, %v17785_v61  ;;  %v5236_v22 = vcombine.high %v5234_v26, %v5234_v26 }
 0x839   : > { %v17804_v8 = vsel %vm1480_vm12, -1e+09, %v5218_v17  ;;  %v5465_v1 = vcombine.low %v17778_v48, %v17794_v36  ;;  %v5243_v40 = vrot.slane %v5227_v13, %v20978_v45  ;;  %v5250_v21 = vrot.slane %v5234_v26, %v20978_v45 }
 0x83a   : > { %v5464_v20 = vcombine.low %v17789_v15, %v17804_v8  ;;  %v5257_v18 = vrot.slane %v5235_v53, %v20978_v45  ;;  %v5264_v39 = vrot.slane %v5236_v22, %v20978_v45  ;;  %v5283_v19 = vrot.slane %v5269_v49, %v20978_v45 }
 0x83b   : > { %v5265_v52 = vcombine.high %v5243_v40, %v5243_v40  ;;  %v5266_v63 = vcombine.high %v5250_v21, %v5250_v21  ;;  %v17817_v28 = vsel %vm1480_vm12, -1e+09, %v5243_v40  ;;  %v17821_v31 = vsel %vm1480_vm12, -1e+09, %v5250_v21 }
 0x83c   : > { %20979 = vst [vmem:[#allocation53_spill] sm:$0xff] %v17821_v31  ;;  %v5267_v47 = vcombine.high %v5257_v18, %v5257_v18  ;;  %v5268_v13 = vcombine.high %v5264_v39, %v5264_v39  ;;  %v17825_v43 = vsel %vm1480_vm12, -1e+09, %v5257_v18  ;;  %v17829_v38 = vsel %vm1480_vm12, -1e+09, %v5264_v39 }
 0x83d   : > { %20980 = vst [vmem:[#allocation50_spill] sm:$0xff] %v17825_v43  ;;  %20981 = vst [vmem:[#allocation51_spill] sm:$0xff] %v17829_v38  ;;  %v17833_v49 = vsel %vm1480_vm12, -1e+09, %v5265_v52  ;;  %v17837_v59 = vsel %vm1480_vm12, -1e+09, %v5266_v63  ;;  %v5512_v51 = vcombine.low %v17817_v28, %v17825_v43  ;;  %v5514_v26 = vcombine.low %v17821_v31, %v17829_v38 }
 0x83e   : > { %20982 = vst [vmem:[#allocation64_spill] sm:$0xff] %v17833_v49  ;;  %v17845_v53 = vsel %vm1480_vm12, -1e+09, %v5267_v47  ;;  %v5284_v17 = vcombine.high %v5276_v56, %v5276_v56  ;;  %v5285_v22 = vcombine.high %v5283_v19, %v5283_v19  ;;  %v5292_v40 = vrot.slane %v5276_v56, %v20978_v45 }
 0x83f   : > { %20983 = vst [vmem:[#allocation55_spill] sm:$0xff] %v17845_v53  ;;  %v5513_v21 = vcombine.low %v17833_v49, %v17845_v53  ;;  %v5299_v18 = vrot.slane %v5283_v19, %v20978_v45  ;;  %v5417_v39 = vcombine.low %v17744_v50, %v17759_v4  ;;  %v5431_v52 = vrot.slane %v5415_v11, %v20978_v45 }
 0x840   : > { %v5306_v63 = vrot.slane %v5284_v17, %v20978_v45  ;;  %v5313_v3 = vrot.slane %v5285_v22, %v20978_v45  ;;  %v5314_v47 = vcombine.high %v5292_v40, %v5292_v40  ;;  %v17858_v37 = vsel %vm1480_vm12, -1e+09, %v5292_v40 }
 0x841   : > { %20984 = vst [vmem:[#allocation63_spill] sm:$0xff] %v17858_v37  ;;  %v5315_v56 = vcombine.high %v5299_v18, %v5299_v18  ;;  %v17862_v27 = vsel %vm1480_vm12, -1e+09, %v5299_v18  ;;  %v20986_v19 = vcombine.low %v17732_v6, %v17740_v33  ;;  %v5445_v11 = vrot.slane %v5417_v39, %v20978_v45 }
 0x842   : > { %20985 = vst [vmem:[#allocation59_spill] sm:$0xff] %v17862_v27  ;;  %v5316_v17 = vcombine.high %v5306_v63, %v5306_v63  ;;  %v5317_v31 = vcombine.high %v5313_v3, %v5313_v3  ;;  %v17871_v22 = vsel %vm1480_vm12, -1e+09, %v5306_v63  ;;  %v17875_v40 = vsel %vm1480_vm12, -1e+09, %v5314_v47 }
 0x843   : > { %v5438_v38 = vrot.slane %v20986_v19, %v20978_v45  ;;  %20987 = vst [vmem:[#allocation60_spill] sm:$0xff] %v17871_v22  ;;  %20988 = vst [vmem:[#allocation61_spill] sm:$0xff] %v17875_v40  ;;  %v17879_v18 = vsel %vm1480_vm12, -1e+09, %v5313_v3  ;;  %v17883_v53 = vsel %vm1480_vm12, -1e+09, %v5315_v56  ;;  %v5561_v39 = vcombine.low %v17858_v37, %v17871_v22 }
 0x844   : > { %20989 = vst [vmem:[#allocation65_spill] sm:$0xff] %v17879_v18  ;;  %v5446_v19 = vcombine.low %v17762_v34, %v5431_v52  ;;  %v17890_v63 = vsel %vm1480_vm12, -1e+09, %v5316_v17  ;;  %v5563_v47 = vcombine.low %v17862_v27, %v17879_v18  ;;  %v17896_v3 = vsel %vm1480_vm12, -1e+09, %v5219_v46 }
 0x845   : > { %20990 = vst [vmem:[#allocation66_spill] sm:$0xff] %v17890_v63  ;;  %v5447_v49 = vcombine.low %v5438_v38, %v5445_v11  ;;  %v5562_v56 = vcombine.low %v17875_v40, %v17890_v63  ;;  %v5466_v34 = vcombine.low %v17798_v25, %v17896_v3  ;;  %v5473_v52 = vrot.slane %v5463_v54, %v20978_v45 }
 0x846   : > { %v5454_v43 = vrot.slane %v5446_v19, %v20978_v45  ;;  %v5480_v22 = vrot.slane %v5464_v20, %v20978_v45  ;;  %v5487_v38 = vrot.slane %v5465_v1, %v20978_v45  ;;  %v17909_v46 = vsel %vm1480_vm12, -1e+09, %v5268_v13 }
 0x847   : > { %v5461_v17 = vrot.slane %v5447_v49, %v20978_v45  ;;  %v5494_v11 = vrot.slane %v5466_v34, %v20978_v45  ;;  %v5515_v19 = vcombine.low %v17837_v59, %v17909_v46  ;;  %v5522_v18 = vrot.slane %v5512_v51, %v20978_v45 }
 0x848   : > { %v5529_v27 = vrot.slane %v5513_v21, %v20978_v45  ;;  %v5495_v63 = vcombine.low %v5473_v52, %v5480_v22  ;;  %v5536_v49 = vrot.slane %v5514_v26, %v20978_v45  ;;  %v17919_v1 = vsel %vm1480_vm12, -1e+09, %v5317_v31 }
 0x849   : > { %v5462_v54 = vcombine.low %v5454_v43, %v5461_v17  ;;  %v5496_v20 = vcombine.low %v5487_v38, %v5494_v11  ;;  %v5543_v13 = vrot.slane %v5515_v19, %v20978_v45  ;;  %v5564_v34 = vcombine.low %v17883_v53, %v17919_v1 }
 0x84a   : > { %v5544_v40 = vcombine.low %v5522_v18, %v5529_v27  ;;  %v5503_v51 = vrot.slane %v5495_v63, %v20978_v45  ;;  %v5571_v43 = vrot.slane %v5561_v39, %v20978_v45  ;;  %v5578_v21 = vrot.slane %v5562_v56, %v20978_v45 }
 0x84b   : > { %v5614_v37 = vsel %vm2496_vm3, %v5462_v54, -inf  ;;  %v5510_v60 = vrot.slane %v5496_v20, %v20978_v45  ;;  %v5545_v31 = vcombine.low %v5536_v49, %v5543_v13  ;;  %v5585_v22 = vrot.slane %v5563_v47, %v20978_v45 }
 0x84c   : > { %5615 = vmax.xlane.f32.xlu0 %v5614_v37  ;;  %v5552_v26 = vrot.slane %v5544_v40, %v20978_v45  ;;  %v5592_v27 = vrot.slane %v5564_v34, %v20978_v45  ;;  %v5593_v18 = vcombine.low %v5571_v43, %v5578_v21  ;;  %v4218_v52 = vcombine.low %v17693_v5, %v17696_v30 }
 0x84d   : > { %v4226_v63 = vcombine.low %v17701_v62, %v17704_v29  ;;  %v5511_v39 = vcombine.low %v5503_v51, %v5510_v60  ;;  %v5559_v56 = vrot.slane %v5545_v31, %v20978_v45  ;;  %v4268_v37 = vcombine.low %v17707_v35, %v17710_v12 }
 0x84e   : > { %v4276_v40 = vcombine.low %v17721_v44, %v17724_v2  ;;  %v5594_v17 = vcombine.low %v5585_v22, %v5592_v27  ;;  %v17942_v47 = vrot.slane %v4218_v52, %v16631_v42  ;;  %v5601_v35 = vrot.slane %v5593_v18, %v20978_v45 }
 0x84f   : > { %v17945_v38 = vrot.slane %v4226_v63, %v16631_v42  ;;  %v5617_v5 = vsel %vm2496_vm3, %v5511_v39, -inf  ;;  %v5560_v30 = vcombine.low %v5552_v26, %v5559_v56  ;;  %v17949_v62 = vrot.slane %v4268_v37, %v16631_v42 }
 0x850   : > { %v17952_v29 = vrot.slane %v4276_v40, %v16631_v42  ;;  %5618 = vmax.xlane.f32.xlu1 %v5617_v5  ;;  %v5608_v12 = vrot.slane %v5594_v17, %v20978_v45 }
 0x851   : > { %v4235_v2 = vcombine.high %v17942_v47, %v17945_v38  ;;  %v5620_v11 = vsel %vm2496_vm3, %v5560_v30, -inf }
 0x852   : > { %v4285_v19 = vcombine.high %v17949_v62, %v17952_v29  ;;  %5621 = vmax.xlane.f32.xlu0 %v5620_v11  ;;  %v5609_v49 = vcombine.low %v5601_v35, %v5608_v12 }
 0x854   : > { %v17965_v20 = vpack.i.bf16 %v4285_v19, %v4235_v2  ;;  %v5623_v13 = vsel %vm2496_vm3, %v5609_v49, -inf }
 0x856   : > { %5624 = vmax.xlane.f32.xlu0 %v5623_v13 }
 0x8d9   : > { %v5616_v34 = vpop.xlane.xlu0 %5615 }
 0x8da   : > { %v5633_v51 = vrot.slane %v5616_v34, %v16948_v24  ;;  %v5637_v43 = vrot.slane %v5616_v34, %v16951_v7  ;;  %v5641_v21 = vrot.slane %v5616_v34, %v16954_v55  ;;  %v5645_v31 = vrot.slane %v5616_v34, %v16957_v14 }
 0x8db   : > { %v5649_v26 = vrot.slane %v5616_v34, %v16960_v9  ;;  %v5653_v27 = vrot.slane %v5616_v34, %v16963_v57  ;;  %v5657_v52 = vrot.slane %v5616_v34, %v16966_v16  ;;  %v5661_v63 = vrot.slane %v5616_v34, %v16975_v10 }
 0x8dc   : > { %v5790_v22 = vsub.f32 %v17714_v23, %v5633_v51  ;;  %v5791_v18 = vsub.f32 %v17718_v32, %v5637_v43  ;;  %v5792_v39 = vsub.f32 %v17728_v41, %v5641_v21  ;;  %v5793_v5 = vsub.f32 %v17736_v58, %v5645_v31 }
 0x8dd   : > { %v5619_v60 = vpop.xlane.xlu1 %5618  ;;  %v5794_v32 = vsub.f32 %v17732_v6, %v5649_v26  ;;  %v5795_v12 = vsub.f32 %v17740_v33, %v5653_v27  ;;  %v5796_v19 = vsub.f32 %v17744_v50, %v5657_v52  ;;  %v5797_v49 = vsub.f32 %v17759_v4, %v5661_v63 }
 0x8de   : > { %v5665_v56 = vrot.slane %v5619_v60, %v16948_v24  ;;  %v5669_v37 = vrot.slane %v5619_v60, %v16951_v7  ;;  %v5673_v40 = vrot.slane %v5619_v60, %v16954_v55  ;;  %v5677_v17 = vrot.slane %v5619_v60, %v16957_v14 }
 0x8df   : > { %v5681_v23 = vrot.slane %v5619_v60, %v16960_v9  ;;  %v5685_v30 = vrot.slane %v5619_v60, %v16963_v57  ;;  %v5822_v35 = vmul.f32 1.442695, %v5790_v22  ;;  %v5689_v41 = vrot.slane %v5619_v60, %v16966_v16  ;;  %v5622_v43 = vpop.xlane.xlu0 %5621 }
 0x8e0   : > { %v5693_v2 = vrot.slane %v5619_v60, %v16975_v10  ;;  %v5824_v11 = vmul.f32 1.442695, %v5791_v18  ;;  %v5798_v13 = vsub.f32 %v17774_v0, %v5665_v56  ;;  %v5826_v34 = vmul.f32 1.442695, %v5792_v39  ;;  %v20991_v39 = vld [vmem:[#allocation50_spill] sm:$0xff] }
 0x8e1   : > { %v5799_v58 = vsub.f32 %v17785_v61, %v5669_v37  ;;  %v5800_v6 = vsub.f32 %v17789_v15, %v5673_v40  ;;  %v5801_v51 = vsub.f32 %v17804_v8, %v5677_v17  ;;  %v5802_v33 = vsub.f32 %v17778_v48, %v5681_v23  ;;  %v20992_v40 = vld [vmem:[#allocation64_spill] sm:$0xff]  ;;  %v20993_v23 = vld [vmem:[#allocation55_spill] sm:$0xff] }
 0x8e2   : > { %v5803_v21 = vsub.f32 %v17794_v36, %v5685_v30  ;;  %15015 = vpow2.f32 %v5822_v35  ;;  %v5828_v60 = vmul.f32 1.442695, %v5793_v5  ;;  %v5830_v31 = vmul.f32 1.442695, %v5794_v32  ;;  %v20994_v35 = vld [vmem:[#allocation53_spill] sm:$0xff] }
 0x8e3   : > { %v5804_v50 = vsub.f32 %v17798_v25, %v5689_v41  ;;  %v5805_v4 = vsub.f32 %v17896_v3, %v5693_v2  ;;  %15017 = vpow2.f32 %v5824_v11  ;;  %v5832_v0 = vmul.f32 1.442695, %v5795_v12  ;;  %v18012_v32 = vpop.xlane.xlu0 %5624  ;;  %v20995_v41 = vld [vmem:[#allocation51_spill] sm:$0xff] }
 0x8e4   : > { %v5697_v61 = vrot.slane %v5622_v43, %v16948_v24  ;;  %v5701_v15 = vrot.slane %v5622_v43, %v16951_v7  ;;  %15019 = vpow2.f32 %v5826_v34  ;;  %v5834_v8 = vmul.f32 1.442695, %v5796_v19 }
 0x8e5   : > { %v5705_v48 = vrot.slane %v5622_v43, %v16954_v55  ;;  %v5709_v26 = vrot.slane %v5622_v43, %v16957_v14  ;;  %15021 = vpow2.f32 %v5828_v60  ;;  %v5836_v36 = vmul.f32 1.442695, %v5797_v49 }
 0x8e6   : > { %v5713_v22 = vrot.slane %v5622_v43, %v16960_v9  ;;  %v5717_v25 = vrot.slane %v5622_v43, %v16963_v57  ;;  %15023 = vpow2.f32 %v5830_v31  ;;  %v5838_v3 = vmul.f32 1.442695, %v5798_v13 }
 0x8e7   : > { %v5721_v27 = vrot.slane %v5622_v43, %v16966_v16  ;;  %v5725_v18 = vrot.slane %v5622_v43, %v16975_v10  ;;  %15025 = vpow2.f32 %v5832_v0  ;;  %v5840_v52 = vmul.f32 1.442695, %v5799_v58 }
 0x8e8   : > { %v5806_v63 = vsub.f32 %v17817_v28, %v5697_v61  ;;  %v5807_v56 = vsub.f32 %v20991_v39, %v5701_v15  ;;  %15027 = vpow2.f32 %v5834_v8  ;;  %v5842_v37 = vmul.f32 1.442695, %v5800_v6 }
 0x8e9   : > { %v5808_v17 = vsub.f32 %v20992_v40, %v5705_v48  ;;  %v5809_v5 = vsub.f32 %v20993_v23, %v5709_v26  ;;  %15029 = vpow2.f32 %v5836_v36  ;;  %v5844_v30 = vmul.f32 1.442695, %v5801_v51 }
 0x8ea   : > { %v5810_v12 = vsub.f32 %v20994_v35, %v5713_v22  ;;  %v5811_v2 = vsub.f32 %v20995_v41, %v5717_v25  ;;  %15031 = vpow2.f32 %v5838_v3  ;;  %v5846_v11 = vmul.f32 1.442695, %v5802_v33  ;;  %v20996_v25 = vld [vmem:[#allocation63_spill] sm:$0xff] }
 0x8eb   : > { %v5812_v28 = vsub.f32 %v17837_v59, %v5721_v27  ;;  %v5813_v19 = vsub.f32 %v17909_v46, %v5725_v18  ;;  %15033 = vpow2.f32 %v5840_v52  ;;  %v5848_v49 = vmul.f32 1.442695, %v5803_v21 }
 0x8ec   : > { %v18018_v13 = vpop.eup %15015  ;;  %v5729_v34 = vrot.slane %v18012_v32, %v16948_v24  ;;  %v5733_v58 = vrot.slane %v18012_v32, %v16951_v7  ;;  %15035 = vpow2.f32 %v5842_v37  ;;  %v5850_v6 = vmul.f32 1.442695, %v5804_v50  ;;  %v20997_v37 = vld [vmem:[#allocation60_spill] sm:$0xff] }
 0x8ed   : > { %v18024_v51 = vpop.eup %15017  ;;  %v5737_v33 = vrot.slane %v18012_v32, %v16954_v55  ;;  %v5741_v59 = vrot.slane %v18012_v32, %v16957_v14  ;;  %15037 = vpow2.f32 %v5844_v30  ;;  %v5852_v46 = vmul.f32 1.442695, %v5805_v4 }
 0x8ee   : > { %v18030_v43 = vpop.eup %15019  ;;  %v5745_v21 = vrot.slane %v18012_v32, %v16960_v9  ;;  %v5918_v60 = vcombine.low %v18018_v13, %v18024_v51  ;;  %15039 = vpow2.f32 %v5846_v11  ;;  %v5854_v31 = vmul.f32 1.442695, %v5806_v63  ;;  %v20998_v11 = vld [vmem:[#allocation61_spill] sm:$0xff] }
 0x8ef   : > { %v18036_v50 = vpop.eup %15021  ;;  %v5749_v0 = vrot.slane %v18012_v32, %v16963_v57  ;;  %v5753_v61 = vrot.slane %v18012_v32, %v16966_v16  ;;  %15041 = vpow2.f32 %v5848_v49  ;;  %v5856_v4 = vmul.f32 1.442695, %v5807_v56  ;;  %v20999_v49 = vld [vmem:[#allocation66_spill] sm:$0xff] }
 0x8f0   : > { %v18042_v15 = vpop.eup %15023  ;;  %v5919_v8 = vcombine.low %v18030_v43, %v18036_v50  ;;  %v5928_v48 = vrot.slane %v5918_v60, %v20978_v45  ;;  %15043 = vpow2.f32 %v5850_v6  ;;  %v5858_v26 = vmul.f32 1.442695, %v5808_v17 }
 0x8f1   : > { %v18047_v36 = vpop.eup %15025  ;;  %v5757_v22 = vrot.slane %v18012_v32, %v16975_v10  ;;  %v5814_v3 = vsub.f32 %v20996_v25, %v5729_v34  ;;  %15045 = vpow2.f32 %v5852_v46  ;;  %v5860_v27 = vmul.f32 1.442695, %v5809_v5 }
 0x8f2   : > { %v18052_v18 = vpop.eup %15027  ;;  %v5920_v52 = vcombine.low %v18042_v15, %v18047_v36  ;;  %v5935_v63 = vrot.slane %v5919_v8, %v20978_v45  ;;  %15047 = vpow2.f32 %v5854_v31  ;;  %v5862_v39 = vmul.f32 1.442695, %v5810_v12  ;;  %v21000_v31 = vld [vmem:[#allocation59_spill] sm:$0xff] }
 0x8f3   : > { %v18057_v56 = vpop.eup %15029  ;;  %v5815_v40 = vsub.f32 %v20997_v37, %v5733_v58  ;;  %15049 = vpow2.f32 %v5856_v4  ;;  %v5864_v17 = vmul.f32 1.442695, %v5811_v2  ;;  %v5866_v23 = vmul.f32 1.442695, %v5812_v28 }
 0x8f4   : > { %v18060_v32 = vpop.eup %15031  ;;  %v5921_v5 = vcombine.low %v18052_v18, %v18057_v56  ;;  %v5942_v30 = vrot.slane %v5920_v52, %v20978_v45  ;;  %v5950_v35 = vcombine.low %v5928_v48, %v5935_v63  ;;  %15051 = vpow2.f32 %v5858_v26 }
 0x8f5   : > { %v18065_v41 = vpop.eup %15033  ;;  %v5816_v12 = vsub.f32 %v20998_v11, %v5737_v33  ;;  %v5817_v34 = vsub.f32 %v20999_v49, %v5741_v59  ;;  %15053 = vpow2.f32 %v5860_v27  ;;  %v5868_v58 = vmul.f32 1.442695, %v5813_v19 }
 0x8f6   : > { %v18069_v6 = vpop.eup %15035  ;;  %v5949_v2 = vrot.slane %v5921_v5, %v20978_v45  ;;  %v5967_v28 = vcombine.low %v18060_v32, %v18065_v41  ;;  %15055 = vpow2.f32 %v5862_v39  ;;  %v5870_v46 = vmul.f32 1.442695, %v5814_v3  ;;  %v21001_v3 = vld [vmem:[#allocation65_spill] sm:$0xff] }
 0x8f7   : > { %v18074_v60 = vpop.eup %15037  ;;  %v5818_v4 = vsub.f32 %v21000_v31, %v5745_v21  ;;  %v5958_v8 = vrot.slane %v5950_v35, %v20978_v45  ;;  %15057 = vpow2.f32 %v5864_v17  ;;  %v5872_v33 = vmul.f32 1.442695, %v5815_v40 }
 0x8f8   : > { %v18078_v59 = vpop.eup %15039  ;;  %v5951_v19 = vcombine.low %v5942_v30, %v5949_v2  ;;  %v5968_v48 = vcombine.low %v18069_v6, %v18074_v60  ;;  %v5977_v26 = vrot.slane %v5967_v28, %v20978_v45  ;;  %15059 = vpow2.f32 %v5866_v23 }
 0x8f9   : > { %v18083_v25 = vpop.eup %15041  ;;  %v5819_v27 = vsub.f32 %v21001_v3, %v5749_v0  ;;  %v5820_v52 = vsub.f32 %v17883_v53, %v5753_v61  ;;  %15061 = vpow2.f32 %v5868_v58  ;;  %v5874_v21 = vmul.f32 1.442695, %v5816_v12 }
 0x8fa   : > { %v18087_v63 = vpop.eup %15043  ;;  %v5965_v39 = vrot.slane %v5951_v19, %v20978_v45  ;;  %v5969_v37 = vcombine.low %v18078_v59, %v18083_v25  ;;  %v5984_v40 = vrot.slane %v5968_v48, %v20978_v45  ;;  %15063 = vpow2.f32 %v5870_v46 }
 0x8fb   : > { %v18093_v17 = vpop.eup %15045  ;;  %v5821_v23 = vsub.f32 %v17919_v1, %v5757_v22  ;;  %15065 = vpow2.f32 %v5872_v33  ;;  %v5876_v0 = vmul.f32 1.442695, %v5817_v34  ;;  %v5878_v5 = vmul.f32 1.442695, %v5818_v4 }
 0x8fc   : > { %v18096_v53 = vpop.eup %15047  ;;  %v5966_v61 = vcombine.low %v5958_v8, %v5965_v39  ;;  %v5970_v30 = vcombine.low %v18087_v63, %v18093_v17  ;;  %v5991_v35 = vrot.slane %v5969_v37, %v20978_v45  ;;  %v5999_v11 = vcombine.low %v5977_v26, %v5984_v40 }
 0x8fd   : > { %v18101_v12 = vpop.eup %15049  ;;  %15067 = vpow2.f32 %v5874_v21  ;;  %v5880_v49 = vmul.f32 1.442695, %v5819_v27  ;;  %v5882_v2 = vmul.f32 1.442695, %v5820_v52  ;;  %v5884_v31 = vmul.f32 1.442695, %v5821_v23 }
 0x8fe   : > { %v18103_v58 = vpop.eup %15051  ;;  %v6118_v1 = vsel %vm2496_vm3, %v5966_v61, 0.0  ;;  %v5998_v22 = vrot.slane %v5970_v30, %v20978_v45  ;;  %v6016_v34 = vcombine.low %v18096_v53, %v18101_v12  ;;  %v6007_v46 = vrot.slane %v5999_v11, %v20978_v45 }
 0x8ff   : > { %v18109_v28 = vpop.eup %15053  ;;  %6119 = vadd.xlane.f32.xlu0 %v6118_v1  ;;  %15069 = vpow2.f32 %v5876_v0 }
 0x900   : > { %v18112_v4 = vpop.eup %15055  ;;  %v6000_v8 = vcombine.low %v5991_v35, %v5998_v22  ;;  %v6017_v33 = vcombine.low %v18103_v58, %v18109_v28  ;;  %v6026_v19 = vrot.slane %v6016_v34, %v20978_v45  ;;  %15071 = vpow2.f32 %v5878_v5 }
 0x901   : > { %21002 = vst [vmem:[#allocation67_spill] sm:$0xff] %v18112_v4  ;;  %v18117_v48 = vpop.eup %15057  ;;  %15073 = vpow2.f32 %v5880_v49 }
 0x902   : > { %21003 = vst [vmem:[#allocation68_spill] sm:$0xff] %v18117_v48  ;;  %v18119_v26 = vpop.eup %15059  ;;  %v6014_v3 = vrot.slane %v6000_v8, %v20978_v45  ;;  %v6018_v27 = vcombine.low %v18112_v4, %v18117_v48  ;;  %v6033_v52 = vrot.slane %v6017_v33, %v20978_v45  ;;  %15075 = vpow2.f32 %v5882_v2 }
 0x903   : > { %21004 = vst [vmem:[#allocation69_spill] sm:$0xff] %v18119_v26  ;;  %v18125_v21 = vpop.eup %15061  ;;  %15077 = vpow2.f32 %v5884_v31 }
 0x904   : > { %21005 = vst [vmem:[#allocation62_spill] sm:$0xff] %v18125_v21  ;;  %v18127_v39 = vpop.eup %15063  ;;  %v6015_v37 = vcombine.low %v6007_v46, %v6014_v3  ;;  %v6019_v40 = vcombine.low %v18119_v26, %v18125_v21  ;;  %v6040_v23 = vrot.slane %v6018_v27, %v20978_v45  ;;  %v6048_v0 = vcombine.low %v6026_v19, %v6033_v52 }
 0x905   : > { %21006 = vst [vmem:[#allocation50_spill] sm:$0xff] %v18127_v39  ;;  %v18132_v5 = vpop.eup %15065 }
 0x906   : > { %v6121_v61 = vsel %vm2496_vm3, %v6015_v37, 0.0  ;;  %v6047_v30 = vrot.slane %v6019_v40, %v20978_v45  ;;  %v6065_v35 = vcombine.low %v18127_v39, %v18132_v5  ;;  %v6056_v1 = vrot.slane %v6048_v0, %v20978_v45 }
 0x907   : > { %v18138_v11 = vpop.eup %15067  ;;  %6122 = vadd.xlane.f32.xlu1 %v6121_v61 }
 0x908   : > { %v6049_v49 = vcombine.low %v6040_v23, %v6047_v30  ;;  %v6075_v31 = vrot.slane %v6065_v35, %v20978_v45 }
 0x909   : > { %v18141_v22 = vpop.eup %15069 }
 0x90a   : > { %21007 = vst [vmem:[#allocation64_spill] sm:$0xff] %v18141_v22  ;;  %v18143_v34 = vpop.eup %15071  ;;  %v6063_v2 = vrot.slane %v6049_v49, %v20978_v45  ;;  %v6066_v46 = vcombine.low %v18138_v11, %v18141_v22 }
 0x90b   : > { %21008 = vst [vmem:[#allocation55_spill] sm:$0xff] %v18143_v34  ;;  %v18149_v8 = vpop.eup %15073 }
 0x90c   : > { %21009 = vst [vmem:[#allocation53_spill] sm:$0xff] %v18149_v8  ;;  %v18151_v33 = vpop.eup %15075  ;;  %v6064_v19 = vcombine.low %v6056_v1, %v6063_v2  ;;  %v6067_v3 = vcombine.low %v18143_v34, %v18149_v8  ;;  %v6082_v27 = vrot.slane %v6066_v46, %v20978_v45  ;;  %v21012_v46 = vld [vmem:[#allocation52_spill] sm:$0xff]  ;;  %v21015_v34 = vld [vmem:[#allocation57_spill] sm:$0xff] }
 0x90d   : > { %21010 = vst [vmem:[#allocation51_spill] sm:$0xff] %v18151_v33  ;;  %v18156_v52 = vpop.eup %15077 }
 0x90e   : > { %21011 = vst [vmem:[#allocation63_spill] sm:$0xff] %v18156_v52  ;;  %v6124_v37 = vsel %vm2496_vm3, %v6064_v19, 0.0  ;;  %v6068_v40 = vcombine.low %v18151_v33, %v18156_v52  ;;  %v6089_v23 = vrot.slane %v6067_v3, %v20978_v45  ;;  %v6097_v0 = vcombine.low %v6075_v31, %v6082_v27  ;;  %v21013_v19 = vld [vmem:[#allocation54_spill] sm:$0xff] }
 0x90f   : > { %6125 = vadd.xlane.f32.xlu0 %v6124_v37  ;;  %v21014_v37 = vmov 0.0  }
 0x910   : > { %v6096_v61 = vrot.slane %v6068_v40, %v20978_v45  ;;  %v6105_v35 = vrot.slane %v6097_v0, %v20978_v45  ;;  %v4788_v40 = vcombine.high %v21012_v46, %v21014_v37 }
 0x912   : > { %v6098_v30 = vcombine.low %v6089_v23, %v6096_v61  ;;  %v4854_v23 = vcombine.high %v21013_v19, %v21014_v37 }
 0x914   : > { %v6112_v49 = vrot.slane %v6098_v30, %v20978_v45 }
 0x916   : > { %v6113_v1 = vcombine.low %v6105_v35, %v6112_v49 }
 0x918   : > { %v6127_v2 = vsel %vm2496_vm3, %v6113_v1, 0.0 }
 0x919   : > { %6128 = vadd.xlane.f32.xlu1 %v6127_v2 }
 0x925   : > { %4782 = vrot.lane.b32.xlu0 %v21012_v46, %s15783_s1 }
 0x92a   : > { %4784 = vrot.lane.b32.xlu1 %v21013_v19, %s15783_s1 }
 0x92e   : > { %14874 = vrot.lane.b32.xlu1 %v17965_v20, %s15788_s3 }
 0x98c   : > { %v6120_v31 = vpop.xlane.xlu0 %6119 }
 0x98d   : > { %15079 = vrcp.f32 %v6120_v31 }
 0x994   : > { %v6123_v3 = vpop.xlane.xlu1 %6122 }
 0x995   : > { %15081 = vrcp.f32 %v6123_v3 }
 0x997   : > { %v15080_v27 = vpop.eup %15079 }
 0x998   : > { %v6141_v0 = vrot.slane %v15080_v27, %v16948_v24  ;;  %v6145_v61 = vrot.slane %v15080_v27, %v16951_v7  ;;  %v6149_v30 = vrot.slane %v15080_v27, %v16954_v55  ;;  %v6153_v35 = vrot.slane %v15080_v27, %v16957_v14 }
 0x999   : > { %v6157_v20 = vrot.slane %v15080_v27, %v16960_v9  ;;  %v6161_v49 = vrot.slane %v15080_v27, %v16963_v57  ;;  %v6165_v1 = vrot.slane %v15080_v27, %v16966_v16  ;;  %v6169_v2 = vrot.slane %v15080_v27, %v16975_v10 }
 0x99a   : > { %v6298_v31 = vmul.f32 %v18018_v13, %v6141_v0  ;;  %v6299_v3 = vmul.f32 %v18024_v51, %v6145_v61  ;;  %v6300_v44 = vmul.f32 %v18030_v43, %v6149_v30  ;;  %v6301_v54 = vmul.f32 %v18036_v50, %v6153_v35 }
 0x99b   : > { %v6302_v45 = vmul.f32 %v18042_v15, %v6157_v20  ;;  %v6303_v52 = vmul.f32 %v18047_v36, %v6161_v49  ;;  %v6304_v33 = vmul.f32 %v18052_v18, %v6165_v1  ;;  %v18192_v8 = vmul.f32 %v18057_v56, %v6169_v2 }
 0x99c   : > { %v4795_v27 = vrot.slane %v21012_v46, %v21015_v34  ;;  %v6126_v39 = vpop.xlane.xlu0 %6125  ;;  %v6330_v13 = vpack.c.bf16 %v6298_v31, %v6298_v31  ;;  %v6331_v0 = vpack.c.bf16 %v6299_v3, %v6299_v3  ;;  %v6332_v51 = vpack.c.bf16 %v6300_v44, %v6300_v44 }
 0x99d   : > { %v4802_v43 = vrot.slane %v4788_v40, %v21015_v34  ;;  %v18199_v50 = vrot.slane %v21013_v19, %v21015_v34  ;;  %v6333_v15 = vpack.c.bf16 %v6301_v54, %v6301_v54  ;;  %v6334_v36 = vpack.c.bf16 %v6302_v45, %v6302_v45 }
 0x99e   : > { %v18202_v18 = vrot.slane %v4854_v23, %v21015_v34  ;;  %15083 = vrcp.f32 %v6126_v39  ;;  %v6335_v56 = vpack.c.bf16 %v6303_v52, %v6303_v52  ;;  %v6336_v61 = vpack.c.bf16 %v6304_v33, %v6304_v33 }
 0x99f   : > { %v15082_v30 = vpop.eup %15081  ;;  %v6337_v46 = vpack.c.bf16 %v18192_v8, %v18192_v8  ;;  %v18206_v35 = vunpack.c.l.b16 %v6330_v13  ;;  %v18208_v44 = vunpack.c.l.b16 %v6331_v0  ;;  %v18210_v40 = vunpack.c.l.b16 %v6332_v51 }
 0x9a0   : > { %v4783_v19 = vpop.permute.xlu0 %4782  ;;  %v6173_v54 = vrot.slane %v15082_v30, %v16948_v24  ;;  %v6177_v45 = vrot.slane %v15082_v30, %v16951_v7  ;;  %v6181_v23 = vrot.slane %v15082_v30, %v16954_v55  ;;  %v6185_v39 = vrot.slane %v15082_v30, %v16957_v14 }
 0x9a1   : > { %v4803_v33 = vcombine.high %v4783_v19, %v21014_v37  ;;  %v4810_v52 = vrot.slane %v4783_v19, %v21015_v34  ;;  %v18218_v8 = vunpack.c.l.b16 %v6333_v15  ;;  %v18220_v20 = vunpack.c.l.b16 %v6334_v36 }
 0x9a2   : > { %v6189_v49 = vrot.slane %v15082_v30, %v16960_v9  ;;  %v6193_v1 = vrot.slane %v15082_v30, %v16963_v57  ;;  %v6197_v2 = vrot.slane %v15082_v30, %v16966_v16  ;;  %v6201_v31 = vrot.slane %v15082_v30, %v16975_v10 }
 0x9a3   : > { %v4817_v3 = vrot.slane %v4803_v33, %v21015_v34  ;;  %v4818_v13 = vcombine.low %v4795_v27, %v4810_v52  ;;  %v4819_v0 = vcombine.high %v4795_v27, %v4810_v52  ;;  %v18227_v51 = vunpack.c.l.b16 %v6335_v56 }
 0x9a4   : > { %v6306_v19 = vmul.f32 %v18060_v32, %v6173_v54  ;;  %v6307_v15 = vmul.f32 %v18065_v41, %v6177_v45  ;;  %v6308_v36 = vmul.f32 %v18069_v6, %v6181_v23  ;;  %v6309_v21 = vmul.f32 %v18074_v60, %v6185_v39 }
 0x9a5   : > { %v4826_v22 = vrot.slane %v4818_v13, %v16631_v42  ;;  %v4833_v26 = vrot.slane %v4819_v0, %v16631_v42  ;;  %v4834_v48 = vcombine.low %v4802_v43, %v4817_v3  ;;  %v4835_v30 = vcombine.high %v4802_v43, %v4817_v3 }
 0x9a6   : > { %v6129_v4 = vpop.xlane.xlu1 %6128  ;;  %v6310_v33 = vmul.f32 %v18078_v59, %v6189_v49  ;;  %v6311_v27 = vmul.f32 %v18083_v25, %v6193_v1  ;;  %v6312_v56 = vmul.f32 %v18087_v63, %v6197_v2  ;;  %v18239_v32 = vmul.f32 %v18093_v17, %v6201_v31 }
 0x9a7   : > { %v4842_v41 = vrot.slane %v4834_v48, %v16631_v42  ;;  %v4849_v6 = vrot.slane %v4835_v30, %v16631_v42  ;;  %v4920_v60 = vcombine.low %v4826_v22, %v4833_v26  ;;  %v14125_v54 = vcombine.high %v4826_v22, %v4833_v26 }
 0x9a8   : > { %v18243_v45 = vpop.eup %15083  ;;  %v6338_v23 = vpack.c.bf16 %v6306_v19, %v6306_v19  ;;  %v6339_v43 = vpack.c.bf16 %v6307_v15, %v6307_v15  ;;  %v6340_v39 = vpack.c.bf16 %v6308_v36, %v6308_v36  ;;  %v18245_v52 = vunpack.c.l.b16 %v6336_v61 }
 0x9a9   : > { %v4927_v59 = vrot.slane %v4920_v60, %v21015_v34  ;;  %v4935_v25 = vrot.slane %v14125_v54, %v21015_v34  ;;  %v4936_v63 = vcombine.low %v4842_v41, %v4849_v6  ;;  %v14126_v17 = vcombine.high %v4842_v41, %v4849_v6 }
 0x9aa   : > { %15085 = vrcp.f32 %v6129_v4  ;;  %v4785_v49 = vpop.permute.xlu1 %4784  ;;  %v6341_v48 = vpack.c.bf16 %v6309_v21, %v6309_v21  ;;  %v6342_v1 = vpack.c.bf16 %v6310_v33, %v6310_v33  ;;  %v6343_v2 = vpack.c.bf16 %v6311_v27, %v6311_v27 }
 0x9ab   : > { %v4952_v31 = vcombine.low %v4927_v59, %v4935_v25  ;;  %v4869_v26 = vcombine.high %v4785_v49, %v21014_v37  ;;  %v6344_v22 = vpack.c.bf16 %v6312_v56, %v6312_v56  ;;  %v6345_v3 = vpack.c.bf16 %v18239_v32, %v18239_v32 }
 0x9ac   : > { %v4943_v61 = vrot.slane %v4936_v63, %v21015_v34  ;;  %v4951_v13 = vrot.slane %v14126_v17, %v21015_v34  ;;  %v4876_v0 = vrot.slane %v4785_v49, %v21015_v34  ;;  %v18255_v19 = vunpack.c.l.b16 %v6337_v46 }
 0x9ad   : > { %v4883_v4 = vrot.slane %v4869_v26, %v21015_v34  ;;  %v6386_v21 = vunpack.c.l.b16 %v6338_v23  ;;  %v6387_v15 = vunpack.c.l.b16 %v6339_v43  ;;  %v6388_v36 = vunpack.c.l.b16 %v6340_v39 }
 0x9ae   : > { %v4884_v30 = vcombine.low %v18199_v50, %v4876_v0  ;;  %v4885_v33 = vcombine.high %v18199_v50, %v4876_v0  ;;  %v14875_v27 = vpop.permute.xlu1 %14874  ;;  %v4959_v56 = vrot.slane %v4952_v31, %v16631_v42  ;;  %v6389_v32 = vunpack.c.l.b16 %v6341_v48 }
 0x9af   : > { %v4900_v41 = vcombine.low %v18202_v18, %v4883_v4  ;;  %v4901_v6 = vcombine.high %v18202_v18, %v4883_v4  ;;  %v14877_v60 = vunpack.i.h.bf16 %v14875_v27  ;;  %v14876_v46 = vunpack.i.l.bf16 %v14875_v27 }
 0x9b0   : > { %v4892_v54 = vrot.slane %v4884_v30, %v16631_v42  ;;  %v4899_v23 = vrot.slane %v4885_v33, %v16631_v42  ;;  %v4960_v43 = vcombine.low %v4943_v61, %v4951_v13  ;;  %v6390_v39 = vunpack.c.l.b16 %v6342_v1 }
 0x9b1   : > { %v4908_v59 = vrot.slane %v4900_v41, %v16631_v42  ;;  %v4915_v50 = vrot.slane %v4901_v6, %v16631_v42  ;;  %v21016_v25 = vcombine.low %v17949_v62, %v17952_v29  ;;  %v21017_v18 = vcombine.low %v17942_v47, %v17945_v38 }
 0x9b2   : > { %v4970_v49 = vcombine.low %v4892_v54, %v4899_v23  ;;  %v14127_v48 = vcombine.high %v4892_v54, %v4899_v23  ;;  %v6391_v31 = vunpack.c.l.b16 %v6343_v2  ;;  %v6392_v13 = vunpack.c.l.b16 %v6344_v22 }
 0x9b3   : > { %v18271_v63 = vsel %vm2496_vm3, %v21016_v25, %v14877_v60  ;;  %v18277_v17 = vsel %vm2496_vm3, %v21017_v18, %v14876_v46  ;;  %v4986_v26 = vcombine.low %v4908_v59, %v4915_v50  ;;  %v14128_v61 = vcombine.high %v4908_v59, %v4915_v50 }
 0x9b4   : > { %v6814_v1 = vpack.c.bf16 %v18271_v63, %v18277_v17  ;;  %v6394_v62 = vrot.slane %v18208_v44, 7  ;;  %v18282_v29 = vpop.eup %15085  ;;  %v4977_v0 = vrot.slane %v4970_v49, %v21015_v34  ;;  %v4985_v47 = vrot.slane %v14127_v48, %v21015_v34 }
 0x9b5   : > { %v4967_v38 = vrot.slane %v4960_v43, %v16631_v42  ;;  %v6396_v4 = vrot.slane %v18210_v40, 6  ;;  %v4993_v30 = vrot.slane %v4986_v26, %v21015_v34  ;;  %v5001_v33 = vrot.slane %v14128_v61, %v21015_v34 }
 0x9b6   : > { %v6395_v2 = vsel %vm3870_vm5, %v6394_v62, %v18206_v35  ;;  %v6398_v22 = vrot.slane %v18218_v8, 5  ;;  %v5002_v44 = vcombine.low %v4977_v0, %v4985_v47  ;;  %v6393_v27 = vunpack.c.l.b16 %v6345_v3 }
 0x9b7   : > { %v6397_v41 = vsel %vm3873_vm6, %v6396_v4, %v6395_v2  ;;  %v6400_v6 = vrot.slane %v18220_v20, 4  ;;  %v5010_v60 = vcombine.low %v4993_v30, %v5001_v33  ;;  %v6402_v40 = vrot.slane %v18227_v51, 3 }
 0x9b8   : > { %v6399_v46 = vsel %vm3876_vm7, %v6398_v22, %v6397_v41  ;;  %v6408_v54 = vrot.slane %v6387_v15, 7  ;;  %v4968_v23 = vcombine.low %v4959_v56, %v4967_v38  ;;  %v5009_v43 = vrot.slane %v5002_v44, %v16631_v42 }
 0x9b9   : > { %v6401_v59 = vsel %vm3879_vm8, %v6400_v6, %v6399_v46  ;;  %v6410_v35 = vrot.slane %v6388_v36, 6  ;;  %v5017_v8 = vrot.slane %v5010_v60, %v16631_v42  ;;  %v6412_v25 = vrot.slane %v6389_v32, 5 }
 0x9ba   : > { %v6403_v3 = vsel %vm3882_vm9, %v6402_v40, %v6401_v59  ;;  %v6409_v50 = vsel %vm3870_vm5, %v6408_v54, %v6386_v21  ;;  %v4969_v20 = vcombine.high %v4959_v56, %v4967_v38  ;;  %v6404_v18 = vrot.slane %v18245_v52, 2  ;;  %v21018_v59 = vld [vmem:[#allocation67_spill] sm:$0xff] }
 0x9bb   : > { %v6411_v49 = vsel %vm3873_vm6, %v6410_v35, %v6409_v50  ;;  %v6414_v51 = vrot.slane %v6390_v39, 4  ;;  %v5018_v15 = vcombine.low %v5009_v43, %v5017_v8  ;;  %v5019_v48 = vcombine.high %v5009_v43, %v5017_v8  ;;  %v21019_v8 = vld [vmem:[#allocation68_spill] sm:$0xff]  ;;  %v21020_v50 = vld [vmem:[#allocation69_spill] sm:$0xff] }
 0x9bc   : > { %v6413_v26 = vsel %vm3876_vm7, %v6412_v25, %v6411_v49  ;;  %v6416_v61 = vrot.slane %v6391_v31, 3  ;;  %v6405_v36 = vsel %vm3885_vm10, %v6404_v18, %v6403_v3  ;;  %v6406_v62 = vrot.slane %v18255_v19, 1 }
 0x9bd   : > { %v6415_v0 = vsel %vm3879_vm8, %v6414_v51, %v6413_v26  ;;  %v6418_v47 = vrot.slane %v6392_v13, 2  ;;  %v5020_v21 = vpack.c.bf16 %v5018_v15, %v4968_v23  ;;  %v5021_v32 = vpack.c.bf16 %v5019_v48, %v4969_v20  ;;  %v21021_v20 = vld [vmem:[#allocation64_spill] sm:$0xff] }
 0x9be   : > { %v6417_v56 = vsel %vm3882_vm9, %v6416_v61, %v6415_v0  ;;  %v6420_v52 = vrot.slane %v6393_v27, 1  ;;  %v6209_v39 = vrot.slane %v18243_v45, %v16951_v7  ;;  %v6213_v31 = vrot.slane %v18243_v45, %v16954_v55  ;;  %v21025_v61 = vld [vmem:[#allocation53_spill] sm:$0xff] }
 0x9bf   : > { %v6419_v38 = vsel %vm3885_vm10, %v6418_v47, %v6417_v56  ;;  %14474 = vmatpush3.bf16.msra.mxu1 %v5020_v21  ;;  %14480 = vmatpush3.bf16.msra.mxu0 %v5021_v32  ;;  %v6407_v19 = vsel %vm3888_vm11, %v6406_v62, %v6405_v36  ;;  %v6217_v30 = vrot.slane %v18243_v45, %v16957_v14  ;;  %v21026_v36 = vld [vmem:[#allocation51_spill] sm:$0xff] }
 0x9c0   : > { %v6421_v4 = vsel %vm3888_vm11, %v6420_v52, %v6419_v38  ;;  %v6241_v33 = vrot.slane %v18282_v29, %v16951_v7  ;;  %v6245_v2 = vrot.slane %v18282_v29, %v16954_v55  ;;  %v6205_v22 = vrot.slane %v18243_v45, %v16948_v24  ;;  %v21027_v21 = vld [vmem:[#allocation63_spill] sm:$0xff] }
 0x9c1   : > { %v6422_v13 = vpack.c.b16 %v6421_v4, %v6407_v19  ;;  %v6221_v44 = vrot.slane %v18243_v45, %v16960_v9  ;;  %v6225_v27 = vrot.slane %v18243_v45, %v16963_v57  ;;  %v6229_v41 = vrot.slane %v18243_v45, %v16966_v16 }
 0x9c2   : > { %v6249_v6 = vrot.slane %v18282_v29, %v16957_v14  ;;  %v6315_v60 = vmul.f32 %v18101_v12, %v6209_v39  ;;  %v6316_v46 = vmul.f32 %v18103_v58, %v6213_v31  ;;  %v6233_v40 = vrot.slane %v18243_v45, %v16975_v10 }
 0x9c3   : > { %14476 = vmatmul.mubr.msk.bf16.vlgmr.msra.gmra.mrb[24].mxu1 %vm2496_vm3, %v6422_v13  ;;  %v6237_v54 = vrot.slane %v18282_v29, %v16948_v24  ;;  %v6253_v23 = vrot.slane %v18282_v29, %v16960_v9  ;;  %v6257_v43 = vrot.slane %v18282_v29, %v16963_v57  ;;  %v6261_v12 = vrot.slane %v18282_v29, %v16966_v16 }
 0x9c4   : > { %14489 = vmatprep.mubr.msk.bf16.mxu1 %vm1489_vm1, %v6814_v1  ;;  %v6317_v58 = vmul.f32 %v18109_v28, %v6217_v30  ;;  %v6323_v63 = vmul.f32 %v18132_v5, %v6241_v33  ;;  %v6324_v17 = vmul.f32 %v18138_v11, %v6245_v2  ;;  %v6265_v45 = vrot.slane %v18282_v29, %v16975_v10  ;;  %v21022_v28 = vld [vmem:[#allocation62_spill] sm:$0xff]  ;;  %v21024_v11 = vld [vmem:[#allocation55_spill] sm:$0xff] }
 0x9c5   : > { %v6314_v1 = vmul.f32 %v18096_v53, %v6205_v22  ;;  %v6318_v35 = vmul.f32 %v21018_v59, %v6221_v44  ;;  %v6319_v3 = vmul.f32 %v21019_v8, %v6225_v27  ;;  %v6320_v25 = vmul.f32 %v21020_v50, %v6229_v41  ;;  %v21023_v5 = vld [vmem:[#allocation50_spill] sm:$0xff] }
 0x9c6   : > { %v6325_v18 = vmul.f32 %v21021_v20, %v6249_v6  ;;  %v6347_v49 = vpack.c.bf16 %v6315_v60, %v6315_v60  ;;  %v6348_v51 = vpack.c.bf16 %v6316_v46, %v6316_v46  ;;  %v6321_v15 = vmul.f32 %v21022_v28, %v6233_v40 }
 0x9c7   : > { %v6322_v48 = vmul.f32 %v21023_v5, %v6237_v54  ;;  %v6326_v26 = vmul.f32 %v21024_v11, %v6253_v23  ;;  %v6327_v29 = vmul.f32 %v21025_v61, %v6257_v43  ;;  %v6328_v53 = vmul.f32 %v21026_v36, %v6261_v12 }
 0x9c8   : > { %v6349_v62 = vpack.c.bf16 %v6317_v58, %v6317_v58  ;;  %v6355_v0 = vpack.c.bf16 %v6323_v63, %v6323_v63  ;;  %v6356_v47 = vpack.c.bf16 %v6324_v17, %v6324_v17  ;;  %v6329_v32 = vmul.f32 %v21027_v21, %v6265_v45 }
 0x9c9   : > { %v6346_v56 = vpack.c.bf16 %v6314_v1, %v6314_v1  ;;  %v6350_v52 = vpack.c.bf16 %v6318_v35, %v6318_v35  ;;  %v6351_v38 = vpack.c.bf16 %v6319_v3, %v6319_v3  ;;  %v6352_v39 = vpack.c.bf16 %v6320_v25, %v6320_v25 }
 0x9ca   : > { %v6357_v31 = vpack.c.bf16 %v6325_v18, %v6325_v18  ;;  %v6484_v19 = vunpack.c.l.b16 %v6347_v49  ;;  %v6485_v4 = vunpack.c.l.b16 %v6348_v51  ;;  %v6353_v13 = vpack.c.bf16 %v6321_v15, %v6321_v15 }
 0x9cb   : > { %v6354_v30 = vpack.c.bf16 %v6322_v48, %v6322_v48  ;;  %v6358_v33 = vpack.c.bf16 %v6326_v26, %v6326_v26  ;;  %v6359_v2 = vpack.c.bf16 %v6327_v29, %v6327_v29  ;;  %v6360_v22 = vpack.c.bf16 %v6328_v53, %v6328_v53 }
 0x9cc   : > { %v6486_v44 = vunpack.c.l.b16 %v6349_v62  ;;  %v6492_v27 = vunpack.c.l.b16 %v6355_v0  ;;  %v6493_v41 = vunpack.c.l.b16 %v6356_v47  ;;  %v6361_v6 = vpack.c.bf16 %v6329_v32, %v6329_v32 }
 0x9cd   : > { %v6483_v60 = vunpack.c.l.b16 %v6346_v56  ;;  %v6487_v46 = vunpack.c.l.b16 %v6350_v52  ;;  %v6488_v40 = vunpack.c.l.b16 %v6351_v38  ;;  %v6489_v54 = vunpack.c.l.b16 %v6352_v39  ;;  %v14899_v39 = vld [vmem:[%s21028_s11] sm:$0xff]   ;;  %s21040_s11 = scalar_lea.vmem [#allocation15], %s16465_s6 }
 0x9ce   : > { %v6494_v23 = vunpack.c.l.b16 %v6357_v31  ;;  %v6499_v43 = vrot.slane %v6484_v19, 7  ;;  %v6501_v12 = vrot.slane %v6485_v4, 6  ;;  %v6490_v58 = vunpack.c.l.b16 %v6353_v13  ;;  %14485 = vmatprep.subr.bf16.mxu1 %v14899_v39 }
 0x9cf   : > { %v6491_v63 = vunpack.c.l.b16 %v6354_v30  ;;  %v6495_v17 = vunpack.c.l.b16 %v6358_v33  ;;  %v6496_v45 = vunpack.c.l.b16 %v6359_v2  ;;  %v6503_v59 = vrot.slane %v6486_v44, 5  ;;  %14486 = vmatpush3.bf16.msra.mxu1 %v14899_v39 }
 0x9d0   : > { %v6500_v1 = vsel %vm3870_vm5, %v6499_v43, %v6483_v60  ;;  %v6513_v35 = vrot.slane %v6492_v27, 7  ;;  %v6515_v8 = vrot.slane %v6493_v41, 6  ;;  %v6497_v3 = vunpack.c.l.b16 %v6360_v22 }
 0x9d1   : > { %v6498_v50 = vunpack.c.l.b16 %v6361_v6  ;;  %v6502_v25 = vsel %vm3873_vm6, %v6501_v12, %v6500_v1  ;;  %v6505_v20 = vrot.slane %v6487_v46, 4  ;;  %v6507_v49 = vrot.slane %v6488_v40, 3 }
 0x9d2   : > { %v6504_v18 = vsel %vm3876_vm7, %v6503_v59, %v6502_v25  ;;  %v6514_v51 = vsel %vm3870_vm5, %v6513_v35, %v6491_v63  ;;  %v6517_v28 = vrot.slane %v6494_v23, 5  ;;  %v6509_v5 = vrot.slane %v6489_v54, 2 }
 0x9d3   : > { %v6506_v15 = vsel %vm3879_vm8, %v6505_v20, %v6504_v18  ;;  %v6516_v48 = vsel %vm3873_vm6, %v6515_v8, %v6514_v51  ;;  %v6519_v11 = vrot.slane %v6495_v17, 4  ;;  %v6521_v29 = vrot.slane %v6496_v45, 3 }
 0x9d4   : > { %v6508_v26 = vsel %vm3882_vm9, %v6507_v49, %v6506_v15  ;;  %v6518_v61 = vsel %vm3876_vm7, %v6517_v28, %v6516_v48  ;;  %v6523_v62 = vrot.slane %v6497_v3, 2  ;;  %v6511_v0 = vrot.slane %v6490_v58, 1 }
 0x9d5   : > { %v6510_v36 = vsel %vm3885_vm10, %v6509_v5, %v6508_v26  ;;  %v6520_v53 = vsel %vm3879_vm8, %v6519_v11, %v6518_v61  ;;  %v6525_v21 = vrot.slane %v6498_v50, 1 }
 0x9d6   : > { %v6522_v47 = vsel %vm3882_vm9, %v6521_v29, %v6520_v53  ;;  %v6512_v56 = vsel %vm3888_vm11, %v6511_v0, %v6510_v36 }
 0x9d7   : > { %v6524_v32 = vsel %vm3885_vm10, %v6523_v62, %v6522_v47 }
 0x9d8   : > { %v6526_v52 = vsel %vm3888_vm11, %v6525_v21, %v6524_v32 }
 0x9d9   : > { %v6527_v38 = vpack.c.b16 %v6526_v52, %v6512_v56 }
 0x9db   : > { %14482 = vmatmul.mubr.msk.bf16.vlgmr.msra.gmra.mrb[12].mxu0 %vm2496_vm3, %v6527_v38  ;;  %v14900_v38 = vld [vmem:[%s21029_s17 + $0x8] sm:$0xff]   ;;  %s21041_s17 = scalar_lea.vmem [#allocation20], %s16473_s26 }
 0x9dc   : > { %14487 = vmatprep.subr.bf16.mxu1 %v14900_v38 }
 0x9dd   : > { %14488 = vmatpush3.bf16.msra.mxu1 %v14900_v38 }
 0xa96   : > { %v6460_v31 = vpop.f32.mrb[24].mxu1 }
 0xa97   : > { %v14477_v19 = vpop.f32.mrb[25].mxu1  ;;  %v6572_v30 = vcombine.high %v6460_v31, %v21014_v37  ;;  %v6579_v2 = vrot.slane %v6460_v31, %v21015_v34 }
 0xa98   : > { %v6463_v4 = vpop.f32.mrb[26].mxu1 }
 0xa99   : > { %v14478_v13 = vpop.f32.mrb[27].mxu1  ;;  %v6586_v41 = vrot.slane %v6572_v30, %v21015_v34  ;;  %v6638_v6 = vcombine.high %v6463_v4, %v21014_v37  ;;  %v6645_v12 = vrot.slane %v6463_v4, %v21015_v34 }
 0xa9b   : > { %v6652_v59 = vrot.slane %v6638_v6, %v21015_v34 }
 0xaae   : > { %v6565_v33 = vpop.f32.mrb[12].mxu0 }
 0xaaf   : > { %v6587_v22 = vcombine.high %v6565_v33, %v21014_v37  ;;  %v6594_v44 = vrot.slane %v6565_v33, %v21015_v34  ;;  %v14483_v27 = vpop.f32.mrb[13].mxu0 }
 0xab0   : > { %v6568_v60 = vpop.f32.mrb[14].mxu0 }
 0xab1   : > { %v6601_v46 = vrot.slane %v6587_v22, %v21015_v34  ;;  %v6602_v40 = vcombine.low %v6579_v2, %v6594_v44  ;;  %v6603_v54 = vcombine.high %v6579_v2, %v6594_v44  ;;  %v6653_v23 = vcombine.high %v6568_v60, %v21014_v37  ;;  %v14484_v43 = vpop.f32.mrb[15].mxu0 }
 0xab2   : > { %v6660_v58 = vrot.slane %v6568_v60, %v21015_v34 }
 0xab3   : > { %v6610_v63 = vrot.slane %v6602_v40, %v16631_v42  ;;  %v6617_v17 = vrot.slane %v6603_v54, %v16631_v42  ;;  %v6618_v45 = vcombine.low %v6586_v41, %v6601_v46  ;;  %v6619_v1 = vcombine.high %v6586_v41, %v6601_v46 }
 0xab4   : > { %v6667_v35 = vrot.slane %v6653_v23, %v21015_v34  ;;  %v6668_v8 = vcombine.low %v6645_v12, %v6660_v58  ;;  %v6669_v3 = vcombine.high %v6645_v12, %v6660_v58 }
 0xab5   : > { %v6626_v50 = vrot.slane %v6618_v45, %v16631_v42  ;;  %v6633_v25 = vrot.slane %v6619_v1, %v16631_v42  ;;  %v6704_v20 = vcombine.low %v6610_v63, %v6617_v17  ;;  %v14133_v18 = vcombine.high %v6610_v63, %v6617_v17  ;;  %v15257_v17 = vld [vmem:[#allocation2] sm:$0xff] }
 0xab6   : > { %v6676_v49 = vrot.slane %v6668_v8, %v16631_v42  ;;  %v6683_v51 = vrot.slane %v6669_v3, %v16631_v42  ;;  %v6684_v28 = vcombine.low %v6652_v59, %v6667_v35  ;;  %v6685_v15 = vcombine.high %v6652_v59, %v6667_v35  ;;  %v15258_v35 = vld [vmem:[#allocation2 + $0x10] sm:$0xff]  ;;  %v15259_v3 = vld [vmem:[#allocation2 + $0x8] sm:$0xff] }
 0xab7   : > { %v6711_v5 = vrot.slane %v6704_v20, %v21015_v34  ;;  %v6719_v48 = vrot.slane %v14133_v18, %v21015_v34  ;;  %v6720_v11 = vcombine.low %v6626_v50, %v6633_v25  ;;  %v14134_v26 = vcombine.high %v6626_v50, %v6633_v25  ;;  %v15260_v18 = vld [vmem:[#allocation2 + $0x18] sm:$0xff] }
 0xab8   : > { %v6692_v61 = vrot.slane %v6684_v28, %v16631_v42  ;;  %v6699_v29 = vrot.slane %v6685_v15, %v16631_v42  ;;  %v6754_v36 = vcombine.low %v6676_v49, %v6683_v51  ;;  %v14135_v53 = vcombine.high %v6676_v49, %v6683_v51  ;;  %v14901_v15 = vld [vmem:[%s21034_s16] sm:$0xff]   ;;  %s21042_s16 = smov %s21041_s17 }
 0xab9   : > { %v6727_v62 = vrot.slane %v6720_v11, %v21015_v34  ;;  %v6735_v0 = vrot.slane %v14134_v26, %v21015_v34  ;;  %v6736_v47 = vcombine.low %v6711_v5, %v6719_v48  ;;  %v14902_v5 = vld [vmem:[%s21035_s8 + $0x8] sm:$0xff]   ;;  %v6965_v48 = vld [vmem:[%s21036_s29] sm:$0xff]  ;;  %14501 = vmatprep.subr.bf16.mxu1 %v14901_v15 }
 0xaba   : > { %v6761_v21 = vrot.slane %v6754_v36, %v21015_v34  ;;  %v6769_v32 = vrot.slane %v14135_v53, %v21015_v34  ;;  %v6770_v56 = vcombine.low %v6692_v61, %v6699_v29  ;;  %v14136_v52 = vcombine.high %v6692_v61, %v6699_v29  ;;  %v6966_v11 = vld [vmem:[%s21036_s29 + $0x8] sm:$0xff]  ;;  %v6967_v61 = vld [vmem:[%s21036_s29 + $0x10] sm:$0xff]  ;;  %v6968_v29 = vld [vmem:[%s21036_s29 + $0x18] sm:$0xff] }
 0xabb   : > { %v6744_v39 = vcombine.low %v6727_v62, %v6735_v0  ;;  %v6743_v13 = vrot.slane %v6736_v47, %v16631_v42  ;;  %v18446_v26 = vpack.c.bf16 %v6966_v11, %v6965_v48  ;;  %v18456_v36 = vpack.c.bf16 %v6968_v29, %v6967_v61  ;;  %v14142_v61 = vld [vmem:[%s21040_s11] ss:$0 sm:$0xff]  ;;  %s21162_s11 = sld [smem:[#allocation99_spill]] (!%p14283_p0) }
 0xabc   : > { %v6777_v31 = vrot.slane %v6770_v56, %v21015_v34  ;;  %v6785_v19 = vrot.slane %v14136_v52, %v21015_v34  ;;  %v6786_v4 = vcombine.low %v6761_v21, %v6769_v32 }
 0xabd   : > { %v6751_v30 = vrot.slane %v6744_v39, %v16631_v42 }
 0xabe   : > { %v6794_v33 = vcombine.low %v6777_v31, %v6785_v19  ;;  %v6793_v44 = vrot.slane %v6786_v4, %v16631_v42 }
 0xabf   : > { %v6752_v2 = vcombine.low %v6743_v13, %v6751_v30  ;;  %v6753_v22 = vcombine.high %v6743_v13, %v6751_v30 }
 0xac0   : > { %v6801_v27 = vrot.slane %v6794_v33, %v16631_v42 }
 0xac2   : > { %v6803_v41 = vcombine.high %v6793_v44, %v6801_v27  ;;  %v6802_v6 = vcombine.low %v6793_v44, %v6801_v27 }
 0xac4   : > { %v14878_v60 = vpack.i.bf16 %v6803_v41, %v6753_v22  ;;  %v14903_v41 = vld [vmem:[%s21037_s12] sm:$0xff]   ;;  %s21161_s12 = sld [smem:[#allocation98_spill]] (!%p14283_p0) }
 0xac5   : > { %14493 = vmatprep.subr.bf16.mxu0 %v14903_v41 }
 0xac6   : > { %14879 = vrot.lane.b32.xlu1 %v14878_v60, %s15788_s3  ;;  %14494 = vmatpush3.bf16.msra.mxu0 %v14903_v41 }
 0xb38   : > { %v14880_v46 = vpop.permute.xlu1 %14879 }
 0xb39   : > { %v14882_v40 = vunpack.i.h.bf16 %v14880_v46  ;;  %v14881_v54 = vunpack.i.l.bf16 %v14880_v46 }
 0xb3b   : > { %v6812_v23 = vsel %vm2496_vm3, %v6752_v2, %v14881_v54  ;;  %v6813_v43 = vsel %vm2496_vm3, %v6802_v6, %v14882_v40  ;;  %v14904_v6 = vld [vmem:[%s21038_s2 + $0x8] sm:$0xff]  }
 0xb3c   : > { %v6815_v12 = vpack.c.bf16 %v6813_v43, %v6812_v23  ;;  %14495 = vmatprep.subr.bf16.mxu0 %v14904_v6 }
 0xb3d   : > { %14496 = vmatpush3.bf16.msra.mxu0 %v14904_v6 }
 0xb3e   : > { %14490 = vmatmul.mubr.msk.bf16.vlgmr.msra.gmra.mrb[28].mxu1 %vm1489_vm1, %v6815_v12 }
 0xb3f   : > { %14502 = vmatpush3.bf16.msra.mxu1 %v14901_v15  ;;  %14505 = vmatprep.mubr.msk.bf16.mxu1 %vm1489_vm1, %v18446_v26 }
 0xb40   : > { %14503 = vmatprep.subr.bf16.mxu1 %v14902_v5 }
 0xb43   : > { %14504 = vmatpush3.bf16.msra.mxu1 %v14902_v5 }
 0xb44   : > { %14517 = vmatprep.subr.bf16.mxu1 %v21014_v37 }
 0xb46   : > { %14506 = vmatmul.mubr.msk.bf16.vlgmr.msra.gmra.mrb[32].mxu1 %vm1489_vm1, %v18456_v36 }
 0xb47   : > { %14519 = vmatprep.mubr.msk.bf16.mxu1 %vm15784_vm2, %v21014_v37 }
 0xc11   : > { %v14491_v58 = vpop.f32.mrb[28].mxu1 }
 0xc12   : > { %v6872_v63 = vpop.f32.mrb[29].mxu1  ;;  %v18422_v8 = vadd.f32 %v15258_v35, %v14491_v58 }
 0xc13   : > { %v18420_v45 = vadd.f32 %v15257_v17, %v6872_v63  ;;  %v14492_v1 = vpop.f32.mrb[30].mxu1 }
 0xc14   : > { %v6875_v59 = vpop.f32.mrb[31].mxu1  ;;  %21031 = vst [vmem:[#allocation61_spill] sm:$0xff] %v18422_v8  ;;  %v18430_v49 = vadd.f32 %v15260_v18, %v14492_v1  ;;  %v6899_v51 = vsel %vm1489_vm1, %v18422_v8, 0.0 }
 0xc15   : > { %21030 = vst [vmem:[#allocation60_spill] sm:$0xff] %v18420_v45  ;;  %v18424_v50 = vadd.f32 %v15259_v3, %v6875_v59  ;;  %v6893_v25 = vsel %vm1489_vm1, %v18420_v45, 0.0 }
 0xc16   : > { %6894 = vadd.xlane.f32.xlu0 %v6893_v25  ;;  %21033 = vst [vmem:[#allocation59_spill] sm:$0xff] %v18430_v49  ;;  %v6902_v28 = vsel %vm1489_vm1, %v18430_v49, 0.0 }
 0xc17   : > { %21032 = vst [vmem:[#allocation66_spill] sm:$0xff] %v18424_v50  ;;  %v6896_v20 = vsel %vm1489_vm1, %v18424_v50, 0.0 }
 0xc18   : > { %6897 = vadd.xlane.f32.xlu1 %v6896_v20 }
 0xc19   : > { %v18475_v60 = vpop.f32.mrb[32].mxu1 }
 0xc1a   : > { %6900 = vadd.xlane.f32.xlu0 %v6899_v51  ;;  %v7104_v46 = vpop.f32.mrb[33].mxu1  ;;  %v14141_v51 = vld [vmem:[%s21039_s14] ss:$0 sm:$0xff] }
 0xc1b   : > { %v18477_v40 = vpop.f32.mrb[34].mxu1 }
 0xc1c   : > { %v7107_v54 = vpop.f32.mrb[35].mxu1 }
 0xc1e   : > { %6903 = vadd.xlane.f32.xlu0 %v6902_v28 }
 0xca3   : > { %v6895_v53 = vpop.xlane.xlu0 %6894 }
 0xca4   : > { %v6905_v62 = vmul.f32 0.03125, %v6895_v53 }
 0xca5   : > { %v6898_v0 = vpop.xlane.xlu1 %6897 }
 0xca6   : > { %v6909_v47 = vsub.f32 %v18420_v45, %v6905_v62  ;;  %v6906_v21 = vmul.f32 0.03125, %v6898_v0 }
 0xca7   : > { %v6901_v32 = vpop.xlane.xlu0 %6900 }
 0xca8   : > { %v6910_v56 = vsub.f32 %v18424_v50, %v6906_v21  ;;  %v6907_v52 = vmul.f32 0.03125, %v6901_v32  ;;  %v6913_v38 = vmul.f32 %v6909_v47, %v6909_v47 }
 0xcaa   : > { %v6911_v39 = vsub.f32 %v18422_v8, %v6907_v52  ;;  %v6917_v31 = vsel %vm1489_vm1, %v6913_v38, 0.0  ;;  %v6914_v19 = vmul.f32 %v6910_v56, %v6910_v56 }
 0xcab   : > { %6918 = vadd.xlane.f32.xlu0 %v6917_v31  ;;  %v6904_v4 = vpop.xlane.xlu0 %6903 }
 0xcac   : > { %v6908_v13 = vmul.f32 0.03125, %v6904_v4  ;;  %v6920_v30 = vsel %vm1489_vm1, %v6914_v19, 0.0  ;;  %v6915_v33 = vmul.f32 %v6911_v39, %v6911_v39 }
 0xcad   : > { %6921 = vadd.xlane.f32.xlu1 %v6920_v30 }
 0xcae   : > { %v6912_v2 = vsub.f32 %v18430_v49, %v6908_v13  ;;  %v6923_v22 = vsel %vm1489_vm1, %v6915_v33, 0.0  ;;  %v7434_v13 = vcombine.high %v7104_v46, %v21014_v37  ;;  %v7500_v33 = vcombine.high %v7107_v54, %v21014_v37 }
 0xcaf   : > { %6924 = vadd.xlane.f32.xlu0 %v6923_v22  ;;  %v7441_v22 = vrot.slane %v7104_v46, %v21015_v34 }
 0xcb0   : > { %v6916_v44 = vmul.f32 %v6912_v2, %v6912_v2  ;;  %v7514_v6 = vrot.slane %v7500_v33, %v21015_v34 }
 0xcb2   : > { %v6926_v27 = vsel %vm1489_vm1, %v6916_v44, 0.0  ;;  %v7448_v44 = vrot.slane %v7434_v13, %v21015_v34 }
 0xcb3   : > { %6927 = vadd.xlane.f32.xlu1 %v6926_v27 }
 0xcc4   : > { %7430 = vrot.lane.b32.xlu1 %v7107_v54, %s15783_s1 }
 0xcc5   : > { %7428 = vrot.lane.b32.xlu0 %v7104_v46, %s15783_s1 }
 0xd38   : > { %v6919_v23 = vpop.xlane.xlu0 %6918 }
 0xd39   : > { %v6929_v43 = vmul.f32 0.03125, %v6919_v23 }
 0xd3a   : > { %v6922_v12 = vpop.xlane.xlu1 %6921 }
 0xd3b   : > { %v6933_v58 = vadd.f32 1e-05, %v6929_v43  ;;  %v6930_v63 = vmul.f32 0.03125, %v6922_v12 }
 0xd3c   : > { %v6925_v17 = vpop.xlane.xlu0 %6924 }
 0xd3d   : > { %15087 = vrsqrt.f32 %v6933_v58  ;;  %v6934_v1 = vadd.f32 1e-05, %v6930_v63  ;;  %v6931_v59 = vmul.f32 0.03125, %v6925_v17 }
 0xd3f   : > { %15089 = vrsqrt.f32 %v6934_v1  ;;  %v6935_v35 = vadd.f32 1e-05, %v6931_v59 }
 0xd40   : > { %v6928_v3 = vpop.xlane.xlu1 %6927 }
 0xd41   : > { %15091 = vrsqrt.f32 %v6935_v35  ;;  %v6932_v25 = vmul.f32 0.03125, %v6928_v3 }
 0xd43   : > { %v6936_v20 = vadd.f32 1e-05, %v6932_v25 }
 0xd45   : > { %15093 = vrsqrt.f32 %v6936_v20 }
 0xd47   : > { %v15088_v18 = vpop.eup %15087 }
 0xd48   : > { %v6941_v28 = vmul.f32 %v15088_v18, %v6909_v47 }
 0xd49   : > { %v15090_v15 = vpop.eup %15089 }
 0xd4a   : > { %v6942_v5 = vmul.f32 %v15090_v15, %v6910_v56  ;;  %v6951_v48 = vmul.f32 %v14141_v51, %v6941_v28  ;;  %v7429_v56 = vpop.permute.xlu0 %7428 }
 0xd4b   : > { %v15092_v11 = vpop.eup %15091  ;;  %v7449_v30 = vcombine.high %v7429_v56, %v21014_v37  ;;  %v7456_v27 = vrot.slane %v7429_v56, %v21015_v34 }
 0xd4c   : > { %v6943_v29 = vmul.f32 %v15092_v11, %v6911_v39  ;;  %v6952_v53 = vmul.f32 %v14141_v51, %v6942_v5  ;;  %v6961_v62 = vadd.f32 %v14142_v61, %v6951_v48  ;;  %v7431_v39 = vpop.permute.xlu1 %7430 }
 0xd4d   : > { %v7463_v41 = vrot.slane %v7449_v30, %v21015_v34  ;;  %v7522_v23 = vrot.slane %v7431_v39, %v21015_v34  ;;  %v7464_v12 = vcombine.low %v7441_v22, %v7456_v27  ;;  %v7465_v58 = vcombine.high %v7441_v22, %v7456_v27 }
 0xd4e   : > { %v6962_v0 = vadd.f32 %v14142_v61, %v6952_v53  ;;  %v6953_v32 = vmul.f32 %v14141_v51, %v6943_v29 }
 0xd4f   : > { %v15094_v21 = vpop.eup %15093  ;;  %v7480_v63 = vcombine.low %v7448_v44, %v7463_v41  ;;  %v7481_v17 = vcombine.high %v7448_v44, %v7463_v41  ;;  %v7472_v3 = vrot.slane %v7464_v12, %v16631_v42  ;;  %v7479_v25 = vrot.slane %v7465_v58, %v16631_v42 }
 0xd50   : > { %v6944_v52 = vmul.f32 %v15094_v21, %v6912_v2  ;;  %v6969_v38 = vpack.c.bf16 %v6962_v0, %v6961_v62  ;;  %v6963_v19 = vadd.f32 %v14142_v61, %v6953_v32  ;;  %v7515_v2 = vcombine.high %v7431_v39, %v21014_v37  ;;  %v14905_v21 = vld [vmem:[%s21041_s17] sm:$0xff]  }
 0xd51   : > { %v7495_v20 = vrot.slane %v7481_v17, %v16631_v42  ;;  %v7566_v5 = vcombine.low %v7472_v3, %v7479_v25  ;;  %v14159_v48 = vcombine.high %v7472_v3, %v7479_v25  ;;  %14509 = vmatprep.subr.bf16.mxu0 %v14905_v21  ;;  %v14906_v39 = vld [vmem:[%s21042_s16 + $0x8] sm:$0xff]  }
 0xd52   : > { %v6954_v31 = vmul.f32 %v14141_v51, %v6944_v52  ;;  %14497 = vmatprep.mubr.msk.bf16.mxu0 %vm1489_vm1, %v6969_v38  ;;  %v7529_v43 = vrot.slane %v7515_v2, %v21015_v34 }
 0xd53   : > { %v7573_v32 = vrot.slane %v7566_v5, %v21015_v34  ;;  %v7581_v52 = vrot.slane %v14159_v48, %v21015_v34 }
 0xd54   : > { %v6964_v4 = vadd.f32 %v14142_v61, %v6954_v31  ;;  %v7546_v59 = vcombine.low %v7514_v6, %v7529_v43  ;;  %v7547_v35 = vcombine.high %v7514_v6, %v7529_v43 }
 0xd55   : > { %v7598_v13 = vcombine.low %v7573_v32, %v7581_v52 }
 0xd56   : > { %v6970_v47 = vpack.c.bf16 %v6964_v4, %v6963_v19  ;;  %v7554_v28 = vrot.slane %v7546_v59, %v16631_v42  ;;  %v7561_v15 = vrot.slane %v7547_v35, %v16631_v42 }
 0xd57   : > { %v7605_v22 = vrot.slane %v7598_v13, %v16631_v42 }
 0xd58   : > { %14498 = vmatmul.mubr.msk.bf16.vlgmr.msra.gmra.mrb[16].mxu0 %vm1489_vm1, %v6970_v47  ;;  %v7632_v62 = vcombine.low %v7554_v28, %v7561_v15  ;;  %v14162_v0 = vcombine.high %v7554_v28, %v7561_v15 }
 0xd59   : > { %14513 = vmatprep.mubr.msk.bf16.mxu0 %vm1489_vm1, %v18446_v26  ;;  %v7507_v26 = vrot.slane %v7107_v54, %v21015_v34  ;;  %v7488_v54 = vrot.slane %v7480_v63, %v16631_v42  ;;  %14510 = vmatpush3.bf16.msra.mxu0 %v14905_v21 }
 0xd5a   : > { %v7639_v47 = vrot.slane %v7632_v62, %v21015_v34  ;;  %v7647_v56 = vrot.slane %v14162_v0, %v21015_v34  ;;  %14511 = vmatprep.subr.bf16.mxu0 %v14906_v39 }
 0xd5b   : > { %v7530_v1 = vcombine.low %v7507_v26, %v7522_v23  ;;  %v7531_v46 = vcombine.high %v7507_v26, %v7522_v23  ;;  %v7582_v11 = vcombine.low %v7488_v54, %v7495_v20  ;;  %v14160_v61 = vcombine.high %v7488_v54, %v7495_v20 }
 0xd5c   : > { %v7656_v2 = vcombine.low %v7639_v47, %v7647_v56 }
 0xd5d   : > { %v7538_v18 = vrot.slane %v7530_v1, %v16631_v42  ;;  %v7545_v51 = vrot.slane %v7531_v46, %v16631_v42  ;;  %v7589_v38 = vrot.slane %v7582_v11, %v21015_v34  ;;  %v7597_v31 = vrot.slane %v14160_v61, %v21015_v34  ;;  %14512 = vmatpush3.bf16.msra.mxu0 %v14906_v39 }
 0xd5e   : > { %14523 = vmatprep.subr.bf16.mxu0 %v21014_v37  ;;  %v7663_v41 = vrot.slane %v7656_v2, %v16631_v42 }
 0xd5f   : > { %v7616_v29 = vcombine.low %v7538_v18, %v7545_v51  ;;  %v14161_v53 = vcombine.high %v7538_v18, %v7545_v51  ;;  %v7606_v30 = vcombine.low %v7589_v38, %v7597_v31 }
 0xd60   : > { %14514 = vmatmul.mubr.msk.bf16.vlgmr.msra.gmra.mrb[20].mxu0 %vm1489_vm1, %v18456_v36 }
 0xd61   : > { %v7623_v19 = vrot.slane %v7616_v29, %v21015_v34  ;;  %v7631_v4 = vrot.slane %v14161_v53, %v21015_v34  ;;  %v7613_v44 = vrot.slane %v7606_v30, %v16631_v42  ;;  %14525 = vmatprep.mubr.msk.bf16.mxu0 %vm15784_vm2, %v21014_v37 }
 0xd63   : > { %v7648_v33 = vcombine.low %v7623_v19, %v7631_v4  ;;  %v7614_v26 = vcombine.low %v7605_v22, %v7613_v44  ;;  %v7615_v23 = vcombine.high %v7605_v22, %v7613_v44 }
 0xd65   : > { %v7655_v27 = vrot.slane %v7648_v33, %v16631_v42 }
 0xd67   : > { %v7664_v6 = vcombine.low %v7655_v27, %v7663_v41  ;;  %v7665_v43 = vcombine.high %v7655_v27, %v7663_v41 }
 0xd69   : > { %v7666_v12 = vpack.c.bf16 %v7664_v6, %v7614_v26  ;;  %v7667_v58 = vpack.c.bf16 %v7665_v43, %v7615_v23 }
 0xd6b   : > { %v7914_v63 = vsel %vm2496_vm3, %v7666_v12, 0  ;;  %v7961_v17 = vsel %vm2496_vm3, %v7667_v58, 0 }
 0xd6c   : > { %14518 = vmatpush3.bf16.xpose.msra.mxu1 %v7914_v63  ;;  %14524 = vmatpush3.bf16.xpose.msra.mxu0 %v7961_v17 }
 0xd6d   : > { %14529 = vmatprep.subr.bf16.mxu1 %v21014_v37  ;;  %14535 = vmatprep.subr.bf16.mxu0 %v21014_v37 }
 0xe2b   : > { %v18534_v36 = vpop.f32.mrb[16].mxu0 }
 0xe2c   : > { %21043 = vst [vmem:[#allocation65_spill] sm:$0xff] %v18534_v36  ;;  %v7027_v1 = vpop.f32.mrb[17].mxu0 }
 0xe2d   : > { %v7042_v46 = vmul.f32 0.25, %v7027_v1  ;;  %v18536_v59 = vpop.f32.mrb[18].mxu0 }
 0xe2e   : > { %21044 = vst [vmem:[#allocation52_spill] sm:$0xff] %v18536_v59  ;;  %v7030_v35 = vpop.f32.mrb[19].mxu0 }
 0xe2f   : > { %7186 = vrot.lane.b32.xlu1 %v7042_v46, %s15783_s1  ;;  %v7043_v3 = vmul.f32 0.25, %v7030_v35  ;;  %v7192_v51 = vcombine.high %v7042_v46, %v21014_v37  ;;  %v7199_v15 = vrot.slane %v7042_v46, %v21015_v34 }
 0xe31   : > { %v7206_v11 = vrot.slane %v7192_v51, %v21015_v34  ;;  %v7258_v62 = vcombine.high %v7043_v3, %v21014_v37  ;;  %v7265_v31 = vrot.slane %v7043_v3, %v21015_v34 }
 0xe33   : > { %7188 = vrot.lane.b32.xlu1 %v7043_v3, %s15783_s1  ;;  %v18540_v25 = vpop.f32.mrb[20].mxu0  ;;  %v7272_v30 = vrot.slane %v7258_v62, %v21015_v34 }
 0xe34   : > { %21045 = vst [vmem:[#allocation54_spill] sm:$0xff] %v18540_v25  ;;  %v18542_v54 = vpop.f32.mrb[21].mxu0 }
 0xe35   : > { %21046 = vst [vmem:[#allocation67_spill] sm:$0xff] %v18542_v54  ;;  %v18544_v20 = vpop.f32.mrb[22].mxu0 }
 0xe36   : > { %21047 = vst [vmem:[#allocation68_spill] sm:$0xff] %v18544_v20  ;;  %v18546_v18 = vpop.f32.mrb[23].mxu0 }
 0xe37   : > { %21048 = vst [vmem:[#allocation69_spill] sm:$0xff] %v18546_v18 }
 0xea1   : > { %v7187_v28 = vpop.permute.xlu1 %7186 }
 0xea2   : > { %v7207_v5 = vcombine.high %v7187_v28, %v21014_v37  ;;  %v7214_v48 = vrot.slane %v7187_v28, %v21015_v34 }
 0xea4   : > { %v7221_v61 = vrot.slane %v7207_v5, %v21015_v34  ;;  %v7222_v29 = vcombine.low %v7199_v15, %v7214_v48  ;;  %v7223_v53 = vcombine.high %v7199_v15, %v7214_v48 }
 0xea5   : > { %v7189_v0 = vpop.permute.xlu1 %7188 }
 0xea6   : > { %v7230_v21 = vrot.slane %v7222_v29, %v16631_v42  ;;  %v7237_v32 = vrot.slane %v7223_v53, %v16631_v42  ;;  %v7238_v52 = vcombine.low %v7206_v11, %v7221_v61  ;;  %v7239_v38 = vcombine.high %v7206_v11, %v7221_v61 }
 0xea7   : > { %v7273_v19 = vcombine.high %v7189_v0, %v21014_v37  ;;  %v7280_v4 = vrot.slane %v7189_v0, %v21015_v34 }
 0xea8   : > { %v7246_v47 = vrot.slane %v7238_v52, %v16631_v42  ;;  %v7253_v56 = vrot.slane %v7239_v38, %v16631_v42  ;;  %v7324_v39 = vcombine.low %v7230_v21, %v7237_v32  ;;  %v14155_v13 = vcombine.high %v7230_v21, %v7237_v32 }
 0xea9   : > { %v7287_v33 = vrot.slane %v7273_v19, %v21015_v34  ;;  %v7288_v2 = vcombine.low %v7265_v31, %v7280_v4  ;;  %v7289_v22 = vcombine.high %v7265_v31, %v7280_v4 }
 0xeaa   : > { %v7340_v44 = vcombine.low %v7246_v47, %v7253_v56  ;;  %v14156_v27 = vcombine.high %v7246_v47, %v7253_v56  ;;  %v7331_v43 = vrot.slane %v7324_v39, %v21015_v34  ;;  %v7339_v12 = vrot.slane %v14155_v13, %v21015_v34  ;;  %v18586_v13 = vld [vmem:[#allocation6] sm:$0x1] }
 0xeab   : > { %v7296_v41 = vrot.slane %v7288_v2, %v16631_v42  ;;  %v7303_v26 = vrot.slane %v7289_v22, %v16631_v42  ;;  %v7304_v6 = vcombine.low %v7272_v30, %v7287_v33  ;;  %v7305_v23 = vcombine.high %v7272_v30, %v7287_v33  ;;  %v21049_v33 = vld [vmem:[#allocation58_spill] sm:$0xff] }
 0xeac   : > { %v7347_v58 = vrot.slane %v7340_v44, %v21015_v34  ;;  %v7355_v63 = vrot.slane %v14156_v27, %v21015_v34  ;;  %v7356_v48 = vcombine.low %v7331_v43, %v7339_v12  ;;  %vm1483_vm13 = vcmp.gt.f32.partialorder %v18586_v13, 0.5 }
 0xead   : > { %v7312_v17 = vrot.slane %v7304_v6, %v16631_v42  ;;  %v7319_v1 = vrot.slane %v7305_v23, %v16631_v42  ;;  %v7374_v46 = vcombine.low %v7296_v41, %v7303_v26  ;;  %v14157_v35 = vcombine.high %v7296_v41, %v7303_v26 }
 0xeae   : > { %v7364_v3 = vcombine.low %v7347_v58, %v7355_v63  ;;  %v7363_v0 = vrot.slane %v7356_v48, %v16631_v42 }
 0xeaf   : > { %v7381_v51 = vrot.slane %v7374_v46, %v21015_v34  ;;  %v7389_v28 = vrot.slane %v14157_v35, %v21015_v34  ;;  %v7390_v15 = vcombine.low %v7312_v17, %v7319_v1  ;;  %v14158_v5 = vcombine.high %v7312_v17, %v7319_v1 }
 0xeb0   : > { %v7371_v53 = vrot.slane %v7364_v3, %v16631_v42 }
 0xeb1   : > { %v7397_v11 = vrot.slane %v7390_v15, %v21015_v34  ;;  %v7405_v61 = vrot.slane %v14158_v5, %v21015_v34  ;;  %v7406_v29 = vcombine.low %v7381_v51, %v7389_v28 }
 0xeb2   : > { %v7372_v52 = vcombine.low %v7363_v0, %v7371_v53  ;;  %v7373_v31 = vcombine.high %v7363_v0, %v7371_v53 }
 0xeb3   : > { %v7414_v62 = vcombine.low %v7397_v11, %v7405_v61  ;;  %v7413_v21 = vrot.slane %v7406_v29, %v16631_v42 }
 0xeb5   : > { %v7421_v32 = vrot.slane %v7414_v62, %v16631_v42 }
 0xeb7   : > { %v7422_v38 = vcombine.low %v7413_v21, %v7421_v32  ;;  %v7423_v19 = vcombine.high %v7413_v21, %v7421_v32 }
 0xeb9   : > { %v7424_v4 = vpack.c.bf16 %v7422_v38, %v7372_v52  ;;  %v7425_v47 = vpack.c.bf16 %v7423_v19, %v7373_v31 }
 0xebb   : > { %14520 = vmatmul.mubr.msk.bf16.vlgmr.msra.gmra.mrb[36].mxu1 %vm2496_vm3, %v7424_v4  ;;  %14526 = vmatmul.mubr.msk.bf16.vlgmr.msra.gmra.mrb[24].mxu0 %vm2496_vm3, %v7425_v47 }
 0xebc   : > { %14531 = vmatprep.mubr.msk.bf16.mxu1 %vm15784_vm2, %v21014_v37  ;;  %14537 = vmatprep.mubr.msk.bf16.mxu0 %vm15784_vm2, %v21014_v37 }
 0xf8e   : > { %v7950_v56 = vpop.f32.mrb[36].mxu1  ;;  %v7997_v39 = vpop.f32.mrb[24].mxu0 }
 0xf8f   : > { %v8010_v30 = vcombine.high %v7950_v56, %v7950_v56  ;;  %v8017_v2 = vrot.slane %v7950_v56, %v21049_v33  ;;  %v8108_v22 = vcombine.high %v7997_v39, %v7997_v39  ;;  %v8115_v44 = vrot.slane %v7997_v39, %v21049_v33  ;;  %v14521_v27 = vpop.f32.mrb[37].mxu1  ;;  %v14527_v41 = vpop.f32.mrb[25].mxu0 }
 0xf90   : > { %v7953_v26 = vpop.f32.mrb[38].mxu1  ;;  %v8000_v6 = vpop.f32.mrb[26].mxu0 }
 0xf91   : > { %v8024_v23 = vrot.slane %v8010_v30, %v21049_v33  ;;  %v8025_v43 = vcombine.high %v8017_v2, %v8017_v2  ;;  %v8033_v12 = vrot.slane %v8017_v2, %v21049_v33  ;;  %v8122_v58 = vrot.slane %v8108_v22, %v21049_v33  ;;  %v14522_v63 = vpop.f32.mrb[39].mxu1  ;;  %v14528_v17 = vpop.f32.mrb[27].mxu0 }
 0xf92   : > { %v8123_v1 = vcombine.high %v8115_v44, %v8115_v44  ;;  %v8131_v46 = vrot.slane %v8115_v44, %v21049_v33  ;;  %v8059_v35 = vcombine.high %v7953_v26, %v7953_v26  ;;  %v8066_v61 = vrot.slane %v7953_v26, %v21049_v33 }
 0xf93   : > { %v8026_v3 = vcombine.high %v8024_v23, %v8024_v23  ;;  %v8040_v51 = vrot.slane %v8024_v23, %v21049_v33  ;;  %v8047_v28 = vrot.slane %v8025_v43, %v21049_v33  ;;  %v8055_v15 = vcombine.high %v8033_v12, %v8033_v12 }
 0xf94   : > { %v8124_v5 = vcombine.high %v8122_v58, %v8122_v58  ;;  %v8138_v48 = vrot.slane %v8122_v58, %v21049_v33  ;;  %v8145_v11 = vrot.slane %v8123_v1, %v21049_v33  ;;  %v18607_v21 = vsel %vm1483_vm13, -1e+09, %v8033_v12 }
 0xf95   : > { %v8054_v29 = vrot.slane %v8026_v3, %v21049_v33  ;;  %v8056_v53 = vcombine.high %v8040_v51, %v8040_v51  ;;  %v8057_v62 = vcombine.high %v8047_v28, %v8047_v28  ;;  %v18603_v0 = vsel %vm1483_vm13, -1e+09, %v8047_v28 }
 0xf96   : > { %v18611_v32 = vsel %vm1483_vm13, -1e+09, %v8055_v15  ;;  %v18615_v52 = vsel %vm1483_vm13, -1e+09, %v8040_v51  ;;  %v18618_v38 = vrot.slane %v8124_v5, %v21049_v33  ;;  %v8153_v30 = vcombine.high %v8131_v46, %v8131_v46 }
 0xf97   : > { %v8058_v31 = vcombine.high %v8054_v29, %v8054_v29  ;;  %v18622_v19 = vsel %vm1483_vm13, -1e+09, %v8057_v62  ;;  %v18626_v4 = vsel %vm1483_vm13, -1e+09, %v8054_v29  ;;  %v18632_v56 = vsel %vm1483_vm13, -1e+09, %v8056_v53 }
 0xf98   : > { %v8303_v39 = vcombine.low %v18611_v32, %v18622_v19  ;;  %v8154_v2 = vcombine.high %v8138_v48, %v8138_v48  ;;  %v8304_v22 = vcombine.low %v18615_v52, %v18626_v4  ;;  %v8155_v44 = vcombine.high %v8145_v11, %v8145_v11 }
 0xf99   : > { %v18640_v27 = vsel %vm1483_vm13, -1e+09, %v8131_v46  ;;  %v18644_v41 = vsel %vm1483_vm13, -1e+09, %v8145_v11  ;;  %v18650_v23 = vsel %vm1483_vm13, -1e+09, %v8153_v30  ;;  %v8073_v1 = vrot.slane %v8059_v35, %v21049_v33 }
 0xf9a   : > { %v18654_v43 = vsel %vm1483_vm13, -1e+09, %v8138_v48  ;;  %v18659_v12 = vsel %vm1483_vm13, -1e+09, %v18618_v38  ;;  %v18663_v58 = vsel %vm1483_vm13, -1e+09, %v8155_v44  ;;  %v8074_v3 = vcombine.high %v8066_v61, %v8066_v61 }
 0xf9b   : > { %v18667_v63 = vsel %vm1483_vm13, -1e+09, %v8154_v2  ;;  %v8082_v51 = vrot.slane %v8066_v61, %v21049_v33  ;;  %v8157_v28 = vcombine.high %v8000_v6, %v8000_v6  ;;  %v8401_v15 = vcombine.low %v18650_v23, %v18663_v58 }
 0xf9c   : > { %v8075_v5 = vcombine.high %v8073_v1, %v8073_v1  ;;  %v8089_v48 = vrot.slane %v8073_v1, %v21049_v33  ;;  %v8164_v11 = vrot.slane %v8000_v6, %v21049_v33  ;;  %v8096_v29 = vrot.slane %v8074_v3, %v21049_v33 }
 0xf9d   : > { %v8104_v53 = vcombine.high %v8082_v51, %v8082_v51  ;;  %v8171_v35 = vrot.slane %v8157_v28, %v21049_v33  ;;  %v18683_v62 = vsel %vm1483_vm13, -1e+09, %v8058_v31  ;;  %v18688_v2 = vsel %vm1483_vm13, -1e+09, %v8082_v51 }
 0xf9e   : > { %v8103_v61 = vrot.slane %v8075_v5, %v21049_v33  ;;  %v8105_v30 = vcombine.high %v8089_v48, %v8089_v48  ;;  %v8172_v44 = vcombine.high %v8164_v11, %v8164_v11  ;;  %v8106_v1 = vcombine.high %v8096_v29, %v8096_v29 }
 0xf9f   : > { %v18692_v6 = vsel %vm1483_vm13, -1e+09, %v8096_v29  ;;  %v18696_v3 = vsel %vm1483_vm13, -1e+09, %v8089_v48  ;;  %v8173_v28 = vcombine.high %v8171_v35, %v8171_v35  ;;  %v18700_v5 = vsel %vm1483_vm13, -1e+09, %v8104_v53 }
 0xfa0   : > { %v8107_v31 = vcombine.high %v8103_v61, %v8103_v61  ;;  %v18704_v51 = vsel %vm1483_vm13, -1e+09, %v8103_v61  ;;  %v18708_v46 = vsel %vm1483_vm13, -1e+09, %v8105_v30  ;;  %v18712_v29 = vsel %vm1483_vm13, -1e+09, %v8106_v1 }
 0xfa1   : > { %v8351_v48 = vcombine.low %v18688_v2, %v18692_v6  ;;  %v8180_v17 = vrot.slane %v8164_v11, %v21049_v33  ;;  %v8187_v53 = vrot.slane %v8171_v35, %v21049_v33  ;;  %v8352_v26 = vcombine.low %v18700_v5, %v18712_v29 }
 0xfa2   : > { %v8353_v61 = vcombine.low %v18696_v3, %v18704_v51  ;;  %v8194_v30 = vrot.slane %v8172_v44, %v21049_v33  ;;  %v8201_v47 = vrot.slane %v8173_v28, %v21049_v33  ;;  %v8305_v11 = vcombine.low %v18632_v56, %v18683_v62 }
 0xfa3   : > { %v8202_v49 = vcombine.high %v8180_v17, %v8180_v17  ;;  %v8203_v1 = vcombine.high %v8187_v53, %v8187_v53  ;;  %v18726_v50 = vsel %vm1483_vm13, -1e+09, %v8180_v17  ;;  %v18736_v8 = vsel %vm1483_vm13, -1e+09, %v8187_v53 }
 0xfa4   : > { %21050 = vst [vmem:[#allocation64_spill] sm:$0xff] %v18726_v50  ;;  %v8204_v35 = vcombine.high %v8194_v30, %v8194_v30  ;;  %v18732_v45 = vsel %vm1483_vm13, -1e+09, %v8194_v30  ;;  %21052 = vst [vmem:[#allocation50_spill] sm:$0xff] %v18736_v8  ;;  %v18740_v44 = vsel %vm1483_vm13, -1e+09, %v8201_v47  ;;  %v8205_v28 = vcombine.high %v8201_v47, %v8201_v47 }
 0xfa5   : > { %21051 = vst [vmem:[#allocation62_spill] sm:$0xff] %v18732_v45  ;;  %21053 = vst [vmem:[#allocation55_spill] sm:$0xff] %v18740_v44  ;;  %v18744_v17 = vsel %vm1483_vm13, -1e+09, %v8202_v49  ;;  %v18748_v20 = vsel %vm1483_vm13, -1e+09, %v8203_v1  ;;  %v8449_v30 = vcombine.low %v18726_v50, %v18732_v45  ;;  %v8451_v25 = vcombine.low %v18736_v8, %v18740_v44 }
 0xfa6   : > { %21054 = vst [vmem:[#allocation53_spill] sm:$0xff] %v18744_v17  ;;  %v18754_v53 = vsel %vm1483_vm13, -1e+09, %v8204_v35  ;;  %v21056_v47 = vcombine.low %v18607_v21, %v18603_v0  ;;  %v8319_v59 = vrot.slane %v8303_v39, %v21049_v33  ;;  %v8326_v36 = vrot.slane %v8304_v22, %v21049_v33 }
 0xfa7   : > { %21055 = vst [vmem:[#allocation51_spill] sm:$0xff] %v18754_v53  ;;  %v8450_v1 = vcombine.low %v18744_v17, %v18754_v53  ;;  %v8333_v54 = vrot.slane %v8305_v11, %v21049_v33  ;;  %v18769_v35 = vsel %vm1483_vm13, -1e+09, %v8107_v31  ;;  %v8361_v8 = vrot.slane %v8351_v48, %v21049_v33 }
 0xfa8   : > { %v8312_v49 = vrot.slane %v21056_v47, %v21049_v33  ;;  %v8354_v44 = vcombine.low %v18708_v46, %v18769_v35  ;;  %v8368_v47 = vrot.slane %v8352_v26, %v21049_v33  ;;  %v8375_v50 = vrot.slane %v8353_v61, %v21049_v33 }
 0xfa9   : > { %v8335_v39 = vcombine.low %v8326_v36, %v8333_v54  ;;  %v21057_v22 = vcombine.high %v18618_v38, %v18618_v38  ;;  %v8417_v31 = vrot.slane %v8401_v15, %v21049_v33  ;;  %v21058_v36 = vcombine.low %v18640_v27, %v18644_v41 }
 0xfaa   : > { %v8334_v45 = vcombine.low %v8312_v49, %v8319_v59  ;;  %v8382_v59 = vrot.slane %v8354_v44, %v21049_v33  ;;  %v8383_v49 = vcombine.low %v8361_v8, %v8368_v47  ;;  %v21059_v61 = vcombine.low %v18654_v43, %v18659_v12 }
 0xfab   : > { %v18781_v11 = vsel %vm1483_vm13, -1e+09, %v21057_v22  ;;  %v8410_v54 = vrot.slane %v21058_v36, %v21049_v33  ;;  %v8349_v38 = vrot.slane %v8335_v39, %v21049_v33  ;;  %v18799_v8 = vsel %vm1483_vm13, -1e+09, %v8205_v28 }
 0xfac   : > { %v8403_v48 = vcombine.low %v18667_v63, %v18781_v11  ;;  %v8342_v26 = vrot.slane %v8334_v45, %v21049_v33  ;;  %v8424_v15 = vrot.slane %v21059_v61, %v21049_v33  ;;  %v8384_v44 = vcombine.low %v8375_v50, %v8382_v59 }
 0xfad   : > { %v8432_v22 = vcombine.low %v8410_v54, %v8417_v31  ;;  %v8452_v36 = vcombine.low %v18748_v20, %v18799_v8  ;;  %v8391_v39 = vrot.slane %v8383_v49, %v21049_v33  ;;  %v8459_v53 = vrot.slane %v8449_v30, %v21049_v33 }
 0xfae   : > { %v8431_v47 = vrot.slane %v8403_v48, %v21049_v33  ;;  %v8350_v45 = vcombine.low %v8342_v26, %v8349_v38  ;;  %v8466_v17 = vrot.slane %v8450_v1, %v21049_v33  ;;  %v8398_v61 = vrot.slane %v8384_v44, %v21049_v33 }
 0xfaf   : > { %v8473_v28 = vrot.slane %v8451_v25, %v21049_v33  ;;  %v8480_v50 = vrot.slane %v8452_v36, %v21049_v33  ;;  %v8440_v30 = vrot.slane %v8432_v22, %v21049_v33 }
 0xfb0   : > { %v8433_v13 = vcombine.low %v8424_v15, %v8431_v47  ;;  %v8510_v31 = vsel %vm2496_vm3, %v8350_v45, -inf  ;;  %v8502_v59 = vsel %vm2496_vm3, %v8350_v45, 0.0  ;;  %v8481_v48 = vcombine.low %v8459_v53, %v8466_v17 }
 0xfb1   : > { %8511 = vmax.xlane.f32.xlu0 %v8510_v31  ;;  %8506 = vst [vmem:[%s16545_s24] sm:$0xff] %v8502_v59  ;;  %v8399_v49 = vcombine.low %v8391_v39, %v8398_v61  ;;  %v8482_v54 = vcombine.low %v8473_v28, %v8480_v50  ;;  %v10026_v28 = vcombine.high %v18477_v40, %v21014_v37 }
 0xfb2   : > { %v8447_v1 = vrot.slane %v8433_v13, %v21049_v33  ;;  %v8489_v25 = vrot.slane %v8481_v48, %v21049_v33  ;;  %v9960_v13 = vcombine.high %v18475_v60, %v21014_v37  ;;  %v18841_v31 = vrot.slane %v18475_v60, %v21015_v34 }
 0xfb3   : > { %v8513_v26 = vsel %vm2496_vm3, %v8399_v49, -inf  ;;  %v8503_v38 = vsel %vm2496_vm3, %v8399_v49, 0.0  ;;  %v8496_v44 = vrot.slane %v8482_v54, %v21049_v33 }
 0xfb4   : > { %v8448_v15 = vcombine.low %v8440_v30, %v8447_v1  ;;  %8514 = vmax.xlane.f32.xlu1 %v8513_v26  ;;  %8507 = vst [vmem:[%s16545_s24 + $0x8] sm:$0xff] %v8503_v38  ;;  %v18850_v26 = vrot.slane %v9960_v13, %v21015_v34  ;;  %v18857_v38 = vrot.slane %v10026_v28, %v21015_v34 }
 0xfb5   : > { %v8497_v47 = vcombine.low %v8489_v25, %v8496_v44 }
 0xfb6   : > { %v8504_v17 = vsel %vm2496_vm3, %v8448_v15, 0.0  ;;  %v8516_v53 = vsel %vm2496_vm3, %v8448_v15, -inf }
 0xfb7   : > { %8508 = vst [vmem:[%s16545_s24 + $0x10] sm:$0xff] %v8504_v17  ;;  %8517 = vmax.xlane.f32.xlu0 %v8516_v53  ;;  %v8505_v22 = vsel %vm2496_vm3, %v8497_v47, 0.0  ;;  %v8519_v36 = vsel %vm2496_vm3, %v8497_v47, -inf }
 0xfb8   : > { %8509 = vst [vmem:[%s16545_s24 + $0x18] sm:$0xff] %v8505_v22 }
 0xfbb   : > { %8520 = vmax.xlane.f32.xlu0 %v8519_v36 }
 0xfc5   : > { %7672 = vrot.lane.b32.xlu1 %v18546_v18, %s15783_s1 }
 0xfc9   : > { %9954 = vrot.lane.b32.xlu1 %v18475_v60, %s15783_s1  ;;  %v18854_v60 = vrot.slane %v18477_v40, %v21015_v34 }
 0xfcd   : > { %9956 = vrot.lane.b32.xlu1 %v18477_v40, %s15783_s1 }
0x103e   : > { %v8512_v39 = vpop.xlane.xlu0 %8511 }
0x103f   : > { %v8529_v50 = vrot.slane %v8512_v39, %v16948_v24  ;;  %v8533_v59 = vrot.slane %v8512_v39, %v16951_v7  ;;  %v8537_v48 = vrot.slane %v8512_v39, %v16954_v55  ;;  %v8541_v49 = vrot.slane %v8512_v39, %v16957_v14 }
0x1040   : > { %v8545_v30 = vrot.slane %v8512_v39, %v16960_v9  ;;  %v8549_v1 = vrot.slane %v8512_v39, %v16963_v57  ;;  %v8553_v54 = vrot.slane %v8512_v39, %v16966_v16  ;;  %v8557_v15 = vrot.slane %v8512_v39, %v16975_v10 }
0x1041   : > { %v8515_v45 = vpop.xlane.xlu1 %8514  ;;  %v18861_v44 = vsub.f32 %v18607_v21, %v8529_v50  ;;  %v18867_v22 = vsub.f32 %v18603_v0, %v8533_v59  ;;  %v18870_v40 = vsub.f32 %v18611_v32, %v8537_v48  ;;  %v18875_v21 = vsub.f32 %v18622_v19, %v8541_v49 }
0x1042   : > { %v8561_v17 = vrot.slane %v8515_v45, %v16948_v24  ;;  %v8565_v53 = vrot.slane %v8515_v45, %v16951_v7  ;;  %v8569_v47 = vrot.slane %v8515_v45, %v16954_v55  ;;  %v8573_v36 = vrot.slane %v8515_v45, %v16957_v14 }
0x1043   : > { %v8577_v13 = vrot.slane %v8515_v45, %v16960_v9  ;;  %v18878_v28 = vsub.f32 %v18615_v52, %v8545_v30  ;;  %v18881_v50 = vsub.f32 %v18626_v4, %v8549_v1  ;;  %v18884_v0 = vsub.f32 %v18632_v56, %v8553_v54 }
0x1044   : > { %v8518_v39 = vpop.xlane.xlu0 %8517  ;;  %v18887_v32 = vsub.f32 %v18683_v62, %v8557_v15  ;;  %v8581_v59 = vrot.slane %v8515_v45, %v16963_v57  ;;  %v8585_v48 = vrot.slane %v8515_v45, %v16966_v16  ;;  %v8589_v18 = vrot.slane %v8515_v45, %v16975_v10 }
0x1045   : > { %v18832_v61 = vpop.permute.xlu1 %7672  ;;  %v18893_v19 = vsub.f32 %v18688_v2, %v8561_v17  ;;  %v18896_v52 = vsub.f32 %v18692_v6, %v8565_v53  ;;  %v18899_v4 = vsub.f32 %v18700_v5, %v8569_v47  ;;  %v8593_v56 = vrot.slane %v8518_v39, %v16948_v24 }
0x1046   : > { %21060 = vst [vmem:[#allocation63_spill] sm:$0xff] %v18832_v61  ;;  %v18903_v62 = vsub.f32 %v18712_v29, %v8573_v36  ;;  %v18906_v30 = vsub.f32 %v18696_v3, %v8577_v13  ;;  %v8597_v45 = vrot.slane %v8518_v39, %v16951_v7  ;;  %v8601_v2 = vrot.slane %v8518_v39, %v16954_v55 }
0x1047   : > { %v8605_v1 = vrot.slane %v8518_v39, %v16957_v14  ;;  %v8609_v6 = vrot.slane %v8518_v39, %v16960_v9  ;;  %v8613_v5 = vrot.slane %v8518_v39, %v16963_v57  ;;  %v8617_v54 = vrot.slane %v8518_v39, %v16966_v16 }
0x1048   : > { %v8621_v15 = vrot.slane %v8518_v39, %v16975_v10  ;;  %v18919_v53 = vsub.f32 %v18704_v51, %v8581_v59  ;;  %v18922_v47 = vsub.f32 %v18708_v46, %v8585_v48  ;;  %v18925_v36 = vsub.f32 %v18769_v35, %v8589_v18 }
0x1049   : > { %v9955_v25 = vpop.permute.xlu1 %9954  ;;  %v18928_v13 = vsub.f32 %v18640_v27, %v8593_v56  ;;  %v18931_v39 = vsub.f32 %v18644_v41, %v8597_v45  ;;  %v18934_v61 = vsub.f32 %v18650_v23, %v8601_v2  ;;  %v18941_v46 = vsub.f32 %v18663_v58, %v8605_v1 }
0x104a   : > { %v9975_v29 = vcombine.high %v9955_v25, %v21014_v37  ;;  %v9982_v17 = vrot.slane %v9955_v25, %v21015_v34  ;;  %v18936_v25 = vpop.xlane.xlu0 %8520  ;;  %v18947_v41 = vsub.f32 %v18654_v43, %v8609_v6  ;;  %v18950_v23 = vsub.f32 %v18659_v12, %v8613_v5 }
0x104b   : > { %v18953_v48 = vsub.f32 %v18667_v63, %v8617_v54  ;;  %v18956_v56 = vsub.f32 %v18781_v11, %v8621_v15  ;;  %v8625_v58 = vrot.slane %v18936_v25, %v16948_v24  ;;  %v8633_v12 = vrot.slane %v18936_v25, %v16954_v55 }
0x104c   : > { %v9989_v51 = vrot.slane %v9975_v29, %v21015_v34  ;;  %v9990_v18 = vcombine.low %v18841_v31, %v9982_v17  ;;  %v9991_v27 = vcombine.high %v18841_v31, %v9982_v17  ;;  %v8629_v31 = vrot.slane %v18936_v25, %v16951_v7  ;;  %v21061_v29 = vld [vmem:[#allocation64_spill] sm:$0xff] }
0x104d   : > { %v9957_v49 = vpop.permute.xlu1 %9956  ;;  %v8637_v63 = vrot.slane %v18936_v25, %v16957_v14  ;;  %v18983_v17 = vsub.f32 %v21061_v29, %v8625_v58  ;;  %v8720_v15 = vmul.f32 1.442695, %v18867_v22 }
0x104e   : > { %v10041_v3 = vcombine.high %v9957_v49, %v21014_v37  ;;  %v10048_v59 = vrot.slane %v9957_v49, %v21015_v34  ;;  %v10006_v49 = vcombine.low %v18850_v26, %v9989_v51  ;;  %v10007_v43 = vcombine.high %v18850_v26, %v9989_v51 }
0x104f   : > { %v9998_v2 = vrot.slane %v9990_v18, %v16631_v42  ;;  %v10005_v1 = vrot.slane %v9991_v27, %v16631_v42  ;;  %v8641_v26 = vrot.slane %v18936_v25, %v16960_v9 }
0x1050   : > { %v10055_v35 = vrot.slane %v10041_v3, %v21015_v34  ;;  %v10056_v45 = vcombine.low %v18854_v60, %v10048_v59  ;;  %v10057_v11 = vcombine.high %v18854_v60, %v10048_v59  ;;  %v21062_v3 = vld [vmem:[#allocation62_spill] sm:$0xff]  ;;  %v10021_v59 = vrot.slane %v10007_v43, %v16631_v42 }
0x1051   : > { %v18986_v51 = vsub.f32 %v21062_v3, %v8629_v31  ;;  %v10092_v54 = vcombine.low %v9998_v2, %v10005_v1  ;;  %v14179_v60 = vcombine.high %v9998_v2, %v10005_v1  ;;  %v8722_v31 = vmul.f32 1.442695, %v18870_v40 }
0x1052   : > { %v10072_v6 = vcombine.low %v18857_v38, %v10055_v35  ;;  %v10073_v5 = vcombine.high %v18857_v38, %v10055_v35  ;;  %v10014_v38 = vrot.slane %v10006_v49, %v16631_v42  ;;  %v10064_v18 = vrot.slane %v10056_v45, %v16631_v42 }
0x1053   : > { %v10071_v27 = vrot.slane %v10057_v11, %v16631_v42  ;;  %v8718_v35 = vmul.f32 1.442695, %v18861_v44  ;;  %v8724_v49 = vmul.f32 1.442695, %v18875_v21  ;;  %v8726_v43 = vmul.f32 1.442695, %v18878_v28 }
0x1054   : > { %v10080_v58 = vrot.slane %v10072_v6, %v16631_v42  ;;  %v10087_v29 = vrot.slane %v10073_v5, %v16631_v42  ;;  %v10108_v45 = vcombine.low %v10014_v38, %v10021_v59  ;;  %v14180_v3 = vcombine.high %v10014_v38, %v10021_v59 }
0x1055   : > { %15095 = vpow2.f32 %v8718_v35  ;;  %v8728_v44 = vmul.f32 1.442695, %v18881_v50  ;;  %v10142_v11 = vcombine.low %v10064_v18, %v10071_v27  ;;  %v14181_v22 = vcombine.high %v10064_v18, %v10071_v27  ;;  %v21063_v18 = vld [vmem:[#allocation53_spill] sm:$0xff] }
0x1056   : > { %15097 = vpow2.f32 %v8720_v15  ;;  %v8730_v2 = vmul.f32 1.442695, %v18884_v0  ;;  %v10158_v1 = vcombine.low %v10080_v58, %v10087_v29  ;;  %v14182_v6 = vcombine.high %v10080_v58, %v10087_v29 }
0x1057   : > { %15099 = vpow2.f32 %v8722_v31  ;;  %v8732_v5 = vmul.f32 1.442695, %v18887_v32  ;;  %v10099_v40 = vrot.slane %v10092_v54, %v21015_v34  ;;  %v10107_v21 = vrot.slane %v14179_v60, %v21015_v34 }
0x1058   : > { %15101 = vpow2.f32 %v8724_v49  ;;  %v8734_v28 = vmul.f32 1.442695, %v18893_v19  ;;  %v10115_v15 = vrot.slane %v10108_v45, %v21015_v34  ;;  %v10123_v50 = vrot.slane %v14180_v3, %v21015_v34 }
0x1059   : > { %15103 = vpow2.f32 %v8726_v43  ;;  %v8736_v38 = vmul.f32 1.442695, %v18896_v52  ;;  %v10149_v0 = vrot.slane %v10142_v11, %v21015_v34  ;;  %v10157_v59 = vrot.slane %v14181_v22, %v21015_v34 }
0x105a   : > { %15105 = vpow2.f32 %v8728_v44  ;;  %v8738_v32 = vmul.f32 1.442695, %v18899_v4  ;;  %v10165_v54 = vrot.slane %v10158_v1, %v21015_v34  ;;  %v10173_v60 = vrot.slane %v14182_v6, %v21015_v34 }
0x105b   : > { %15107 = vpow2.f32 %v8730_v2  ;;  %v8740_v19 = vmul.f32 1.442695, %v18903_v62  ;;  %v19015_v27 = vsub.f32 %v21063_v18, %v8633_v12  ;;  %v8742_v52 = vmul.f32 1.442695, %v18906_v30 }
0x105c   : > { %15109 = vpow2.f32 %v8732_v5  ;;  %v8744_v35 = vmul.f32 1.442695, %v18919_v53  ;;  %v8746_v58 = vmul.f32 1.442695, %v18922_v47  ;;  %v8748_v4 = vmul.f32 1.442695, %v18925_v36 }
0x105d   : > { %15111 = vpow2.f32 %v8734_v28  ;;  %v8750_v29 = vmul.f32 1.442695, %v18928_v13  ;;  %v8752_v62 = vmul.f32 1.442695, %v18931_v39  ;;  %v8754_v12 = vmul.f32 1.442695, %v18934_v61 }
0x105e   : > { %15113 = vpow2.f32 %v8736_v38  ;;  %v10124_v49 = vcombine.low %v10099_v40, %v10107_v21  ;;  %v10132_v30 = vcombine.low %v10115_v15, %v10123_v50  ;;  %v10174_v53 = vcombine.low %v10149_v0, %v10157_v59 }
0x105f   : > { %v19022_v31 = vpop.eup %15095  ;;  %15115 = vpow2.f32 %v8738_v32  ;;  %v10182_v45 = vcombine.low %v10165_v54, %v10173_v60  ;;  %v8756_v36 = vmul.f32 1.442695, %v18941_v46  ;;  %v8758_v46 = vmul.f32 1.442695, %v18947_v41 }
0x1060   : > { %v19026_v43 = vpop.eup %15097  ;;  %15117 = vpow2.f32 %v8740_v19  ;;  %v10131_v13 = vrot.slane %v10124_v49, %v16631_v42  ;;  %v10139_v61 = vrot.slane %v10132_v30, %v16631_v42  ;;  %v10181_v44 = vrot.slane %v10174_v53, %v16631_v42 }
0x1061   : > { %v19028_v3 = vpop.eup %15099  ;;  %v8814_v47 = vcombine.low %v19022_v31, %v19026_v43  ;;  %15119 = vpow2.f32 %v8742_v52  ;;  %v10189_v11 = vrot.slane %v10182_v45, %v16631_v42  ;;  %v8760_v5 = vmul.f32 1.442695, %v18950_v23 }
0x1062   : > { %v19034_v39 = vpop.eup %15101  ;;  %15121 = vpow2.f32 %v8744_v35  ;;  %v10140_v40 = vcombine.low %v10131_v13, %v10139_v61  ;;  %v8762_v38 = vmul.f32 1.442695, %v18953_v48  ;;  %v10141_v59 = vcombine.high %v10131_v13, %v10139_v61  ;;  %v21064_v48 = vld [vmem:[#allocation51_spill] sm:$0xff] }
0x1063   : > { %v19039_v22 = vpop.eup %15103  ;;  %v8815_v2 = vcombine.low %v19028_v3, %v19034_v39  ;;  %v8824_v1 = vrot.slane %v8814_v47, %v21049_v33  ;;  %15123 = vpow2.f32 %v8746_v58  ;;  %v10190_v21 = vcombine.low %v10181_v44, %v10189_v11 }
0x1064   : > { %v19045_v6 = vpop.eup %15105  ;;  %15125 = vpow2.f32 %v8748_v4  ;;  %v10191_v32 = vcombine.high %v10181_v44, %v10189_v11  ;;  %v8713_v52 = vsub.f32 %v21064_v48, %v8637_v63  ;;  %v8764_v35 = vmul.f32 1.442695, %v18956_v56  ;;  %v21066_v63 = vld [vmem:[#allocation50_spill] sm:$0xff] }
0x1065   : > { %v19048_v28 = vpop.eup %15107  ;;  %v8816_v15 = vcombine.low %v19039_v22, %v19045_v6  ;;  %v8831_v50 = vrot.slane %v8815_v2, %v21049_v33  ;;  %15127 = vpow2.f32 %v8750_v29  ;;  %v19056_v41 = vpack.c.bf16 %v10190_v21, %v10140_v40 }
0x1066   : > { %v19054_v0 = vpop.eup %15109  ;;  %15129 = vpow2.f32 %v8752_v62  ;;  %v19070_v58 = vpack.c.bf16 %v10191_v32, %v10141_v59  ;;  %v8714_v30 = vsub.f32 %v21066_v63, %v8641_v26  ;;  %v8768_v53 = vmul.f32 1.442695, %v18986_v51  ;;  %v21068_v26 = vld [vmem:[#allocation55_spill] sm:$0xff] }
0x1067   : > { %v19058_v23 = vpop.eup %15111  ;;  %v8817_v54 = vcombine.low %v19048_v28, %v19054_v0  ;;  %v8838_v60 = vrot.slane %v8816_v15, %v21049_v33  ;;  %v8846_v19 = vcombine.low %v8824_v1, %v8831_v50  ;;  %15131 = vpow2.f32 %v8754_v12 }
0x1068   : > { %v19063_v18 = vpop.eup %15113  ;;  %15133 = vpow2.f32 %v8756_v36  ;;  %21065 = vst [vmem:[#allocation64_spill] sm:$0xff] %v19070_v58  ;;  %v8766_v12 = vmul.f32 1.442695, %v18983_v17  ;;  %v21067_v61 = vrot.slane %v18936_v25, %v16963_v57  ;;  %v21069_v11 = vrot.slane %v18936_v25, %v16966_v16 }
0x1069   : > { %v19072_v4 = vpop.eup %15115  ;;  %v8845_v29 = vrot.slane %v8817_v54, %v21049_v33  ;;  %v8863_v62 = vcombine.low %v19058_v23, %v19063_v18  ;;  %15135 = vpow2.f32 %v8758_v46  ;;  %v8854_v56 = vrot.slane %v8846_v19, %v21049_v33 }
0x106a   : > { %v19078_v49 = vpop.eup %15117  ;;  %15137 = vpow2.f32 %v8760_v5  ;;  %v8715_v44 = vsub.f32 %v21068_v26, %v21067_v61  ;;  %v8716_v51 = vsub.f32 %v18748_v20, %v21069_v11  ;;  %v8770_v2 = vmul.f32 1.442695, %v19015_v27 }
0x106b   : > { %v19086_v45 = vpop.eup %15119  ;;  %v8847_v47 = vcombine.low %v8838_v60, %v8845_v29  ;;  %v8864_v36 = vcombine.low %v19072_v4, %v19078_v49  ;;  %v8873_v17 = vrot.slane %v8863_v62, %v21049_v33  ;;  %15139 = vpow2.f32 %v8762_v38 }
0x106c   : > { %v19091_v13 = vpop.eup %15121  ;;  %15141 = vpow2.f32 %v8764_v35  ;;  %v21070_v15 = vrot.slane %v18936_v25, %v16975_v10  ;;  %v8772_v50 = vmul.f32 1.442695, %v8713_v52  ;;  %v8774_v27 = vmul.f32 1.442695, %v8714_v30 }
0x106d   : > { %v19102_v1 = vpop.eup %15123  ;;  %v8861_v46 = vrot.slane %v8847_v47, %v21049_v33  ;;  %v8865_v5 = vcombine.low %v19086_v45, %v19091_v13  ;;  %v8880_v40 = vrot.slane %v8864_v36, %v21049_v33  ;;  %15143 = vpow2.f32 %v8766_v12 }
0x106e   : > { %v19108_v21 = vpop.eup %15125  ;;  %v8717_v20 = vsub.f32 %v18799_v8, %v21070_v15  ;;  %15145 = vpow2.f32 %v8768_v53  ;;  %v8776_v48 = vmul.f32 1.442695, %v8715_v44  ;;  %v8778_v29 = vmul.f32 1.442695, %v8716_v51 }
0x106f   : > { %v19114_v38 = vpop.eup %15127  ;;  %v8862_v59 = vcombine.low %v8854_v56, %v8861_v46  ;;  %v8866_v32 = vcombine.low %v19102_v1, %v19108_v21  ;;  %v8887_v54 = vrot.slane %v8865_v5, %v21049_v33  ;;  %v8895_v60 = vcombine.low %v8873_v17, %v8880_v40 }
0x1070   : > { %v19119_v19 = vpop.eup %15129  ;;  %15147 = vpow2.f32 %v8770_v2  ;;  %v8780_v63 = vmul.f32 1.442695, %v8717_v20 }
0x1071   : > { %v19121_v35 = vpop.eup %15131  ;;  %v9014_v8 = vsel %vm2496_vm3, %v8862_v59, 0.0  ;;  %v8894_v25 = vrot.slane %v8866_v32, %v21049_v33  ;;  %v8912_v52 = vcombine.low %v19114_v38, %v19119_v19  ;;  %v8903_v12 = vrot.slane %v8895_v60, %v21049_v33 }
0x1072   : > { %v19127_v62 = vpop.eup %15133  ;;  %9015 = vadd.xlane.f32.xlu0 %v9014_v8  ;;  %15149 = vpow2.f32 %v8772_v50 }
0x1073   : > { %v19130_v30 = vpop.eup %15135  ;;  %v8896_v56 = vcombine.low %v8887_v54, %v8894_v25  ;;  %v8913_v53 = vcombine.low %v19121_v35, %v19127_v62  ;;  %v8922_v47 = vrot.slane %v8912_v52, %v21049_v33  ;;  %15151 = vpow2.f32 %v8774_v27 }
0x1074   : > { %v19135_v36 = vpop.eup %15137  ;;  %15153 = vpow2.f32 %v8776_v48 }
0x1075   : > { %v19137_v17 = vpop.eup %15139  ;;  %v8910_v61 = vrot.slane %v8896_v56, %v21049_v33  ;;  %v8914_v26 = vcombine.low %v19130_v30, %v19135_v36  ;;  %v8929_v44 = vrot.slane %v8913_v53, %v21049_v33  ;;  %15155 = vpow2.f32 %v8778_v29 }
0x1076   : > { %21071 = vst [vmem:[#allocation62_spill] sm:$0xff] %v19137_v17  ;;  %v19143_v11 = vpop.eup %15141  ;;  %15157 = vpow2.f32 %v8780_v63 }
0x1077   : > { %21072 = vst [vmem:[#allocation53_spill] sm:$0xff] %v19143_v11  ;;  %v19145_v51 = vpop.eup %15143  ;;  %v8911_v2 = vcombine.low %v8903_v12, %v8910_v61  ;;  %v8915_v46 = vcombine.low %v19137_v17, %v19143_v11  ;;  %v8936_v5 = vrot.slane %v8914_v26, %v21049_v33  ;;  %v8944_v40 = vcombine.low %v8922_v47, %v8929_v44 }
0x1078   : > { %21073 = vst [vmem:[#allocation51_spill] sm:$0xff] %v19145_v51  ;;  %v19150_v15 = vpop.eup %15145 }
0x1079   : > { %v9017_v20 = vsel %vm2496_vm3, %v8911_v2, 0.0  ;;  %v8943_v50 = vrot.slane %v8915_v46, %v21049_v33  ;;  %v8961_v27 = vcombine.low %v19145_v51, %v19150_v15  ;;  %v8952_v54 = vrot.slane %v8944_v40, %v21049_v33 }
0x107a   : > { %v19156_v59 = vpop.eup %15147  ;;  %9018 = vadd.xlane.f32.xlu1 %v9017_v20 }
0x107b   : > { %21074 = vst [vmem:[#allocation50_spill] sm:$0xff] %v19156_v59  ;;  %v8945_v32 = vcombine.low %v8936_v5, %v8943_v50  ;;  %v8971_v52 = vrot.slane %v8961_v27, %v21049_v33 }
0x107c   : > { %v19159_v60 = vpop.eup %15149 }
0x107d   : > { %21075 = vst [vmem:[#allocation55_spill] sm:$0xff] %v19159_v60  ;;  %v19161_v48 = vpop.eup %15151  ;;  %v8959_v8 = vrot.slane %v8945_v32, %v21049_v33  ;;  %v8962_v25 = vcombine.low %v19156_v59, %v19159_v60  ;;  %v21080_v32 = vld [vmem:[#allocation67_spill] sm:$0xff] }
0x107e   : > { %21076 = vst [vmem:[#allocation70_spill] sm:$0xff] %v19161_v48  ;;  %v19167_v29 = vpop.eup %15153 }
0x107f   : > { %21077 = vst [vmem:[#allocation71_spill] sm:$0xff] %v19167_v29  ;;  %v19169_v12 = vpop.eup %15155  ;;  %v8960_v63 = vcombine.low %v8952_v54, %v8959_v8  ;;  %v8963_v56 = vcombine.low %v19161_v48, %v19167_v29  ;;  %v8978_v53 = vrot.slane %v8962_v25, %v21049_v33  ;;  %v21081_v54 = vld [vmem:[#allocation65_spill] sm:$0xff]  ;;  %v21082_v25 = vld [vmem:[#allocation52_spill] sm:$0xff] }
0x1080   : > { %21078 = vst [vmem:[#allocation72_spill] sm:$0xff] %v19169_v12  ;;  %v19174_v47 = vpop.eup %15157  ;;  %v7044_v8 = vmul.f32 0.25, %v21081_v54 }
0x1081   : > { %21079 = vst [vmem:[#allocation73_spill] sm:$0xff] %v19174_v47  ;;  %v9020_v61 = vsel %vm2496_vm3, %v8960_v63, 0.0  ;;  %v8964_v26 = vcombine.low %v19169_v12, %v19174_v47  ;;  %v8985_v44 = vrot.slane %v8963_v56, %v21049_v33  ;;  %v8993_v2 = vcombine.low %v8971_v52, %v8978_v53  ;;  %v21083_v52 = vld [vmem:[#allocation63_spill] sm:$0xff]  ;;  %v21084_v53 = vld [vmem:[#allocation69_spill] sm:$0xff] }
0x1082   : > { %9021 = vadd.xlane.f32.xlu0 %v9020_v61  ;;  %v7045_v63 = vmul.f32 0.25, %v21082_v25  ;;  %v7757_v56 = vcombine.high %v21083_v52, %v21014_v37  ;;  %v7742_v61 = vcombine.high %v21084_v53, %v21014_v37 }
0x1083   : > { %v8992_v46 = vrot.slane %v8964_v26, %v21049_v33  ;;  %v9001_v40 = vrot.slane %v8993_v2, %v21049_v33  ;;  %v7764_v26 = vrot.slane %v21083_v52, %v21015_v34  ;;  %v7749_v2 = vrot.slane %v21084_v53, %v21015_v34 }
0x1085   : > { %v8994_v5 = vcombine.low %v8985_v44, %v8992_v46  ;;  %v7771_v44 = vrot.slane %v7757_v56, %v21015_v34  ;;  %v7756_v46 = vrot.slane %v7742_v61, %v21015_v34 }
0x1087   : > { %v9008_v20 = vrot.slane %v8994_v5, %v21049_v33  ;;  %v7772_v5 = vcombine.low %v7749_v2, %v7764_v26 }
0x1089   : > { %v9009_v50 = vcombine.low %v9001_v40, %v9008_v20  ;;  %v7773_v40 = vcombine.high %v7749_v2, %v7764_v26  ;;  %v7788_v20 = vcombine.low %v7756_v46, %v7771_v44  ;;  %v9718_v2 = vcombine.high %v7044_v8, %v21014_v37 }
0x108b   : > { %v9023_v27 = vsel %vm2496_vm3, %v9009_v50, 0.0  ;;  %v7789_v50 = vcombine.high %v7756_v46, %v7771_v44  ;;  %v7787_v54 = vrot.slane %v7773_v40, %v16631_v42  ;;  %v7796_v25 = vrot.slane %v7788_v20, %v16631_v42 }
0x108c   : > { %9024 = vadd.xlane.f32.xlu1 %v9023_v27  ;;  %v7780_v27 = vrot.slane %v7772_v5, %v16631_v42  ;;  %v9784_v46 = vcombine.high %v7045_v63, %v21014_v37 }
0x108d   : > { %v7803_v33 = vrot.slane %v7789_v50, %v16631_v42 }
0x108e   : > { %v7858_v52 = vcombine.low %v7780_v27, %v7787_v54  ;;  %v14165_v58 = vcombine.high %v7780_v27, %v7787_v54  ;;  %v19220_v50 = vrot.slane %v9784_v46, %v21015_v34  ;;  %v7676_v27 = vcombine.high %v21080_v32, %v21014_v37 }
0x108f   : > { %v7874_v56 = vcombine.low %v7796_v25, %v7803_v33  ;;  %v14166_v47 = vcombine.high %v7796_v25, %v7803_v33  ;;  %v19211_v33 = vrot.slane %v7044_v8, %v21015_v34  ;;  %v7683_v54 = vrot.slane %v21080_v32, %v21015_v34 }
0x1090   : > { %v7865_v53 = vrot.slane %v7858_v52, %v21015_v34  ;;  %v7873_v61 = vrot.slane %v14165_v58, %v21015_v34  ;;  %v19217_v58 = vrot.slane %v7045_v63, %v21015_v34 }
0x1091   : > { %v7881_v26 = vrot.slane %v7874_v56, %v21015_v34  ;;  %v7889_v44 = vrot.slane %v14166_v47, %v21015_v34 }
0x1092   : > { %v7890_v5 = vcombine.low %v7865_v53, %v7873_v61 }
0x1093   : > { %v7898_v40 = vcombine.low %v7881_v26, %v7889_v44 }
0x1094   : > { %v19227_v25 = vrot.slane %v7890_v5, %v16631_v42 }
0x1098   : > { %7670 = vrot.lane.b32.xlu0 %v21080_v32, %s15783_s1 }
0x109c   : > { %9712 = vrot.lane.b32.xlu0 %v7044_v8, %s15783_s1  ;;  %v19230_v8 = vrot.slane %v7898_v40, %v16631_v42 }
0x109d   : > { %9714 = vrot.lane.b32.xlu1 %v7045_v63, %s15783_s1 }
0x10ff   : > { %v9016_v12 = vpop.xlane.xlu0 %9015 }
0x1100   : > { %15159 = vrcp.f32 %v9016_v12  ;;  %v19214_v12 = vrot.slane %v9718_v2, %v21015_v34 }
0x1107   : > { %v9019_v20 = vpop.xlane.xlu1 %9018 }
0x1108   : > { %15161 = vrcp.f32 %v9019_v20 }
0x110a   : > { %v15160_v47 = vpop.eup %15159 }
0x110b   : > { %v9037_v52 = vrot.slane %v15160_v47, %v16948_v24  ;;  %v9041_v63 = vrot.slane %v15160_v47, %v16951_v7  ;;  %v9045_v56 = vrot.slane %v15160_v47, %v16954_v55  ;;  %v9049_v53 = vrot.slane %v15160_v47, %v16957_v14 }
0x110c   : > { %v9053_v61 = vrot.slane %v15160_v47, %v16960_v9  ;;  %v9057_v26 = vrot.slane %v15160_v47, %v16963_v57  ;;  %v9061_v32 = vrot.slane %v15160_v47, %v16966_v16  ;;  %v9065_v44 = vrot.slane %v15160_v47, %v16975_v10 }
0x110d   : > { %v9194_v2 = vmul.f32 %v19022_v31, %v9037_v52  ;;  %v9195_v46 = vmul.f32 %v19026_v43, %v9041_v63  ;;  %v9196_v5 = vmul.f32 %v19028_v3, %v9045_v56  ;;  %v9197_v40 = vmul.f32 %v19034_v39, %v9049_v53 }
0x110e   : > { %v9198_v20 = vmul.f32 %v19039_v22, %v9053_v61  ;;  %v9199_v29 = vmul.f32 %v19045_v6, %v9057_v26  ;;  %v19247_v48 = vmul.f32 %v19048_v28, %v9061_v32  ;;  %v19250_v60 = vmul.f32 %v19054_v0, %v9065_v44 }
0x110f   : > { %v7690_v47 = vrot.slane %v7676_v27, %v21015_v34  ;;  %v9022_v51 = vpop.xlane.xlu0 %9021  ;;  %v9226_v31 = vpack.c.bf16 %v9194_v2, %v9194_v2  ;;  %v9227_v52 = vpack.c.bf16 %v9195_v46, %v9195_v46  ;;  %v9228_v43 = vpack.c.bf16 %v9196_v5, %v9196_v5 }
0x1110   : > { %v9229_v22 = vpack.c.bf16 %v9197_v40, %v9197_v40  ;;  %v9230_v6 = vpack.c.bf16 %v9198_v20, %v9198_v20  ;;  %15163 = vrcp.f32 %v9022_v51  ;;  %v9231_v28 = vpack.c.bf16 %v9199_v29, %v9199_v29 }
0x1111   : > { %v19261_v27 = vsel %vm2496_vm3, %v19056_v41, 0  ;;  %v19267_v53 = vunpack.c.l.b16 %v9226_v31  ;;  %v19269_v61 = vunpack.c.l.b16 %v9227_v52  ;;  %v19271_v26 = vunpack.c.l.b16 %v9228_v43 }
0x1112   : > { %v19263_v63 = vpop.eup %15161  ;;  %v19283_v5 = vunpack.c.l.b16 %v9229_v22  ;;  %v19285_v40 = vunpack.c.l.b16 %v9230_v6  ;;  %v19293_v43 = vunpack.c.l.b16 %v9231_v28 }
0x1113   : > { %v7671_v51 = vpop.permute.xlu0 %7670  ;;  %v9069_v29 = vrot.slane %v19263_v63, %v16948_v24  ;;  %v9073_v32 = vrot.slane %v19263_v63, %v16951_v7  ;;  %v9077_v41 = vrot.slane %v19263_v63, %v16954_v55  ;;  %v9081_v44 = vrot.slane %v19263_v63, %v16957_v14 }
0x1114   : > { %v7691_v2 = vcombine.high %v7671_v51, %v21014_v37  ;;  %v7698_v46 = vrot.slane %v7671_v51, %v21015_v34  ;;  %v9085_v20 = vrot.slane %v19263_v63, %v16960_v9  ;;  %v9089_v31 = vrot.slane %v19263_v63, %v16963_v57 }
0x1115   : > { %v9093_v52 = vrot.slane %v19263_v63, %v16966_v16  ;;  %v9097_v22 = vrot.slane %v19263_v63, %v16975_v10  ;;  %v19299_v51 = vmul.f32 %v19058_v23, %v9069_v29  ;;  %v19302_v3 = vmul.f32 %v19063_v18, %v9073_v32 }
0x1116   : > { %v7705_v56 = vrot.slane %v7691_v2, %v21015_v34  ;;  %v7706_v0 = vcombine.low %v7683_v54, %v7698_v46  ;;  %v7707_v39 = vcombine.high %v7683_v54, %v7698_v46  ;;  %v19305_v11 = vmul.f32 %v19072_v4, %v9077_v41 }
0x1117   : > { %v9713_v6 = vpop.permute.xlu0 %9712  ;;  %v19308_v28 = vmul.f32 %v19078_v49, %v9081_v44  ;;  %v19317_v18 = vmul.f32 %v19086_v45, %v9085_v20  ;;  %v19320_v4 = vmul.f32 %v19091_v13, %v9089_v31  ;;  %v19330_v45 = vmul.f32 %v19102_v1, %v9093_v52 }
0x1118   : > { %v7714_v2 = vrot.slane %v7706_v0, %v16631_v42  ;;  %v7721_v54 = vrot.slane %v7707_v39, %v16631_v42  ;;  %v7722_v46 = vcombine.low %v7690_v47, %v7705_v56  ;;  %v7723_v17 = vcombine.high %v7690_v47, %v7705_v56 }
0x1119   : > { %v19312_v63 = vpop.xlane.xlu1 %9024  ;;  %v9733_v23 = vcombine.high %v9713_v6, %v21014_v37  ;;  %v9740_v29 = vrot.slane %v9713_v6, %v21015_v34 }
0x111a   : > { %v7730_v49 = vrot.slane %v7722_v46, %v16631_v42  ;;  %v7737_v0 = vrot.slane %v7723_v17, %v16631_v42  ;;  %v7808_v32 = vcombine.low %v7714_v2, %v7721_v54  ;;  %v14163_v39 = vcombine.high %v7714_v2, %v7721_v54  ;;  %v19324_v41 = vpop.eup %15163 }
0x111b   : > { %v9747_v47 = vrot.slane %v9733_v23, %v21015_v34  ;;  %v9748_v56 = vcombine.low %v19211_v33, %v9740_v29  ;;  %v9749_v44 = vcombine.high %v19211_v33, %v9740_v29  ;;  %15165 = vrcp.f32 %v19312_v63 }
0x111c   : > { %v7815_v13 = vrot.slane %v7808_v32, %v21015_v34  ;;  %v7823_v20 = vrot.slane %v14163_v39, %v21015_v34  ;;  %v7824_v31 = vcombine.low %v7730_v49, %v7737_v0  ;;  %v14164_v6 = vcombine.high %v7730_v49, %v7737_v0 }
0x111d   : > { %v9756_v17 = vrot.slane %v9748_v56, %v16631_v42  ;;  %v9763_v2 = vrot.slane %v9749_v44, %v16631_v42  ;;  %v9764_v54 = vcombine.low %v19214_v12, %v9747_v47  ;;  %v9765_v46 = vcombine.high %v19214_v12, %v9747_v47  ;;  %v9715_v23 = vpop.permute.xlu1 %9714 }
0x111e   : > { %v7831_v33 = vrot.slane %v7824_v31, %v21015_v34  ;;  %v7839_v1 = vrot.slane %v14164_v6, %v21015_v34  ;;  %v7840_v52 = vcombine.low %v7815_v13, %v7823_v20  ;;  %v9799_v29 = vcombine.high %v9715_v23, %v21014_v37 }
0x111f   : > { %v9772_v32 = vrot.slane %v9764_v54, %v16631_v42  ;;  %v9779_v49 = vrot.slane %v9765_v46, %v16631_v42  ;;  %v9850_v0 = vcombine.low %v9756_v17, %v9763_v2  ;;  %v14175_v39 = vcombine.high %v9756_v17, %v9763_v2 }
0x1120   : > { %v9806_v56 = vrot.slane %v9715_v23, %v21015_v34  ;;  %v9813_v44 = vrot.slane %v9799_v29, %v21015_v34  ;;  %v7848_v59 = vcombine.low %v7831_v33, %v7839_v1  ;;  %v9209_v12 = vmul.f32 %v19108_v21, %v9097_v22 }
0x1121   : > { %v9857_v47 = vrot.slane %v9850_v0, %v21015_v34  ;;  %v9865_v31 = vrot.slane %v14175_v39, %v21015_v34  ;;  %v9866_v13 = vcombine.low %v9772_v32, %v9779_v49  ;;  %v14176_v20 = vcombine.high %v9772_v32, %v9779_v49 }
0x1122   : > { %v9814_v6 = vcombine.low %v19217_v58, %v9806_v56  ;;  %v9815_v54 = vcombine.high %v19217_v58, %v9806_v56  ;;  %v9830_v46 = vcombine.low %v19220_v50, %v9813_v44  ;;  %v9831_v17 = vcombine.high %v19220_v50, %v9813_v44 }
0x1123   : > { %v9873_v2 = vrot.slane %v9866_v13, %v21015_v34  ;;  %v9881_v23 = vrot.slane %v14176_v20, %v21015_v34  ;;  %v7847_v21 = vrot.slane %v7840_v52, %v16631_v42  ;;  %v7855_v22 = vrot.slane %v7848_v59, %v16631_v42 }
0x1124   : > { %v9822_v33 = vrot.slane %v9814_v6, %v16631_v42  ;;  %v9829_v1 = vrot.slane %v9815_v54, %v16631_v42  ;;  %v9838_v29 = vrot.slane %v9830_v46, %v16631_v42  ;;  %v9845_v58 = vrot.slane %v9831_v17, %v16631_v42 }
0x1125   : > { %v9882_v32 = vcombine.low %v9857_v47, %v9865_v31  ;;  %v7856_v49 = vcombine.low %v7847_v21, %v7855_v22  ;;  %v7857_v0 = vcombine.high %v7847_v21, %v7855_v22  ;;  %v9234_v50 = vpack.c.bf16 %v19299_v51, %v19299_v51 }
0x1126   : > { %v9900_v39 = vcombine.low %v9822_v33, %v9829_v1  ;;  %v14177_v56 = vcombine.high %v9822_v33, %v9829_v1  ;;  %v9916_v44 = vcombine.low %v9838_v29, %v9845_v58  ;;  %v14178_v52 = vcombine.high %v9838_v29, %v9845_v58 }
0x1127   : > { %v9890_v13 = vcombine.low %v9873_v2, %v9881_v23  ;;  %v21085_v59 = vcombine.low %v19227_v25, %v19230_v8  ;;  %v21086_v6 = vcombine.high %v19227_v25, %v19230_v8  ;;  %v9235_v47 = vpack.c.bf16 %v19302_v3, %v19302_v3 }
0x1128   : > { %v9907_v31 = vrot.slane %v9900_v39, %v21015_v34  ;;  %v9915_v51 = vrot.slane %v14177_v56, %v21015_v34  ;;  %v9923_v46 = vrot.slane %v9916_v44, %v21015_v34  ;;  %v9931_v17 = vrot.slane %v14178_v52, %v21015_v34 }
0x1129   : > { %v7908_v20 = vpack.c.bf16 %v21085_v59, %v7856_v49  ;;  %v7909_v54 = vpack.c.bf16 %v21086_v6, %v7857_v0  ;;  %v9236_v2 = vpack.c.bf16 %v19305_v11, %v19305_v11  ;;  %v9237_v25 = vpack.c.bf16 %v19308_v28, %v19308_v28 }
0x112a   : > { %v9238_v8 = vpack.c.bf16 %v19317_v18, %v19317_v18  ;;  %v9932_v3 = vcombine.low %v9907_v31, %v9915_v51  ;;  %v9940_v23 = vcombine.low %v9923_v46, %v9931_v17  ;;  %v9239_v21 = vpack.c.bf16 %v19320_v4, %v19320_v4  ;;  %v15166_v17 = vpop.eup %15165 }
0x112b   : > { %14530 = vmatpush3.bf16.msra.mxu1 %v7908_v20  ;;  %14536 = vmatpush3.bf16.msra.mxu0 %v7909_v54  ;;  %v9240_v22 = vpack.c.bf16 %v19330_v45, %v19330_v45  ;;  %v19387_v63 = vrot.slane %v9882_v32, %v16631_v42  ;;  %v9241_v11 = vpack.c.bf16 %v9209_v12, %v9209_v12  ;;  %v9283_v1 = vunpack.c.l.b16 %v9235_v47 }
0x112c   : > { %14541 = vmatprep.subr.bf16.mxu1 %v21014_v37  ;;  %v21087_v28 = vpack.c.bf16 %v19247_v48, %v19247_v48  ;;  %14547 = vmatprep.subr.bf16.mxu0 %v21014_v37  ;;  %v19394_v18 = vrot.slane %v9890_v13, %v16631_v42  ;;  %v21088_v4 = vpack.c.bf16 %v19250_v60, %v19250_v60  ;;  %v9282_v29 = vunpack.c.l.b16 %v9234_v50 }
0x112d   : > { %v9284_v58 = vunpack.c.l.b16 %v9236_v2  ;;  %v19400_v32 = vrot.slane %v9932_v3, %v16631_v42  ;;  %v19403_v12 = vrot.slane %v9940_v23, %v16631_v42  ;;  %v9285_v48 = vunpack.c.l.b16 %v9237_v25 }
0x112e   : > { %v9280_v33 = vunpack.c.l.b16 %v21087_v28  ;;  %v9281_v45 = vunpack.c.l.b16 %v21088_v4  ;;  %v9290_v49 = vrot.slane %v19269_v61, 7  ;;  %v9286_v0 = vunpack.c.l.b16 %v9238_v8 }
0x112f   : > { %v9287_v39 = vunpack.c.l.b16 %v9239_v21  ;;  %v9288_v56 = vunpack.c.l.b16 %v9240_v22  ;;  %v9292_v44 = vrot.slane %v19271_v26, 6  ;;  %v9289_v52 = vunpack.c.l.b16 %v9241_v11 }
0x1130   : > { %v9291_v60 = vsel %vm3870_vm5, %v9290_v49, %v19267_v53  ;;  %v9294_v50 = vrot.slane %v19283_v5, 5  ;;  %v9304_v13 = vrot.slane %v9283_v1, 7  ;;  %v9296_v20 = vrot.slane %v19285_v40, 4 }
0x1131   : > { %v9293_v59 = vsel %vm3873_vm6, %v9292_v44, %v9291_v60  ;;  %v9298_v6 = vrot.slane %v19293_v43, 3  ;;  %v9306_v54 = vrot.slane %v9284_v58, 6  ;;  %v9300_v47 = vrot.slane %v9280_v33, 2 }
0x1132   : > { %v9295_v61 = vsel %vm3876_vm7, %v9294_v50, %v9293_v59  ;;  %v9305_v31 = vsel %vm3870_vm5, %v9304_v13, %v9282_v29  ;;  %v9308_v26 = vrot.slane %v9285_v48, 5  ;;  %v9302_v46 = vrot.slane %v9281_v45, 1 }
0x1133   : > { %v9297_v51 = vsel %vm3879_vm8, %v9296_v20, %v9295_v61  ;;  %v9307_v53 = vsel %vm3873_vm6, %v9306_v54, %v9305_v31  ;;  %v9310_v5 = vrot.slane %v9286_v0, 4  ;;  %v9312_v25 = vrot.slane %v9287_v39, 3  ;;  %v21089_v31 = vld [vmem:[#allocation50_spill] sm:$0xff] }
0x1134   : > { %v9299_v2 = vsel %vm3882_vm9, %v9298_v6, %v9297_v51  ;;  %v9309_v40 = vsel %vm3876_vm7, %v9308_v26, %v9307_v53  ;;  %v9314_v43 = vrot.slane %v9288_v56, 2  ;;  %v9316_v23 = vrot.slane %v9289_v52, 1  ;;  %v21090_v26 = vld [vmem:[#allocation62_spill] sm:$0xff] }
0x1135   : > { %v9301_v8 = vsel %vm3885_vm10, %v9300_v47, %v9299_v2  ;;  %v9311_v3 = vsel %vm3879_vm8, %v9310_v5, %v9309_v40  ;;  %v9101_v21 = vrot.slane %v19324_v41, %v16948_v24  ;;  %v9105_v11 = vrot.slane %v19324_v41, %v16951_v7  ;;  %v21092_v5 = vld [vmem:[#allocation51_spill] sm:$0xff] }
0x1136   : > { %v9313_v22 = vsel %vm3882_vm9, %v9312_v25, %v9311_v3  ;;  %v9109_v28 = vrot.slane %v19324_v41, %v16954_v55  ;;  %v9113_v33 = vrot.slane %v19324_v41, %v16957_v14  ;;  %v9303_v1 = vsel %vm3888_vm11, %v9302_v46, %v9301_v8  ;;  %v21091_v46 = vld [vmem:[#allocation53_spill] sm:$0xff]  ;;  %v21093_v2 = vld [vmem:[#allocation55_spill] sm:$0xff] }
0x1137   : > { %v9315_v4 = vsel %vm3885_vm10, %v9314_v43, %v9313_v22  ;;  %v9117_v45 = vrot.slane %v19324_v41, %v16960_v9  ;;  %v9121_v29 = vrot.slane %v19324_v41, %v16963_v57  ;;  %v9125_v48 = vrot.slane %v19324_v41, %v16966_v16  ;;  %v21097_v8 = vld [vmem:[#allocation73_spill] sm:$0xff] }
0x1138   : > { %v9317_v58 = vsel %vm3888_vm11, %v9316_v23, %v9315_v4  ;;  %v9137_v49 = vrot.slane %v15166_v17, %v16951_v7  ;;  %v9141_v0 = vrot.slane %v15166_v17, %v16954_v55  ;;  %v9129_v56 = vrot.slane %v19324_v41, %v16975_v10 }
0x1139   : > { %v9318_v39 = vpack.c.b16 %v9317_v58, %v9303_v1  ;;  %v9133_v44 = vrot.slane %v15166_v17, %v16948_v24  ;;  %v9145_v52 = vrot.slane %v15166_v17, %v16957_v14  ;;  %v9149_v60 = vrot.slane %v15166_v17, %v16960_v9 }
0x113a   : > { %v9153_v50 = vrot.slane %v15166_v17, %v16963_v57  ;;  %v9211_v13 = vmul.f32 %v19119_v19, %v9105_v11  ;;  %v9212_v59 = vmul.f32 %v19121_v35, %v9109_v28  ;;  %v9157_v20 = vrot.slane %v15166_v17, %v16966_v16 }
0x113b   : > { %14532 = vmatmul.mubr.msk.bf16.vlgmr.msra.gmra.mrb[40].mxu1 %vm2496_vm3, %v9318_v39  ;;  %v9161_v6 = vrot.slane %v15166_v17, %v16975_v10  ;;  %v9210_v41 = vmul.f32 %v19114_v38, %v9101_v21  ;;  %v9213_v54 = vmul.f32 %v19127_v62, %v9113_v33  ;;  %v9214_v61 = vmul.f32 %v19130_v30, %v9117_v45  ;;  %v21094_v62 = vld [vmem:[#allocation70_spill] sm:$0xff]  ;;  %v21095_v30 = vld [vmem:[#allocation71_spill] sm:$0xff] }
0x113c   : > { %14542 = vmatpush3.bf16.xpose.msra.mxu1 %v19261_v27  ;;  %v9215_v47 = vmul.f32 %v19135_v36, %v9121_v29  ;;  %v9219_v19 = vmul.f32 %v19150_v15, %v9137_v49  ;;  %v9220_v35 = vmul.f32 %v21089_v31, %v9141_v0  ;;  %v9216_v51 = vmul.f32 %v21090_v26, %v9125_v48  ;;  %v21096_v15 = vld [vmem:[#allocation72_spill] sm:$0xff] }
0x113d   : > { %v9217_v53 = vmul.f32 %v21091_v46, %v9129_v56  ;;  %v9218_v17 = vmul.f32 %v21092_v5, %v9133_v44  ;;  %v9221_v38 = vmul.f32 %v21093_v2, %v9145_v52  ;;  %14543 = vmatprep.mubr.msk.bf16.mxu1 %vm15784_vm2, %v21014_v37  ;;  %v9222_v27 = vmul.f32 %v21094_v62, %v9149_v60 }
0x113e   : > { %v9223_v40 = vmul.f32 %v21095_v30, %v9153_v50  ;;  %v9243_v36 = vpack.c.bf16 %v9211_v13, %v9211_v13  ;;  %v9244_v25 = vpack.c.bf16 %v9212_v59, %v9212_v59  ;;  %14553 = vmatprep.subr.bf16.mxu1 %v21014_v37  ;;  %v9224_v43 = vmul.f32 %v21096_v15, %v9157_v20 }
0x113f   : > { %v9225_v3 = vmul.f32 %v21097_v8, %v9161_v6  ;;  %v9242_v23 = vpack.c.bf16 %v9210_v41, %v9210_v41  ;;  %v9245_v21 = vpack.c.bf16 %v9213_v54, %v9213_v54  ;;  %v9246_v22 = vpack.c.bf16 %v9214_v61, %v9214_v61 }
0x1140   : > { %v9247_v11 = vpack.c.bf16 %v9215_v47, %v9215_v47  ;;  %v9251_v28 = vpack.c.bf16 %v9219_v19, %v9219_v19  ;;  %v9252_v33 = vpack.c.bf16 %v9220_v35, %v9220_v35  ;;  %v9248_v1 = vpack.c.bf16 %v9216_v51, %v9216_v51 }
0x1141   : > { %v9249_v4 = vpack.c.bf16 %v9217_v53, %v9217_v53  ;;  %v9250_v45 = vpack.c.bf16 %v9218_v17, %v9218_v17  ;;  %v9253_v29 = vpack.c.bf16 %v9221_v38, %v9221_v38  ;;  %v9254_v58 = vpack.c.bf16 %v9222_v27, %v9222_v27 }
0x1142   : > { %v9255_v48 = vpack.c.bf16 %v9223_v40, %v9223_v40  ;;  %v9380_v49 = vunpack.c.l.b16 %v9243_v36  ;;  %v9381_v0 = vunpack.c.l.b16 %v9244_v25  ;;  %v9256_v39 = vpack.c.bf16 %v9224_v43, %v9224_v43 }
0x1143   : > { %v9257_v56 = vpack.c.bf16 %v9225_v3, %v9225_v3  ;;  %v9379_v44 = vunpack.c.l.b16 %v9242_v23  ;;  %v9382_v52 = vunpack.c.l.b16 %v9245_v21  ;;  %v9383_v60 = vunpack.c.l.b16 %v9246_v22 }
0x1144   : > { %v9384_v50 = vunpack.c.l.b16 %v9247_v11  ;;  %v9388_v13 = vunpack.c.l.b16 %v9251_v28  ;;  %v9389_v59 = vunpack.c.l.b16 %v9252_v33  ;;  %v9385_v20 = vunpack.c.l.b16 %v9248_v1 }
0x1145   : > { %v9386_v6 = vunpack.c.l.b16 %v9249_v4  ;;  %v9387_v41 = vunpack.c.l.b16 %v9250_v45  ;;  %v9390_v54 = vunpack.c.l.b16 %v9253_v29  ;;  %v9391_v61 = vunpack.c.l.b16 %v9254_v58 }
0x1146   : > { %v9392_v47 = vunpack.c.l.b16 %v9255_v48  ;;  %v9395_v19 = vrot.slane %v9380_v49, 7  ;;  %v9397_v31 = vrot.slane %v9381_v0, 6  ;;  %v9393_v35 = vunpack.c.l.b16 %v9256_v39  ;;  %v21098_v0 = vld [vmem:[#allocation64_spill] sm:$0xff] }
0x1147   : > { %v9394_v26 = vunpack.c.l.b16 %v9257_v56  ;;  %v9399_v51 = vrot.slane %v9382_v52, 5  ;;  %v9409_v46 = vrot.slane %v9388_v13, 7  ;;  %v9401_v5 = vrot.slane %v9383_v60, 4 }
0x1148   : > { %v9396_v53 = vsel %vm3870_vm5, %v9395_v19, %v9379_v44  ;;  %v9403_v17 = vrot.slane %v9384_v50, 3  ;;  %v9411_v2 = vrot.slane %v9389_v59, 6  ;;  %v9405_v62 = vrot.slane %v9385_v20, 2 }
0x1149   : > { %v9398_v38 = vsel %vm3873_vm6, %v9397_v31, %v9396_v53  ;;  %v9410_v27 = vsel %vm3870_vm5, %v9409_v46, %v9387_v41  ;;  %v9413_v30 = vrot.slane %v9390_v54, 5  ;;  %v9415_v25 = vrot.slane %v9391_v61, 4 }
0x114a   : > { %v9400_v40 = vsel %vm3876_vm7, %v9399_v51, %v9398_v38  ;;  %v9412_v36 = vsel %vm3873_vm6, %v9411_v2, %v9410_v27  ;;  %v9898_v15 = vcombine.low %v19387_v63, %v19394_v18  ;;  %v9417_v3 = vrot.slane %v9392_v47, 3 }
0x114b   : > { %v9402_v43 = vsel %vm3879_vm8, %v9401_v5, %v9400_v40  ;;  %v9414_v8 = vsel %vm3876_vm7, %v9413_v30, %v9412_v36  ;;  %v9948_v23 = vcombine.low %v19400_v32, %v19403_v12  ;;  %v9407_v22 = vrot.slane %v9386_v6, 1 }
0x114c   : > { %v9404_v21 = vsel %vm3882_vm9, %v9403_v17, %v9402_v43  ;;  %v9416_v11 = vsel %vm3879_vm8, %v9415_v25, %v9414_v8  ;;  %v9419_v28 = vrot.slane %v9393_v35, 2  ;;  %v9421_v4 = vrot.slane %v9394_v26, 1 }
0x114d   : > { %v9406_v33 = vsel %vm3885_vm10, %v9405_v62, %v9404_v21  ;;  %v9418_v1 = vsel %vm3882_vm9, %v9417_v3, %v9416_v11  ;;  %v9950_v45 = vpack.c.bf16 %v9948_v23, %v9898_v15  ;;  %v10487_v39 = vsel %vm2496_vm3, %v21098_v0, 0 }
0x114e   : > { %v9420_v29 = vsel %vm3885_vm10, %v9419_v28, %v9418_v1  ;;  %v9408_v58 = vsel %vm3888_vm11, %v9407_v22, %v9406_v33  ;;  %v9899_v56 = vcombine.high %v19387_v63, %v19394_v18  ;;  %v9949_v44 = vcombine.high %v19400_v32, %v19403_v12  ;;  %v19506_v63 = vld [vmem:[#allocation6 + $0x1] sm:$0x1] }
0x114f   : > { %v9422_v48 = vsel %vm3888_vm11, %v9421_v4, %v9420_v29  ;;  %14544 = vmatmul.mubr.msk.bf16.vlgmr.msra.gmra.mrb[44].mxu1 %vm2496_vm3, %v9950_v45  ;;  %v21099_v12 = vld [vmem:[#allocation58_spill] sm:$0xff]  ;;  %vm1484_vm14 = vcmp.gt.f32.partialorder %v19506_v63, 0.5 }
0x1150   : > { %v9423_v49 = vpack.c.b16 %v9422_v48, %v9408_v58  ;;  %14555 = vmatprep.mubr.msk.bf16.mxu1 %vm15784_vm2, %v21014_v37  ;;  %v9951_v52 = vpack.c.bf16 %v9949_v44, %v9899_v56 }
0x1152   : > { %14538 = vmatmul.mubr.msk.bf16.vlgmr.msra.gmra.mrb[28].mxu0 %vm2496_vm3, %v9423_v49 }
0x1153   : > { %14548 = vmatpush3.bf16.xpose.msra.mxu0 %v10487_v39  ;;  %14549 = vmatprep.mubr.msk.bf16.mxu0 %vm15784_vm2, %v21014_v37 }
0x1154   : > { %14559 = vmatprep.subr.bf16.mxu0 %v21014_v37 }
0x115a   : > { %14550 = vmatmul.mubr.msk.bf16.vlgmr.msra.gmra.mrb[32].mxu0 %vm2496_vm3, %v9951_v52 }
0x115b   : > { %14561 = vmatprep.mubr.msk.bf16.mxu0 %vm15784_vm2, %v21014_v37 }
0x120e   : > { %v9356_v60 = vpop.f32.mrb[40].mxu1 }
0x120f   : > { %v14533_v50 = vpop.f32.mrb[41].mxu1  ;;  %v9468_v20 = vcombine.high %v9356_v60, %v21014_v37  ;;  %v9475_v61 = vrot.slane %v9356_v60, %v21015_v34 }
0x1210   : > { %v9359_v13 = vpop.f32.mrb[42].mxu1 }
0x1211   : > { %v14534_v59 = vpop.f32.mrb[43].mxu1  ;;  %v9534_v6 = vcombine.high %v9359_v13, %v21014_v37  ;;  %v9482_v47 = vrot.slane %v9468_v20, %v21015_v34  ;;  %v9541_v19 = vrot.slane %v9359_v13, %v21015_v34 }
0x1213   : > { %v9548_v35 = vrot.slane %v9534_v6, %v21015_v34 }
0x1222   : > { %v10476_v18 = vpop.f32.mrb[44].mxu1 }
0x1223   : > { %v10536_v32 = vcombine.high %v10476_v18, %v10476_v18  ;;  %v10543_v41 = vrot.slane %v10476_v18, %v21099_v12  ;;  %v14545_v54 = vpop.f32.mrb[45].mxu1 }
0x1224   : > { %v19512_v31 = vpop.f32.mrb[46].mxu1 }
0x1225   : > { %v9461_v26 = vpop.f32.mrb[28].mxu0  ;;  %v10550_v51 = vrot.slane %v10536_v32, %v21099_v12  ;;  %v10551_v46 = vcombine.high %v10543_v41, %v10543_v41  ;;  %v10559_v53 = vrot.slane %v10543_v41, %v21099_v12  ;;  %v14546_v5 = vpop.f32.mrb[47].mxu1  ;;  %v10585_v62 = vcombine.high %v19512_v31, %v19512_v31 }
0x1226   : > { %v9483_v17 = vcombine.high %v9461_v26, %v21014_v37  ;;  %v9490_v2 = vrot.slane %v9461_v26, %v21015_v34  ;;  %v14539_v38 = vpop.f32.mrb[29].mxu0  ;;  %v19524_v27 = vrot.slane %v19512_v31, %v21099_v12 }
0x1227   : > { %v9464_v30 = vpop.f32.mrb[30].mxu0  ;;  %v10552_v40 = vcombine.high %v10550_v51, %v10550_v51  ;;  %v10566_v36 = vrot.slane %v10550_v51, %v21099_v12  ;;  %v10573_v25 = vrot.slane %v10551_v46, %v21099_v12  ;;  %v10581_v15 = vcombine.high %v10559_v53, %v10559_v53 }
0x1228   : > { %v9497_v43 = vrot.slane %v9483_v17, %v21015_v34  ;;  %v9498_v8 = vcombine.low %v9475_v61, %v9490_v2  ;;  %v9499_v3 = vcombine.high %v9475_v61, %v9490_v2  ;;  %v9549_v23 = vcombine.high %v9464_v30, %v21014_v37  ;;  %v14540_v21 = vpop.f32.mrb[31].mxu0 }
0x1229   : > { %v9556_v22 = vrot.slane %v9464_v30, %v21015_v34  ;;  %v19532_v11 = vrot.slane %v10552_v40, %v21099_v12  ;;  %v10582_v28 = vcombine.high %v10566_v36, %v10566_v36  ;;  %v10583_v33 = vcombine.high %v10573_v25, %v10573_v25 }
0x122a   : > { %v9506_v1 = vrot.slane %v9498_v8, %v16631_v42  ;;  %v9513_v4 = vrot.slane %v9499_v3, %v16631_v42  ;;  %v9514_v45 = vcombine.low %v9482_v47, %v9497_v43  ;;  %v9515_v29 = vcombine.high %v9482_v47, %v9497_v43 }
0x122b   : > { %v9563_v58 = vrot.slane %v9549_v23, %v21015_v34  ;;  %v9564_v48 = vcombine.low %v9541_v19, %v9556_v22  ;;  %v9565_v49 = vcombine.high %v9541_v19, %v9556_v22  ;;  %v10584_v0 = vcombine.high %v19532_v11, %v19532_v11 }
0x122c   : > { %v9522_v39 = vrot.slane %v9514_v45, %v16631_v42  ;;  %v9529_v56 = vrot.slane %v9515_v29, %v16631_v42  ;;  %v9600_v44 = vcombine.low %v9506_v1, %v9513_v4  ;;  %v14171_v52 = vcombine.high %v9506_v1, %v9513_v4 }
0x122d   : > { %v9572_v60 = vrot.slane %v9564_v48, %v16631_v42  ;;  %v9579_v50 = vrot.slane %v9565_v49, %v16631_v42  ;;  %v9580_v13 = vcombine.low %v9548_v35, %v9563_v58  ;;  %v9581_v59 = vcombine.high %v9548_v35, %v9563_v58  ;;  %v10523_v20 = vpop.f32.mrb[32].mxu0 }
0x122e   : > { %v19544_v6 = vrot.slane %v9600_v44, %v21015_v34  ;;  %v19547_v18 = vrot.slane %v14171_v52, %v21015_v34  ;;  %v9616_v32 = vcombine.low %v9522_v39, %v9529_v56  ;;  %v14172_v41 = vcombine.high %v9522_v39, %v9529_v56  ;;  %v14551_v54 = vpop.f32.mrb[33].mxu0 }
0x122f   : > { %v9588_v61 = vrot.slane %v9580_v13, %v16631_v42  ;;  %v9595_v47 = vrot.slane %v9581_v59, %v16631_v42  ;;  %v9650_v19 = vcombine.low %v9572_v60, %v9579_v50  ;;  %v14173_v31 = vcombine.high %v9572_v60, %v9579_v50  ;;  %v10526_v26 = vpop.f32.mrb[34].mxu0 }
0x1230   : > { %v19552_v51 = vrot.slane %v9616_v32, %v21015_v34  ;;  %v19555_v35 = vrot.slane %v14172_v41, %v21015_v34  ;;  %v19559_v46 = vsel %vm1484_vm14, -1e+09, %v10559_v53  ;;  %v19563_v5 = vsel %vm1484_vm14, -1e+09, %v10573_v25  ;;  %v14552_v17 = vpop.f32.mrb[35].mxu0 }
0x1231   : > { %v19566_v2 = vrot.slane %v9650_v19, %v21015_v34  ;;  %v19569_v38 = vrot.slane %v14173_v31, %v21015_v34  ;;  %v9666_v30 = vcombine.low %v9588_v61, %v9595_v47  ;;  %v14174_v40 = vcombine.high %v9588_v61, %v9595_v47 }
0x1232   : > { %v19573_v43 = vsel %vm1484_vm14, -1e+09, %v10581_v15  ;;  %v19577_v53 = vsel %vm1484_vm14, -1e+09, %v10583_v33  ;;  %v19581_v25 = vsel %vm1484_vm14, -1e+09, %v10566_v36  ;;  %v10828_v8 = vcombine.low %v19559_v46, %v19563_v5 }
0x1233   : > { %v19586_v3 = vrot.slane %v9666_v30, %v21015_v34  ;;  %v19589_v23 = vrot.slane %v14174_v40, %v21015_v34  ;;  %v19594_v15 = vsel %vm1484_vm14, -1e+09, %v19532_v11  ;;  %v19598_v21 = vsel %vm1484_vm14, -1e+09, %v10582_v28 }
0x1234   : > { %v10599_v33 = vrot.slane %v10585_v62, %v21099_v12  ;;  %v10600_v1 = vcombine.high %v19524_v27, %v19524_v27  ;;  %v10608_v4 = vrot.slane %v19524_v27, %v21099_v12  ;;  %v10634_v45 = vcombine.high %v10523_v20, %v10523_v20 }
0x1235   : > { %v10641_v29 = vrot.slane %v10523_v20, %v21099_v12  ;;  %v10683_v58 = vcombine.high %v10526_v26, %v10526_v26  ;;  %v10690_v39 = vrot.slane %v10526_v26, %v21099_v12 }
0x1236   : > { %v10601_v28 = vcombine.high %v10599_v33, %v10599_v33  ;;  %v10615_v48 = vrot.slane %v10599_v33, %v21099_v12  ;;  %v10622_v49 = vrot.slane %v10600_v1, %v21099_v12  ;;  %v10630_v56 = vcombine.high %v10608_v4, %v10608_v4 }
0x1237   : > { %v19615_v62 = vsel %vm1484_vm14, -1e+09, %v10608_v4  ;;  %v10648_v44 = vrot.slane %v10634_v45, %v21099_v12  ;;  %v10649_v52 = vcombine.high %v10641_v29, %v10641_v29  ;;  %v10657_v17 = vrot.slane %v10641_v29, %v21099_v12 }
0x1238   : > { %v10629_v27 = vrot.slane %v10601_v28, %v21099_v12  ;;  %v10631_v60 = vcombine.high %v10615_v48, %v10615_v48  ;;  %v10632_v50 = vcombine.high %v10622_v49, %v10622_v49  ;;  %v19621_v13 = vsel %vm1484_vm14, -1e+09, %v10622_v49 }
0x1239   : > { %v19625_v59 = vsel %vm1484_vm14, -1e+09, %v10630_v56  ;;  %v19629_v20 = vsel %vm1484_vm14, -1e+09, %v10615_v48  ;;  %v10877_v32 = vcombine.low %v19615_v62, %v19621_v13  ;;  %v10650_v41 = vcombine.high %v10648_v44, %v10648_v44 }
0x123a   : > { %v10633_v54 = vcombine.high %v10629_v27, %v10629_v27  ;;  %v19635_v61 = vsel %vm1484_vm14, -1e+09, %v10632_v50  ;;  %v19639_v47 = vsel %vm1484_vm14, -1e+09, %v10629_v27  ;;  %v19643_v19 = vsel %vm1484_vm14, -1e+09, %v10631_v60 }
0x123b   : > { %v10878_v31 = vcombine.low %v19625_v59, %v19635_v61  ;;  %v10879_v26 = vcombine.low %v19629_v20, %v19639_v47  ;;  %v10664_v30 = vrot.slane %v10648_v44, %v21099_v12  ;;  %v10671_v40 = vrot.slane %v10649_v52, %v21099_v12 }
0x123c   : > { %v10678_v33 = vrot.slane %v10650_v41, %v21099_v12  ;;  %v10697_v1 = vrot.slane %v10683_v58, %v21099_v12  ;;  %v10698_v4 = vcombine.high %v10690_v39, %v10690_v39  ;;  %v10679_v45 = vcombine.high %v10657_v17, %v10657_v17 }
0x123d   : > { %v10680_v28 = vcombine.high %v10664_v30, %v10664_v30  ;;  %v19656_v48 = vsel %vm1484_vm14, -1e+09, %v10657_v17  ;;  %v19660_v49 = vsel %vm1484_vm14, -1e+09, %v10664_v30  ;;  %v10681_v29 = vcombine.high %v10671_v40, %v10671_v40 }
0x123e   : > { %21100 = vst [vmem:[#allocation67_spill] sm:$0xff] %v19660_v49  ;;  %v10682_v56 = vcombine.high %v10678_v33, %v10678_v33  ;;  %v19664_v44 = vsel %vm1484_vm14, -1e+09, %v10671_v40  ;;  %v19668_v58 = vsel %vm1484_vm14, -1e+09, %v10678_v33  ;;  %v10699_v17 = vcombine.high %v10697_v1, %v10697_v1 }
0x123f   : > { %21101 = vst [vmem:[#allocation65_spill] sm:$0xff] %v19668_v58  ;;  %v19672_v52 = vsel %vm1484_vm14, -1e+09, %v10679_v45  ;;  %v19676_v27 = vsel %vm1484_vm14, -1e+09, %v10680_v28  ;;  %v10926_v60 = vcombine.low %v19656_v48, %v19664_v44  ;;  %v10928_v50 = vcombine.low %v19660_v49, %v19668_v58 }
0x1240   : > { %21102 = vst [vmem:[#allocation52_spill] sm:$0xff] %v19672_v52  ;;  %v19684_v41 = vsel %vm1484_vm14, -1e+09, %v10681_v29  ;;  %v10706_v30 = vrot.slane %v10690_v39, %v21099_v12  ;;  %v10713_v40 = vrot.slane %v10697_v1, %v21099_v12  ;;  %v10720_v45 = vrot.slane %v10698_v4, %v21099_v12 }
0x1241   : > { %21103 = vst [vmem:[#allocation63_spill] sm:$0xff] %v19684_v41  ;;  %v10927_v33 = vcombine.low %v19672_v52, %v19684_v41  ;;  %v19696_v28 = vsel %vm1484_vm14, -1e+09, %v10584_v0  ;;  %v10838_v29 = vrot.slane %v10828_v8, %v21099_v12  ;;  %v10727_v22 = vrot.slane %v10699_v17, %v21099_v12 }
0x1242   : > { %v10728_v36 = vcombine.high %v10706_v30, %v10706_v30  ;;  %v10729_v39 = vcombine.high %v10713_v40, %v10713_v40  ;;  %v19702_v1 = vsel %vm1484_vm14, -1e+09, %v10706_v30  ;;  %v10730_v34 = vcombine.high %v10720_v45, %v10720_v45 }
0x1243   : > { %21104 = vst [vmem:[#allocation69_spill] sm:$0xff] %v19702_v1  ;;  %v19706_v4 = vsel %vm1484_vm14, -1e+09, %v10720_v45  ;;  %v19710_v11 = vsel %vm1484_vm14, -1e+09, %v10713_v40  ;;  %v10831_v0 = vcombine.low %v19598_v21, %v19696_v28  ;;  %v10731_v8 = vcombine.high %v10727_v22, %v10727_v22 }
0x1244   : > { %21105 = vst [vmem:[#allocation50_spill] sm:$0xff] %v19706_v4  ;;  %21106 = vst [vmem:[#allocation62_spill] sm:$0xff] %v19710_v11  ;;  %v19716_v17 = vsel %vm1484_vm14, -1e+09, %v10728_v36  ;;  %v19720_v30 = vsel %vm1484_vm14, -1e+09, %v10727_v22  ;;  %v10975_v37 = vcombine.low %v19702_v1, %v19706_v4  ;;  %v21110_v36 = vcombine.low %v19573_v43, %v19577_v53 }
0x1245   : > { %21107 = vst [vmem:[#allocation53_spill] sm:$0xff] %v19716_v17  ;;  %21108 = vst [vmem:[#allocation51_spill] sm:$0xff] %v19720_v30  ;;  %v19724_v45 = vsel %vm1484_vm14, -1e+09, %v10729_v39  ;;  %v19728_v40 = vsel %vm1484_vm14, -1e+09, %v10730_v34  ;;  %v10977_v58 = vcombine.low %v19710_v11, %v19720_v30  ;;  %v21111_v39 = vcombine.low %v19581_v25, %v19594_v15 }
0x1246   : > { %21109 = vst [vmem:[#allocation55_spill] sm:$0xff] %v19728_v40  ;;  %v10845_v22 = vrot.slane %v21110_v36, %v21099_v12  ;;  %v10976_v49 = vcombine.low %v19716_v17, %v19728_v40  ;;  %v10859_v41 = vrot.slane %v10831_v0, %v21099_v12  ;;  %v19747_v4 = vsel %vm1484_vm14, -1e+09, %v10633_v54 }
0x1247   : > { %v10852_v34 = vrot.slane %v21111_v39, %v21099_v12  ;;  %v10880_v11 = vcombine.low %v19643_v19, %v19747_v4  ;;  %v10887_v36 = vrot.slane %v10877_v32, %v21099_v12  ;;  %v10894_v1 = vrot.slane %v10878_v31, %v21099_v12 }
0x1248   : > { %v10860_v30 = vcombine.low %v10838_v29, %v10845_v22  ;;  %v10901_v17 = vrot.slane %v10879_v26, %v21099_v12  ;;  %v19756_v39 = vsel %vm1484_vm14, -1e+09, %v10682_v56  ;;  %v10936_v0 = vrot.slane %v10926_v60, %v21099_v12 }
0x1249   : > { %v10861_v40 = vcombine.low %v10852_v34, %v10859_v41  ;;  %v10908_v29 = vrot.slane %v10880_v11, %v21099_v12  ;;  %v10909_v22 = vcombine.low %v10887_v36, %v10894_v1  ;;  %v10929_v52 = vcombine.low %v19676_v27, %v19756_v39 }
0x124a   : > { %v10868_v54 = vrot.slane %v10860_v30, %v21099_v12  ;;  %v10943_v31 = vrot.slane %v10927_v33, %v21099_v12  ;;  %v10950_v26 = vrot.slane %v10928_v50, %v21099_v12  ;;  %v19768_v56 = vsel %vm1484_vm14, -1e+09, %v10731_v8 }
0x124b   : > { %v10875_v32 = vrot.slane %v10861_v40, %v21099_v12  ;;  %v10910_v41 = vcombine.low %v10901_v17, %v10908_v29  ;;  %v10917_v60 = vrot.slane %v10909_v22, %v21099_v12  ;;  %v10957_v11 = vrot.slane %v10929_v52, %v21099_v12 }
0x124c   : > { %v10978_v1 = vcombine.low %v19724_v45, %v19768_v56  ;;  %v10958_v34 = vcombine.low %v10936_v0, %v10943_v31  ;;  %v10985_v40 = vrot.slane %v10975_v37, %v21099_v12  ;;  %v10992_v33 = vrot.slane %v10976_v49, %v21099_v12 }
0x124d   : > { %v10876_v30 = vcombine.low %v10868_v54, %v10875_v32  ;;  %v10924_v50 = vrot.slane %v10910_v41, %v21099_v12  ;;  %v10959_v63 = vcombine.low %v10950_v26, %v10957_v11  ;;  %v10999_v8 = vrot.slane %v10977_v58, %v21099_v12 }
0x124e   : > { %v11006_v17 = vrot.slane %v10978_v1, %v21099_v12  ;;  %v10966_v29 = vrot.slane %v10958_v34, %v21099_v12  ;;  %v11007_v22 = vcombine.low %v10985_v40, %v10992_v33  ;;  %v9632_v54 = vcombine.low %v19544_v6, %v19547_v18 }
0x124f   : > { %v11037_v36 = vsel %vm2496_vm3, %v10876_v30, -inf  ;;  %v11028_v52 = vsel %vm2496_vm3, %v10876_v30, 0.0  ;;  %v10925_v37 = vcombine.low %v10917_v60, %v10924_v50  ;;  %v10973_v49 = vrot.slane %v10959_v63, %v21099_v12 }
0x1250   : > { %11038 = vmax.xlane.f32.xlu0 %v11037_v36  ;;  %14189 = vst [vmem:[%s16545_s24 + $0x20] sm:$0xff] %v11028_v52  ;;  %v11008_v0 = vcombine.low %v10999_v8, %v11006_v17  ;;  %v11015_v58 = vrot.slane %v11007_v22, %v21099_v12  ;;  %v9640_v32 = vcombine.low %v19552_v51, %v19555_v35 }
0x1251   : > { %v9682_v31 = vcombine.low %v19566_v2, %v19569_v38  ;;  %v9690_v26 = vcombine.low %v19586_v3, %v19589_v23  ;;  %v11040_v41 = vsel %vm2496_vm3, %v10925_v37, -inf  ;;  %v11029_v60 = vsel %vm2496_vm3, %v10925_v37, 0.0 }
0x1252   : > { %v10974_v11 = vcombine.low %v10966_v29, %v10973_v49  ;;  %v11022_v1 = vrot.slane %v11008_v0, %v21099_v12  ;;  %11041 = vmax.xlane.f32.xlu1 %v11040_v41  ;;  %14190 = vst [vmem:[%s16545_s24 + $0x28] sm:$0xff] %v11029_v60  ;;  %v19798_v6 = vrot.slane %v9632_v54, %v16631_v42 }
0x1253   : > { %v19801_v18 = vrot.slane %v9640_v32, %v16631_v42  ;;  %v19804_v51 = vrot.slane %v9682_v31, %v16631_v42  ;;  %v19807_v35 = vrot.slane %v9690_v26, %v16631_v42 }
0x1254   : > { %v11030_v2 = vsel %vm2496_vm3, %v10974_v11, 0.0  ;;  %v11043_v38 = vsel %vm2496_vm3, %v10974_v11, -inf  ;;  %v11023_v3 = vcombine.low %v11015_v58, %v11022_v1 }
0x1255   : > { %14191 = vst [vmem:[%s16545_s24 + $0x30] sm:$0xff] %v11030_v2  ;;  %11044 = vmax.xlane.f32.xlu0 %v11043_v38  ;;  %v9649_v30 = vcombine.high %v19798_v6, %v19801_v18  ;;  %v9699_v34 = vcombine.high %v19804_v51, %v19807_v35 }
0x1256   : > { %v11031_v33 = vsel %vm2496_vm3, %v11023_v3, 0.0  ;;  %v11046_v63 = vsel %vm2496_vm3, %v11023_v3, -inf }
0x1257   : > { %14192 = vst [vmem:[%s16545_s24 + $0x38] sm:$0xff] %v11031_v33  ;;  %v19822_v50 = vpack.i.bf16 %v9699_v34, %v9649_v30 }
0x1259   : > { %11047 = vmax.xlane.f32.xlu0 %v11046_v63 }
0x12dd   : > { %v11039_v8 = vpop.xlane.xlu0 %11038 }
0x12de   : > { %v11056_v17 = vrot.slane %v11039_v8, %v16948_v24  ;;  %v11060_v36 = vrot.slane %v11039_v8, %v16951_v7  ;;  %v11064_v52 = vrot.slane %v11039_v8, %v16954_v55  ;;  %v11068_v29 = vrot.slane %v11039_v8, %v16957_v14 }
0x12df   : > { %v11042_v22 = vpop.xlane.xlu1 %11041  ;;  %v11072_v37 = vrot.slane %v11039_v8, %v16960_v9  ;;  %v11076_v49 = vrot.slane %v11039_v8, %v16963_v57  ;;  %v11080_v0 = vrot.slane %v11039_v8, %v16966_v16  ;;  %v11084_v54 = vrot.slane %v11039_v8, %v16975_v10 }
0x12e0   : > { %v11213_v58 = vsub.f32 %v19559_v46, %v11056_v17  ;;  %v11214_v32 = vsub.f32 %v19563_v5, %v11060_v36  ;;  %v11215_v31 = vsub.f32 %v19573_v43, %v11064_v52  ;;  %v11088_v26 = vrot.slane %v11042_v22, %v16948_v24 }
0x12e1   : > { %v11216_v41 = vsub.f32 %v19577_v53, %v11068_v29  ;;  %v11092_v60 = vrot.slane %v11042_v22, %v16951_v7  ;;  %v11096_v11 = vrot.slane %v11042_v22, %v16954_v55  ;;  %v11100_v1 = vrot.slane %v11042_v22, %v16957_v14 }
0x12e2   : > { %v11217_v2 = vsub.f32 %v19581_v25, %v11072_v37  ;;  %v11218_v38 = vsub.f32 %v19594_v15, %v11076_v49  ;;  %v11104_v46 = vrot.slane %v11042_v22, %v16960_v9  ;;  %v11108_v5 = vrot.slane %v11042_v22, %v16963_v57  ;;  %v11045_v36 = vpop.xlane.xlu0 %11044 }
0x12e3   : > { %v11219_v43 = vsub.f32 %v19598_v21, %v11080_v0  ;;  %v11220_v3 = vsub.f32 %v19696_v28, %v11084_v54  ;;  %v11112_v53 = vrot.slane %v11042_v22, %v16966_v16  ;;  %v11116_v30 = vrot.slane %v11042_v22, %v16975_v10 }
0x12e4   : > { %v11221_v34 = vsub.f32 %v19615_v62, %v11088_v26  ;;  %v11245_v33 = vmul.f32 1.442695, %v11213_v58  ;;  %v11247_v63 = vmul.f32 1.442695, %v11214_v32  ;;  %v11249_v8 = vmul.f32 1.442695, %v11215_v31 }
0x12e5   : > { %v11222_v25 = vsub.f32 %v19621_v13, %v11092_v60  ;;  %v11223_v15 = vsub.f32 %v19625_v59, %v11096_v11  ;;  %v11224_v17 = vsub.f32 %v19635_v61, %v11100_v1  ;;  %v11251_v52 = vmul.f32 1.442695, %v11216_v41  ;;  %v21112_v60 = vld [vmem:[#allocation52_spill] sm:$0xff]  ;;  %v21113_v1 = vld [vmem:[#allocation63_spill] sm:$0xff] }
0x12e6   : > { %v11225_v21 = vsub.f32 %v19629_v20, %v11104_v46  ;;  %v11226_v28 = vsub.f32 %v19639_v47, %v11108_v5  ;;  %15167 = vpow2.f32 %v11245_v33  ;;  %v11253_v29 = vmul.f32 1.442695, %v11217_v2  ;;  %v21114_v5 = vld [vmem:[#allocation67_spill] sm:$0xff] }
0x12e7   : > { %v11227_v22 = vsub.f32 %v19643_v19, %v11112_v53  ;;  %v11228_v62 = vsub.f32 %v19747_v4, %v11116_v30  ;;  %15169 = vpow2.f32 %v11247_v63  ;;  %v11255_v37 = vmul.f32 1.442695, %v11218_v38  ;;  %v19869_v38 = vpop.xlane.xlu0 %11047 }
0x12e8   : > { %v11120_v13 = vrot.slane %v11045_v36, %v16948_v24  ;;  %v11124_v59 = vrot.slane %v11045_v36, %v16951_v7  ;;  %15171 = vpow2.f32 %v11249_v8  ;;  %v11257_v61 = vmul.f32 1.442695, %v11219_v43 }
0x12e9   : > { %v11128_v49 = vrot.slane %v11045_v36, %v16954_v55  ;;  %v11132_v20 = vrot.slane %v11045_v36, %v16957_v14  ;;  %15173 = vpow2.f32 %v11251_v52  ;;  %v11259_v47 = vmul.f32 1.442695, %v11220_v3  ;;  %v21115_v3 = vld [vmem:[#allocation65_spill] sm:$0xff] }
0x12ea   : > { %v11136_v0 = vrot.slane %v11045_v36, %v16960_v9  ;;  %v11140_v19 = vrot.slane %v11045_v36, %v16963_v57  ;;  %15175 = vpow2.f32 %v11253_v29  ;;  %v11261_v4 = vmul.f32 1.442695, %v11221_v34 }
0x12eb   : > { %v11144_v54 = vrot.slane %v11045_v36, %v16966_v16  ;;  %v11148_v58 = vrot.slane %v11045_v36, %v16975_v10  ;;  %15177 = vpow2.f32 %v11255_v37  ;;  %v11263_v32 = vmul.f32 1.442695, %v11222_v25 }
0x12ec   : > { %v11229_v31 = vsub.f32 %v19656_v48, %v11120_v13  ;;  %v11230_v26 = vsub.f32 %v19664_v44, %v11124_v59  ;;  %15179 = vpow2.f32 %v11257_v61  ;;  %v11265_v41 = vmul.f32 1.442695, %v11223_v15 }
0x12ed   : > { %v11231_v11 = vsub.f32 %v21112_v60, %v11128_v49  ;;  %v11232_v2 = vsub.f32 %v21113_v1, %v11132_v20  ;;  %15181 = vpow2.f32 %v11259_v47  ;;  %v11267_v46 = vmul.f32 1.442695, %v11224_v17 }
0x12ee   : > { %v11233_v43 = vsub.f32 %v21114_v5, %v11136_v0  ;;  %v11234_v53 = vsub.f32 %v21115_v3, %v11140_v19  ;;  %15183 = vpow2.f32 %v11261_v4  ;;  %v11269_v30 = vmul.f32 1.442695, %v11225_v21  ;;  %v21116_v0 = vld [vmem:[#allocation69_spill] sm:$0xff] }
0x12ef   : > { %v11235_v48 = vsub.f32 %v19676_v27, %v11144_v54  ;;  %v11236_v44 = vsub.f32 %v19756_v39, %v11148_v58  ;;  %15185 = vpow2.f32 %v11263_v32  ;;  %v11271_v34 = vmul.f32 1.442695, %v11226_v28 }
0x12f0   : > { %v19875_v33 = vpop.eup %15167  ;;  %v11152_v63 = vrot.slane %v19869_v38, %v16948_v24  ;;  %v11156_v8 = vrot.slane %v19869_v38, %v16951_v7  ;;  %15187 = vpow2.f32 %v11265_v41  ;;  %v11273_v25 = vmul.f32 1.442695, %v11227_v22  ;;  %v21117_v41 = vld [vmem:[#allocation50_spill] sm:$0xff] }
0x12f1   : > { %v19881_v15 = vpop.eup %15169  ;;  %v11160_v17 = vrot.slane %v19869_v38, %v16954_v55  ;;  %v11164_v27 = vrot.slane %v19869_v38, %v16957_v14  ;;  %15189 = vpow2.f32 %v11267_v46  ;;  %v11275_v39 = vmul.f32 1.442695, %v11228_v62 }
0x12f2   : > { %v19887_v36 = vpop.eup %15171  ;;  %v11168_v52 = vrot.slane %v19869_v38, %v16960_v9  ;;  %v11341_v21 = vcombine.low %v19875_v33, %v19881_v15  ;;  %15191 = vpow2.f32 %v11269_v30  ;;  %v11277_v28 = vmul.f32 1.442695, %v11229_v31  ;;  %v21118_v30 = vld [vmem:[#allocation53_spill] sm:$0xff] }
0x12f3   : > { %v19893_v29 = vpop.eup %15173  ;;  %v11172_v22 = vrot.slane %v19869_v38, %v16963_v57  ;;  %v11176_v37 = vrot.slane %v19869_v38, %v16966_v16  ;;  %15193 = vpow2.f32 %v11271_v34  ;;  %v11279_v62 = vmul.f32 1.442695, %v11230_v26  ;;  %v21119_v34 = vld [vmem:[#allocation55_spill] sm:$0xff] }
0x12f4   : > { %v19899_v13 = vpop.eup %15175  ;;  %v11342_v59 = vcombine.low %v19887_v36, %v19893_v29  ;;  %v11351_v61 = vrot.slane %v11341_v21, %v21099_v12  ;;  %15195 = vpow2.f32 %v11273_v25  ;;  %v11281_v49 = vmul.f32 1.442695, %v11231_v11 }
0x12f5   : > { %v19904_v20 = vpop.eup %15177  ;;  %v11180_v47 = vrot.slane %v19869_v38, %v16975_v10  ;;  %v11237_v19 = vsub.f32 %v21116_v0, %v11152_v63  ;;  %15197 = vpow2.f32 %v11275_v39  ;;  %v11283_v4 = vmul.f32 1.442695, %v11232_v2 }
0x12f6   : > { %v19909_v54 = vpop.eup %15179  ;;  %v11343_v58 = vcombine.low %v19899_v13, %v19904_v20  ;;  %v11358_v32 = vrot.slane %v11342_v59, %v21099_v12  ;;  %15199 = vpow2.f32 %v11277_v28  ;;  %v11285_v31 = vmul.f32 1.442695, %v11233_v43  ;;  %v21120_v28 = vld [vmem:[#allocation62_spill] sm:$0xff] }
0x12f7   : > { %v19914_v26 = vpop.eup %15181  ;;  %v11238_v60 = vsub.f32 %v21117_v41, %v11156_v8  ;;  %15201 = vpow2.f32 %v11279_v62  ;;  %v11287_v11 = vmul.f32 1.442695, %v11234_v53  ;;  %v11289_v1 = vmul.f32 1.442695, %v11235_v48 }
0x12f8   : > { %v19917_v38 = vpop.eup %15183  ;;  %v11344_v2 = vcombine.low %v19909_v54, %v19914_v26  ;;  %v11365_v46 = vrot.slane %v11343_v58, %v21099_v12  ;;  %v11373_v5 = vcombine.low %v11351_v61, %v11358_v32  ;;  %15203 = vpow2.f32 %v11281_v49 }
0x12f9   : > { %v19922_v3 = vpop.eup %15185  ;;  %v11239_v43 = vsub.f32 %v21118_v30, %v11160_v17  ;;  %v11240_v63 = vsub.f32 %v21119_v34, %v11164_v27  ;;  %15205 = vpow2.f32 %v11283_v4  ;;  %v11291_v8 = vmul.f32 1.442695, %v11236_v44 }
0x12fa   : > { %v19926_v25 = vpop.eup %15187  ;;  %v11372_v53 = vrot.slane %v11344_v2, %v21099_v12  ;;  %v11390_v48 = vcombine.low %v19917_v38, %v19922_v3  ;;  %15207 = vpow2.f32 %v11285_v31  ;;  %v11293_v39 = vmul.f32 1.442695, %v11237_v19  ;;  %v21121_v19 = vld [vmem:[#allocation51_spill] sm:$0xff] }
0x12fb   : > { %v19931_v21 = vpop.eup %15189  ;;  %v11241_v62 = vsub.f32 %v21120_v28, %v11168_v52  ;;  %v11381_v59 = vrot.slane %v11373_v5, %v21099_v12  ;;  %15209 = vpow2.f32 %v11287_v11  ;;  %v11295_v17 = vmul.f32 1.442695, %v11238_v60 }
0x12fc   : > { %v19935_v27 = vpop.eup %15191  ;;  %v11374_v44 = vcombine.low %v11365_v46, %v11372_v53  ;;  %v11391_v61 = vcombine.low %v19926_v25, %v19931_v21  ;;  %v11400_v49 = vrot.slane %v11390_v48, %v21099_v12  ;;  %15211 = vpow2.f32 %v11289_v1 }
0x12fd   : > { %v19940_v0 = vpop.eup %15193  ;;  %v11242_v4 = vsub.f32 %v21121_v19, %v11172_v22  ;;  %v11243_v58 = vsub.f32 %v19724_v45, %v11176_v37  ;;  %15213 = vpow2.f32 %v11291_v8  ;;  %v11297_v52 = vmul.f32 1.442695, %v11239_v43 }
0x12fe   : > { %v19944_v32 = vpop.eup %15195  ;;  %v11388_v31 = vrot.slane %v11374_v44, %v21099_v12  ;;  %v11392_v41 = vcombine.low %v19935_v27, %v19940_v0  ;;  %v11407_v60 = vrot.slane %v11391_v61, %v21099_v12  ;;  %15215 = vpow2.f32 %v11293_v39 }
0x12ff   : > { %v19950_v11 = vpop.eup %15197  ;;  %v11244_v1 = vsub.f32 %v19768_v56, %v11180_v47  ;;  %15217 = vpow2.f32 %v11295_v17  ;;  %v11299_v22 = vmul.f32 1.442695, %v11240_v63  ;;  %v11301_v2 = vmul.f32 1.442695, %v11241_v62 }
0x1300   : > { %v19953_v45 = vpop.eup %15199  ;;  %v11389_v37 = vcombine.low %v11381_v59, %v11388_v31  ;;  %v11393_v46 = vcombine.low %v19944_v32, %v19950_v11  ;;  %v11414_v5 = vrot.slane %v11392_v41, %v21099_v12  ;;  %v11422_v30 = vcombine.low %v11400_v49, %v11407_v60 }
0x1301   : > { %v19958_v43 = vpop.eup %15201  ;;  %15219 = vpow2.f32 %v11297_v52  ;;  %v11303_v34 = vmul.f32 1.442695, %v11242_v4  ;;  %v11305_v53 = vmul.f32 1.442695, %v11243_v58  ;;  %v11307_v28 = vmul.f32 1.442695, %v11244_v1 }
0x1302   : > { %v19960_v8 = vpop.eup %15203  ;;  %v11541_v56 = vsel %vm2496_vm3, %v11389_v37, 0.0  ;;  %v11421_v47 = vrot.slane %v11393_v46, %v21099_v12  ;;  %v11439_v63 = vcombine.low %v19953_v45, %v19958_v43  ;;  %v11430_v39 = vrot.slane %v11422_v30, %v21099_v12 }
0x1303   : > { %v19966_v48 = vpop.eup %15205  ;;  %11542 = vadd.xlane.f32.xlu0 %v11541_v56  ;;  %15221 = vpow2.f32 %v11299_v22 }
0x1304   : > { %v19969_v62 = vpop.eup %15207  ;;  %v11423_v59 = vcombine.low %v11414_v5, %v11421_v47  ;;  %v11440_v17 = vcombine.low %v19960_v8, %v19966_v48  ;;  %v11449_v44 = vrot.slane %v11439_v63, %v21099_v12  ;;  %15223 = vpow2.f32 %v11301_v2 }
0x1305   : > { %21122 = vst [vmem:[#allocation70_spill] sm:$0xff] %v19969_v62  ;;  %v19974_v61 = vpop.eup %15209  ;;  %15225 = vpow2.f32 %v11303_v34 }
0x1306   : > { %21123 = vst [vmem:[#allocation71_spill] sm:$0xff] %v19974_v61  ;;  %v19976_v49 = vpop.eup %15211  ;;  %v11437_v19 = vrot.slane %v11423_v59, %v21099_v12  ;;  %v11441_v4 = vcombine.low %v19969_v62, %v19974_v61  ;;  %v11456_v58 = vrot.slane %v11440_v17, %v21099_v12  ;;  %15227 = vpow2.f32 %v11305_v53 }
0x1307   : > { %21124 = vst [vmem:[#allocation72_spill] sm:$0xff] %v19976_v49  ;;  %v19982_v52 = vpop.eup %15213  ;;  %15229 = vpow2.f32 %v11307_v28 }
0x1308   : > { %21125 = vst [vmem:[#allocation73_spill] sm:$0xff] %v19982_v52  ;;  %v19984_v31 = vpop.eup %15215  ;;  %v11438_v41 = vcombine.low %v11430_v39, %v11437_v19  ;;  %v11442_v60 = vcombine.low %v19976_v49, %v19982_v52  ;;  %v11463_v1 = vrot.slane %v11441_v4, %v21099_v12  ;;  %v11471_v22 = vcombine.low %v11449_v44, %v11456_v58 }
0x1309   : > { %21126 = vst [vmem:[#allocation64_spill] sm:$0xff] %v19984_v31  ;;  %v19989_v2 = vpop.eup %15217 }
0x130a   : > { %v11544_v37 = vsel %vm2496_vm3, %v11438_v41, 0.0  ;;  %v11470_v46 = vrot.slane %v11442_v60, %v21099_v12  ;;  %v11488_v5 = vcombine.low %v19984_v31, %v19989_v2  ;;  %v11479_v56 = vrot.slane %v11471_v22, %v21099_v12 }
0x130b   : > { %v19995_v30 = vpop.eup %15219  ;;  %11545 = vadd.xlane.f32.xlu1 %v11544_v37 }
0x130c   : > { %v11472_v34 = vcombine.low %v11463_v1, %v11470_v46  ;;  %v11498_v28 = vrot.slane %v11488_v5, %v21099_v12 }
0x130d   : > { %v19998_v47 = vpop.eup %15221 }
0x130e   : > { %21127 = vst [vmem:[#allocation58_spill] sm:$0xff] %v19998_v47  ;;  %v20000_v63 = vpop.eup %15223  ;;  %v11486_v53 = vrot.slane %v11472_v34, %v21099_v12  ;;  %v11489_v39 = vcombine.low %v19995_v30, %v19998_v47 }
0x130f   : > { %21128 = vst [vmem:[#allocation52_spill] sm:$0xff] %v20000_v63  ;;  %v20006_v59 = vpop.eup %15225 }
0x1310   : > { %21129 = vst [vmem:[#allocation63_spill] sm:$0xff] %v20006_v59  ;;  %v20008_v17 = vpop.eup %15227  ;;  %v11487_v44 = vcombine.low %v11479_v56, %v11486_v53  ;;  %v11490_v19 = vcombine.low %v20000_v63, %v20006_v59  ;;  %v11505_v4 = vrot.slane %v11489_v39, %v21099_v12  ;;  %v21132_v39 = vld [vmem:[#allocation54_spill] sm:$0xff]  ;;  %v21135_v63 = vld [vmem:[#allocation57_spill] sm:$0xff] }
0x1311   : > { %21130 = vst [vmem:[#allocation67_spill] sm:$0xff] %v20008_v17  ;;  %v20013_v58 = vpop.eup %15229 }
0x1312   : > { %21131 = vst [vmem:[#allocation65_spill] sm:$0xff] %v20013_v58  ;;  %v11547_v41 = vsel %vm2496_vm3, %v11487_v44, 0.0  ;;  %v11491_v60 = vcombine.low %v20008_v17, %v20013_v58  ;;  %v11512_v1 = vrot.slane %v11490_v19, %v21099_v12  ;;  %v11520_v22 = vcombine.low %v11498_v28, %v11505_v4  ;;  %v21133_v44 = vld [vmem:[#allocation68_spill] sm:$0xff] }
0x1313   : > { %11548 = vadd.xlane.f32.xlu0 %v11547_v41  ;;  %v21134_v41 = vmov 0.0  }
0x1314   : > { %v11519_v37 = vrot.slane %v11491_v60, %v21099_v12  ;;  %v11528_v5 = vrot.slane %v11520_v22, %v21099_v12  ;;  %v10268_v60 = vcombine.high %v21133_v44, %v21134_v41 }
0x1316   : > { %v11521_v46 = vcombine.low %v11512_v1, %v11519_v37 }
0x1318   : > { %v11535_v34 = vrot.slane %v11521_v46, %v21099_v12  ;;  %v10202_v12 = vcombine.high %v21132_v39, %v21134_v41 }
0x131a   : > { %v11536_v56 = vcombine.low %v11528_v5, %v11535_v34 }
0x131c   : > { %v11550_v53 = vsel %vm2496_vm3, %v11536_v56, 0.0 }
0x131d   : > { %11551 = vadd.xlane.f32.xlu1 %v11550_v53 }
0x1329   : > { %10196 = vrot.lane.b32.xlu0 %v21132_v39, %s15783_s1 }
0x132e   : > { %10198 = vrot.lane.b32.xlu1 %v21133_v44, %s15783_s1  ;;  %s21148_s1 = scalar_lea.vmem [#allocation21], %s16473_s26 }
0x132f   : > { %s21149_s8 = smov %s21148_s1 }
0x1332   : > { %14884 = vrot.lane.b32.xlu1 %v19822_v50, %s15788_s3 }
0x1390   : > { %v11543_v28 = vpop.xlane.xlu0 %11542 }
0x1391   : > { %15231 = vrcp.f32 %v11543_v28 }
0x1398   : > { %v11546_v19 = vpop.xlane.xlu1 %11545 }
0x1399   : > { %15233 = vrcp.f32 %v11546_v19 }
0x139b   : > { %v15232_v4 = vpop.eup %15231 }
0x139c   : > { %v11564_v1 = vrot.slane %v15232_v4, %v16948_v24  ;;  %v11568_v22 = vrot.slane %v15232_v4, %v16951_v7  ;;  %v11572_v37 = vrot.slane %v15232_v4, %v16954_v55  ;;  %v11576_v46 = vrot.slane %v15232_v4, %v16957_v14 }
0x139d   : > { %v11580_v50 = vrot.slane %v15232_v4, %v16960_v9  ;;  %v11584_v5 = vrot.slane %v15232_v4, %v16963_v57  ;;  %v11588_v34 = vrot.slane %v15232_v4, %v16966_v16  ;;  %v11592_v56 = vrot.slane %v15232_v4, %v16975_v10 }
0x139e   : > { %v11721_v53 = vmul.f32 %v19875_v33, %v11564_v1  ;;  %v11722_v28 = vmul.f32 %v19881_v15, %v11568_v22  ;;  %v11723_v19 = vmul.f32 %v19887_v36, %v11572_v37  ;;  %v11724_v23 = vmul.f32 %v19893_v29, %v11576_v46 }
0x139f   : > { %v11725_v40 = vmul.f32 %v19899_v13, %v11580_v50  ;;  %v11726_v58 = vmul.f32 %v19904_v20, %v11584_v5  ;;  %v11727_v17 = vmul.f32 %v19909_v54, %v11588_v34  ;;  %v20049_v59 = vmul.f32 %v19914_v26, %v11592_v56 }
0x13a0   : > { %v10209_v4 = vrot.slane %v21132_v39, %v21135_v63  ;;  %v11549_v31 = vpop.xlane.xlu0 %11548  ;;  %v11753_v33 = vpack.c.bf16 %v11721_v53, %v11721_v53  ;;  %v11754_v1 = vpack.c.bf16 %v11722_v28, %v11722_v28  ;;  %v11755_v15 = vpack.c.bf16 %v11723_v19, %v11723_v19 }
0x13a1   : > { %v10216_v36 = vrot.slane %v10202_v12, %v21135_v63  ;;  %v20056_v29 = vrot.slane %v21133_v44, %v21135_v63  ;;  %v11756_v13 = vpack.c.bf16 %v11724_v23, %v11724_v23  ;;  %v11757_v20 = vpack.c.bf16 %v11725_v40, %v11725_v40 }
0x13a2   : > { %v20059_v54 = vrot.slane %v10268_v60, %v21135_v63  ;;  %15235 = vrcp.f32 %v11549_v31  ;;  %v11758_v26 = vpack.c.bf16 %v11726_v58, %v11726_v58  ;;  %v11759_v22 = vpack.c.bf16 %v11727_v17, %v11727_v17 }
0x13a3   : > { %v15234_v37 = vpop.eup %15233  ;;  %v11760_v39 = vpack.c.bf16 %v20049_v59, %v20049_v59  ;;  %v20063_v46 = vunpack.c.l.b16 %v11753_v33  ;;  %v20065_v50 = vunpack.c.l.b16 %v11754_v1  ;;  %v20067_v12 = vunpack.c.l.b16 %v11755_v15 }
0x13a4   : > { %v10197_v44 = vpop.permute.xlu0 %10196  ;;  %v11596_v23 = vrot.slane %v15234_v37, %v16948_v24  ;;  %v11600_v40 = vrot.slane %v15234_v37, %v16951_v7  ;;  %v11604_v60 = vrot.slane %v15234_v37, %v16954_v55  ;;  %v11608_v31 = vrot.slane %v15234_v37, %v16957_v14 }
0x13a5   : > { %v10217_v17 = vcombine.high %v10197_v44, %v21134_v41  ;;  %v10224_v58 = vrot.slane %v10197_v44, %v21135_v63  ;;  %v20075_v59 = vunpack.c.l.b16 %v11756_v13  ;;  %v20077_v5 = vunpack.c.l.b16 %v11757_v20 }
0x13a6   : > { %v11612_v34 = vrot.slane %v15234_v37, %v16960_v9  ;;  %v11616_v56 = vrot.slane %v15234_v37, %v16963_v57  ;;  %v11620_v53 = vrot.slane %v15234_v37, %v16966_v16  ;;  %v11624_v28 = vrot.slane %v15234_v37, %v16975_v10 }
0x13a7   : > { %v10231_v19 = vrot.slane %v10217_v17, %v21135_v63  ;;  %v10232_v33 = vcombine.low %v10209_v4, %v10224_v58  ;;  %v10233_v1 = vcombine.high %v10209_v4, %v10224_v58  ;;  %v20084_v15 = vunpack.c.l.b16 %v11758_v26 }
0x13a8   : > { %v11729_v44 = vmul.f32 %v19917_v38, %v11596_v23  ;;  %v11730_v13 = vmul.f32 %v19922_v3, %v11600_v40  ;;  %v11731_v20 = vmul.f32 %v19926_v25, %v11604_v60  ;;  %v11732_v52 = vmul.f32 %v19931_v21, %v11608_v31 }
0x13a9   : > { %v10240_v47 = vrot.slane %v10232_v33, %v16631_v42  ;;  %v10247_v49 = vrot.slane %v10233_v1, %v16631_v42  ;;  %v10248_v61 = vcombine.low %v10216_v36, %v10231_v19  ;;  %v10249_v37 = vcombine.high %v10216_v36, %v10231_v19 }
0x13aa   : > { %v11552_v62 = vpop.xlane.xlu1 %11551  ;;  %v11733_v17 = vmul.f32 %v19935_v27, %v11612_v34  ;;  %v11734_v4 = vmul.f32 %v19940_v0, %v11616_v56  ;;  %v11735_v26 = vmul.f32 %v19944_v32, %v11620_v53  ;;  %v20096_v38 = vmul.f32 %v19950_v11, %v11624_v28 }
0x13ab   : > { %v10256_v3 = vrot.slane %v10248_v61, %v16631_v42  ;;  %v10263_v25 = vrot.slane %v10249_v37, %v16631_v42  ;;  %v10334_v21 = vcombine.low %v10240_v47, %v10247_v49  ;;  %v14183_v23 = vcombine.high %v10240_v47, %v10247_v49 }
0x13ac   : > { %v20100_v40 = vpop.eup %15235  ;;  %v11761_v60 = vpack.c.bf16 %v11729_v44, %v11729_v44  ;;  %v11762_v36 = vpack.c.bf16 %v11730_v13, %v11730_v13  ;;  %v11763_v31 = vpack.c.bf16 %v11731_v20, %v11731_v20  ;;  %v20102_v58 = vunpack.c.l.b16 %v11759_v22 }
0x13ad   : > { %v10341_v27 = vrot.slane %v10334_v21, %v21135_v63  ;;  %v10349_v0 = vrot.slane %v14183_v23, %v21135_v63  ;;  %v10350_v32 = vcombine.low %v10256_v3, %v10263_v25  ;;  %v14184_v11 = vcombine.high %v10256_v3, %v10263_v25 }
0x13ae   : > { %15237 = vrcp.f32 %v11552_v62  ;;  %v10199_v34 = vpop.permute.xlu1 %10198  ;;  %v11764_v61 = vpack.c.bf16 %v11732_v52, %v11732_v52  ;;  %v11765_v56 = vpack.c.bf16 %v11733_v17, %v11733_v17  ;;  %v11766_v53 = vpack.c.bf16 %v11734_v4, %v11734_v4 }
0x13af   : > { %v10366_v28 = vcombine.low %v10341_v27, %v10349_v0  ;;  %v10283_v49 = vcombine.high %v10199_v34, %v21134_v41  ;;  %v11767_v47 = vpack.c.bf16 %v11735_v26, %v11735_v26  ;;  %v11768_v19 = vpack.c.bf16 %v20096_v38, %v20096_v38 }
0x13b0   : > { %v10357_v22 = vrot.slane %v10350_v32, %v21135_v63  ;;  %v10365_v33 = vrot.slane %v14184_v11, %v21135_v63  ;;  %v10290_v1 = vrot.slane %v10199_v34, %v21135_v63  ;;  %v20112_v44 = vunpack.c.l.b16 %v11760_v39 }
0x13b1   : > { %v10297_v62 = vrot.slane %v10283_v49, %v21135_v63  ;;  %v11809_v52 = vunpack.c.l.b16 %v11761_v60  ;;  %v11810_v13 = vunpack.c.l.b16 %v11762_v36  ;;  %v11811_v20 = vunpack.c.l.b16 %v11763_v31 }
0x13b2   : > { %v10298_v37 = vcombine.low %v20056_v29, %v10290_v1  ;;  %v10299_v17 = vcombine.high %v20056_v29, %v10290_v1  ;;  %v14885_v4 = vpop.permute.xlu1 %14884  ;;  %v10373_v26 = vrot.slane %v10366_v28, %v16631_v42  ;;  %v11812_v38 = vunpack.c.l.b16 %v11764_v61 }
0x13b3   : > { %v10314_v3 = vcombine.low %v20059_v54, %v10297_v62  ;;  %v10315_v25 = vcombine.high %v20059_v54, %v10297_v62  ;;  %v14887_v21 = vunpack.i.h.bf16 %v14885_v4  ;;  %v14886_v39 = vunpack.i.l.bf16 %v14885_v4 }
0x13b4   : > { %v10306_v23 = vrot.slane %v10298_v37, %v16631_v42  ;;  %v10313_v60 = vrot.slane %v10299_v17, %v16631_v42  ;;  %v10374_v36 = vcombine.low %v10357_v22, %v10365_v33  ;;  %v11813_v31 = vunpack.c.l.b16 %v11765_v56 }
0x13b5   : > { %v10322_v27 = vrot.slane %v10314_v3, %v16631_v42  ;;  %v10329_v29 = vrot.slane %v10315_v25, %v16631_v42  ;;  %v21136_v0 = vcombine.low %v19804_v51, %v19807_v35  ;;  %v21137_v54 = vcombine.low %v19798_v6, %v19801_v18 }
0x13b6   : > { %v10384_v34 = vcombine.low %v10306_v23, %v10313_v60  ;;  %v14185_v61 = vcombine.high %v10306_v23, %v10313_v60  ;;  %v11814_v28 = vunpack.c.l.b16 %v11766_v53  ;;  %v11815_v33 = vunpack.c.l.b16 %v11767_v47 }
0x13b7   : > { %v20128_v32 = vsel %vm2496_vm3, %v21136_v0, %v14887_v21  ;;  %v20134_v11 = vsel %vm2496_vm3, %v21137_v54, %v14886_v39  ;;  %v10400_v49 = vcombine.low %v10322_v27, %v10329_v29  ;;  %v14186_v22 = vcombine.high %v10322_v27, %v10329_v29 }
0x13b8   : > { %v12237_v56 = vpack.c.bf16 %v20128_v32, %v20134_v11  ;;  %v11817_v51 = vrot.slane %v20065_v50, 7  ;;  %v20139_v35 = vpop.eup %15237  ;;  %v10391_v1 = vrot.slane %v10384_v34, %v21135_v63  ;;  %v10399_v6 = vrot.slane %v14185_v61, %v21135_v63 }
0x13b9   : > { %v10381_v18 = vrot.slane %v10374_v36, %v16631_v42  ;;  %v11819_v62 = vrot.slane %v20067_v12, 6  ;;  %v10407_v37 = vrot.slane %v10400_v49, %v21135_v63  ;;  %v10415_v17 = vrot.slane %v14186_v22, %v21135_v63 }
0x13ba   : > { %v11818_v53 = vsel %vm3870_vm5, %v11817_v51, %v20063_v46  ;;  %v11821_v47 = vrot.slane %v20075_v59, 5  ;;  %v10416_v50 = vcombine.low %v10391_v1, %v10399_v6  ;;  %v11816_v4 = vunpack.c.l.b16 %v11768_v19 }
0x13bb   : > { %v11820_v3 = vsel %vm3873_vm6, %v11819_v62, %v11818_v53  ;;  %v11823_v25 = vrot.slane %v20077_v5, 4  ;;  %v10424_v21 = vcombine.low %v10407_v37, %v10415_v17  ;;  %v11825_v12 = vrot.slane %v20084_v15, 3 }
0x13bc   : > { %v11822_v39 = vsel %vm3876_vm7, %v11821_v47, %v11820_v3  ;;  %v11831_v23 = vrot.slane %v11810_v13, 7  ;;  %v10382_v60 = vcombine.low %v10373_v26, %v10381_v18  ;;  %v10423_v36 = vrot.slane %v10416_v50, %v16631_v42 }
0x13bd   : > { %v11824_v27 = vsel %vm3879_vm8, %v11823_v25, %v11822_v39  ;;  %v11833_v46 = vrot.slane %v11811_v20, 6  ;;  %v10431_v59 = vrot.slane %v10424_v21, %v16631_v42  ;;  %v11835_v0 = vrot.slane %v11812_v38, 5 }
0x13be   : > { %v11826_v19 = vsel %vm3882_vm9, %v11825_v12, %v11824_v27  ;;  %v11832_v29 = vsel %vm3870_vm5, %v11831_v23, %v11809_v52  ;;  %v10383_v5 = vcombine.high %v10373_v26, %v10381_v18  ;;  %v11827_v54 = vrot.slane %v20102_v58, 2  ;;  %v21141_v27 = vld [vmem:[#allocation58_spill] sm:$0xff] }
0x13bf   : > { %v11834_v34 = vsel %vm3873_vm6, %v11833_v46, %v11832_v29  ;;  %v11837_v15 = vrot.slane %v11813_v31, 4  ;;  %v10432_v13 = vcombine.low %v10423_v36, %v10431_v59  ;;  %v10433_v61 = vcombine.high %v10423_v36, %v10431_v59  ;;  %v21140_v36 = vld [vmem:[#allocation72_spill] sm:$0xff] }
0x13c0   : > { %v11836_v49 = vsel %vm3876_vm7, %v11835_v0, %v11834_v34  ;;  %v11839_v22 = vrot.slane %v11814_v28, 3  ;;  %v11828_v20 = vsel %vm3885_vm10, %v11827_v54, %v11826_v19  ;;  %v11829_v51 = vrot.slane %v20112_v44, 1 }
0x13c1   : > { %v11838_v1 = vsel %vm3879_vm8, %v11837_v15, %v11836_v49  ;;  %v11841_v6 = vrot.slane %v11815_v33, 2  ;;  %v10434_v52 = vpack.c.bf16 %v10432_v13, %v10382_v60  ;;  %v10435_v38 = vpack.c.bf16 %v10433_v61, %v10383_v5  ;;  %v21145_v5 = vld [vmem:[#allocation63_spill] sm:$0xff]  ;;  %v21147_v13 = vld [vmem:[#allocation65_spill] sm:$0xff] }
0x13c2   : > { %v11840_v26 = vsel %vm3882_vm9, %v11839_v22, %v11838_v1  ;;  %v11843_v58 = vrot.slane %v11816_v4, 1  ;;  %v11632_v31 = vrot.slane %v20100_v40, %v16951_v7  ;;  %v11636_v28 = vrot.slane %v20100_v40, %v16954_v55 }
0x13c3   : > { %v11842_v18 = vsel %vm3885_vm10, %v11841_v6, %v11840_v26  ;;  %14554 = vmatpush3.bf16.msra.mxu1 %v10434_v52  ;;  %14560 = vmatpush3.bf16.msra.mxu0 %v10435_v38  ;;  %v11830_v44 = vsel %vm3888_vm11, %v11829_v51, %v11828_v20  ;;  %v11640_v37 = vrot.slane %v20100_v40, %v16957_v14 }
0x13c4   : > { %v11844_v62 = vsel %vm3888_vm11, %v11843_v58, %v11842_v18  ;;  %v11664_v17 = vrot.slane %v20139_v35, %v16951_v7  ;;  %v11668_v53 = vrot.slane %v20139_v35, %v16954_v55  ;;  %v11628_v47 = vrot.slane %v20100_v40, %v16948_v24 }
0x13c5   : > { %v11845_v33 = vpack.c.b16 %v11844_v62, %v11830_v44  ;;  %v11644_v50 = vrot.slane %v20100_v40, %v16960_v9  ;;  %v11648_v4 = vrot.slane %v20100_v40, %v16963_v57  ;;  %v11652_v3 = vrot.slane %v20100_v40, %v16966_v16 }
0x13c6   : > { %v11672_v7 = vrot.slane %v20139_v35, %v16957_v14  ;;  %v11738_v25 = vmul.f32 %v19958_v43, %v11632_v31  ;;  %v11739_v55 = vmul.f32 %v19960_v8, %v11636_v28  ;;  %v11656_v21 = vrot.slane %v20100_v40, %v16975_v10 }
0x13c7   : > { %14556 = vmatmul.mubr.msk.bf16.vlgmr.msra.gmra.mrb[48].mxu1 %vm2496_vm3, %v11845_v33  ;;  %v11660_v39 = vrot.slane %v20139_v35, %v16948_v24  ;;  %v11676_v12 = vrot.slane %v20139_v35, %v16960_v9  ;;  %v11680_v14 = vrot.slane %v20139_v35, %v16963_v57  ;;  %v11684_v43 = vrot.slane %v20139_v35, %v16966_v16  ;;  %v21139_v9 = vld [vmem:[#allocation71_spill] sm:$0xff] }
0x13c8   : > { %14569 = vmatprep.mubr.msk.bf16.mxu1 %vm1489_vm1, %v12237_v56  ;;  %v11740_v8 = vmul.f32 %v19966_v48, %v11640_v37  ;;  %v11746_v32 = vmul.f32 %v19989_v2, %v11664_v17  ;;  %v11747_v11 = vmul.f32 %v19995_v30, %v11668_v53  ;;  %v11688_v40 = vrot.slane %v20139_v35, %v16975_v10  ;;  %v21138_v56 = vld [vmem:[#allocation70_spill] sm:$0xff]  ;;  %v21142_v48 = vld [vmem:[#allocation73_spill] sm:$0xff]  ;;  %v21143_v2 = vld [vmem:[#allocation64_spill] sm:$0xff] }
0x13c9   : > { %v11737_v24 = vmul.f32 %v19953_v45, %v11628_v47  ;;  %v11741_v23 = vmul.f32 %v21138_v56, %v11644_v50  ;;  %v11742_v60 = vmul.f32 %v21139_v9, %v11648_v4  ;;  %v11743_v57 = vmul.f32 %v21140_v36, %v11652_v3  ;;  %v21144_v30 = vld [vmem:[#allocation52_spill] sm:$0xff]  ;;  %v21146_v35 = vld [vmem:[#allocation67_spill] sm:$0xff] }
0x13ca   : > { %v11748_v46 = vmul.f32 %v21141_v27, %v11672_v7  ;;  %v11770_v16 = vpack.c.bf16 %v11738_v25, %v11738_v25  ;;  %v11771_v59 = vpack.c.bf16 %v11739_v55, %v11739_v55  ;;  %v11744_v19 = vmul.f32 %v21142_v48, %v11656_v21 }
0x13cb   : > { %v11745_v29 = vmul.f32 %v21143_v2, %v11660_v39  ;;  %v11749_v0 = vmul.f32 %v21144_v30, %v11676_v12  ;;  %v11750_v10 = vmul.f32 %v21145_v5, %v11680_v14  ;;  %v11751_v45 = vmul.f32 %v21146_v35, %v11684_v43 }
0x13cc   : > { %v11772_v54 = vpack.c.bf16 %v11740_v8, %v11740_v8  ;;  %v11778_v34 = vpack.c.bf16 %v11746_v32, %v11746_v32  ;;  %v11779_v15 = vpack.c.bf16 %v11747_v11, %v11747_v11  ;;  %v11752_v61 = vmul.f32 %v21147_v13, %v11688_v40 }
0x13cd   : > { %v11769_v49 = vpack.c.bf16 %v11737_v24, %v11737_v24  ;;  %v11773_v22 = vpack.c.bf16 %v11741_v23, %v11741_v23  ;;  %v11774_v20 = vpack.c.bf16 %v11742_v60, %v11742_v60  ;;  %v11775_v51 = vpack.c.bf16 %v11743_v57, %v11743_v57 }
0x13ce   : > { %v11780_v1 = vpack.c.bf16 %v11748_v46, %v11748_v46  ;;  %v11907_v6 = vunpack.c.l.b16 %v11770_v16  ;;  %v11908_v52 = vunpack.c.l.b16 %v11771_v59  ;;  %v11776_v38 = vpack.c.bf16 %v11744_v19, %v11744_v19 }
0x13cf   : > { %v11777_v26 = vpack.c.bf16 %v11745_v29, %v11745_v29  ;;  %v11781_v58 = vpack.c.bf16 %v11749_v0, %v11749_v0  ;;  %v11782_v18 = vpack.c.bf16 %v11750_v10, %v11750_v10  ;;  %v11783_v31 = vpack.c.bf16 %v11751_v45, %v11751_v45 }
0x13d0   : > { %v11909_v28 = vunpack.c.l.b16 %v11772_v54  ;;  %v11915_v44 = vunpack.c.l.b16 %v11778_v34  ;;  %v11916_v62 = vunpack.c.l.b16 %v11779_v15  ;;  %v11784_v33 = vpack.c.bf16 %v11752_v61, %v11752_v61  ;;  %v14907_v54 = vld [vmem:[%s21148_s1] sm:$0xff]  }
0x13d1   : > { %v11906_v37 = vunpack.c.l.b16 %v11769_v49  ;;  %v11910_v17 = vunpack.c.l.b16 %v11773_v22  ;;  %v11911_v53 = vunpack.c.l.b16 %v11774_v20  ;;  %v11912_v47 = vunpack.c.l.b16 %v11775_v51  ;;  %14565 = vmatprep.subr.bf16.mxu1 %v14907_v54 }
0x13d2   : > { %v11917_v50 = vunpack.c.l.b16 %v11780_v1  ;;  %v11922_v4 = vrot.slane %v11907_v6, 7  ;;  %v11924_v3 = vrot.slane %v11908_v52, 6  ;;  %v11913_v7 = vunpack.c.l.b16 %v11776_v38  ;;  %14566 = vmatpush3.bf16.msra.mxu1 %v14907_v54 }
0x13d3   : > { %v11914_v25 = vunpack.c.l.b16 %v11777_v26  ;;  %v11918_v55 = vunpack.c.l.b16 %v11781_v58  ;;  %v11919_v21 = vunpack.c.l.b16 %v11782_v18  ;;  %v11926_v12 = vrot.slane %v11909_v28, 5 }
0x13d4   : > { %v11923_v39 = vsel %vm3870_vm5, %v11922_v4, %v11906_v37  ;;  %v11936_v14 = vrot.slane %v11915_v44, 7  ;;  %v11938_v43 = vrot.slane %v11916_v62, 6  ;;  %v11920_v8 = vunpack.c.l.b16 %v11783_v31 }
0x13d5   : > { %v11921_v32 = vunpack.c.l.b16 %v11784_v33  ;;  %v11925_v11 = vsel %vm3873_vm6, %v11924_v3, %v11923_v39  ;;  %v11928_v40 = vrot.slane %v11910_v17, 4  ;;  %v11930_v56 = vrot.slane %v11911_v53, 3 }
0x13d6   : > { %v11927_v24 = vsel %vm3876_vm7, %v11926_v12, %v11925_v11  ;;  %v11937_v23 = vsel %vm3870_vm5, %v11936_v14, %v11914_v25  ;;  %v11940_v9 = vrot.slane %v11917_v50, 5  ;;  %v11932_v36 = vrot.slane %v11912_v47, 2 }
0x13d7   : > { %v11929_v60 = vsel %vm3879_vm8, %v11928_v40, %v11927_v24  ;;  %v11939_v57 = vsel %vm3873_vm6, %v11938_v43, %v11937_v23  ;;  %v11942_v27 = vrot.slane %v11918_v55, 4  ;;  %v11944_v59 = vrot.slane %v11919_v21, 3 }
0x13d8   : > { %v11931_v46 = vsel %vm3882_vm9, %v11930_v56, %v11929_v60  ;;  %v11941_v16 = vsel %vm3876_vm7, %v11940_v9, %v11939_v57  ;;  %v11946_v2 = vrot.slane %v11920_v8, 2  ;;  %v11934_v29 = vrot.slane %v11913_v7, 1 }
0x13d9   : > { %v11933_v48 = vsel %vm3885_vm10, %v11932_v36, %v11931_v46  ;;  %v11943_v19 = vsel %vm3879_vm8, %v11942_v27, %v11941_v16  ;;  %v11948_v0 = vrot.slane %v11921_v32, 1 }
0x13da   : > { %v11945_v30 = vsel %vm3882_vm9, %v11944_v59, %v11943_v19  ;;  %v11935_v10 = vsel %vm3888_vm11, %v11934_v29, %v11933_v48  ;;  %v14908_v19 = vld [vmem:[%s21149_s8 + $0x8] sm:$0xff]  }
0x13db   : > { %v11947_v5 = vsel %vm3885_vm10, %v11946_v2, %v11945_v30  ;;  %14567 = vmatprep.subr.bf16.mxu1 %v14908_v19 }
0x13dc   : > { %v11949_v35 = vsel %vm3888_vm11, %v11948_v0, %v11947_v5  ;;  %14568 = vmatpush3.bf16.msra.mxu1 %v14908_v19 }
0x13dd   : > { %v11950_v45 = vpack.c.b16 %v11949_v35, %v11935_v10 }
0x13df   : > { %14562 = vmatmul.mubr.msk.bf16.vlgmr.msra.gmra.mrb[36].mxu0 %vm2496_vm3, %v11950_v45 }
0x149a   : > { %v11883_v34 = vpop.f32.mrb[48].mxu1 }
0x149b   : > { %v14557_v15 = vpop.f32.mrb[49].mxu1  ;;  %v11995_v49 = vcombine.high %v11883_v34, %v21134_v41  ;;  %v12002_v20 = vrot.slane %v11883_v34, %v21135_v63 }
0x149c   : > { %v11886_v13 = vpop.f32.mrb[50].mxu1 }
0x149d   : > { %v14558_v61 = vpop.f32.mrb[51].mxu1  ;;  %v12009_v52 = vrot.slane %v11995_v49, %v21135_v63  ;;  %v12061_v38 = vcombine.high %v11886_v13, %v21134_v41  ;;  %v12068_v62 = vrot.slane %v11886_v13, %v21135_v63 }
0x149f   : > { %v12075_v50 = vrot.slane %v12061_v38, %v21135_v63  ;;  %v21150_v38 = vld [vmem:[#allocation61_spill] sm:$0xff] }
0x14b2   : > { %v11988_v22 = vpop.f32.mrb[36].mxu0 }
0x14b3   : > { %v12010_v51 = vcombine.high %v11988_v22, %v21134_v41  ;;  %v12017_v1 = vrot.slane %v11988_v22, %v21135_v63  ;;  %v14563_v6 = vpop.f32.mrb[37].mxu0 }
0x14b4   : > { %v11991_v26 = vpop.f32.mrb[38].mxu0 }
0x14b5   : > { %v12024_v58 = vrot.slane %v12010_v51, %v21135_v63  ;;  %v12025_v18 = vcombine.low %v12002_v20, %v12017_v1  ;;  %v12026_v31 = vcombine.high %v12002_v20, %v12017_v1  ;;  %v12076_v28 = vcombine.high %v11991_v26, %v21134_v41  ;;  %v14564_v44 = vpop.f32.mrb[39].mxu0 }
0x14b6   : > { %v12083_v33 = vrot.slane %v11991_v26, %v21135_v63 }
0x14b7   : > { %v12033_v37 = vrot.slane %v12025_v18, %v16631_v42  ;;  %v12040_v17 = vrot.slane %v12026_v31, %v16631_v42  ;;  %v12041_v53 = vcombine.low %v12009_v52, %v12024_v58  ;;  %v12042_v47 = vcombine.high %v12009_v52, %v12024_v58  ;;  %v21151_v58 = vld [vmem:[#allocation60_spill] sm:$0xff] }
0x14b8   : > { %v12090_v4 = vrot.slane %v12076_v28, %v21135_v63  ;;  %v12091_v3 = vcombine.low %v12068_v62, %v12083_v33  ;;  %v12092_v7 = vcombine.high %v12068_v62, %v12083_v33  ;;  %v21152_v62 = vld [vmem:[#allocation66_spill] sm:$0xff] }
0x14b9   : > { %v12049_v25 = vrot.slane %v12041_v53, %v16631_v42  ;;  %v12056_v55 = vrot.slane %v12042_v47, %v16631_v42  ;;  %v12127_v21 = vcombine.low %v12033_v37, %v12040_v17  ;;  %v14195_v39 = vcombine.high %v12033_v37, %v12040_v17  ;;  %v21153_v17 = vld [vmem:[#allocation59_spill] sm:$0xff] }
0x14ba   : > { %v12099_v12 = vrot.slane %v12091_v3, %v16631_v42  ;;  %v12106_v14 = vrot.slane %v12092_v7, %v16631_v42  ;;  %v12107_v43 = vcombine.low %v12075_v50, %v12090_v4  ;;  %v12108_v8 = vcombine.high %v12075_v50, %v12090_v4 }
0x14bb   : > { %v12134_v32 = vrot.slane %v12127_v21, %v21135_v63  ;;  %v12142_v11 = vrot.slane %v14195_v39, %v21135_v63  ;;  %v12143_v40 = vcombine.low %v12049_v25, %v12056_v55  ;;  %v14196_v24 = vcombine.high %v12049_v25, %v12056_v55 }
0x14bc   : > { %v12115_v56 = vrot.slane %v12107_v43, %v16631_v42  ;;  %v12122_v23 = vrot.slane %v12108_v8, %v16631_v42  ;;  %v12177_v9 = vcombine.low %v12099_v12, %v12106_v14  ;;  %v14197_v60 = vcombine.high %v12099_v12, %v12106_v14 }
0x14bd   : > { %v12150_v36 = vrot.slane %v12143_v40, %v21135_v63  ;;  %v12158_v57 = vrot.slane %v14196_v24, %v21135_v63  ;;  %v12159_v27 = vcombine.low %v12134_v32, %v12142_v11 }
0x14be   : > { %v12184_v46 = vrot.slane %v12177_v9, %v21135_v63  ;;  %v12192_v16 = vrot.slane %v14197_v60, %v21135_v63  ;;  %v12193_v59 = vcombine.low %v12115_v56, %v12122_v23  ;;  %v14198_v48 = vcombine.high %v12115_v56, %v12122_v23 }
0x14bf   : > { %v12167_v2 = vcombine.low %v12150_v36, %v12158_v57  ;;  %v12166_v5 = vrot.slane %v12159_v27, %v16631_v42  ;;  %v14909_v57 = vld [vmem:[%s16543_s22] sm:$0xff]   ;;  %v14910_v27 = vld [vmem:[%s16543_s22 + $0x8] sm:$0xff]  }
0x14c0   : > { %v12200_v29 = vrot.slane %v12193_v59, %v21135_v63  ;;  %v12208_v30 = vrot.slane %v14198_v48, %v21135_v63  ;;  %v12209_v0 = vcombine.low %v12184_v46, %v12192_v16  ;;  %14573 = vmatprep.subr.bf16.mxu0 %v14909_v57  ;;  %v14911_v46 = vld [vmem:[%s16543_s22 + $0x80] sm:$0xff]  }
0x14c1   : > { %v12174_v10 = vrot.slane %v12167_v2, %v16631_v42  ;;  %14574 = vmatpush3.bf16.msra.mxu0 %v14909_v57 }
0x14c2   : > { %v12217_v35 = vcombine.low %v12200_v29, %v12208_v30  ;;  %v12216_v34 = vrot.slane %v12209_v0, %v16631_v42  ;;  %14575 = vmatprep.subr.bf16.mxu0 %v14910_v27 }
0x14c3   : > { %v12175_v45 = vcombine.low %v12166_v5, %v12174_v10  ;;  %v12176_v54 = vcombine.high %v12166_v5, %v12174_v10 }
0x14c4   : > { %v12224_v15 = vrot.slane %v12217_v35, %v16631_v42 }
0x14c5   : > { %14576 = vmatpush3.bf16.msra.mxu0 %v14910_v27 }
0x14c6   : > { %v12226_v13 = vcombine.high %v12216_v34, %v12224_v15  ;;  %v12225_v61 = vcombine.low %v12216_v34, %v12224_v15  ;;  %14581 = vmatprep.subr.bf16.mxu0 %v14911_v46  ;;  %v14203_v34 = vld [vmem:[%s21155_s5] ss:$0 sm:$0xff] }
0x14c8   : > { %v14888_v49 = vpack.i.bf16 %v12226_v13, %v12176_v54 }
0x14ca   : > { %14889 = vrot.lane.b32.xlu1 %v14888_v49, %s15788_s3 }
0x153c   : > { %v14890_v63 = vpop.permute.xlu1 %14889 }
0x153d   : > { %v14892_v22 = vunpack.i.h.bf16 %v14890_v63  ;;  %v14891_v20 = vunpack.i.l.bf16 %v14890_v63 }
0x153f   : > { %v12235_v51 = vsel %vm2496_vm3, %v12175_v45, %v14891_v20  ;;  %v12236_v1 = vsel %vm2496_vm3, %v12225_v61, %v14892_v22  ;;  %v14204_v61 = vld [vmem:[%s1437_s4] ss:$0 sm:$0xff] }
0x1540   : > { %v12238_v6 = vpack.c.bf16 %v12236_v1, %v12235_v51 }
0x1542   : > { %14570 = vmatmul.mubr.msk.bf16.vlgmr.msra.gmra.mrb[52].mxu1 %vm1489_vm1, %v12238_v6 }
0x1615   : > { %v14571_v52 = vpop.f32.mrb[52].mxu1 }
0x1616   : > { %v20278_v26 = vadd.f32 %v14571_v52, %v21150_v38  ;;  %v12295_v42 = vpop.f32.mrb[53].mxu1 }
0x1617   : > { %v20281_v18 = vadd.f32 %v12295_v42, %v21151_v58  ;;  %v14572_v31 = vpop.f32.mrb[54].mxu1 }
0x1618   : > { %v12298_v28 = vpop.f32.mrb[55].mxu1  ;;  %v12322_v44 = vsel %vm1489_vm1, %v20278_v26, 0.0  ;;  %v20291_v53 = vadd.f32 %v14572_v31, %v21153_v17  ;;  %v14912_v31 = vld [vmem:[%s16543_s22 + $0x88] sm:$0xff]   ;;  %v21157_v17 = vld [vmem:[#allocation56_spill] sm:$0xff] }
0x1619   : > { %v20286_v33 = vadd.f32 %v12298_v28, %v21152_v62  ;;  %12323 = vadd.xlane.f32.xlu1 %v12322_v44  ;;  %v12316_v37 = vsel %vm1489_vm1, %v20281_v18, 0.0  ;;  %vm12600_vm0 = vcmp.lt.s32.totalorder %v21157_v17, 7  ;;  %vm12695_vm2 = vcmp.lt.s32.totalorder %v21157_v17, 6 }
0x161a   : > { %12317 = vadd.xlane.f32.xlu0 %v12316_v37  ;;  %v12325_v50 = vsel %vm1489_vm1, %v20291_v53, 0.0  ;;  %vm13075_vm5 = vcmp.lt.s32.totalorder %v21157_v17, 2  ;;  %vm13170_vm8 = vcmp.lt.s32.totalorder %v21157_v17, 1  ;;  %vm12790_vm11 = vcmp.lt.s32.totalorder %v21157_v17, 5 }
0x161b   : > { %v12319_v47 = vsel %vm1489_vm1, %v20286_v33, 0.0  ;;  %vm12885_vm14 = vcmp.lt.s32.totalorder %v21157_v17, 4 }
0x161e   : > { %12320 = vadd.xlane.f32.xlu0 %v12319_v47  ;;  %v20334_v47 = vand.u32 15, %v21157_v17 }
0x1620   : > { %vm12605_vm15 = vcmp.lt.s32.totalorder %v20334_v47, 7  ;;  %vm12700_vm3 = vcmp.lt.s32.totalorder %v20334_v47, 6  ;;  %vm13080_vm6 = vcmp.lt.s32.totalorder %v20334_v47, 2  ;;  %vm13175_vm9 = vcmp.lt.s32.totalorder %v20334_v47, 1 }
0x1621   : > { %vm12795_vm12 = vcmp.lt.s32.totalorder %v20334_v47, 5 }
0x1622   : > { %12326 = vadd.xlane.f32.xlu0 %v12325_v50  ;;  %v14913_v50 = vld [vmem:[%s16543_s22 + $0x10] sm:$0xff]  }
0x16a6   : > { %v12324_v4 = vpop.xlane.xlu1 %12323 }
0x16a7   : > { %v12330_v3 = vmul.f32 0.03125, %v12324_v4  ;;  %v12318_v7 = vpop.xlane.xlu0 %12317 }
0x16a8   : > { %v12328_v25 = vmul.f32 0.03125, %v12318_v7 }
0x16a9   : > { %v12334_v55 = vsub.f32 %v20278_v26, %v12330_v3 }
0x16aa   : > { %v12332_v21 = vsub.f32 %v20281_v18, %v12328_v25 }
0x16ab   : > { %v12321_v39 = vpop.xlane.xlu0 %12320  ;;  %v12338_v12 = vmul.f32 %v12334_v55, %v12334_v55 }
0x16ac   : > { %v12329_v14 = vmul.f32 0.03125, %v12321_v39  ;;  %v12336_v43 = vmul.f32 %v12332_v21, %v12332_v21 }
0x16ad   : > { %v12346_v8 = vsel %vm1489_vm1, %v12338_v12, 0.0 }
0x16ae   : > { %v12333_v32 = vsub.f32 %v20286_v33, %v12329_v14  ;;  %12347 = vadd.xlane.f32.xlu1 %v12346_v8  ;;  %v12340_v11 = vsel %vm1489_vm1, %v12336_v43, 0.0  ;;  %v14914_v43 = vld [vmem:[%s16543_s22 + $0x18] sm:$0xff]  }
0x16af   : > { %12341 = vadd.xlane.f32.xlu0 %v12340_v11  ;;  %v12327_v40 = vpop.xlane.xlu0 %12326 }
0x16b0   : > { %v12331_v24 = vmul.f32 0.03125, %v12327_v40  ;;  %v12337_v56 = vmul.f32 %v12333_v32, %v12333_v32 }
0x16b2   : > { %v12335_v23 = vsub.f32 %v20291_v53, %v12331_v24  ;;  %v12343_v9 = vsel %vm1489_vm1, %v12337_v56, 0.0 }
0x16b3   : > { %12344 = vadd.xlane.f32.xlu0 %v12343_v9 }
0x16b4   : > { %v12339_v60 = vmul.f32 %v12335_v23, %v12335_v23 }
0x16b6   : > { %v12349_v36 = vsel %vm1489_vm1, %v12339_v60, 0.0  ;;  %v14915_v60 = vld [vmem:[%s16543_s22 + $0x20] sm:$0xff]  }
0x16b7   : > { %12350 = vadd.xlane.f32.xlu1 %v12349_v36 }
0x173b   : > { %v12348_v16 = vpop.xlane.xlu1 %12347 }
0x173c   : > { %v12354_v59 = vmul.f32 0.03125, %v12348_v16  ;;  %v12342_v48 = vpop.xlane.xlu0 %12341 }
0x173d   : > { %v12352_v19 = vmul.f32 0.03125, %v12342_v48 }
0x173e   : > { %v12358_v2 = vadd.f32 1e-05, %v12354_v59 }
0x173f   : > { %v12356_v29 = vadd.f32 1e-05, %v12352_v19 }
0x1740   : > { %15239 = vrsqrt.f32 %v12358_v2  ;;  %v12345_v30 = vpop.xlane.xlu0 %12344 }
0x1741   : > { %15241 = vrsqrt.f32 %v12356_v29  ;;  %v12353_v0 = vmul.f32 0.03125, %v12345_v30 }
0x1743   : > { %v12357_v5 = vadd.f32 1e-05, %v12353_v0 }
0x1744   : > { %v12351_v10 = vpop.xlane.xlu1 %12350 }
0x1745   : > { %15243 = vrsqrt.f32 %v12357_v5  ;;  %v12355_v35 = vmul.f32 0.03125, %v12351_v10 }
0x1747   : > { %v12359_v45 = vadd.f32 1e-05, %v12355_v35 }
0x1749   : > { %15245 = vrsqrt.f32 %v12359_v45 }
0x174a   : > { %v15240_v54 = vpop.eup %15239 }
0x174b   : > { %v15242_v15 = vpop.eup %15241  ;;  %v12366_v13 = vmul.f32 %v15240_v54, %v12334_v55 }
0x174c   : > { %v12364_v49 = vmul.f32 %v15242_v15, %v12332_v21 }
0x174d   : > { %v12376_v63 = vmul.f32 %v14203_v34, %v12366_v13 }
0x174e   : > { %v12374_v22 = vmul.f32 %v14203_v34, %v12364_v49 }
0x174f   : > { %v15244_v20 = vpop.eup %15243  ;;  %v20318_v51 = vadd.f32 %v14204_v61, %v12376_v63 }
0x1750   : > { %v20320_v1 = vadd.f32 %v14204_v61, %v12374_v22  ;;  %v12365_v6 = vmul.f32 %v15244_v20, %v12333_v32 }
0x1751   : > { %v12457_v58 = vpack.c.bf16 %v20318_v51, %v21134_v41  ;;  %v12598_v24 = vrot.slane %v20318_v51, 1 }
0x1752   : > { %v12375_v52 = vmul.f32 %v14203_v34, %v12365_v6  ;;  %v12456_v38 = vpack.c.bf16 %v20320_v1, %v21134_v41  ;;  %v12391_v41 = vadd.s32 16, %v21157_v17  ;;  %v12596_v3 = vrot.slane %v20320_v1, 1 }
0x1753   : > { %v15246_v42 = vpop.eup %15245  ;;  %v13071_v40 = vrot.slane %v20320_v1, 6  ;;  %v12691_v56 = vrot.slane %v20320_v1, 2  ;;  %v13166_v9 = vrot.slane %v20320_v1, 7 }
0x1754   : > { %v20327_v28 = vadd.f32 %v14204_v61, %v12375_v52  ;;  %v12367_v44 = vmul.f32 %v15246_v42, %v12335_v23  ;;  %14577 = vmatprep.mubr.msk.bf16.mxu0 %vm1489_vm1, %v12456_v38  ;;  %v20346_v55 = vand.u32 15, %v12391_v41  ;;  %v13073_v23 = vrot.slane %v20318_v51, 6  ;;  %v14916_v42 = vld [vmem:[%s16543_s22 + $0x28] sm:$0xff]  }
0x1755   : > { %14578 = vmatmul.mubr.msk.bf16.vlgmr.msra.gmra.mrb[40].mxu0 %vm1489_vm1, %v12457_v58 }
0x1756   : > { %v12377_v62 = vmul.f32 %v14203_v34, %v12367_v44  ;;  %14582 = vmatpush3.bf16.msra.mxu0 %v14911_v46  ;;  %v12441_v37 = vpack.c.bf16 %v20327_v28, %v20320_v1  ;;  %v12597_v25 = vrot.slane %v20327_v28, 1  ;;  %vm12607_vm4 = vcmp.lt.s32.totalorder %v20346_v55, 7  ;;  %v14917_v44 = vld [vmem:[%s16543_s22 + $0x30] sm:$0xff]  }
0x1757   : > { %14583 = vmatprep.subr.bf16.mxu0 %v14912_v31  ;;  %v13072_v8 = vrot.slane %v20327_v28, 6  ;;  %vm13082_vm7 = vcmp.lt.s32.totalorder %v20346_v55, 2  ;;  %vm13177_vm10 = vcmp.lt.s32.totalorder %v20346_v55, 1  ;;  %v12692_v36 = vrot.slane %v20327_v28, 2 }
0x1758   : > { %v20338_v4 = vadd.f32 %v14204_v61, %v12377_v62  ;;  %14585 = vmatprep.mubr.msk.bf16.mxu0 %vm1489_vm1, %v12441_v37  ;;  %v12603_v14 = vsel %vm12600_vm0, %v12596_v3, %v12597_v25  ;;  %v13168_v46 = vrot.slane %v20318_v51, 7  ;;  %v12602_v16 = vsel %vm12600_vm0, %v12597_v25, %v12598_v24 }
0x1759   : > { %v20378_v27 = vsel %vm13075_vm5, %v13071_v40, %v13072_v8  ;;  %v13077_v59 = vsel %vm13075_vm5, %v13072_v8, %v13073_v23  ;;  %v13167_v48 = vrot.slane %v20327_v28, 7  ;;  %v12611_v6 = vsel %vm12607_vm4, 0.0, %v12602_v16  ;;  %v14920_v16 = vld [vmem:[%s16543_s22 + $0x48] sm:$0xff]  }
0x175a   : > { %14584 = vmatpush3.bf16.msra.mxu0 %v14912_v31  ;;  %v12599_v7 = vrot.slane %v20338_v4, 1  ;;  %v12442_v12 = vpack.c.bf16 %v20338_v4, %v20318_v51  ;;  %v12694_v11 = vrot.slane %v20338_v4, 2  ;;  %v13074_v57 = vrot.slane %v20338_v4, 6 }
0x175b   : > { %14589 = vmatprep.subr.bf16.mxu0 %v14913_v50  ;;  %v13169_v19 = vrot.slane %v20338_v4, 7  ;;  %v20397_v0 = vsel %vm13082_vm7, 0.0, %v13077_v59  ;;  %v20407_v35 = vsel %vm13170_vm8, %v13166_v9, %v13167_v48  ;;  %v13172_v13 = vsel %vm13170_vm8, %v13167_v48, %v13168_v46 }
0x175c   : > { %v12604_v21 = vsel %vm12600_vm0, %v12599_v7, %v12596_v3  ;;  %v12699_v2 = vsel %vm12695_vm2, %v12694_v11, %v12691_v56  ;;  %v13079_v29 = vsel %vm13075_vm5, %v13074_v57, %v13071_v40  ;;  %v20393_v30 = vsel %vm13075_vm5, %v13073_v23, %v13074_v57 }
0x175d   : > { %v12609_v39 = vsel %vm12605_vm15, 0.0, %v12604_v21  ;;  %v20401_v5 = vsel %vm13080_vm6, 0.0, %v13079_v29  ;;  %v13089_v10 = vpack.c.bf16 %v20393_v30, %v20397_v0  ;;  %v13174_v45 = vsel %vm13170_vm8, %v13169_v19, %v13166_v9  ;;  %v14929_v30 = vld [vmem:[%s16537_s28 + $0x10] sm:$0xff]   ;;  %v14930_v0 = vld [vmem:[%s16537_s28 + $0x18] sm:$0xff]  }
0x175e   : > { %v12613_v32 = vpack.c.bf16 %v12603_v14, %v12609_v39  ;;  %v13088_v54 = vpack.c.bf16 %v20378_v27, %v20401_v5  ;;  %v20415_v34 = vsel %vm13175_vm9, 0.0, %v13174_v45  ;;  %v20419_v15 = vsel %vm13170_vm8, %v13168_v46, %v13169_v19  ;;  %v14918_v14 = vld [vmem:[%s16543_s22 + $0x38] sm:$0xff]   ;;  %v14921_v19 = vld [vmem:[%s16543_s22 + $0x50] sm:$0xff]  }
0x175f   : > { %v12601_v61 = vsel %vm12600_vm0, %v12598_v24, %v12599_v7  ;;  %v13183_v49 = vpack.c.bf16 %v20407_v35, %v20415_v34  ;;  %v20429_v63 = vsel %vm13177_vm10, 0.0, %v13172_v13  ;;  %v12704_v22 = vsel %vm12700_vm3, 0.0, %v12699_v2  ;;  %v14928_v27 = vld [vmem:[%s16537_s28 + $0x8] sm:$0xff]   ;;  %v14931_v5 = vld [vmem:[%s16537_s28 + $0x20] sm:$0xff]   ;;  %v14933_v35 = vld [vmem:[%s16537_s28 + $0x30] sm:$0xff]  }
0x1760   : > { %v13184_v20 = vpack.c.bf16 %v20419_v15, %v20429_v63  ;;  %v12614_v52 = vpack.c.bf16 %v12601_v61, %v12611_v6  ;;  %v12698_v38 = vsel %vm12695_vm2, %v12691_v56, %v12692_v36  ;;  %v12789_v31 = vrot.slane %v20338_v4, 3  ;;  %v14273_v34 = vld [vmem:[%s1440_s23] ss:$0 sm:$0xff] }
0x1761   : > { %14586 = vmatmul.mubr.msk.bf16.vlgmr.msra.gmra.mrb[40].mxu0 %vm1489_vm1, %v12442_v12  ;;  %v12708_v58 = vpack.c.bf16 %v12698_v38, %v12704_v22  ;;  %v12786_v62 = vrot.slane %v20320_v1, 3  ;;  %v12693_v37 = vrot.slane %v20318_v51, 2  ;;  %vm12702_vm13 = vcmp.lt.s32.totalorder %v20346_v55, 6 }
0x1762   : > { %14593 = vmatprep.mubr.msk.bf16.mxu0 %vm1489_vm1, %v12613_v32  ;;  %14590 = vmatpush3.bf16.msra.mxu0 %v14913_v50  ;;  %v12787_v3 = vrot.slane %v20327_v28, 3  ;;  %v12884_v8 = vrot.slane %v20338_v4, 4  ;;  %v14919_v32 = vld [vmem:[%s16543_s22 + $0x40] sm:$0xff]   ;;  %v12788_v40 = vrot.slane %v20318_v51, 3  ;;  %vm12890_vm15 = vcmp.lt.s32.totalorder %v20334_v47, 4 }
0x1763   : > { %14591 = vmatprep.subr.bf16.mxu0 %v14914_v43  ;;  %v12794_v50 = vsel %vm12790_vm11, %v12789_v31, %v12786_v62  ;;  %v12697_v41 = vsel %vm12695_vm2, %v12692_v36, %v12693_v37  ;;  %v12696_v7 = vsel %vm12695_vm2, %v12693_v37, %v12694_v11  ;;  %v12881_v11 = vrot.slane %v20320_v1, 4  ;;  %v14924_v37 = vld [vmem:[%s16543_s22 + $0x68] sm:$0xff]  }
0x1764   : > { %v12799_v25 = vsel %vm12795_vm12, 0.0, %v12794_v50  ;;  %v12706_v21 = vsel %vm12702_vm13, 0.0, %v12697_v41  ;;  %v12793_v12 = vsel %vm12790_vm11, %v12786_v62, %v12787_v3  ;;  %v12792_v56 = vsel %vm12790_vm11, %v12787_v3, %v12788_v40 }
0x1765   : > { %v12709_v39 = vpack.c.bf16 %v12696_v7, %v12706_v21  ;;  %v12889_v24 = vsel %vm12885_vm14, %v12884_v8, %v12881_v11  ;;  %vm12797_vm0 = vcmp.lt.s32.totalorder %v20346_v55, 5  ;;  %v12882_v23 = vrot.slane %v20327_v28, 4 }
0x1766   : > { %14592 = vmatpush3.bf16.msra.mxu0 %v14914_v43  ;;  %v12803_v43 = vpack.c.bf16 %v12793_v12, %v12799_v25  ;;  %v12791_v9 = vsel %vm12790_vm11, %v12788_v40, %v12789_v31  ;;  %v12801_v36 = vsel %vm12797_vm0, 0.0, %v12792_v56  ;;  %v12979_v48 = vrot.slane %v20338_v4, 5 }
0x1767   : > { %14597 = vmatprep.subr.bf16.mxu0 %v14915_v60  ;;  %v12804_v57 = vpack.c.bf16 %v12791_v9, %v12801_v36  ;;  %v12888_v46 = vsel %vm12885_vm14, %v12881_v11, %v12882_v23  ;;  %v12976_v2 = vrot.slane %v20320_v1, 5  ;;  %v12883_v29 = vrot.slane %v20318_v51, 4 }
0x1768   : > { %vm12980_vm2 = vcmp.lt.s32.totalorder %v21157_v17, 3  ;;  %vm12985_vm3 = vcmp.lt.s32.totalorder %v20334_v47, 3  ;;  %vm12892_vm4 = vcmp.lt.s32.totalorder %v20346_v55, 4  ;;  %v12977_v4 = vrot.slane %v20327_v28, 5  ;;  %v14922_v47 = vld [vmem:[%s16543_s22 + $0x58] sm:$0xff]   ;;  %v14923_v28 = vld [vmem:[%s16543_s22 + $0x60] sm:$0xff]  }
0x1769   : > { %v12984_v45 = vsel %vm12980_vm2, %v12979_v48, %v12976_v2  ;;  %v12887_v13 = vsel %vm12885_vm14, %v12882_v23, %v12883_v29  ;;  %v12886_v1 = vsel %vm12885_vm14, %v12883_v29, %v12884_v8  ;;  %vm12987_vm5 = vcmp.lt.s32.totalorder %v20346_v55, 3  ;;  %v14926_v17 = vld [vmem:[%s16543_s22 + $0x78] sm:$0xff]  }
0x176a   : > { %v12989_v61 = vsel %vm12985_vm3, 0.0, %v12984_v45  ;;  %v12896_v22 = vsel %vm12892_vm4, 0.0, %v12887_v13  ;;  %v14927_v55 = vld [vmem:[%s16537_s28] sm:$0xff]  }
0x176b   : > { %v12899_v6 = vpack.c.bf16 %v12886_v1, %v12896_v22  ;;  %14645 = vmatprep.subr.bf16.mxu1 %v14927_v55 }
0x176c   : > { %14646 = vmatpush3.bf16.msra.mxu1 %v14927_v55  ;;  %v14282_v55 = vld [vmem:[%s1448_s20] ss:$0 sm:$0xff] }
0x176d   : > { %14594 = vmatmul.mubr.msk.bf16.vlgmr.msra.gmra.mrb[40].mxu0 %vm1489_vm1, %v12614_v52  ;;  %v12983_v52 = vsel %vm12980_vm2, %v12976_v2, %v12977_v4  ;;  %14647 = vmatprep.subr.bf16.mxu1 %v14928_v27 }
0x176e   : > { %14601 = vmatprep.mubr.msk.bf16.mxu0 %vm1489_vm1, %v12708_v58  ;;  %14598 = vmatpush3.bf16.msra.mxu0 %v14915_v60  ;;  %v12894_v60 = vsel %vm12890_vm15, 0.0, %v12889_v24  ;;  %v12993_v38 = vpack.c.bf16 %v12983_v52, %v12989_v61 }
0x176f   : > { %14599 = vmatprep.subr.bf16.mxu0 %v14916_v42  ;;  %v12898_v59 = vpack.c.bf16 %v12888_v46, %v12894_v60 }
0x1770   : > { %14648 = vmatpush3.bf16.msra.mxu1 %v14928_v27 }
0x1771   : > { %14649 = vmatprep.subr.bf16.mxu1 %v14929_v30 }
0x1772   : > { %14600 = vmatpush3.bf16.msra.mxu0 %v14916_v42  ;;  %v12978_v42 = vrot.slane %v20318_v51, 5  ;;  %v14925_v51 = vld [vmem:[%s16543_s22 + $0x70] sm:$0xff]  }
0x1773   : > { %14605 = vmatprep.subr.bf16.mxu0 %v14917_v44 }
0x1774   : > { %v12982_v58 = vsel %vm12980_vm2, %v12977_v4, %v12978_v42  ;;  %v12981_v31 = vsel %vm12980_vm2, %v12978_v42, %v12979_v48  ;;  %14650 = vmatpush3.bf16.msra.mxu1 %v14929_v30 }
0x1775   : > { %14651 = vmatprep.subr.bf16.mxu1 %v14930_v0 }
0x1778   : > { %14652 = vmatpush3.bf16.msra.mxu1 %v14930_v0 }
0x1779   : > { %14602 = vmatmul.mubr.msk.bf16.vlgmr.msra.gmra.mrb[40].mxu0 %vm1489_vm1, %v12709_v39  ;;  %14653 = vmatprep.subr.bf16.mxu1 %v14931_v5 }
0x177a   : > { %14609 = vmatprep.mubr.msk.bf16.mxu0 %vm1489_vm1, %v12803_v43  ;;  %14606 = vmatpush3.bf16.msra.mxu0 %v14917_v44  ;;  %v12991_v44 = vsel %vm12987_vm5, 0.0, %v12982_v58 }
0x177b   : > { %14607 = vmatprep.subr.bf16.mxu0 %v14918_v14  ;;  %v12994_v62 = vpack.c.bf16 %v12981_v31, %v12991_v44 }
0x177c   : > { %14654 = vmatpush3.bf16.msra.mxu1 %v14931_v5 }
0x177e   : > { %14608 = vmatpush3.bf16.msra.mxu0 %v14918_v14 }
0x177f   : > { %14613 = vmatprep.subr.bf16.mxu0 %v14919_v32 }
0x1785   : > { %14610 = vmatmul.mubr.msk.bf16.vlgmr.msra.gmra.mrb[40].mxu0 %vm1489_vm1, %v12804_v57 }
0x1786   : > { %14617 = vmatprep.mubr.msk.bf16.mxu0 %vm1489_vm1, %v12898_v59  ;;  %14614 = vmatpush3.bf16.msra.mxu0 %v14919_v32 }
0x1787   : > { %14615 = vmatprep.subr.bf16.mxu0 %v14920_v16 }
0x178a   : > { %14616 = vmatpush3.bf16.msra.mxu0 %v14920_v16 }
0x178b   : > { %14621 = vmatprep.subr.bf16.mxu0 %v14921_v19 }
0x1791   : > { %14618 = vmatmul.mubr.msk.bf16.vlgmr.msra.gmra.mrb[40].mxu0 %vm1489_vm1, %v12899_v6 }
0x1792   : > { %14625 = vmatprep.mubr.msk.bf16.mxu0 %vm1489_vm1, %v12993_v38  ;;  %14622 = vmatpush3.bf16.msra.mxu0 %v14921_v19 }
0x1793   : > { %14623 = vmatprep.subr.bf16.mxu0 %v14922_v47 }
0x1796   : > { %14624 = vmatpush3.bf16.msra.mxu0 %v14922_v47 }
0x1797   : > { %14629 = vmatprep.subr.bf16.mxu0 %v14923_v28 }
0x179d   : > { %14626 = vmatmul.mubr.msk.bf16.vlgmr.msra.gmra.mrb[40].mxu0 %vm1489_vm1, %v12994_v62 }
0x179e   : > { %14633 = vmatprep.mubr.msk.bf16.mxu0 %vm1489_vm1, %v13088_v54  ;;  %14630 = vmatpush3.bf16.msra.mxu0 %v14923_v28  ;;  %v14934_v54 = vld [vmem:[%s16537_s28 + $0x38] sm:$0xff]  }
0x179f   : > { %14631 = vmatprep.subr.bf16.mxu0 %v14924_v37 }
0x17a2   : > { %14632 = vmatpush3.bf16.msra.mxu0 %v14924_v37 }
0x17a3   : > { %14637 = vmatprep.subr.bf16.mxu0 %v14925_v51 }
0x17a9   : > { %14634 = vmatmul.mubr.msk.bf16.vlgmr.msra.gmra.mrb[40].mxu0 %vm1489_vm1, %v13089_v10  ;;  %v14932_v10 = vld [vmem:[%s16537_s28 + $0x28] sm:$0xff]  }
0x17aa   : > { %14641 = vmatprep.mubr.msk.bf16.mxu0 %vm1489_vm1, %v13183_v49  ;;  %14638 = vmatpush3.bf16.msra.mxu0 %v14925_v51 }
0x17ab   : > { %14639 = vmatprep.subr.bf16.mxu0 %v14926_v17  ;;  %14655 = vmatprep.subr.bf16.mxu1 %v14932_v10 }
0x17ac   : > { %14656 = vmatpush3.bf16.msra.mxu1 %v14932_v10 }
0x17ad   : > { %14657 = vmatprep.subr.bf16.mxu1 %v14933_v35 }
0x17ae   : > { %14640 = vmatpush3.bf16.msra.mxu0 %v14926_v17 }
0x17b0   : > { %14658 = vmatpush3.bf16.msra.mxu1 %v14933_v35 }
0x17b1   : > { %14659 = vmatprep.subr.bf16.mxu1 %v14934_v54 }
0x17b4   : > { %14660 = vmatpush3.bf16.msra.mxu1 %v14934_v54 }
0x17b5   : > { %14642 = vmatmul.mubr.msk.bf16.vlgmr.msra.gmra.mrb[40].mxu0 %vm1489_vm1, %v13184_v20 }
0x1888   : > { %v14643_v15 = vpop.f32.mrb[40].mxu0 }
0x1889   : > { %v13270_v49 = vadd.f32 %v14643_v15, %v14273_v34  ;;  %v13242_v63 = vpop.f32.mrb[41].mxu0 }
0x188a   : > { %v13268_v20 = vadd.f32 %v14273_v34, %v13242_v63  ;;  %v14644_v50 = vpop.f32.mrb[42].mxu0 }
0x188b   : > { %v13274_v41 = vmul.f32 0.33333334, %v13270_v49  ;;  %v13271_v3 = vadd.f32 %v14644_v50, %v14273_v34  ;;  %v13245_v7 = vpop.f32.mrb[43].mxu0 }
0x188c   : > { %v13272_v25 = vmul.f32 0.33333334, %v13268_v20  ;;  %v13269_v21 = vadd.f32 %v14273_v34, %v13245_v7 }
0x188d   : > { %v13278_v39 = vmul.f32 %v13274_v41, %v13274_v41  ;;  %v13275_v12 = vmul.f32 0.33333334, %v13271_v3 }
0x188e   : > { %v13276_v14 = vmul.f32 %v13272_v25, %v13272_v25  ;;  %v13273_v43 = vmul.f32 0.33333334, %v13269_v21 }
0x188f   : > { %v13282_v8 = vmul.f32 %v13278_v39, %v13274_v41  ;;  %v13279_v32 = vmul.f32 %v13275_v12, %v13275_v12 }
0x1890   : > { %v13280_v11 = vmul.f32 %v13276_v14, %v13272_v25  ;;  %v13277_v40 = vmul.f32 %v13273_v43, %v13273_v43 }
0x1891   : > { %v13286_v24 = vmul.f32 0.044715, %v13282_v8  ;;  %v13283_v56 = vmul.f32 %v13279_v32, %v13275_v12 }
0x1892   : > { %v13284_v23 = vmul.f32 0.044715, %v13280_v11  ;;  %v13281_v9 = vmul.f32 %v13277_v40, %v13273_v43 }
0x1893   : > { %v13290_v60 = vadd.f32 %v13286_v24, %v13274_v41  ;;  %v13287_v36 = vmul.f32 0.044715, %v13283_v56 }
0x1894   : > { %v13288_v57 = vadd.f32 %v13284_v23, %v13272_v25  ;;  %v13285_v46 = vmul.f32 0.044715, %v13281_v9 }
0x1895   : > { %v13294_v16 = vmul.f32 0.7978846, %v13290_v60  ;;  %v13291_v59 = vadd.f32 %v13287_v36, %v13275_v12 }
0x1896   : > { %v13292_v48 = vmul.f32 0.7978846, %v13288_v57  ;;  %v13289_v19 = vadd.f32 %v13285_v46, %v13273_v43 }
0x1897   : > { %15247 = vtanh.f32 %v13294_v16  ;;  %v13295_v2 = vmul.f32 0.7978846, %v13291_v59 }
0x1898   : > { %15249 = vtanh.f32 %v13292_v48  ;;  %v13293_v29 = vmul.f32 0.7978846, %v13289_v19 }
0x1899   : > { %15251 = vtanh.f32 %v13295_v2 }
0x189a   : > { %15253 = vtanh.f32 %v13293_v29 }
0x18a1   : > { %v15248_v45 = vpop.eup %15247 }
0x18a2   : > { %v15250_v13 = vpop.eup %15249  ;;  %v13302_v4 = vadd.f32 1.0, %v15248_v45 }
0x18a3   : > { %v15252_v1 = vpop.eup %15251  ;;  %v13300_v61 = vadd.f32 1.0, %v15250_v13 }
0x18a4   : > { %v15254_v22 = vpop.eup %15253  ;;  %v13306_v6 = vmul.f32 0.5, %v13302_v4  ;;  %v13303_v52 = vadd.f32 1.0, %v15252_v1 }
0x18a5   : > { %v13301_v47 = vadd.f32 1.0, %v15254_v22  ;;  %v13304_v38 = vmul.f32 0.5, %v13300_v61  ;;  %v14284_v61 = vld [vmem:[%s21161_s12] ss:$0 sm:$0xff] (!%p14283_p0) }
0x18a6   : > { %v13307_v28 = vmul.f32 0.5, %v13303_v52  ;;  %v13310_v58 = vmul.f32 %v13306_v6, %v13274_v41  ;;  %v14285_v6 = vld [vmem:[%s21162_s11] ss:$0 sm:$0xff] (!%p14283_p0) }
0x18a7   : > { %v13305_v42 = vmul.f32 0.5, %v13301_v47  ;;  %v13308_v44 = vmul.f32 %v13304_v38, %v13272_v25 }
0x18a8   : > { %v13311_v31 = vmul.f32 %v13307_v28, %v13275_v12 }
0x18a9   : > { %v13309_v62 = vmul.f32 %v13305_v42, %v13273_v43 }
0x18aa   : > { %v13313_v37 = vpack.c.bf16 %v13311_v31, %v13310_v58 }
0x18ab   : > { %v13312_v51 = vpack.c.bf16 %v13309_v62, %v13308_v44 }
0x18ad   : > { %14661 = vmatprep.mubr.bf16.mxu1 %v13312_v51 }
0x18ae   : > { %14662 = vmatmul.mubr.bf16.vlgmr.msra.gmra.mrb[56].mxu1 %v13313_v37 }
0x1981   : > { %v14663_v17 = vpop.f32.mrb[56].mxu1 }
0x1982   : > { %v13429_v27 = vadd.f32 %v14663_v17, %v20278_v26  ;;  %v13412_v30 = vpop.f32.mrb[57].mxu1 }
0x1983   : > { %v13427_v0 = vadd.f32 %v13412_v30, %v20281_v18  ;;  %v14664_v5 = vpop.f32.mrb[58].mxu1  ;;  %13449 = sbr.rel (%p14283_p0) target bundleno = 6857 (0x1ac9), region = 184 }
0x1984   : > { %v13440_v10 = vadd.f32 %v14282_v55, %v13429_v27  ;;  %v13430_v35 = vadd.f32 %v14664_v5, %v20291_v53  ;;  %v13415_v54 = vpop.f32.mrb[59].mxu1 }
0x1985   : > { %v13438_v34 = vadd.f32 %v14282_v55, %v13427_v0  ;;  %v13428_v15 = vadd.f32 %v13415_v54, %v20286_v33 }
0x1986   : > { %13444 = vst.msk [vmem:[#allocation2 + $0x10] sm:$0xff] %vm1489_vm1, %v13440_v10  ;;  %v13441_v49 = vadd.f32 %v14282_v55, %v13430_v35  ;;  %v13458_v18 = vsel (!%p14283_p0), %vm1489_vm1, %v13440_v10, 0.0 }
0x1987   : > { %13442 = vst.msk [vmem:[#allocation2] sm:$0xff] %vm1489_vm1, %v13438_v34  ;;  %v13439_v63 = vadd.f32 %v14282_v55, %v13428_v15  ;;  %v13452_v26 = vsel (!%p14283_p0), %vm1489_vm1, %v13438_v34, 0.0  ;;  %13459 = vadd.xlane.f32.xlu1 (!%p14283_p0), %v13458_v18 }
0x1988   : > { %13445 = vst.msk [vmem:[#allocation2 + $0x18] sm:$0xff] %vm1489_vm1, %v13441_v49  ;;  %13453 = vadd.xlane.f32.xlu0 (!%p14283_p0), %v13452_v26  ;;  %v13461_v53 = vsel (!%p14283_p0), %vm1489_vm1, %v13441_v49, 0.0 }
0x1989   : > { %13443 = vst.msk [vmem:[#allocation2 + $0x8] sm:$0xff] %vm1489_vm1, %v13439_v63  ;;  %v13455_v33 = vsel (!%p14283_p0), %vm1489_vm1, %v13439_v63, 0.0 }
0x198b   : > { %13462 = vadd.xlane.f32.xlu1 %v13461_v53 }
0x198c   : > { %13456 = vadd.xlane.f32.xlu0 %v13455_v33 }
0x1a14   : > { %v13460_v50 = vpop.xlane.xlu1 %13459 }
0x1a15   : > { %v13454_v20 = vpop.xlane.xlu0 %13453  ;;  %v13466_v3 = vmul.f32 0.03125, %v13460_v50 }
0x1a16   : > { %v13464_v41 = vmul.f32 0.03125, %v13454_v20 }
0x1a17   : > { %v13470_v25 = vsub.f32 %v13440_v10, %v13466_v3 }
0x1a18   : > { %v13468_v7 = vsub.f32 %v13438_v34, %v13464_v41  ;;  %v13463_v39 = vpop.xlane.xlu1 %13462 }
0x1a19   : > { %v13457_v21 = vpop.xlane.xlu0 %13456  ;;  %v13467_v14 = vmul.f32 0.03125, %v13463_v39  ;;  %v13474_v8 = vmul.f32 %v13470_v25, %v13470_v25 }
0x1a1a   : > { %v13465_v12 = vmul.f32 0.03125, %v13457_v21  ;;  %v13472_v43 = vmul.f32 %v13468_v7, %v13468_v7 }
0x1a1b   : > { %v13471_v11 = vsub.f32 %v13441_v49, %v13467_v14  ;;  %v13482_v24 = vsel %vm1489_vm1, %v13474_v8, 0.0 }
0x1a1c   : > { %v13469_v32 = vsub.f32 %v13439_v63, %v13465_v12  ;;  %v13476_v40 = vsel %vm1489_vm1, %v13472_v43, 0.0 }
0x1a1d   : > { %13477 = vadd.xlane.f32.xlu0 %v13476_v40  ;;  %v13475_v23 = vmul.f32 %v13471_v11, %v13471_v11 }
0x1a1e   : > { %v13473_v56 = vmul.f32 %v13469_v32, %v13469_v32 }
0x1a1f   : > { %v13485_v60 = vsel %vm1489_vm1, %v13475_v23, 0.0 }
0x1a20   : > { %v13479_v9 = vsel %vm1489_vm1, %v13473_v56, 0.0 }
0x1a21   : > { %13483 = vadd.xlane.f32.xlu0 %v13482_v24  ;;  %13480 = vadd.xlane.f32.xlu1 %v13479_v9 }
0x1a25   : > { %13486 = vadd.xlane.f32.xlu1 %v13485_v60 }
0x1aaa   : > { %v13478_v36 = vpop.xlane.xlu0 %13477 }
0x1aab   : > { %v13488_v57 = vmul.f32 0.03125, %v13478_v36 }
0x1aad   : > { %v13492_v46 = vadd.f32 1e-05, %v13488_v57 }
0x1aae   : > { %v13481_v16 = vpop.xlane.xlu1 %13480  ;;  %v13484_v59 = vpop.xlane.xlu0 %13483 }
0x1aaf   : > { %15261 = vrsqrt.f32 %v13492_v46  ;;  %v13489_v48 = vmul.f32 0.03125, %v13481_v16  ;;  %v13490_v19 = vmul.f32 0.03125, %v13484_v59 }
0x1ab1   : > { %v13493_v2 = vadd.f32 1e-05, %v13489_v48  ;;  %v13494_v29 = vadd.f32 1e-05, %v13490_v19 }
0x1ab2   : > { %v13487_v45 = vpop.xlane.xlu1 %13486 }
0x1ab3   : > { %15263 = vrsqrt.f32 %v13493_v2  ;;  %v13491_v13 = vmul.f32 0.03125, %v13487_v45 }
0x1ab4   : > { %15265 = vrsqrt.f32 %v13494_v29 }
0x1ab5   : > { %v13495_v4 = vadd.f32 1e-05, %v13491_v13 }
0x1ab7   : > { %15267 = vrsqrt.f32 %v13495_v4 }
0x1ab9   : > { %v15262_v1 = vpop.eup %15261 }
0x1aba   : > { %v13500_v22 = vmul.f32 %v15262_v1, %v13468_v7 }
0x1abc   : > { %v13510_v52 = vmul.f32 %v14284_v61, %v13500_v22 }
0x1abd   : > { %v15264_v47 = vpop.eup %15263 }
0x1abe   : > { %v15266_v38 = vpop.eup %15265  ;;  %v13520_v28 = vadd.f32 %v14285_v6, %v13510_v52  ;;  %v13501_v42 = vmul.f32 %v15264_v47, %v13469_v32 }
0x1abf   : > { %v13502_v58 = vmul.f32 %v15266_v38, %v13470_v25 }
0x1ac0   : > { %13524 = vst.msk [vmem:[#allocation24] sm:$0xff] %vm1489_vm1, %v13520_v28  ;;  %v13511_v31 = vmul.f32 %v14284_v61, %v13501_v42 }
0x1ac1   : > { %v15268_v44 = vpop.eup %15267  ;;  %v13512_v62 = vmul.f32 %v14284_v61, %v13502_v58 }
0x1ac2   : > { %v13521_v37 = vadd.f32 %v14285_v6, %v13511_v31  ;;  %v13503_v51 = vmul.f32 %v15268_v44, %v13471_v11 }
0x1ac3   : > { %v13522_v17 = vadd.f32 %v14285_v6, %v13512_v62 }
0x1ac4   : > { %13525 = vst.msk [vmem:[#allocation24 + $0x8] sm:$0xff] %vm1489_vm1, %v13521_v37  ;;  %v13513_v55 = vmul.f32 %v14284_v61, %v13503_v51 }
0x1ac5   : > { %13526 = vst.msk [vmem:[#allocation24 + $0x10] sm:$0xff] %vm1489_vm1, %v13522_v17 }
0x1ac6   : > { %v13523_v27 = vadd.f32 %v14285_v6, %v13513_v55 }
0x1ac8   : > { %13527 = vst.msk [vmem:[#allocation24 + $0x18] sm:$0xff] %vm1489_vm1, %v13523_v27 }
0x1ac9 PF: > { %s15789_s17 = smov [#allocation24]   ;;  %s21163_s16 = sld [smem:[#allocation43_spill]] }
0x1aca   : > { %s13543_s1 = sshll.u32 %s15789_s17, 4  ;;  %s13544_s1 = int_to_ptr.vmem [resolvable:$true] %s13543_s1 }
0x1acb   : > { %s15653_s8 = scalar_lea.vmem %s13544_s1, 512  ;;  %p15660_p11 = scmp.lt.s32.totalorder %s13544_s1, %s13544_s1 }
0x1acc   : > { %p15654_p7 = scmp.ne.s32.totalorder %s13544_s1, %s15653_s8  ;;  %p15661_p2 = scmp.lt.s32.totalorder %s15653_s8, %s15653_s8 }
0x1ace   : > { %p15662_p9 = por %p15661_p2, %p15660_p11 }
0x1acf   : > { %p21164_p12 = scmp.eq.s32.totalorder %s21163_s16, 1 }
0x1ad1   : > { %p15655_p8 = pnand %p15654_p7, %p21164_p12 }
0x1ad3   : > { %p15656_p6 = pneg %p15655_p8 }
0x1ad5   : > { %p15663_p3 = pnand %p15662_p9, %p15656_p6 }
0x1ad7   : > { %15666 = shalt.err (!%p15663_p3)
}
0x1ad8   : > { %s21165_s18 = sld [smem:[#allocation100_spill]]  ;;  %p21166_p5 = pmov %p21164_p12 }
0x1ade   : > { %s15667_s5 = scalar_lea.hbm %s21165_s18, 512 }
0x1adf   : > { %p15668_p4 = scmp.ne.s32.totalorder %s21165_s18, %s15667_s5  ;;  %p15673_p1 = scmp.lt.u32.totalorder %s15667_s5, %s21165_s18 }
0x1ae1   : > { %p15669_p10 = pnand %p15668_p4, %p21166_p5 }
0x1ae3   : > { %p15670_p13 = pneg %p15669_p10 }
0x1ae5   : > { %p15675_p0 = pnand %p15673_p1, %p15670_p13 }
0x1ae7   : > { %15678 = shalt.err (!%p15675_p0)
}
0x1ae8   : > { %s15790_s22 = smov 128   ;;  %s15791_s27 = smov 8  }
0x1ae9   : > { %p21167_p7 = pmov %p21166_p5  ;;  %s13529_s19 = scalar_lea.sflag [#allocation26], %s16465_s6 }
0x1aeb   : > { %14733 = dma.vmem_to_hbm [thread:$0]  (%p21167_p7), %s13544_s1, 512, %s21165_s18, [#allocation5], %s15790_s22, %s15790_s22, %s15791_s27  }
0x1aec   : > { %s21168_s30 = sld [smem:[#allocation41_spill]]  ;;  %s21169_s20 = sld [smem:[#allocation45_spill]] }
0x1aed   : > { %s13578_s12 = sshll.u32 %s16545_s24, 4  ;;  %s21170_s11 = sld [smem:[#allocation101_spill]]  ;;  %s13579_s12 = int_to_ptr.vmem [resolvable:$true] %s13578_s12 }
0x1aee   : > { %s15792_s8 = smov 512   ;;  %s15793_s6 = smov 1024  }
0x1aef   : > { %s15794_s1 = smov 4   ;;  %s15795_s26 = smov 128  }
0x1af0   : > { %s15796_s24 = smov 8   ;;  %s15797_s3 = smov [#allocation27]  }
0x1af1   : > { %s15798_s5 = smov 0   ;;  %p21172_p8 = pmov %p21166_p5 }
0x1af2   : > { %s14302_s13 = sshll.u32 %s21168_s30, 9  ;;  %p21171_p12 = scmp.ne.s32.totalorder %s21169_s20, 0 }
0x1af3   : > { %s13561_s17 = scalar_lea.hbm %s21170_s11, %s14302_s13 }
0x1af4   : > { %14734 = sst [smem:[#allocation28]] (%p21171_p12), %s15792_s8 }
0x1af5   : > { %14735 = sst [smem:[#allocation28 + $0x1]] (%p21171_p12), %s15793_s6 }
0x1af6   : > { %14736 = sst [smem:[#allocation28 + $0x2]] (%p21171_p12), %s15794_s1 }
0x1af7   : > { %14737 = sst [smem:[#allocation28 + $0x3]] (%p21171_p12), %s15795_s26 }
0x1af8   : > { %14738 = sst [smem:[#allocation28 + $0x4]] (%p21171_p12), %s15795_s26 }
0x1af9   : > { %14739 = sst [smem:[#allocation28 + $0x5]] (%p21171_p12), %s15796_s24 }
0x1afa   : > { %14740 = dma.general (%p21171_p12), %s13579_s12, 1024, %s13561_s17, %s13529_s19, %s15797_s3, [#allocation28], %s15798_s5, 0  }
0x1afb   : > { %15732 = dma.done.wait (%p21172_p8), [#allocation5], 512   ;;  %p21173_p6 = pmov %p21166_p5 }
0x1afd   : > { %15734 = vsyncadd (%p21173_p6), [#allocation5], 4294966784 }
0x1afe PF: > { %s21174_s7 = sld [smem:[#allocation38_spill]]  ;;  %s21175_s25 = sld [smem:[#allocation46_spill]] }
0x1aff   : > { %s21176_s10 = sld [smem:[#allocation42_spill]] }
0x1b04   : > { %s13610_s4 = sand.u32 1, %s21174_s7   ;;  %p21177_p11 = scmp.ne.s32.totalorder %s21175_s25, 0 }
0x1b05   : > { %p21178_p2 = scmp.ge.s32.totalorder %s21176_s10, 2  ;;  %s13611_s22 = scalar_lea.sflag [#allocation26], %s13610_s4 }
0x1b07   : > { %p14786_p9 = pnand %p21178_p2, %p21177_p11 }
0x1b09   : > { %15736 = dma.done.wait (!%p14786_p9), %s13611_s22, 1024  }
0x1b0a   : > { %15738 = vsyncadd (!%p14786_p9), %s13611_s22, 4294966272  ;;  %s59_s5 = sadd.s32 1, %s21176_s10   ;;  %s21179_s7 = sld [smem:[#allocation39_spill]] }
0x1b0b   : > { %p56_p3 = scmp.ge.s32.totalorder %s59_s5, 4   ;;  %s21180_s4 = sld [smem:[#allocation40_spill]] }
0x1b0c   : > { %s21181_s8 = sld [smem:[#allocation49_spill]]  ;;  %s21182_s16 = sld [smem:[#allocation48_spill]] }
0x1b0d   : > { %s21183_s30 = smov %s15757_s9  ;;  %58 = sbr.rel (!%p56_p3) target bundleno = 46 (0x2e), region = 356 }
0x1b12   : > { %s21184_s9 = smov %s21182_s16 }
0x1b14   :  { %13616 = vsyncpa [#allocation4], 1 }
0x1b15   :  { %13618 = vsyncpa [#allocation4 + $0x1], 1 }
0x1b16   :  { %13619 = vsyncpa [#allocation7], 1 }
0x1b17   :  { %13620 = vsyncpa [#allocation10], 1 }
0x1b18   :  { %13622 = vsyncpa [#allocation10 + $0x1], 1 }
0x1b19   :  { %13623 = vsyncpa [#allocation13], 1 }
0x1b1a   :  { %13625 = vsyncpa [#allocation13 + $0x1], 1 }
0x1b1b   :  { %13626 = vsyncpa [#allocation16], 1 }
0x1b1c   :  { %13628 = vsyncpa [#allocation16 + $0x1], 1 }
0x1b1d   :  { %13629 = vsyncpa [#allocation19], 1 }
0x1b1e   :  { %13631 = vsyncpa [#allocation19 + $0x1], 1 }
0x1b1f   :  { %13632 = vsyncpa [#allocation22], 1 }
0x1b20   :  { %13634 = vsyncpa [#allocation22 + $0x1], 1 }
0x1b21   :  { %13635 = vsyncpa [#allocation5], 1 }
0x1b22   :  { %13637 = vsyncpa [#allocation5 + $0x1], 1 }
0x1b23   :  { %13638 = vsyncpa [#allocation26], 1 }
0x1b24   :  { %13640 = vsyncpa [#allocation26 + $0x1], 1 }

</bundles_post_ra>
